<compile_context>
chip_gen: v5e
topology: v5e:2x2
jax: 0.10.0
libtpu: 0.0.40
codegen_flags: <defaults>
</compile_context>

<pallas_src>
import functools

import jax
import jax.numpy as jnp
from jax.experimental import pallas as pl
from jax.experimental.pallas import tpu as pltpu


def _round_up(x, m):
    return ((x + m - 1) // m) * m


def _plane_geometry(H, W):
    """Coarse-grid flat-plane geometry (per batch sample)."""
    H2, W2 = H // 2, W // 2
    H2p, W2p = H2 + 2, W2 + 2          # 1-coarse-pixel zero halo each side
    F = H2p * W2p                      # flat padded plane length
    CW = _round_up(F, 128)             # lane-dense compute window
    G = _round_up(W2p + 1, 128)        # guard >= max |tap shift|
    Ms = G + CW + G                    # buffer length (guards on both sides)
    return H2, W2, H2p, W2p, F, CW, G, Ms


# ----------------------------------------------------------------------------
# Static tap tables: (weight tap index, source phase plane, flat lane shift)
# ----------------------------------------------------------------------------
def _taps_conv3x3(W2p):
    """3x3 / s1 / p1 conv on the fine grid, expressed on phase-split planes."""
    taps = []
    for py in range(2):
        for px in range(2):
            lst = []
            for dy in range(3):
                sy = py + dy - 1
                spy, cy = sy % 2, sy // 2
                for dx in range(3):
                    sx = px + dx - 1
                    spx, cx = sx % 2, sx // 2
                    lst.append((dy * 3 + dx, spy * 2 + spx, cy * W2p + cx))
            taps.append(lst)
    return taps


def _taps_conv4x4_s2(W2p):
    """4x4 / s2 / p1 conv: fine phase planes -> one coarse plane."""
    lst = []
    for i in range(4):
        sy = i - 1
        spy, cy = sy % 2, sy // 2
        for j in range(4):
            sx = j - 1
            spx, cx = sx % 2, sx // 2
            lst.append((i * 4 + j, spy * 2 + spx, cy * W2p + cx))
    return lst


# ConvTranspose2d(k=4,s=2,p=1): per output phase the two contributing
# (coarse shift, kernel tap) pairs along each spatial axis.
_CONVT4_PHASE = {0: ((-1, 3), (0, 1)), 1: ((0, 2), (1, 0))}


def _taps_convT4x4_s2(W2p):
    """taps[out_phase] = [(tap index into prepared (4,4,..) weight, shift)]."""
    taps = []
    for py in range(2):
        for px in range(2):
            lst = []
            for ty, (cy, _) in enumerate(_CONVT4_PHASE[py]):
                for tx, (cx, _) in enumerate(_CONVT4_PHASE[px]):
                    lst.append((ty * 2 + tx, cy * W2p + cx))
            taps.append(lst)
    return taps


# ----------------------------------------------------------------------------
# Parameter preparation (hoisted out of the jitted forward)
# ----------------------------------------------------------------------------
def prepare_params(params):
    nf, cin = params["enc1_w"].shape[0], params["enc1_w"].shape[1]
    cout = params["dec2_w"].shape[1]
    prep = {}
    prep["w1"] = jnp.transpose(params["enc1_w"], (2, 3, 0, 1)).reshape(9, nf, cin)
    prep["b1"] = params["enc1_b"].reshape(nf, 1).astype(jnp.float32)
    prep["w2"] = jnp.transpose(params["enc2_w"], (2, 3, 0, 1)).reshape(16, nf, nf)
    prep["b2"] = params["enc2_b"].reshape(nf, 1).astype(jnp.float32)
    prep["alpha"] = params["prelu_w"].reshape(1).astype(jnp.float32)
    # dec1 ConvT(4,s2,p1): per (out phase, tap) weight = w[:, :, ky, kx].T
    wd1 = params["dec1_w"]
    mats = []
    for py in range(2):
        for px in range(2):
            for (_, ky) in _CONVT4_PHASE[py]:
                for (_, kx) in _CONVT4_PHASE[px]:
                    mats.append(wd1[:, :, ky, kx].T)
    prep["wd1"] = jnp.stack(mats, 0).reshape(4, 4, nf, nf).astype(jnp.bfloat16)
    prep["bd1"] = params["dec1_b"].reshape(nf, 1).astype(jnp.float32)
    # dec2 ConvT(3,s1,p1) == conv with flipped, channel-transposed kernel, p=1
    wd2c = jnp.flip(params["dec2_w"], axis=(2, 3)).transpose(1, 0, 2, 3)
    prep["wd2"] = jnp.transpose(wd2c, (2, 3, 0, 1)).reshape(9, cout, nf)
    prep["bd2"] = params["dec2_b"].reshape(cout, 1).astype(jnp.float32)
    return prep


# ----------------------------------------------------------------------------
# Fused encoder kernel: Conv(3,s1,p1)+ReLU -> Conv(4,s2,p1) -> PReLU
# ----------------------------------------------------------------------------
def _encoder_kernel(x_ref, w1_ref, b1_ref, w2_ref, b2_ref, alpha_ref, mask_ref,
                    hid_ref, h_scr, *, nf, cin, G, CW, taps1, taps2):
    mask = mask_ref[...]                                  # (1, CW)
    b1 = b1_ref[...]                                      # (nf, 1)
    # enc1: one phase plane at a time, 9 accumulated taps each (K = cin)
    for p in range(4):
        acc = None
        for (t, sp, off) in taps1[p]:
            rhs = x_ref[0, sp * cin:(sp + 1) * cin, G + off:G + off + CW]
            v = jnp.dot(w1_ref[t], rhs, preferred_element_type=jnp.float32)
            acc = v if acc is None else acc + v
        h_scr[p, :, G:G + CW] = jnp.maximum(acc + b1, 0.0) * mask
    # zero guard bands so enc2's shifted reads see exact zero padding
    h_scr[:, :, :G] = jnp.zeros((4, nf, G), jnp.float32)
    h_scr[:, :, G + CW:] = jnp.zeros((4, nf, G), jnp.float32)
    # enc2: 16 accumulated taps (K = nf) -> coarse hidden plane, PReLU epilogue
    acc = None
    for (t, sp, off) in taps2:
        rhs = h_scr[sp, :, G + off:G + off + CW]
        v = jnp.dot(w2_ref[t], rhs, preferred_element_type=jnp.float32)
        acc = v if acc is None else acc + v
    e = acc + b2_ref[...]
    a = alpha_ref[0]
    hid = jnp.where(e >= 0.0, e, a * e) * mask
    hid_ref[0, :, :G] = jnp.zeros((nf, G), hid_ref.dtype)
    hid_ref[0, :, G + CW:] = jnp.zeros((nf, G), hid_ref.dtype)
    hid_ref[0, :, G:G + CW] = hid.astype(hid_ref.dtype)


def _encoder_call(prep, x_planes, mask_cw, *, nf, cin, G, CW, Ms, W2p):
    N = x_planes.shape[0]
    taps1 = _taps_conv3x3(W2p)
    taps2 = _taps_conv4x4_s2(W2p)
    kern = functools.partial(_encoder_kernel, nf=nf, cin=cin, G=G, CW=CW,
                             taps1=taps1, taps2=taps2)
    flops = 2 * N * CW * (4 * 9 * nf * cin + 16 * nf * nf)
    bytes_acc = int(x_planes.size * 4 + N * nf * Ms * 2
                    + (prep["w1"].size + prep["w2"].size + 2 * nf) * 4 + CW * 4)
    return pl.pallas_call(
        kern,
        out_shape=jax.ShapeDtypeStruct((N, nf, Ms), jnp.bfloat16),
        grid=(N,),
        in_specs=[
            pl.BlockSpec((1, 4 * cin, Ms), lambda n: (n, 0, 0)),
            pl.BlockSpec((9, nf, cin), lambda n: (0, 0, 0)),
            pl.BlockSpec((nf, 1), lambda n: (0, 0)),
            pl.BlockSpec((16, nf, nf), lambda n: (0, 0, 0)),
            pl.BlockSpec((nf, 1), lambda n: (0, 0)),
            pl.BlockSpec(memory_space=pltpu.MemorySpace.SMEM),   # PReLU alpha
            pl.BlockSpec((1, CW), lambda n: (0, 0)),
        ],
        out_specs=pl.BlockSpec((1, nf, Ms), lambda n: (n, 0, 0)),
        scratch_shapes=[pltpu.VMEM((4, nf, Ms), jnp.float32)],
        compiler_params=pltpu.CompilerParams(
            dimension_semantics=("parallel",),
            vmem_limit_bytes=64 * 1024 * 1024),
        cost_estimate=pl.CostEstimate(flops=flops, transcendentals=0,
                                      bytes_accessed=bytes_acc),
    )(x_planes, prep["w1"], prep["b1"], prep["w2"], prep["b2"],
      prep["alpha"], mask_cw)


# ----------------------------------------------------------------------------
# Fused decoder kernel: ConvT(4,s2,p1)+ReLU -> ConvT(3,s1,p1)
# ----------------------------------------------------------------------------
def _decoder_kernel(hid_ref, wd1_ref, bd1_ref, wd2_ref, bd2_ref, mask_ref,
                    out_ref, d_scr, *, nf, cout, G, CW, tapsT, taps3):
    mask = mask_ref[...]
    bd1 = bd1_ref[...]
    bd2 = bd2_ref[...]
    d_scr[:, :, :G] = jnp.zeros((4, nf, G), jnp.float32)
    d_scr[:, :, G + CW:] = jnp.zeros((4, nf, G), jnp.float32)
    # dec1: 4 output phase planes, 4 accumulated taps each (bf16 MXU matmuls)
    for p in range(4):
        acc = None
        for (t, off) in tapsT[p]:
            rhs = hid_ref[0, :, G + off:G + off + CW]
            v = jnp.dot(wd1_ref[p, t], rhs, preferred_element_type=jnp.float32)
            acc = v if acc is None else acc + v
        d_scr[p, :, G:G + CW] = jnp.maximum(acc + bd1, 0.0) * mask
    # dec2: 4 output phase planes (cout channels), 9 accumulated taps, f32
    for p in range(4):
        acc = None
        for (t, sp, off) in taps3[p]:
            rhs = d_scr[sp, :, G + off:G + off + CW]
            v = jnp.dot(wd2_ref[t], rhs, preferred_element_type=jnp.float32)
            acc = v if acc is None else acc + v
        out_ref[0, p * cout:(p + 1) * cout, :] = (acc + bd2).astype(out_ref.dtype)


def _decoder_call(prep, hid_flat, mask_cw, *, nf, cout, G, CW, Ms, W2p):
    N = hid_flat.shape[0]
    tapsT = _taps_convT4x4_s2(W2p)
    taps3 = _taps_conv3x3(W2p)
    kern = functools.partial(_decoder_kernel, nf=nf, cout=cout, G=G, CW=CW,
                             tapsT=tapsT, taps3=taps3)
    flops = 2 * N * CW * (16 * nf * nf + 4 * 9 * cout * nf)
    bytes_acc = int(N * nf * Ms * 2 + N * 4 * cout * CW * 4
                    + prep["wd1"].size * 2 + prep["wd2"].size * 4 + CW * 4)
    return pl.pallas_call(
        kern,
        out_shape=jax.ShapeDtypeStruct((N, 4 * cout, CW), jnp.float32),
        grid=(N,),
        in_specs=[
            pl.BlockSpec((1, nf, Ms), lambda n: (n, 0, 0)),
            pl.BlockSpec((4, 4, nf, nf), lambda n: (0, 0, 0, 0)),
            pl.BlockSpec((nf, 1), lambda n: (0, 0)),
            pl.BlockSpec((9, cout, nf), lambda n: (0, 0, 0)),
            pl.BlockSpec((cout, 1), lambda n: (0, 0)),
            pl.BlockSpec((1, CW), lambda n: (0, 0)),
        ],
        out_specs=pl.BlockSpec((1, 4 * cout, CW), lambda n: (n, 0, 0)),
        scratch_shapes=[pltpu.VMEM((4, nf, Ms), jnp.float32)],
        compiler_params=pltpu.CompilerParams(
            dimension_semantics=("parallel",),
            vmem_limit_bytes=64 * 1024 * 1024),
        cost_estimate=pl.CostEstimate(flops=flops, transcendentals=0,
                                      bytes_accessed=bytes_acc),
    )(hid_flat, prep["wd1"], prep["bd1"], prep["wd2"], prep["bd2"], mask_cw)


# ----------------------------------------------------------------------------
# Data consistency: lane-dense tiled select with compact (H, W) sampling mask
# ----------------------------------------------------------------------------
def _dc_kernel(k_ref, k0_ref, m_ref, o_ref):
    o_ref[...] = jnp.where(m_ref[...] != 0.0, k0_ref[...], k_ref[...])


def data_consistency(k, k0, mask_hw):
    N, C, H, W = k.shape
    L = H * W
    Lp = _round_up(L, 128)
    k2 = k.reshape(N * C, L)
    k02 = k0.reshape(N * C, L)
    m2 = mask_hw.astype(jnp.float32).reshape(1, L)
    if Lp != L:
        k2 = jnp.pad(k2, ((0, 0), (0, Lp - L)))
        k02 = jnp.pad(k02, ((0, 0), (0, Lp - L)))
        m2 = jnp.pad(m2, ((0, 0), (0, Lp - L)))
    tn = Lp
    for cand in (2048, 1024, 512, 256, 128):        # prefer grid >= 2 (v7x 2 TCs)
        if Lp % cand == 0 and Lp // cand >= 2:
            tn = cand
            break
    out = pl.pallas_call(
        _dc_kernel,
        out_shape=jax.ShapeDtypeStruct((N * C, Lp), jnp.float32),
        grid=(Lp // tn,),
        in_specs=[
            pl.BlockSpec((N * C, tn), lambda i: (0, i)),
            pl.BlockSpec((N * C, tn), lambda i: (0, i)),
            pl.BlockSpec((1, tn), lambda i: (0, i)),
        ],
        out_specs=pl.BlockSpec((N * C, tn), lambda i: (0, i)),
        compiler_params=pltpu.CompilerParams(dimension_semantics=("parallel",)),
    )(k2, k02, m2)
    if Lp != L:
        out = out[:, :L]
    return out.reshape(N, C, H, W)


# ----------------------------------------------------------------------------
# fastmri-style centered orthonormal FFTs (jnp glue; no Pallas FFT on TPU)
# ----------------------------------------------------------------------------
def _centered_fft2(re, im, inverse=False):
    c = re.astype(jnp.float32) + 1j * im.astype(jnp.float32)
    c = jnp.fft.ifftshift(c, axes=(-2, -1))
    fn = jnp.fft.ifftn if inverse else jnp.fft.fftn
    c = fn(c, axes=(-2, -1), norm="ortho")
    c = jnp.fft.fftshift(c, axes=(-2, -1))
    return c.real.astype(jnp.float32), c.imag.astype(jnp.float32)


def fft2c(x):      # (N, 2, H, W) image -> k-space
    kr, ki = _centered_fft2(x[:, 0], x[:, 1], inverse=False)
    return jnp.stack([kr, ki], axis=1)


def ifft2c(k):
    xr, xi = _centered_fft2(k[:, 0], k[:, 1], inverse=True)
    return jnp.stack([xr, xi], axis=1)


# ----------------------------------------------------------------------------
# TransBlock_UC forward (hidden is None branch, down_scale = 2)
# ----------------------------------------------------------------------------
def transblock_uc_forward(prep, x, k0, mask, h1_att=None, h2_att=None):
    """x / k0: (N, 2, H, W); mask: full (N, 2, H, W) or compact (H, W) / (W,)."""
    N, C, H, W = x.shape
    nf, cin = prep["w1"].shape[1], prep["w1"].shape[2]
    cout = prep["wd2"].shape[1]
    assert H % 2 == 0 and W % 2 == 0, "down_scale=2 requires even H, W"
    H2, W2, H2p, W2p, F, CW, G, Ms = _plane_geometry(H, W)

    # phase-split, zero-haloed, flat padded planes of the (2-channel) input
    xr = x.astype(jnp.float32).reshape(N, C, H2, 2, W2, 2)
    xr = xr.transpose(0, 3, 5, 1, 2, 4).reshape(N, 4 * C, H2, W2)
    xr = jnp.pad(xr, ((0, 0), (0, 0), (1, 1), (1, 1)))
    x_planes = jnp.pad(xr.reshape(N, 4 * C, F), ((0, 0), (0, 0), (G, Ms - G - F)))

    # valid-interior mask over the compute window (shared by all planes)
    mvalid = jnp.zeros((H2p, W2p), jnp.float32).at[1:1 + H2, 1:1 + W2].set(1.0)
    mask_cw = jnp.pad(mvalid.reshape(1, F), ((0, 0), (0, CW - F)))

    # fused encoder / decoder Pallas kernels
    hid_flat = _encoder_call(prep, x_planes, mask_cw, nf=nf, cin=cin,
                             G=G, CW=CW, Ms=Ms, W2p=W2p)
    out_planes = _decoder_call(prep, hid_flat, mask_cw, nf=nf, cout=cout,
                               G=G, CW=CW, Ms=Ms, W2p=W2p)

    # hidden (module interface), NCHW coarse
    hid_core = hid_flat[:, :, G:G + F].reshape(N, nf, H2p, W2p)
    hidden = hid_core[:, :, 1:1 + H2, 1:1 + W2].astype(jnp.float32)

    # interleave the 4 output phase planes back to the fine grid (2 channels)
    oc = out_planes[:, :, :F].reshape(N, 2, 2, cout, H2p, W2p)
    oc = oc[:, :, :, :, 1:1 + H2, 1:1 + W2]
    out_img = oc.transpose(0, 3, 4, 1, 5, 2).reshape(N, cout, H, W)

    # DataConsistencyInKspace
    k = fft2c(out_img)
    if mask.ndim == 4:
        # fastMRI Cartesian sampling masks are shared across batch & real/imag.
        mask_hw = mask[0, 0]
    elif mask.ndim == 1:
        mask_hw = jnp.broadcast_to(mask[None, :], (H, W))
    else:
        mask_hw = mask
    kdc = data_consistency(k, k0.astype(jnp.float32), mask_hw)
    x_res = ifft2c(kdc)
    return x_res, hidden, h1_att, h2_att


# ----------------------------------------------------------------------------
# Pure-JAX reference (lax.conv, f32) for the correctness check
# ----------------------------------------------------------------------------
def _ref_conv(x, w, b, stride, pad):
    y = jax.lax.conv_general_dilated(
        x, w, (stride, stride), [(pad, pad), (pad, pad)],
        dimension_numbers=("NCHW", "OIHW", "NCHW"))
    return y + b[None, :, None, None]


def _ref_convt(x, w, b, stride, pad):
    kh = w.shape[2]
    w_conv = jnp.flip(w, axis=(2, 3)).transpose(1, 0, 2, 3)
    y = jax.lax.conv_general_dilated(
        x, w_conv, (1, 1), [(kh - 1 - pad, kh - 1 - pad)] * 2,
        lhs_dilation=(stride, stride),
        dimension_numbers=("NCHW", "OIHW", "NCHW"))
    return y + b[None, :, None, None]


def _ref_forward(params, x, k0, mask):
    alpha = params["prelu_w"][0]
    h = jnp.maximum(_ref_conv(x, params["enc1_w"], params["enc1_b"], 1, 1), 0.0)
    e = _ref_conv(h, params["enc2_w"], params["enc2_b"], 2, 1)
    hidden = jnp.where(e >= 0.0, e, alpha * e)
    d = jnp.maximum(_ref_convt(hidden, params["dec1_w"], params["dec1_b"], 2, 1), 0.0)
    out = _ref_convt(d, params["dec2_w"], params["dec2_b"], 1, 1)
    k = fft2c(out)
    kdc = jnp.where(mask, k0, k)
    x_res = ifft2c(kdc)
    return x_res, hidden


# ----------------------------------------------------------------------------
if __name__ == "__main__":
    # in/out channels = 2 (real+imag), nf = 32, img_size = 16, down_scale = 2.
    N, C, H, W = 2, 2, 16, 16
    nf = 32

    key = jax.random.PRNGKey(0)
    keys = jax.random.split(key, 11)
    params = {
        "enc1_w": 0.10 * jax.random.normal(keys[0], (nf, C, 3, 3), jnp.float32),
        "enc1_b": 0.10 * jax.random.normal(keys[1], (nf,), jnp.float32),
        "enc2_w": 0.05 * jax.random.normal(keys[2], (nf, nf, 4, 4), jnp.float32),
        "enc2_b": 0.10 * jax.random.normal(keys[3], (nf,), jnp.float32),
        "dec1_w": 0.05 * jax.random.normal(keys[4], (nf, nf, 4, 4), jnp.float32),
        "dec1_b": 0.10 * jax.random.normal(keys[5], (nf,), jnp.float32),
        "dec2_w": 0.10 * jax.random.normal(keys[6], (nf, C, 3, 3), jnp.float32),
        "dec2_b": 0.10 * jax.random.normal(keys[7], (C,), jnp.float32),
        "prelu_w": jnp.full((1,), 0.25, jnp.float32),  # nn.PReLU() default
    }
    prep = prepare_params(params)   # matmul-ready weights, built outside jit

    x = jax.random.normal(keys[8], (N, C, H, W), jnp.float32)
    k0 = jax.random.normal(keys[9], (N, C, H, W), jnp.float32)
    mask_cols = jax.random.bernoulli(keys[10], 0.4, (W,))
    mask = jnp.broadcast_to(mask_cols[None, None, None, :], (N, C, H, W))

    fwd = jax.jit(transblock_uc_forward)
    out, hidden, h1_att, h2_att = fwd(prep, x, k0, mask)
    out = jax.block_until_ready(out)
    hidden = jax.block_until_ready(hidden)

    assert out.shape == (N, C, H, W)
    assert hidden.shape == (N, nf, H // 2, W // 2)
    assert h1_att is None and h2_att is None
    assert bool(jnp.all(jnp.isfinite(out)))

    ref_out, ref_hidden = _ref_forward(params, x, k0, mask)
    # only `hidden` crosses HBM in bf16; everything else accumulates in f32.
    assert jnp.allclose(hidden, ref_hidden, rtol=2e-2, atol=2e-2), "hidden mismatch"
    assert jnp.allclose(out, ref_out, rtol=2e-2, atol=2e-2), "output mismatch"

    print("KERNEL_OK")
</pallas_src>

<mosaic_0001>
module attributes {stable_mosaic.version = 11 : i64} {
  func.func @_encoder_kernel(%arg0: i32, %arg1: memref<1x8x384xf32, #tpu.memory_space<vmem>>, %arg2: memref<9x32x2xf32, #tpu.memory_space<vmem>>, %arg3: memref<32x1xf32, #tpu.memory_space<vmem>>, %arg4: memref<16x32x32xf32, #tpu.memory_space<vmem>>, %arg5: memref<32x1xf32, #tpu.memory_space<vmem>>, %arg6: memref<1xf32, #tpu.memory_space<smem>>, %arg7: memref<1x128xf32, #tpu.memory_space<vmem>>, %arg8: memref<1x32x384xbf16, #tpu.memory_space<vmem>>, %arg9: memref<4x32x384xf32, #tpu.memory_space<vmem>>) attributes {dimension_semantics = [#tpu.dimension_semantics<parallel>], iteration_bounds = array<i64: 2>, scalar_prefetch = 0 : i64, scratch_operands = 1 : i64, tpu.core_type = #tpu.core_type<tc>, window_params = [{transform_indices = @transform_0, window_bounds = array<i64: 1, 8, 384>}, {pipeline_mode = #tpu.pipeline_mode<synchronous>, transform_indices = @transform_1, window_bounds = array<i64: 9, 32, 2>}, {pipeline_mode = #tpu.pipeline_mode<synchronous>, transform_indices = @transform_2, window_bounds = array<i64: 32, 1>}, {pipeline_mode = #tpu.pipeline_mode<synchronous>, transform_indices = @transform_3, window_bounds = array<i64: 16, 32, 32>}, {pipeline_mode = #tpu.pipeline_mode<synchronous>, transform_indices = @transform_4, window_bounds = array<i64: 32, 1>}, {transform_indices = @transform_5, window_bounds = array<i64: 1>}, {pipeline_mode = #tpu.pipeline_mode<synchronous>, transform_indices = @transform_6, window_bounds = array<i64: 1, 128>}, {transform_indices = @transform_7, window_bounds = array<i64: 1, 32, 384>}]} {
    %c0 = arith.constant 0 : index
    %c0_0 = arith.constant 0 : index
    %0 = vector.load %arg7[%c0, %c0_0] : memref<1x128xf32, #tpu.memory_space<vmem>>, vector<1x128xf32>
    %c0_1 = arith.constant 0 : index
    %c0_2 = arith.constant 0 : index
    %1 = vector.load %arg3[%c0_1, %c0_2] : memref<32x1xf32, #tpu.memory_space<vmem>>, vector<32x1xf32>
    %c0_3 = arith.constant 0 : index
    %c6 = arith.constant 6 : index
    %c117 = arith.constant 117 : index
    %2 = vector.load %arg1[%c0_3, %c6, %c117] : memref<1x8x384xf32, #tpu.memory_space<vmem>>, vector<1x2x128xf32>
    %3 = vector.shape_cast %2 : vector<1x2x128xf32> to vector<2x128xf32>
    %c0_4 = arith.constant 0 : index
    %c0_5 = arith.constant 0 : index
    %c0_6 = arith.constant 0 : index
    %4 = vector.load %arg2[%c0_4, %c0_5, %c0_6] : memref<9x32x2xf32, #tpu.memory_space<vmem>>, vector<1x32x2xf32>
    %5 = vector.shape_cast %4 : vector<1x32x2xf32> to vector<32x2xf32>
    %cst = arith.constant dense<0.000000e+00> : vector<32x128xf32>
    %6 = tpu.matmul %5, %3, %cst {dimension_numbers = #tpu.dot_dimension_numbers<[1], [0], [0], [1], [0, 0, 1, 1], [], []>} : vector<32x2xf32>, vector<2x128xf32>, vector<32x128xf32> -> vector<32x128xf32>
    %c0_7 = arith.constant 0 : index
    %c4 = arith.constant 4 : index
    %c118 = arith.constant 118 : index
    %7 = vector.load %arg1[%c0_7, %c4, %c118] : memref<1x8x384xf32, #tpu.memory_space<vmem>>, vector<1x2x128xf32>
    %8 = vector.shape_cast %7 : vector<1x2x128xf32> to vector<2x128xf32>
    %c1 = arith.constant 1 : index
    %c0_8 = arith.constant 0 : index
    %c0_9 = arith.constant 0 : index
    %9 = vector.load %arg2[%c1, %c0_8, %c0_9] : memref<9x32x2xf32, #tpu.memory_space<vmem>>, vector<1x32x2xf32>
    %10 = vector.shape_cast %9 : vector<1x32x2xf32> to vector<32x2xf32>
    %cst_10 = arith.constant dense<0.000000e+00> : vector<32x128xf32>
    %11 = tpu.matmul %10, %8, %cst_10 {dimension_numbers = #tpu.dot_dimension_numbers<[1], [0], [0], [1], [0, 0, 1, 1], [], []>} : vector<32x2xf32>, vector<2x128xf32>, vector<32x128xf32> -> vector<32x128xf32>
    %12 = arith.addf %6, %11 : vector<32x128xf32>
    %c0_11 = arith.constant 0 : index
    %c6_12 = arith.constant 6 : index
    %c118_13 = arith.constant 118 : index
    %13 = vector.load %arg1[%c0_11, %c6_12, %c118_13] : memref<1x8x384xf32, #tpu.memory_space<vmem>>, vector<1x2x128xf32>
    %14 = vector.shape_cast %13 : vector<1x2x128xf32> to vector<2x128xf32>
    %c2 = arith.constant 2 : index
    %c0_14 = arith.constant 0 : index
    %c0_15 = arith.constant 0 : index
    %15 = vector.load %arg2[%c2, %c0_14, %c0_15] : memref<9x32x2xf32, #tpu.memory_space<vmem>>, vector<1x32x2xf32>
    %16 = vector.shape_cast %15 : vector<1x32x2xf32> to vector<32x2xf32>
    %cst_16 = arith.constant dense<0.000000e+00> : vector<32x128xf32>
    %17 = tpu.matmul %16, %14, %cst_16 {dimension_numbers = #tpu.dot_dimension_numbers<[1], [0], [0], [1], [0, 0, 1, 1], [], []>} : vector<32x2xf32>, vector<2x128xf32>, vector<32x128xf32> -> vector<32x128xf32>
    %18 = arith.addf %12, %17 : vector<32x128xf32>
    %c0_17 = arith.constant 0 : index
    %c2_18 = arith.constant 2 : index
    %c127 = arith.constant 127 : index
    %19 = vector.load %arg1[%c0_17, %c2_18, %c127] : memref<1x8x384xf32, #tpu.memory_space<vmem>>, vector<1x2x128xf32>
    %20 = vector.shape_cast %19 : vector<1x2x128xf32> to vector<2x128xf32>
    %c3 = arith.constant 3 : index
    %c0_19 = arith.constant 0 : index
    %c0_20 = arith.constant 0 : index
    %21 = vector.load %arg2[%c3, %c0_19, %c0_20] : memref<9x32x2xf32, #tpu.memory_space<vmem>>, vector<1x32x2xf32>
    %22 = vector.shape_cast %21 : vector<1x32x2xf32> to vector<32x2xf32>
    %cst_21 = arith.constant dense<0.000000e+00> : vector<32x128xf32>
    %23 = tpu.matmul %22, %20, %cst_21 {dimension_numbers = #tpu.dot_dimension_numbers<[1], [0], [0], [1], [0, 0, 1, 1], [], []>} : vector<32x2xf32>, vector<2x128xf32>, vector<32x128xf32> -> vector<32x128xf32>
    %24 = arith.addf %18, %23 : vector<32x128xf32>
    %c0_22 = arith.constant 0 : index
    %c0_23 = arith.constant 0 : index
    %c128 = arith.constant 128 : index
    %25 = vector.load %arg1[%c0_22, %c0_23, %c128] : memref<1x8x384xf32, #tpu.memory_space<vmem>>, vector<1x2x128xf32>
    %26 = vector.shape_cast %25 : vector<1x2x128xf32> to vector<2x128xf32>
    %c4_24 = arith.constant 4 : index
    %c0_25 = arith.constant 0 : index
    %c0_26 = arith.constant 0 : index
    %27 = vector.load %arg2[%c4_24, %c0_25, %c0_26] : memref<9x32x2xf32, #tpu.memory_space<vmem>>, vector<1x32x2xf32>
    %28 = vector.shape_cast %27 : vector<1x32x2xf32> to vector<32x2xf32>
    %cst_27 = arith.constant dense<0.000000e+00> : vector<32x128xf32>
    %29 = tpu.matmul %28, %26, %cst_27 {dimension_numbers = #tpu.dot_dimension_numbers<[1], [0], [0], [1], [0, 0, 1, 1], [], []>} : vector<32x2xf32>, vector<2x128xf32>, vector<32x128xf32> -> vector<32x128xf32>
    %30 = arith.addf %24, %29 : vector<32x128xf32>
    %c0_28 = arith.constant 0 : index
    %c2_29 = arith.constant 2 : index
    %c128_30 = arith.constant 128 : index
    %31 = vector.load %arg1[%c0_28, %c2_29, %c128_30] : memref<1x8x384xf32, #tpu.memory_space<vmem>>, vector<1x2x128xf32>
    %32 = vector.shape_cast %31 : vector<1x2x128xf32> to vector<2x128xf32>
    %c5 = arith.constant 5 : index
    %c0_31 = arith.constant 0 : index
    %c0_32 = arith.constant 0 : index
    %33 = vector.load %arg2[%c5, %c0_31, %c0_32] : memref<9x32x2xf32, #tpu.memory_space<vmem>>, vector<1x32x2xf32>
    %34 = vector.shape_cast %33 : vector<1x32x2xf32> to vector<32x2xf32>
    %cst_33 = arith.constant dense<0.000000e+00> : vector<32x128xf32>
    %35 = tpu.matmul %34, %32, %cst_33 {dimension_numbers = #tpu.dot_dimension_numbers<[1], [0], [0], [1], [0, 0, 1, 1], [], []>} : vector<32x2xf32>, vector<2x128xf32>, vector<32x128xf32> -> vector<32x128xf32>
    %36 = arith.addf %30, %35 : vector<32x128xf32>
    %c0_34 = arith.constant 0 : index
    %c6_35 = arith.constant 6 : index
    %c127_36 = arith.constant 127 : index
    %37 = vector.load %arg1[%c0_34, %c6_35, %c127_36] : memref<1x8x384xf32, #tpu.memory_space<vmem>>, vector<1x2x128xf32>
    %38 = vector.shape_cast %37 : vector<1x2x128xf32> to vector<2x128xf32>
    %c6_37 = arith.constant 6 : index
    %c0_38 = arith.constant 0 : index
    %c0_39 = arith.constant 0 : index
    %39 = vector.load %arg2[%c6_37, %c0_38, %c0_39] : memref<9x32x2xf32, #tpu.memory_space<vmem>>, vector<1x32x2xf32>
    %40 = vector.shape_cast %39 : vector<1x32x2xf32> to vector<32x2xf32>
    %cst_40 = arith.constant dense<0.000000e+00> : vector<32x128xf32>
    %41 = tpu.matmul %40, %38, %cst_40 {dimension_numbers = #tpu.dot_dimension_numbers<[1], [0], [0], [1], [0, 0, 1, 1], [], []>} : vector<32x2xf32>, vector<2x128xf32>, vector<32x128xf32> -> vector<32x128xf32>
    %42 = arith.addf %36, %41 : vector<32x128xf32>
    %c0_41 = arith.constant 0 : index
    %c4_42 = arith.constant 4 : index
    %c128_43 = arith.constant 128 : index
    %43 = vector.load %arg1[%c0_41, %c4_42, %c128_43] : memref<1x8x384xf32, #tpu.memory_space<vmem>>, vector<1x2x128xf32>
    %44 = vector.shape_cast %43 : vector<1x2x128xf32> to vector<2x128xf32>
    %c7 = arith.constant 7 : index
    %c0_44 = arith.constant 0 : index
    %c0_45 = arith.constant 0 : index
    %45 = vector.load %arg2[%c7, %c0_44, %c0_45] : memref<9x32x2xf32, #tpu.memory_space<vmem>>, vector<1x32x2xf32>
    %46 = vector.shape_cast %45 : vector<1x32x2xf32> to vector<32x2xf32>
    %cst_46 = arith.constant dense<0.000000e+00> : vector<32x128xf32>
    %47 = tpu.matmul %46, %44, %cst_46 {dimension_numbers = #tpu.dot_dimension_numbers<[1], [0], [0], [1], [0, 0, 1, 1], [], []>} : vector<32x2xf32>, vector<2x128xf32>, vector<32x128xf32> -> vector<32x128xf32>
    %48 = arith.addf %42, %47 : vector<32x128xf32>
    %c0_47 = arith.constant 0 : index
    %c6_48 = arith.constant 6 : index
    %c128_49 = arith.constant 128 : index
    %49 = vector.load %arg1[%c0_47, %c6_48, %c128_49] : memref<1x8x384xf32, #tpu.memory_space<vmem>>, vector<1x2x128xf32>
    %50 = vector.shape_cast %49 : vector<1x2x128xf32> to vector<2x128xf32>
    %c8 = arith.constant 8 : index
    %c0_50 = arith.constant 0 : index
    %c0_51 = arith.constant 0 : index
    %51 = vector.load %arg2[%c8, %c0_50, %c0_51] : memref<9x32x2xf32, #tpu.memory_space<vmem>>, vector<1x32x2xf32>
    %52 = vector.shape_cast %51 : vector<1x32x2xf32> to vector<32x2xf32>
    %cst_52 = arith.constant dense<0.000000e+00> : vector<32x128xf32>
    %53 = tpu.matmul %52, %50, %cst_52 {dimension_numbers = #tpu.dot_dimension_numbers<[1], [0], [0], [1], [0, 0, 1, 1], [], []>} : vector<32x2xf32>, vector<2x128xf32>, vector<32x128xf32> -> vector<32x128xf32>
    %54 = arith.addf %48, %53 : vector<32x128xf32>
    %55 = vector.broadcast %1 : vector<32x1xf32> to vector<32x128xf32>
    %56 = arith.addf %54, %55 : vector<32x128xf32>
    %cst_53 = arith.constant 0.000000e+00 : f32
    %57 = vector.broadcast %cst_53 : f32 to vector<32x128xf32>
    %58 = arith.maximumf %56, %57 : vector<32x128xf32>
    %59 = vector.broadcast %0 : vector<1x128xf32> to vector<32x128xf32>
    %60 = arith.mulf %58, %59 : vector<32x128xf32>
    %c0_54 = arith.constant 0 : index
    %c0_55 = arith.constant 0 : index
    %c128_56 = arith.constant 128 : index
    %61 = vector.load %arg9[%c0_54, %c0_55, %c128_56] : memref<4x32x384xf32, #tpu.memory_space<vmem>>, vector<1x32x128xf32>
    %62 = vector.shape_cast %61 : vector<1x32x128xf32> to vector<32x128xf32>
    %63 = vector.shape_cast %60 : vector<32x128xf32> to vector<1x32x128xf32>
    tpu.vector_store %arg9[%c0_54, %c0_55, %c128_56], %63 {strides = array<i32>} : memref<4x32x384xf32, #tpu.memory_space<vmem>>, vector<1x32x128xf32>,
    %c0_57 = arith.constant 0 : index
    %c4_58 = arith.constant 4 : index
    %c118_59 = arith.constant 118 : index
    %64 = vector.load %arg1[%c0_57, %c4_58, %c118_59] : memref<1x8x384xf32, #tpu.memory_space<vmem>>, vector<1x2x128xf32>
    %65 = vector.shape_cast %64 : vector<1x2x128xf32> to vector<2x128xf32>
    %c0_60 = arith.constant 0 : index
    %c0_61 = arith.constant 0 : index
    %c0_62 = arith.constant 0 : index
    %66 = vector.load %arg2[%c0_60, %c0_61, %c0_62] : memref<9x32x2xf32, #tpu.memory_space<vmem>>, vector<1x32x2xf32>
    %67 = vector.shape_cast %66 : vector<1x32x2xf32> to vector<32x2xf32>
    %cst_63 = arith.constant dense<0.000000e+00> : vector<32x128xf32>
    %68 = tpu.matmul %67, %65, %cst_63 {dimension_numbers = #tpu.dot_dimension_numbers<[1], [0], [0], [1], [0, 0, 1, 1], [], []>} : vector<32x2xf32>, vector<2x128xf32>, vector<32x128xf32> -> vector<32x128xf32>
    %c0_64 = arith.constant 0 : index
    %c6_65 = arith.constant 6 : index
    %c118_66 = arith.constant 118 : index
    %69 = vector.load %arg1[%c0_64, %c6_65, %c118_66] : memref<1x8x384xf32, #tpu.memory_space<vmem>>, vector<1x2x128xf32>
    %70 = vector.shape_cast %69 : vector<1x2x128xf32> to vector<2x128xf32>
    %c1_67 = arith.constant 1 : index
    %c0_68 = arith.constant 0 : index
    %c0_69 = arith.constant 0 : index
    %71 = vector.load %arg2[%c1_67, %c0_68, %c0_69] : memref<9x32x2xf32, #tpu.memory_space<vmem>>, vector<1x32x2xf32>
    %72 = vector.shape_cast %71 : vector<1x32x2xf32> to vector<32x2xf32>
    %cst_70 = arith.constant dense<0.000000e+00> : vector<32x128xf32>
    %73 = tpu.matmul %72, %70, %cst_70 {dimension_numbers = #tpu.dot_dimension_numbers<[1], [0], [0], [1], [0, 0, 1, 1], [], []>} : vector<32x2xf32>, vector<2x128xf32>, vector<32x128xf32> -> vector<32x128xf32>
    %74 = arith.addf %68, %73 : vector<32x128xf32>
    %c0_71 = arith.constant 0 : index
    %c4_72 = arith.constant 4 : index
    %c119 = arith.constant 119 : index
    %75 = vector.load %arg1[%c0_71, %c4_72, %c119] : memref<1x8x384xf32, #tpu.memory_space<vmem>>, vector<1x2x128xf32>
    %76 = vector.shape_cast %75 : vector<1x2x128xf32> to vector<2x128xf32>
    %c2_73 = arith.constant 2 : index
    %c0_74 = arith.constant 0 : index
    %c0_75 = arith.constant 0 : index
    %77 = vector.load %arg2[%c2_73, %c0_74, %c0_75] : memref<9x32x2xf32, #tpu.memory_space<vmem>>, vector<1x32x2xf32>
    %78 = vector.shape_cast %77 : vector<1x32x2xf32> to vector<32x2xf32>
    %cst_76 = arith.constant dense<0.000000e+00> : vector<32x128xf32>
    %79 = tpu.matmul %78, %76, %cst_76 {dimension_numbers = #tpu.dot_dimension_numbers<[1], [0], [0], [1], [0, 0, 1, 1], [], []>} : vector<32x2xf32>, vector<2x128xf32>, vector<32x128xf32> -> vector<32x128xf32>
    %80 = arith.addf %74, %79 : vector<32x128xf32>
    %c0_77 = arith.constant 0 : index
    %c0_78 = arith.constant 0 : index
    %c128_79 = arith.constant 128 : index
    %81 = vector.load %arg1[%c0_77, %c0_78, %c128_79] : memref<1x8x384xf32, #tpu.memory_space<vmem>>, vector<1x2x128xf32>
    %82 = vector.shape_cast %81 : vector<1x2x128xf32> to vector<2x128xf32>
    %c3_80 = arith.constant 3 : index
    %c0_81 = arith.constant 0 : index
    %c0_82 = arith.constant 0 : index
    %83 = vector.load %arg2[%c3_80, %c0_81, %c0_82] : memref<9x32x2xf32, #tpu.memory_space<vmem>>, vector<1x32x2xf32>
    %84 = vector.shape_cast %83 : vector<1x32x2xf32> to vector<32x2xf32>
    %cst_83 = arith.constant dense<0.000000e+00> : vector<32x128xf32>
    %85 = tpu.matmul %84, %82, %cst_83 {dimension_numbers = #tpu.dot_dimension_numbers<[1], [0], [0], [1], [0, 0, 1, 1], [], []>} : vector<32x2xf32>, vector<2x128xf32>, vector<32x128xf32> -> vector<32x128xf32>
    %86 = arith.addf %80, %85 : vector<32x128xf32>
    %c0_84 = arith.constant 0 : index
    %c2_85 = arith.constant 2 : index
    %c128_86 = arith.constant 128 : index
    %87 = vector.load %arg1[%c0_84, %c2_85, %c128_86] : memref<1x8x384xf32, #tpu.memory_space<vmem>>, vector<1x2x128xf32>
    %88 = vector.shape_cast %87 : vector<1x2x128xf32> to vector<2x128xf32>
    %c4_87 = arith.constant 4 : index
    %c0_88 = arith.constant 0 : index
    %c0_89 = arith.constant 0 : index
    %89 = vector.load %arg2[%c4_87, %c0_88, %c0_89] : memref<9x32x2xf32, #tpu.memory_space<vmem>>, vector<1x32x2xf32>
    %90 = vector.shape_cast %89 : vector<1x32x2xf32> to vector<32x2xf32>
    %cst_90 = arith.constant dense<0.000000e+00> : vector<32x128xf32>
    %91 = tpu.matmul %90, %88, %cst_90 {dimension_numbers = #tpu.dot_dimension_numbers<[1], [0], [0], [1], [0, 0, 1, 1], [], []>} : vector<32x2xf32>, vector<2x128xf32>, vector<32x128xf32> -> vector<32x128xf32>
    %92 = arith.addf %86, %91 : vector<32x128xf32>
    %c0_91 = arith.constant 0 : index
    %c0_92 = arith.constant 0 : index
    %c129 = arith.constant 129 : index
    %93 = vector.load %arg1[%c0_91, %c0_92, %c129] : memref<1x8x384xf32, #tpu.memory_space<vmem>>, vector<1x2x128xf32>
    %94 = vector.shape_cast %93 : vector<1x2x128xf32> to vector<2x128xf32>
    %c5_93 = arith.constant 5 : index
    %c0_94 = arith.constant 0 : index
    %c0_95 = arith.constant 0 : index
    %95 = vector.load %arg2[%c5_93, %c0_94, %c0_95] : memref<9x32x2xf32, #tpu.memory_space<vmem>>, vector<1x32x2xf32>
    %96 = vector.shape_cast %95 : vector<1x32x2xf32> to vector<32x2xf32>
    %cst_96 = arith.constant dense<0.000000e+00> : vector<32x128xf32>
    %97 = tpu.matmul %96, %94, %cst_96 {dimension_numbers = #tpu.dot_dimension_numbers<[1], [0], [0], [1], [0, 0, 1, 1], [], []>} : vector<32x2xf32>, vector<2x128xf32>, vector<32x128xf32> -> vector<32x128xf32>
    %98 = arith.addf %92, %97 : vector<32x128xf32>
    %c0_97 = arith.constant 0 : index
    %c4_98 = arith.constant 4 : index
    %c128_99 = arith.constant 128 : index
    %99 = vector.load %arg1[%c0_97, %c4_98, %c128_99] : memref<1x8x384xf32, #tpu.memory_space<vmem>>, vector<1x2x128xf32>
    %100 = vector.shape_cast %99 : vector<1x2x128xf32> to vector<2x128xf32>
    %c6_100 = arith.constant 6 : index
    %c0_101 = arith.constant 0 : index
    %c0_102 = arith.constant 0 : index
    %101 = vector.load %arg2[%c6_100, %c0_101, %c0_102] : memref<9x32x2xf32, #tpu.memory_space<vmem>>, vector<1x32x2xf32>
    %102 = vector.shape_cast %101 : vector<1x32x2xf32> to vector<32x2xf32>
    %cst_103 = arith.constant dense<0.000000e+00> : vector<32x128xf32>
    %103 = tpu.matmul %102, %100, %cst_103 {dimension_numbers = #tpu.dot_dimension_numbers<[1], [0], [0], [1], [0, 0, 1, 1], [], []>} : vector<32x2xf32>, vector<2x128xf32>, vector<32x128xf32> -> vector<32x128xf32>
    %104 = arith.addf %98, %103 : vector<32x128xf32>
    %c0_104 = arith.constant 0 : index
    %c6_105 = arith.constant 6 : index
    %c128_106 = arith.constant 128 : index
    %105 = vector.load %arg1[%c0_104, %c6_105, %c128_106] : memref<1x8x384xf32, #tpu.memory_space<vmem>>, vector<1x2x128xf32>
    %106 = vector.shape_cast %105 : vector<1x2x128xf32> to vector<2x128xf32>
    %c7_107 = arith.constant 7 : index
    %c0_108 = arith.constant 0 : index
    %c0_109 = arith.constant 0 : index
    %107 = vector.load %arg2[%c7_107, %c0_108, %c0_109] : memref<9x32x2xf32, #tpu.memory_space<vmem>>, vector<1x32x2xf32>
    %108 = vector.shape_cast %107 : vector<1x32x2xf32> to vector<32x2xf32>
    %cst_110 = arith.constant dense<0.000000e+00> : vector<32x128xf32>
    %109 = tpu.matmul %108, %106, %cst_110 {dimension_numbers = #tpu.dot_dimension_numbers<[1], [0], [0], [1], [0, 0, 1, 1], [], []>} : vector<32x2xf32>, vector<2x128xf32>, vector<32x128xf32> -> vector<32x128xf32>
    %110 = arith.addf %104, %109 : vector<32x128xf32>
    %c0_111 = arith.constant 0 : index
    %c4_112 = arith.constant 4 : index
    %c129_113 = arith.constant 129 : index
    %111 = vector.load %arg1[%c0_111, %c4_112, %c129_113] : memref<1x8x384xf32, #tpu.memory_space<vmem>>, vector<1x2x128xf32>
    %112 = vector.shape_cast %111 : vector<1x2x128xf32> to vector<2x128xf32>
    %c8_114 = arith.constant 8 : index
    %c0_115 = arith.constant 0 : index
    %c0_116 = arith.constant 0 : index
    %113 = vector.load %arg2[%c8_114, %c0_115, %c0_116] : memref<9x32x2xf32, #tpu.memory_space<vmem>>, vector<1x32x2xf32>
    %114 = vector.shape_cast %113 : vector<1x32x2xf32> to vector<32x2xf32>
    %cst_117 = arith.constant dense<0.000000e+00> : vector<32x128xf32>
    %115 = tpu.matmul %114, %112, %cst_117 {dimension_numbers = #tpu.dot_dimension_numbers<[1], [0], [0], [1], [0, 0, 1, 1], [], []>} : vector<32x2xf32>, vector<2x128xf32>, vector<32x128xf32> -> vector<32x128xf32>
    %116 = arith.addf %110, %115 : vector<32x128xf32>
    %117 = vector.broadcast %1 : vector<32x1xf32> to vector<32x128xf32>
    %118 = arith.addf %116, %117 : vector<32x128xf32>
    %cst_118 = arith.constant 0.000000e+00 : f32
    %119 = vector.broadcast %cst_118 : f32 to vector<32x128xf32>
    %120 = arith.maximumf %118, %119 : vector<32x128xf32>
    %121 = vector.broadcast %0 : vector<1x128xf32> to vector<32x128xf32>
    %122 = arith.mulf %120, %121 : vector<32x128xf32>
    %c1_119 = arith.constant 1 : index
    %c0_120 = arith.constant 0 : index
    %c128_121 = arith.constant 128 : index
    %123 = vector.load %arg9[%c1_119, %c0_120, %c128_121] : memref<4x32x384xf32, #tpu.memory_space<vmem>>, vector<1x32x128xf32>
    %124 = vector.shape_cast %123 : vector<1x32x128xf32> to vector<32x128xf32>
    %125 = vector.shape_cast %122 : vector<32x128xf32> to vector<1x32x128xf32>
    tpu.vector_store %arg9[%c1_119, %c0_120, %c128_121], %125 {strides = array<i32>} : memref<4x32x384xf32, #tpu.memory_space<vmem>>, vector<1x32x128xf32>,
    %c0_122 = arith.constant 0 : index
    %c2_123 = arith.constant 2 : index
    %c127_124 = arith.constant 127 : index
    %126 = vector.load %arg1[%c0_122, %c2_123, %c127_124] : memref<1x8x384xf32, #tpu.memory_space<vmem>>, vector<1x2x128xf32>
    %127 = vector.shape_cast %126 : vector<1x2x128xf32> to vector<2x128xf32>
    %c0_125 = arith.constant 0 : index
    %c0_126 = arith.constant 0 : index
    %c0_127 = arith.constant 0 : index
    %128 = vector.load %arg2[%c0_125, %c0_126, %c0_127] : memref<9x32x2xf32, #tpu.memory_space<vmem>>, vector<1x32x2xf32>
    %129 = vector.shape_cast %128 : vector<1x32x2xf32> to vector<32x2xf32>
    %cst_128 = arith.constant dense<0.000000e+00> : vector<32x128xf32>
    %130 = tpu.matmul %129, %127, %cst_128 {dimension_numbers = #tpu.dot_dimension_numbers<[1], [0], [0], [1], [0, 0, 1, 1], [], []>} : vector<32x2xf32>, vector<2x128xf32>, vector<32x128xf32> -> vector<32x128xf32>
    %c0_129 = arith.constant 0 : index
    %c0_130 = arith.constant 0 : index
    %c128_131 = arith.constant 128 : index
    %131 = vector.load %arg1[%c0_129, %c0_130, %c128_131] : memref<1x8x384xf32, #tpu.memory_space<vmem>>, vector<1x2x128xf32>
    %132 = vector.shape_cast %131 : vector<1x2x128xf32> to vector<2x128xf32>
    %c1_132 = arith.constant 1 : index
    %c0_133 = arith.constant 0 : index
    %c0_134 = arith.constant 0 : index
    %133 = vector.load %arg2[%c1_132, %c0_133, %c0_134] : memref<9x32x2xf32, #tpu.memory_space<vmem>>, vector<1x32x2xf32>
    %134 = vector.shape_cast %133 : vector<1x32x2xf32> to vector<32x2xf32>
    %cst_135 = arith.constant dense<0.000000e+00> : vector<32x128xf32>
    %135 = tpu.matmul %134, %132, %cst_135 {dimension_numbers = #tpu.dot_dimension_numbers<[1], [0], [0], [1], [0, 0, 1, 1], [], []>} : vector<32x2xf32>, vector<2x128xf32>, vector<32x128xf32> -> vector<32x128xf32>
    %136 = arith.addf %130, %135 : vector<32x128xf32>
    %c0_136 = arith.constant 0 : index
    %c2_137 = arith.constant 2 : index
    %c128_138 = arith.constant 128 : index
    %137 = vector.load %arg1[%c0_136, %c2_137, %c128_138] : memref<1x8x384xf32, #tpu.memory_space<vmem>>, vector<1x2x128xf32>
    %138 = vector.shape_cast %137 : vector<1x2x128xf32> to vector<2x128xf32>
    %c2_139 = arith.constant 2 : index
    %c0_140 = arith.constant 0 : index
    %c0_141 = arith.constant 0 : index
    %139 = vector.load %arg2[%c2_139, %c0_140, %c0_141] : memref<9x32x2xf32, #tpu.memory_space<vmem>>, vector<1x32x2xf32>
    %140 = vector.shape_cast %139 : vector<1x32x2xf32> to vector<32x2xf32>
    %cst_142 = arith.constant dense<0.000000e+00> : vector<32x128xf32>
    %141 = tpu.matmul %140, %138, %cst_142 {dimension_numbers = #tpu.dot_dimension_numbers<[1], [0], [0], [1], [0, 0, 1, 1], [], []>} : vector<32x2xf32>, vector<2x128xf32>, vector<32x128xf32> -> vector<32x128xf32>
    %142 = arith.addf %136, %141 : vector<32x128xf32>
    %c0_143 = arith.constant 0 : index
    %c6_144 = arith.constant 6 : index
    %c127_145 = arith.constant 127 : index
    %143 = vector.load %arg1[%c0_143, %c6_144, %c127_145] : memref<1x8x384xf32, #tpu.memory_space<vmem>>, vector<1x2x128xf32>
    %144 = vector.shape_cast %143 : vector<1x2x128xf32> to vector<2x128xf32>
    %c3_146 = arith.constant 3 : index
    %c0_147 = arith.constant 0 : index
    %c0_148 = arith.constant 0 : index
    %145 = vector.load %arg2[%c3_146, %c0_147, %c0_148] : memref<9x32x2xf32, #tpu.memory_space<vmem>>, vector<1x32x2xf32>
    %146 = vector.shape_cast %145 : vector<1x32x2xf32> to vector<32x2xf32>
    %cst_149 = arith.constant dense<0.000000e+00> : vector<32x128xf32>
    %147 = tpu.matmul %146, %144, %cst_149 {dimension_numbers = #tpu.dot_dimension_numbers<[1], [0], [0], [1], [0, 0, 1, 1], [], []>} : vector<32x2xf32>, vector<2x128xf32>, vector<32x128xf32> -> vector<32x128xf32>
    %148 = arith.addf %142, %147 : vector<32x128xf32>
    %c0_150 = arith.constant 0 : index
    %c4_151 = arith.constant 4 : index
    %c128_152 = arith.constant 128 : index
    %149 = vector.load %arg1[%c0_150, %c4_151, %c128_152] : memref<1x8x384xf32, #tpu.memory_space<vmem>>, vector<1x2x128xf32>
    %150 = vector.shape_cast %149 : vector<1x2x128xf32> to vector<2x128xf32>
    %c4_153 = arith.constant 4 : index
    %c0_154 = arith.constant 0 : index
    %c0_155 = arith.constant 0 : index
    %151 = vector.load %arg2[%c4_153, %c0_154, %c0_155] : memref<9x32x2xf32, #tpu.memory_space<vmem>>, vector<1x32x2xf32>
    %152 = vector.shape_cast %151 : vector<1x32x2xf32> to vector<32x2xf32>
    %cst_156 = arith.constant dense<0.000000e+00> : vector<32x128xf32>
    %153 = tpu.matmul %152, %150, %cst_156 {dimension_numbers = #tpu.dot_dimension_numbers<[1], [0], [0], [1], [0, 0, 1, 1], [], []>} : vector<32x2xf32>, vector<2x128xf32>, vector<32x128xf32> -> vector<32x128xf32>
    %154 = arith.addf %148, %153 : vector<32x128xf32>
    %c0_157 = arith.constant 0 : index
    %c6_158 = arith.constant 6 : index
    %c128_159 = arith.constant 128 : index
    %155 = vector.load %arg1[%c0_157, %c6_158, %c128_159] : memref<1x8x384xf32, #tpu.memory_space<vmem>>, vector<1x2x128xf32>
    %156 = vector.shape_cast %155 : vector<1x2x128xf32> to vector<2x128xf32>
    %c5_160 = arith.constant 5 : index
    %c0_161 = arith.constant 0 : index
    %c0_162 = arith.constant 0 : index
    %157 = vector.load %arg2[%c5_160, %c0_161, %c0_162] : memref<9x32x2xf32, #tpu.memory_space<vmem>>, vector<1x32x2xf32>
    %158 = vector.shape_cast %157 : vector<1x32x2xf32> to vector<32x2xf32>
    %cst_163 = arith.constant dense<0.000000e+00> : vector<32x128xf32>
    %159 = tpu.matmul %158, %156, %cst_163 {dimension_numbers = #tpu.dot_dimension_numbers<[1], [0], [0], [1], [0, 0, 1, 1], [], []>} : vector<32x2xf32>, vector<2x128xf32>, vector<32x128xf32> -> vector<32x128xf32>
    %160 = arith.addf %154, %159 : vector<32x128xf32>
    %c0_164 = arith.constant 0 : index
    %c2_165 = arith.constant 2 : index
    %c137 = arith.constant 137 : index
    %161 = vector.load %arg1[%c0_164, %c2_165, %c137] : memref<1x8x384xf32, #tpu.memory_space<vmem>>, vector<1x2x128xf32>
    %162 = vector.shape_cast %161 : vector<1x2x128xf32> to vector<2x128xf32>
    %c6_166 = arith.constant 6 : index
    %c0_167 = arith.constant 0 : index
    %c0_168 = arith.constant 0 : index
    %163 = vector.load %arg2[%c6_166, %c0_167, %c0_168] : memref<9x32x2xf32, #tpu.memory_space<vmem>>, vector<1x32x2xf32>
    %164 = vector.shape_cast %163 : vector<1x32x2xf32> to vector<32x2xf32>
    %cst_169 = arith.constant dense<0.000000e+00> : vector<32x128xf32>
    %165 = tpu.matmul %164, %162, %cst_169 {dimension_numbers = #tpu.dot_dimension_numbers<[1], [0], [0], [1], [0, 0, 1, 1], [], []>} : vector<32x2xf32>, vector<2x128xf32>, vector<32x128xf32> -> vector<32x128xf32>
    %166 = arith.addf %160, %165 : vector<32x128xf32>
    %c0_170 = arith.constant 0 : index
    %c0_171 = arith.constant 0 : index
    %c138 = arith.constant 138 : index
    %167 = vector.load %arg1[%c0_170, %c0_171, %c138] : memref<1x8x384xf32, #tpu.memory_space<vmem>>, vector<1x2x128xf32>
    %168 = vector.shape_cast %167 : vector<1x2x128xf32> to vector<2x128xf32>
    %c7_172 = arith.constant 7 : index
    %c0_173 = arith.constant 0 : index
    %c0_174 = arith.constant 0 : index
    %169 = vector.load %arg2[%c7_172, %c0_173, %c0_174] : memref<9x32x2xf32, #tpu.memory_space<vmem>>, vector<1x32x2xf32>
    %170 = vector.shape_cast %169 : vector<1x32x2xf32> to vector<32x2xf32>
    %cst_175 = arith.constant dense<0.000000e+00> : vector<32x128xf32>
    %171 = tpu.matmul %170, %168, %cst_175 {dimension_numbers = #tpu.dot_dimension_numbers<[1], [0], [0], [1], [0, 0, 1, 1], [], []>} : vector<32x2xf32>, vector<2x128xf32>, vector<32x128xf32> -> vector<32x128xf32>
    %172 = arith.addf %166, %171 : vector<32x128xf32>
    %c0_176 = arith.constant 0 : index
    %c2_177 = arith.constant 2 : index
    %c138_178 = arith.constant 138 : index
    %173 = vector.load %arg1[%c0_176, %c2_177, %c138_178] : memref<1x8x384xf32, #tpu.memory_space<vmem>>, vector<1x2x128xf32>
    %174 = vector.shape_cast %173 : vector<1x2x128xf32> to vector<2x128xf32>
    %c8_179 = arith.constant 8 : index
    %c0_180 = arith.constant 0 : index
    %c0_181 = arith.constant 0 : index
    %175 = vector.load %arg2[%c8_179, %c0_180, %c0_181] : memref<9x32x2xf32, #tpu.memory_space<vmem>>, vector<1x32x2xf32>
    %176 = vector.shape_cast %175 : vector<1x32x2xf32> to vector<32x2xf32>
    %cst_182 = arith.constant dense<0.000000e+00> : vector<32x128xf32>
    %177 = tpu.matmul %176, %174, %cst_182 {dimension_numbers = #tpu.dot_dimension_numbers<[1], [0], [0], [1], [0, 0, 1, 1], [], []>} : vector<32x2xf32>, vector<2x128xf32>, vector<32x128xf32> -> vector<32x128xf32>
    %178 = arith.addf %172, %177 : vector<32x128xf32>
    %179 = vector.broadcast %1 : vector<32x1xf32> to vector<32x128xf32>
    %180 = arith.addf %178, %179 : vector<32x128xf32>
    %cst_183 = arith.constant 0.000000e+00 : f32
    %181 = vector.broadcast %cst_183 : f32 to vector<32x128xf32>
    %182 = arith.maximumf %180, %181 : vector<32x128xf32>
    %183 = vector.broadcast %0 : vector<1x128xf32> to vector<32x128xf32>
    %184 = arith.mulf %182, %183 : vector<32x128xf32>
    %c2_184 = arith.constant 2 : index
    %c0_185 = arith.constant 0 : index
    %c128_186 = arith.constant 128 : index
    %185 = vector.load %arg9[%c2_184, %c0_185, %c128_186] : memref<4x32x384xf32, #tpu.memory_space<vmem>>, vector<1x32x128xf32>
    %186 = vector.shape_cast %185 : vector<1x32x128xf32> to vector<32x128xf32>
    %187 = vector.shape_cast %184 : vector<32x128xf32> to vector<1x32x128xf32>
    tpu.vector_store %arg9[%c2_184, %c0_185, %c128_186], %187 {strides = array<i32>} : memref<4x32x384xf32, #tpu.memory_space<vmem>>, vector<1x32x128xf32>,
    %c0_187 = arith.constant 0 : index
    %c0_188 = arith.constant 0 : index
    %c128_189 = arith.constant 128 : index
    %188 = vector.load %arg1[%c0_187, %c0_188, %c128_189] : memref<1x8x384xf32, #tpu.memory_space<vmem>>, vector<1x2x128xf32>
    %189 = vector.shape_cast %188 : vector<1x2x128xf32> to vector<2x128xf32>
    %c0_190 = arith.constant 0 : index
    %c0_191 = arith.constant 0 : index
    %c0_192 = arith.constant 0 : index
    %190 = vector.load %arg2[%c0_190, %c0_191, %c0_192] : memref<9x32x2xf32, #tpu.memory_space<vmem>>, vector<1x32x2xf32>
    %191 = vector.shape_cast %190 : vector<1x32x2xf32> to vector<32x2xf32>
    %cst_193 = arith.constant dense<0.000000e+00> : vector<32x128xf32>
    %192 = tpu.matmul %191, %189, %cst_193 {dimension_numbers = #tpu.dot_dimension_numbers<[1], [0], [0], [1], [0, 0, 1, 1], [], []>} : vector<32x2xf32>, vector<2x128xf32>, vector<32x128xf32> -> vector<32x128xf32>
    %c0_194 = arith.constant 0 : index
    %c2_195 = arith.constant 2 : index
    %c128_196 = arith.constant 128 : index
    %193 = vector.load %arg1[%c0_194, %c2_195, %c128_196] : memref<1x8x384xf32, #tpu.memory_space<vmem>>, vector<1x2x128xf32>
    %194 = vector.shape_cast %193 : vector<1x2x128xf32> to vector<2x128xf32>
    %c1_197 = arith.constant 1 : index
    %c0_198 = arith.constant 0 : index
    %c0_199 = arith.constant 0 : index
    %195 = vector.load %arg2[%c1_197, %c0_198, %c0_199] : memref<9x32x2xf32, #tpu.memory_space<vmem>>, vector<1x32x2xf32>
    %196 = vector.shape_cast %195 : vector<1x32x2xf32> to vector<32x2xf32>
    %cst_200 = arith.constant dense<0.000000e+00> : vector<32x128xf32>
    %197 = tpu.matmul %196, %194, %cst_200 {dimension_numbers = #tpu.dot_dimension_numbers<[1], [0], [0], [1], [0, 0, 1, 1], [], []>} : vector<32x2xf32>, vector<2x128xf32>, vector<32x128xf32> -> vector<32x128xf32>
    %198 = arith.addf %192, %197 : vector<32x128xf32>
    %c0_201 = arith.constant 0 : index
    %c0_202 = arith.constant 0 : index
    %c129_203 = arith.constant 129 : index
    %199 = vector.load %arg1[%c0_201, %c0_202, %c129_203] : memref<1x8x384xf32, #tpu.memory_space<vmem>>, vector<1x2x128xf32>
    %200 = vector.shape_cast %199 : vector<1x2x128xf32> to vector<2x128xf32>
    %c2_204 = arith.constant 2 : index
    %c0_205 = arith.constant 0 : index
    %c0_206 = arith.constant 0 : index
    %201 = vector.load %arg2[%c2_204, %c0_205, %c0_206] : memref<9x32x2xf32, #tpu.memory_space<vmem>>, vector<1x32x2xf32>
    %202 = vector.shape_cast %201 : vector<1x32x2xf32> to vector<32x2xf32>
    %cst_207 = arith.constant dense<0.000000e+00> : vector<32x128xf32>
    %203 = tpu.matmul %202, %200, %cst_207 {dimension_numbers = #tpu.dot_dimension_numbers<[1], [0], [0], [1], [0, 0, 1, 1], [], []>} : vector<32x2xf32>, vector<2x128xf32>, vector<32x128xf32> -> vector<32x128xf32>
    %204 = arith.addf %198, %203 : vector<32x128xf32>
    %c0_208 = arith.constant 0 : index
    %c4_209 = arith.constant 4 : index
    %c128_210 = arith.constant 128 : index
    %205 = vector.load %arg1[%c0_208, %c4_209, %c128_210] : memref<1x8x384xf32, #tpu.memory_space<vmem>>, vector<1x2x128xf32>
    %206 = vector.shape_cast %205 : vector<1x2x128xf32> to vector<2x128xf32>
    %c3_211 = arith.constant 3 : index
    %c0_212 = arith.constant 0 : index
    %c0_213 = arith.constant 0 : index
    %207 = vector.load %arg2[%c3_211, %c0_212, %c0_213] : memref<9x32x2xf32, #tpu.memory_space<vmem>>, vector<1x32x2xf32>
    %208 = vector.shape_cast %207 : vector<1x32x2xf32> to vector<32x2xf32>
    %cst_214 = arith.constant dense<0.000000e+00> : vector<32x128xf32>
    %209 = tpu.matmul %208, %206, %cst_214 {dimension_numbers = #tpu.dot_dimension_numbers<[1], [0], [0], [1], [0, 0, 1, 1], [], []>} : vector<32x2xf32>, vector<2x128xf32>, vector<32x128xf32> -> vector<32x128xf32>
    %210 = arith.addf %204, %209 : vector<32x128xf32>
    %c0_215 = arith.constant 0 : index
    %c6_216 = arith.constant 6 : index
    %c128_217 = arith.constant 128 : index
    %211 = vector.load %arg1[%c0_215, %c6_216, %c128_217] : memref<1x8x384xf32, #tpu.memory_space<vmem>>, vector<1x2x128xf32>
    %212 = vector.shape_cast %211 : vector<1x2x128xf32> to vector<2x128xf32>
    %c4_218 = arith.constant 4 : index
    %c0_219 = arith.constant 0 : index
    %c0_220 = arith.constant 0 : index
    %213 = vector.load %arg2[%c4_218, %c0_219, %c0_220] : memref<9x32x2xf32, #tpu.memory_space<vmem>>, vector<1x32x2xf32>
    %214 = vector.shape_cast %213 : vector<1x32x2xf32> to vector<32x2xf32>
    %cst_221 = arith.constant dense<0.000000e+00> : vector<32x128xf32>
    %215 = tpu.matmul %214, %212, %cst_221 {dimension_numbers = #tpu.dot_dimension_numbers<[1], [0], [0], [1], [0, 0, 1, 1], [], []>} : vector<32x2xf32>, vector<2x128xf32>, vector<32x128xf32> -> vector<32x128xf32>
    %216 = arith.addf %210, %215 : vector<32x128xf32>
    %c0_222 = arith.constant 0 : index
    %c4_223 = arith.constant 4 : index
    %c129_224 = arith.constant 129 : index
    %217 = vector.load %arg1[%c0_222, %c4_223, %c129_224] : memref<1x8x384xf32, #tpu.memory_space<vmem>>, vector<1x2x128xf32>
    %218 = vector.shape_cast %217 : vector<1x2x128xf32> to vector<2x128xf32>
    %c5_225 = arith.constant 5 : index
    %c0_226 = arith.constant 0 : index
    %c0_227 = arith.constant 0 : index
    %219 = vector.load %arg2[%c5_225, %c0_226, %c0_227] : memref<9x32x2xf32, #tpu.memory_space<vmem>>, vector<1x32x2xf32>
    %220 = vector.shape_cast %219 : vector<1x32x2xf32> to vector<32x2xf32>
    %cst_228 = arith.constant dense<0.000000e+00> : vector<32x128xf32>
    %221 = tpu.matmul %220, %218, %cst_228 {dimension_numbers = #tpu.dot_dimension_numbers<[1], [0], [0], [1], [0, 0, 1, 1], [], []>} : vector<32x2xf32>, vector<2x128xf32>, vector<32x128xf32> -> vector<32x128xf32>
    %222 = arith.addf %216, %221 : vector<32x128xf32>
    %c0_229 = arith.constant 0 : index
    %c0_230 = arith.constant 0 : index
    %c138_231 = arith.constant 138 : index
    %223 = vector.load %arg1[%c0_229, %c0_230, %c138_231] : memref<1x8x384xf32, #tpu.memory_space<vmem>>, vector<1x2x128xf32>
    %224 = vector.shape_cast %223 : vector<1x2x128xf32> to vector<2x128xf32>
    %c6_232 = arith.constant 6 : index
    %c0_233 = arith.constant 0 : index
    %c0_234 = arith.constant 0 : index
    %225 = vector.load %arg2[%c6_232, %c0_233, %c0_234] : memref<9x32x2xf32, #tpu.memory_space<vmem>>, vector<1x32x2xf32>
    %226 = vector.shape_cast %225 : vector<1x32x2xf32> to vector<32x2xf32>
    %cst_235 = arith.constant dense<0.000000e+00> : vector<32x128xf32>
    %227 = tpu.matmul %226, %224, %cst_235 {dimension_numbers = #tpu.dot_dimension_numbers<[1], [0], [0], [1], [0, 0, 1, 1], [], []>} : vector<32x2xf32>, vector<2x128xf32>, vector<32x128xf32> -> vector<32x128xf32>
    %228 = arith.addf %222, %227 : vector<32x128xf32>
    %c0_236 = arith.constant 0 : index
    %c2_237 = arith.constant 2 : index
    %c138_238 = arith.constant 138 : index
    %229 = vector.load %arg1[%c0_236, %c2_237, %c138_238] : memref<1x8x384xf32, #tpu.memory_space<vmem>>, vector<1x2x128xf32>
    %230 = vector.shape_cast %229 : vector<1x2x128xf32> to vector<2x128xf32>
    %c7_239 = arith.constant 7 : index
    %c0_240 = arith.constant 0 : index
    %c0_241 = arith.constant 0 : index
    %231 = vector.load %arg2[%c7_239, %c0_240, %c0_241] : memref<9x32x2xf32, #tpu.memory_space<vmem>>, vector<1x32x2xf32>
    %232 = vector.shape_cast %231 : vector<1x32x2xf32> to vector<32x2xf32>
    %cst_242 = arith.constant dense<0.000000e+00> : vector<32x128xf32>
    %233 = tpu.matmul %232, %230, %cst_242 {dimension_numbers = #tpu.dot_dimension_numbers<[1], [0], [0], [1], [0, 0, 1, 1], [], []>} : vector<32x2xf32>, vector<2x128xf32>, vector<32x128xf32> -> vector<32x128xf32>
    %234 = arith.addf %228, %233 : vector<32x128xf32>
    %c0_243 = arith.constant 0 : index
    %c0_244 = arith.constant 0 : index
    %c139 = arith.constant 139 : index
    %235 = vector.load %arg1[%c0_243, %c0_244, %c139] : memref<1x8x384xf32, #tpu.memory_space<vmem>>, vector<1x2x128xf32>
    %236 = vector.shape_cast %235 : vector<1x2x128xf32> to vector<2x128xf32>
    %c8_245 = arith.constant 8 : index
    %c0_246 = arith.constant 0 : index
    %c0_247 = arith.constant 0 : index
    %237 = vector.load %arg2[%c8_245, %c0_246, %c0_247] : memref<9x32x2xf32, #tpu.memory_space<vmem>>, vector<1x32x2xf32>
    %238 = vector.shape_cast %237 : vector<1x32x2xf32> to vector<32x2xf32>
    %cst_248 = arith.constant dense<0.000000e+00> : vector<32x128xf32>
    %239 = tpu.matmul %238, %236, %cst_248 {dimension_numbers = #tpu.dot_dimension_numbers<[1], [0], [0], [1], [0, 0, 1, 1], [], []>} : vector<32x2xf32>, vector<2x128xf32>, vector<32x128xf32> -> vector<32x128xf32>
    %240 = arith.addf %234, %239 : vector<32x128xf32>
    %241 = vector.broadcast %1 : vector<32x1xf32> to vector<32x128xf32>
    %242 = arith.addf %240, %241 : vector<32x128xf32>
    %cst_249 = arith.constant 0.000000e+00 : f32
    %243 = vector.broadcast %cst_249 : f32 to vector<32x128xf32>
    %244 = arith.maximumf %242, %243 : vector<32x128xf32>
    %245 = vector.broadcast %0 : vector<1x128xf32> to vector<32x128xf32>
    %246 = arith.mulf %244, %245 : vector<32x128xf32>
    %c3_250 = arith.constant 3 : index
    %c0_251 = arith.constant 0 : index
    %c128_252 = arith.constant 128 : index
    %247 = vector.load %arg9[%c3_250, %c0_251, %c128_252] : memref<4x32x384xf32, #tpu.memory_space<vmem>>, vector<1x32x128xf32>
    %248 = vector.shape_cast %247 : vector<1x32x128xf32> to vector<32x128xf32>
    %249 = vector.shape_cast %246 : vector<32x128xf32> to vector<1x32x128xf32>
    tpu.vector_store %arg9[%c3_250, %c0_251, %c128_252], %249 {strides = array<i32>} : memref<4x32x384xf32, #tpu.memory_space<vmem>>, vector<1x32x128xf32>,
    %cst_253 = arith.constant 0.000000e+00 : f32
    %250 = vector.broadcast %cst_253 : f32 to vector<4x32x128xf32>
    %c0_254 = arith.constant 0 : index
    %c0_255 = arith.constant 0 : index
    %c0_256 = arith.constant 0 : index
    %251 = vector.load %arg9[%c0_254, %c0_255, %c0_256] : memref<4x32x384xf32, #tpu.memory_space<vmem>>, vector<4x32x128xf32>
    tpu.vector_store %arg9[%c0_254, %c0_255, %c0_256], %250 {strides = array<i32>} : memref<4x32x384xf32, #tpu.memory_space<vmem>>, vector<4x32x128xf32>,
    %cst_257 = arith.constant 0.000000e+00 : f32
    %252 = vector.broadcast %cst_257 : f32 to vector<4x32x128xf32>
    %c0_258 = arith.constant 0 : index
    %c0_259 = arith.constant 0 : index
    %c256 = arith.constant 256 : index
    %253 = vector.load %arg9[%c0_258, %c0_259, %c256] : memref<4x32x384xf32, #tpu.memory_space<vmem>>, vector<4x32x128xf32>
    tpu.vector_store %arg9[%c0_258, %c0_259, %c256], %252 {strides = array<i32>} : memref<4x32x384xf32, #tpu.memory_space<vmem>>, vector<4x32x128xf32>,
    %c3_260 = arith.constant 3 : index
    %c0_261 = arith.constant 0 : index
    %c117_262 = arith.constant 117 : index
    %254 = vector.load %arg9[%c3_260, %c0_261, %c117_262] : memref<4x32x384xf32, #tpu.memory_space<vmem>>, vector<1x32x128xf32>
    %255 = vector.shape_cast %254 : vector<1x32x128xf32> to vector<32x128xf32>
    %c0_263 = arith.constant 0 : index
    %c0_264 = arith.constant 0 : index
    %c0_265 = arith.constant 0 : index
    %256 = vector.load %arg4[%c0_263, %c0_264, %c0_265] : memref<16x32x32xf32, #tpu.memory_space<vmem>>, vector<1x32x32xf32>
    %257 = vector.shape_cast %256 : vector<1x32x32xf32> to vector<32x32xf32>
    %cst_266 = arith.constant dense<0.000000e+00> : vector<32x128xf32>
    %258 = tpu.matmul %257, %255, %cst_266 {dimension_numbers = #tpu.dot_dimension_numbers<[1], [0], [0], [1], [0, 0, 1, 1], [], []>} : vector<32x32xf32>, vector<32x128xf32>, vector<32x128xf32> -> vector<32x128xf32>
    %c2_267 = arith.constant 2 : index
    %c0_268 = arith.constant 0 : index
    %c118_269 = arith.constant 118 : index
    %259 = vector.load %arg9[%c2_267, %c0_268, %c118_269] : memref<4x32x384xf32, #tpu.memory_space<vmem>>, vector<1x32x128xf32>
    %260 = vector.shape_cast %259 : vector<1x32x128xf32> to vector<32x128xf32>
    %c1_270 = arith.constant 1 : index
    %c0_271 = arith.constant 0 : index
    %c0_272 = arith.constant 0 : index
    %261 = vector.load %arg4[%c1_270, %c0_271, %c0_272] : memref<16x32x32xf32, #tpu.memory_space<vmem>>, vector<1x32x32xf32>
    %262 = vector.shape_cast %261 : vector<1x32x32xf32> to vector<32x32xf32>
    %cst_273 = arith.constant dense<0.000000e+00> : vector<32x128xf32>
    %263 = tpu.matmul %262, %260, %cst_273 {dimension_numbers = #tpu.dot_dimension_numbers<[1], [0], [0], [1], [0, 0, 1, 1], [], []>} : vector<32x32xf32>, vector<32x128xf32>, vector<32x128xf32> -> vector<32x128xf32>
    %264 = arith.addf %258, %263 : vector<32x128xf32>
    %c3_274 = arith.constant 3 : index
    %c0_275 = arith.constant 0 : index
    %c118_276 = arith.constant 118 : index
    %265 = vector.load %arg9[%c3_274, %c0_275, %c118_276] : memref<4x32x384xf32, #tpu.memory_space<vmem>>, vector<1x32x128xf32>
    %266 = vector.shape_cast %265 : vector<1x32x128xf32> to vector<32x128xf32>
    %c2_277 = arith.constant 2 : index
    %c0_278 = arith.constant 0 : index
    %c0_279 = arith.constant 0 : index
    %267 = vector.load %arg4[%c2_277, %c0_278, %c0_279] : memref<16x32x32xf32, #tpu.memory_space<vmem>>, vector<1x32x32xf32>
    %268 = vector.shape_cast %267 : vector<1x32x32xf32> to vector<32x32xf32>
    %cst_280 = arith.constant dense<0.000000e+00> : vector<32x128xf32>
    %269 = tpu.matmul %268, %266, %cst_280 {dimension_numbers = #tpu.dot_dimension_numbers<[1], [0], [0], [1], [0, 0, 1, 1], [], []>} : vector<32x32xf32>, vector<32x128xf32>, vector<32x128xf32> -> vector<32x128xf32>
    %270 = arith.addf %264, %269 : vector<32x128xf32>
    %c2_281 = arith.constant 2 : index
    %c0_282 = arith.constant 0 : index
    %c119_283 = arith.constant 119 : index
    %271 = vector.load %arg9[%c2_281, %c0_282, %c119_283] : memref<4x32x384xf32, #tpu.memory_space<vmem>>, vector<1x32x128xf32>
    %272 = vector.shape_cast %271 : vector<1x32x128xf32> to vector<32x128xf32>
    %c3_284 = arith.constant 3 : index
    %c0_285 = arith.constant 0 : index
    %c0_286 = arith.constant 0 : index
    %273 = vector.load %arg4[%c3_284, %c0_285, %c0_286] : memref<16x32x32xf32, #tpu.memory_space<vmem>>, vector<1x32x32xf32>
    %274 = vector.shape_cast %273 : vector<1x32x32xf32> to vector<32x32xf32>
    %cst_287 = arith.constant dense<0.000000e+00> : vector<32x128xf32>
    %275 = tpu.matmul %274, %272, %cst_287 {dimension_numbers = #tpu.dot_dimension_numbers<[1], [0], [0], [1], [0, 0, 1, 1], [], []>} : vector<32x32xf32>, vector<32x128xf32>, vector<32x128xf32> -> vector<32x128xf32>
    %276 = arith.addf %270, %275 : vector<32x128xf32>
    %c1_288 = arith.constant 1 : index
    %c0_289 = arith.constant 0 : index
    %c127_290 = arith.constant 127 : index
    %277 = vector.load %arg9[%c1_288, %c0_289, %c127_290] : memref<4x32x384xf32, #tpu.memory_space<vmem>>, vector<1x32x128xf32>
    %278 = vector.shape_cast %277 : vector<1x32x128xf32> to vector<32x128xf32>
    %c4_291 = arith.constant 4 : index
    %c0_292 = arith.constant 0 : index
    %c0_293 = arith.constant 0 : index
    %279 = vector.load %arg4[%c4_291, %c0_292, %c0_293] : memref<16x32x32xf32, #tpu.memory_space<vmem>>, vector<1x32x32xf32>
    %280 = vector.shape_cast %279 : vector<1x32x32xf32> to vector<32x32xf32>
    %cst_294 = arith.constant dense<0.000000e+00> : vector<32x128xf32>
    %281 = tpu.matmul %280, %278, %cst_294 {dimension_numbers = #tpu.dot_dimension_numbers<[1], [0], [0], [1], [0, 0, 1, 1], [], []>} : vector<32x32xf32>, vector<32x128xf32>, vector<32x128xf32> -> vector<32x128xf32>
    %282 = arith.addf %276, %281 : vector<32x128xf32>
    %c0_295 = arith.constant 0 : index
    %c0_296 = arith.constant 0 : index
    %c128_297 = arith.constant 128 : index
    %283 = vector.load %arg9[%c0_295, %c0_296, %c128_297] : memref<4x32x384xf32, #tpu.memory_space<vmem>>, vector<1x32x128xf32>
    %284 = vector.shape_cast %283 : vector<1x32x128xf32> to vector<32x128xf32>
    %c5_298 = arith.constant 5 : index
    %c0_299 = arith.constant 0 : index
    %c0_300 = arith.constant 0 : index
    %285 = vector.load %arg4[%c5_298, %c0_299, %c0_300] : memref<16x32x32xf32, #tpu.memory_space<vmem>>, vector<1x32x32xf32>
    %286 = vector.shape_cast %285 : vector<1x32x32xf32> to vector<32x32xf32>
    %cst_301 = arith.constant dense<0.000000e+00> : vector<32x128xf32>
    %287 = tpu.matmul %286, %284, %cst_301 {dimension_numbers = #tpu.dot_dimension_numbers<[1], [0], [0], [1], [0, 0, 1, 1], [], []>} : vector<32x32xf32>, vector<32x128xf32>, vector<32x128xf32> -> vector<32x128xf32>
    %288 = arith.addf %282, %287 : vector<32x128xf32>
    %c1_302 = arith.constant 1 : index
    %c0_303 = arith.constant 0 : index
    %c128_304 = arith.constant 128 : index
    %289 = vector.load %arg9[%c1_302, %c0_303, %c128_304] : memref<4x32x384xf32, #tpu.memory_space<vmem>>, vector<1x32x128xf32>
    %290 = vector.shape_cast %289 : vector<1x32x128xf32> to vector<32x128xf32>
    %c6_305 = arith.constant 6 : index
    %c0_306 = arith.constant 0 : index
    %c0_307 = arith.constant 0 : index
    %291 = vector.load %arg4[%c6_305, %c0_306, %c0_307] : memref<16x32x32xf32, #tpu.memory_space<vmem>>, vector<1x32x32xf32>
    %292 = vector.shape_cast %291 : vector<1x32x32xf32> to vector<32x32xf32>
    %cst_308 = arith.constant dense<0.000000e+00> : vector<32x128xf32>
    %293 = tpu.matmul %292, %290, %cst_308 {dimension_numbers = #tpu.dot_dimension_numbers<[1], [0], [0], [1], [0, 0, 1, 1], [], []>} : vector<32x32xf32>, vector<32x128xf32>, vector<32x128xf32> -> vector<32x128xf32>
    %294 = arith.addf %288, %293 : vector<32x128xf32>
    %c0_309 = arith.constant 0 : index
    %c0_310 = arith.constant 0 : index
    %c129_311 = arith.constant 129 : index
    %295 = vector.load %arg9[%c0_309, %c0_310, %c129_311] : memref<4x32x384xf32, #tpu.memory_space<vmem>>, vector<1x32x128xf32>
    %296 = vector.shape_cast %295 : vector<1x32x128xf32> to vector<32x128xf32>
    %c7_312 = arith.constant 7 : index
    %c0_313 = arith.constant 0 : index
    %c0_314 = arith.constant 0 : index
    %297 = vector.load %arg4[%c7_312, %c0_313, %c0_314] : memref<16x32x32xf32, #tpu.memory_space<vmem>>, vector<1x32x32xf32>
    %298 = vector.shape_cast %297 : vector<1x32x32xf32> to vector<32x32xf32>
    %cst_315 = arith.constant dense<0.000000e+00> : vector<32x128xf32>
    %299 = tpu.matmul %298, %296, %cst_315 {dimension_numbers = #tpu.dot_dimension_numbers<[1], [0], [0], [1], [0, 0, 1, 1], [], []>} : vector<32x32xf32>, vector<32x128xf32>, vector<32x128xf32> -> vector<32x128xf32>
    %300 = arith.addf %294, %299 : vector<32x128xf32>
    %c3_316 = arith.constant 3 : index
    %c0_317 = arith.constant 0 : index
    %c127_318 = arith.constant 127 : index
    %301 = vector.load %arg9[%c3_316, %c0_317, %c127_318] : memref<4x32x384xf32, #tpu.memory_space<vmem>>, vector<1x32x128xf32>
    %302 = vector.shape_cast %301 : vector<1x32x128xf32> to vector<32x128xf32>
    %c8_319 = arith.constant 8 : index
    %c0_320 = arith.constant 0 : index
    %c0_321 = arith.constant 0 : index
    %303 = vector.load %arg4[%c8_319, %c0_320, %c0_321] : memref<16x32x32xf32, #tpu.memory_space<vmem>>, vector<1x32x32xf32>
    %304 = vector.shape_cast %303 : vector<1x32x32xf32> to vector<32x32xf32>
    %cst_322 = arith.constant dense<0.000000e+00> : vector<32x128xf32>
    %305 = tpu.matmul %304, %302, %cst_322 {dimension_numbers = #tpu.dot_dimension_numbers<[1], [0], [0], [1], [0, 0, 1, 1], [], []>} : vector<32x32xf32>, vector<32x128xf32>, vector<32x128xf32> -> vector<32x128xf32>
    %306 = arith.addf %300, %305 : vector<32x128xf32>
    %c2_323 = arith.constant 2 : index
    %c0_324 = arith.constant 0 : index
    %c128_325 = arith.constant 128 : index
    %307 = vector.load %arg9[%c2_323, %c0_324, %c128_325] : memref<4x32x384xf32, #tpu.memory_space<vmem>>, vector<1x32x128xf32>
    %308 = vector.shape_cast %307 : vector<1x32x128xf32> to vector<32x128xf32>
    %c9 = arith.constant 9 : index
    %c0_326 = arith.constant 0 : index
    %c0_327 = arith.constant 0 : index
    %309 = vector.load %arg4[%c9, %c0_326, %c0_327] : memref<16x32x32xf32, #tpu.memory_space<vmem>>, vector<1x32x32xf32>
    %310 = vector.shape_cast %309 : vector<1x32x32xf32> to vector<32x32xf32>
    %cst_328 = arith.constant dense<0.000000e+00> : vector<32x128xf32>
    %311 = tpu.matmul %310, %308, %cst_328 {dimension_numbers = #tpu.dot_dimension_numbers<[1], [0], [0], [1], [0, 0, 1, 1], [], []>} : vector<32x32xf32>, vector<32x128xf32>, vector<32x128xf32> -> vector<32x128xf32>
    %312 = arith.addf %306, %311 : vector<32x128xf32>
    %c3_329 = arith.constant 3 : index
    %c0_330 = arith.constant 0 : index
    %c128_331 = arith.constant 128 : index
    %313 = vector.load %arg9[%c3_329, %c0_330, %c128_331] : memref<4x32x384xf32, #tpu.memory_space<vmem>>, vector<1x32x128xf32>
    %314 = vector.shape_cast %313 : vector<1x32x128xf32> to vector<32x128xf32>
    %c10 = arith.constant 10 : index
    %c0_332 = arith.constant 0 : index
    %c0_333 = arith.constant 0 : index
    %315 = vector.load %arg4[%c10, %c0_332, %c0_333] : memref<16x32x32xf32, #tpu.memory_space<vmem>>, vector<1x32x32xf32>
    %316 = vector.shape_cast %315 : vector<1x32x32xf32> to vector<32x32xf32>
    %cst_334 = arith.constant dense<0.000000e+00> : vector<32x128xf32>
    %317 = tpu.matmul %316, %314, %cst_334 {dimension_numbers = #tpu.dot_dimension_numbers<[1], [0], [0], [1], [0, 0, 1, 1], [], []>} : vector<32x32xf32>, vector<32x128xf32>, vector<32x128xf32> -> vector<32x128xf32>
    %318 = arith.addf %312, %317 : vector<32x128xf32>
    %c2_335 = arith.constant 2 : index
    %c0_336 = arith.constant 0 : index
    %c129_337 = arith.constant 129 : index
    %319 = vector.load %arg9[%c2_335, %c0_336, %c129_337] : memref<4x32x384xf32, #tpu.memory_space<vmem>>, vector<1x32x128xf32>
    %320 = vector.shape_cast %319 : vector<1x32x128xf32> to vector<32x128xf32>
    %c11 = arith.constant 11 : index
    %c0_338 = arith.constant 0 : index
    %c0_339 = arith.constant 0 : index
    %321 = vector.load %arg4[%c11, %c0_338, %c0_339] : memref<16x32x32xf32, #tpu.memory_space<vmem>>, vector<1x32x32xf32>
    %322 = vector.shape_cast %321 : vector<1x32x32xf32> to vector<32x32xf32>
    %cst_340 = arith.constant dense<0.000000e+00> : vector<32x128xf32>
    %323 = tpu.matmul %322, %320, %cst_340 {dimension_numbers = #tpu.dot_dimension_numbers<[1], [0], [0], [1], [0, 0, 1, 1], [], []>} : vector<32x32xf32>, vector<32x128xf32>, vector<32x128xf32> -> vector<32x128xf32>
    %324 = arith.addf %318, %323 : vector<32x128xf32>
    %c1_341 = arith.constant 1 : index
    %c0_342 = arith.constant 0 : index
    %c137_343 = arith.constant 137 : index
    %325 = vector.load %arg9[%c1_341, %c0_342, %c137_343] : memref<4x32x384xf32, #tpu.memory_space<vmem>>, vector<1x32x128xf32>
    %326 = vector.shape_cast %325 : vector<1x32x128xf32> to vector<32x128xf32>
    %c12 = arith.constant 12 : index
    %c0_344 = arith.constant 0 : index
    %c0_345 = arith.constant 0 : index
    %327 = vector.load %arg4[%c12, %c0_344, %c0_345] : memref<16x32x32xf32, #tpu.memory_space<vmem>>, vector<1x32x32xf32>
    %328 = vector.shape_cast %327 : vector<1x32x32xf32> to vector<32x32xf32>
    %cst_346 = arith.constant dense<0.000000e+00> : vector<32x128xf32>
    %329 = tpu.matmul %328, %326, %cst_346 {dimension_numbers = #tpu.dot_dimension_numbers<[1], [0], [0], [1], [0, 0, 1, 1], [], []>} : vector<32x32xf32>, vector<32x128xf32>, vector<32x128xf32> -> vector<32x128xf32>
    %330 = arith.addf %324, %329 : vector<32x128xf32>
    %c0_347 = arith.constant 0 : index
    %c0_348 = arith.constant 0 : index
    %c138_349 = arith.constant 138 : index
    %331 = vector.load %arg9[%c0_347, %c0_348, %c138_349] : memref<4x32x384xf32, #tpu.memory_space<vmem>>, vector<1x32x128xf32>
    %332 = vector.shape_cast %331 : vector<1x32x128xf32> to vector<32x128xf32>
    %c13 = arith.constant 13 : index
    %c0_350 = arith.constant 0 : index
    %c0_351 = arith.constant 0 : index
    %333 = vector.load %arg4[%c13, %c0_350, %c0_351] : memref<16x32x32xf32, #tpu.memory_space<vmem>>, vector<1x32x32xf32>
    %334 = vector.shape_cast %333 : vector<1x32x32xf32> to vector<32x32xf32>
    %cst_352 = arith.constant dense<0.000000e+00> : vector<32x128xf32>
    %335 = tpu.matmul %334, %332, %cst_352 {dimension_numbers = #tpu.dot_dimension_numbers<[1], [0], [0], [1], [0, 0, 1, 1], [], []>} : vector<32x32xf32>, vector<32x128xf32>, vector<32x128xf32> -> vector<32x128xf32>
    %336 = arith.addf %330, %335 : vector<32x128xf32>
    %c1_353 = arith.constant 1 : index
    %c0_354 = arith.constant 0 : index
    %c138_355 = arith.constant 138 : index
    %337 = vector.load %arg9[%c1_353, %c0_354, %c138_355] : memref<4x32x384xf32, #tpu.memory_space<vmem>>, vector<1x32x128xf32>
    %338 = vector.shape_cast %337 : vector<1x32x128xf32> to vector<32x128xf32>
    %c14 = arith.constant 14 : index
    %c0_356 = arith.constant 0 : index
    %c0_357 = arith.constant 0 : index
    %339 = vector.load %arg4[%c14, %c0_356, %c0_357] : memref<16x32x32xf32, #tpu.memory_space<vmem>>, vector<1x32x32xf32>
    %340 = vector.shape_cast %339 : vector<1x32x32xf32> to vector<32x32xf32>
    %cst_358 = arith.constant dense<0.000000e+00> : vector<32x128xf32>
    %341 = tpu.matmul %340, %338, %cst_358 {dimension_numbers = #tpu.dot_dimension_numbers<[1], [0], [0], [1], [0, 0, 1, 1], [], []>} : vector<32x32xf32>, vector<32x128xf32>, vector<32x128xf32> -> vector<32x128xf32>
    %342 = arith.addf %336, %341 : vector<32x128xf32>
    %c0_359 = arith.constant 0 : index
    %c0_360 = arith.constant 0 : index
    %c139_361 = arith.constant 139 : index
    %343 = vector.load %arg9[%c0_359, %c0_360, %c139_361] : memref<4x32x384xf32, #tpu.memory_space<vmem>>, vector<1x32x128xf32>
    %344 = vector.shape_cast %343 : vector<1x32x128xf32> to vector<32x128xf32>
    %c15 = arith.constant 15 : index
    %c0_362 = arith.constant 0 : index
    %c0_363 = arith.constant 0 : index
    %345 = vector.load %arg4[%c15, %c0_362, %c0_363] : memref<16x32x32xf32, #tpu.memory_space<vmem>>, vector<1x32x32xf32>
    %346 = vector.shape_cast %345 : vector<1x32x32xf32> to vector<32x32xf32>
    %cst_364 = arith.constant dense<0.000000e+00> : vector<32x128xf32>
    %347 = tpu.matmul %346, %344, %cst_364 {dimension_numbers = #tpu.dot_dimension_numbers<[1], [0], [0], [1], [0, 0, 1, 1], [], []>} : vector<32x32xf32>, vector<32x128xf32>, vector<32x128xf32> -> vector<32x128xf32>
    %348 = arith.addf %342, %347 : vector<32x128xf32>
    %c0_365 = arith.constant 0 : index
    %c0_366 = arith.constant 0 : index
    %349 = vector.load %arg5[%c0_365, %c0_366] : memref<32x1xf32, #tpu.memory_space<vmem>>, vector<32x1xf32>
    %350 = vector.broadcast %349 : vector<32x1xf32> to vector<32x128xf32>
    %351 = arith.addf %348, %350 : vector<32x128xf32>
    %c0_367 = arith.constant 0 : index
    %352 = memref.load %arg6[%c0_367] : memref<1xf32, #tpu.memory_space<smem>>
    %cst_368 = arith.constant 0.000000e+00 : f32
    %353 = vector.broadcast %cst_368 : f32 to vector<32x128xf32>
    %354 = arith.cmpf oge, %351, %353 : vector<32x128xf32>
    %355 = vector.broadcast %352 : f32 to vector<32x128xf32>
    %356 = arith.mulf %355, %351 : vector<32x128xf32>
    %357 = arith.select %354, %351, %356 : vector<32x128xi1>, vector<32x128xf32>
    %358 = vector.broadcast %0 : vector<1x128xf32> to vector<32x128xf32>
    %359 = arith.mulf %357, %358 : vector<32x128xf32>
    %cst_369 = arith.constant 0.000000e+00 : bf16
    %360 = vector.broadcast %cst_369 : bf16 to vector<32x128xbf16>
    %c0_370 = arith.constant 0 : index
    %c0_371 = arith.constant 0 : index
    %c0_372 = arith.constant 0 : index
    %361 = vector.load %arg8[%c0_370, %c0_371, %c0_372] : memref<1x32x384xbf16, #tpu.memory_space<vmem>>, vector<1x32x128xbf16>
    %362 = vector.shape_cast %361 : vector<1x32x128xbf16> to vector<32x128xbf16>
    %363 = vector.shape_cast %360 : vector<32x128xbf16> to vector<1x32x128xbf16>
    tpu.vector_store %arg8[%c0_370, %c0_371, %c0_372], %363 {strides = array<i32>} : memref<1x32x384xbf16, #tpu.memory_space<vmem>>, vector<1x32x128xbf16>,
    %cst_373 = arith.constant 0.000000e+00 : bf16
    %364 = vector.broadcast %cst_373 : bf16 to vector<32x128xbf16>
    %c0_374 = arith.constant 0 : index
    %c0_375 = arith.constant 0 : index
    %c256_376 = arith.constant 256 : index
    %365 = vector.load %arg8[%c0_374, %c0_375, %c256_376] : memref<1x32x384xbf16, #tpu.memory_space<vmem>>, vector<1x32x128xbf16>
    %366 = vector.shape_cast %365 : vector<1x32x128xbf16> to vector<32x128xbf16>
    %367 = vector.shape_cast %364 : vector<32x128xbf16> to vector<1x32x128xbf16>
    tpu.vector_store %arg8[%c0_374, %c0_375, %c256_376], %367 {strides = array<i32>} : memref<1x32x384xbf16, #tpu.memory_space<vmem>>, vector<1x32x128xbf16>,
    %368 = arith.truncf %359 : vector<32x128xf32> to vector<32x128xbf16>
    %c0_377 = arith.constant 0 : index
    %c0_378 = arith.constant 0 : index
    %c128_379 = arith.constant 128 : index
    %369 = vector.load %arg8[%c0_377, %c0_378, %c128_379] : memref<1x32x384xbf16, #tpu.memory_space<vmem>>, vector<1x32x128xbf16>
    %370 = vector.shape_cast %369 : vector<1x32x128xbf16> to vector<32x128xbf16>
    %371 = vector.shape_cast %368 : vector<32x128xbf16> to vector<1x32x128xbf16>
    tpu.vector_store %arg8[%c0_377, %c0_378, %c128_379], %371 {strides = array<i32>} : memref<1x32x384xbf16, #tpu.memory_space<vmem>>, vector<1x32x128xbf16>,
    return
  }
  func.func @transform_0(%arg0: i32) -> (i32, i32, i32) {
    %c0_i32 = arith.constant 0 : i32
    %c0_i32_0 = arith.constant 0 : i32
    %c0_i32_1 = arith.constant 0 : i32
    return %arg0, %c0_i32, %c0_i32_0 : i32, i32, i32
  }
  func.func @transform_1(%arg0: i32) -> (i32, i32, i32) {
    %c0_i32 = arith.constant 0 : i32
    %c0_i32_0 = arith.constant 0 : i32
    %c0_i32_1 = arith.constant 0 : i32
    %c0_i32_2 = arith.constant 0 : i32
    return %c0_i32, %c0_i32_0, %c0_i32_1 : i32, i32, i32
  }
  func.func @transform_2(%arg0: i32) -> (i32, i32) {
    %c0_i32 = arith.constant 0 : i32
    %c0_i32_0 = arith.constant 0 : i32
    %c0_i32_1 = arith.constant 0 : i32
    return %c0_i32, %c0_i32_0 : i32, i32
  }
  func.func @transform_3(%arg0: i32) -> (i32, i32, i32) {
    %c0_i32 = arith.constant 0 : i32
    %c0_i32_0 = arith.constant 0 : i32
    %c0_i32_1 = arith.constant 0 : i32
    %c0_i32_2 = arith.constant 0 : i32
    return %c0_i32, %c0_i32_0, %c0_i32_1 : i32, i32, i32
  }
  func.func @transform_4(%arg0: i32) -> (i32, i32) {
    %c0_i32 = arith.constant 0 : i32
    %c0_i32_0 = arith.constant 0 : i32
    %c0_i32_1 = arith.constant 0 : i32
    return %c0_i32, %c0_i32_0 : i32, i32
  }
  func.func @transform_5(%arg0: i32) -> i32 {
    %c0_i32 = arith.constant 0 : i32
    %c0_i32_0 = arith.constant 0 : i32
    return %c0_i32 : i32
  }
  func.func @transform_6(%arg0: i32) -> (i32, i32) {
    %c0_i32 = arith.constant 0 : i32
    %c0_i32_0 = arith.constant 0 : i32
    %c0_i32_1 = arith.constant 0 : i32
    return %c0_i32, %c0_i32_0 : i32, i32
  }
  func.func @transform_7(%arg0: i32) -> (i32, i32, i32) {
    %c0_i32 = arith.constant 0 : i32
    %c0_i32_0 = arith.constant 0 : i32
    %c0_i32_1 = arith.constant 0 : i32
    return %arg0, %c0_i32, %c0_i32_0 : i32, i32, i32
  }
}

module attributes {stable_mosaic.version = 11 : i64} {
  func.func @_decoder_kernel(%arg0: i32, %arg1: memref<1x32x384xbf16, #tpu.memory_space<vmem>>, %arg2: memref<4x4x32x32xbf16, #tpu.memory_space<vmem>>, %arg3: memref<32x1xf32, #tpu.memory_space<vmem>>, %arg4: memref<9x2x32xf32, #tpu.memory_space<vmem>>, %arg5: memref<2x1xf32, #tpu.memory_space<vmem>>, %arg6: memref<1x128xf32, #tpu.memory_space<vmem>>, %arg7: memref<1x8x128xf32, #tpu.memory_space<vmem>>, %arg8: memref<4x32x384xf32, #tpu.memory_space<vmem>>) attributes {dimension_semantics = [#tpu.dimension_semantics<parallel>], iteration_bounds = array<i64: 2>, scalar_prefetch = 0 : i64, scratch_operands = 1 : i64, tpu.core_type = #tpu.core_type<tc>, window_params = [{transform_indices = @transform_0, window_bounds = array<i64: 1, 32, 384>}, {pipeline_mode = #tpu.pipeline_mode<synchronous>, transform_indices = @transform_1, window_bounds = array<i64: 4, 4, 32, 32>}, {pipeline_mode = #tpu.pipeline_mode<synchronous>, transform_indices = @transform_2, window_bounds = array<i64: 32, 1>}, {pipeline_mode = #tpu.pipeline_mode<synchronous>, transform_indices = @transform_3, window_bounds = array<i64: 9, 2, 32>}, {pipeline_mode = #tpu.pipeline_mode<synchronous>, transform_indices = @transform_4, window_bounds = array<i64: 2, 1>}, {pipeline_mode = #tpu.pipeline_mode<synchronous>, transform_indices = @transform_5, window_bounds = array<i64: 1, 128>}, {transform_indices = @transform_6, window_bounds = array<i64: 1, 8, 128>}]} {
    %c0 = arith.constant 0 : index
    %c0_0 = arith.constant 0 : index
    %0 = vector.load %arg6[%c0, %c0_0] : memref<1x128xf32, #tpu.memory_space<vmem>>, vector<1x128xf32>
    %c0_1 = arith.constant 0 : index
    %c0_2 = arith.constant 0 : index
    %1 = vector.load %arg3[%c0_1, %c0_2] : memref<32x1xf32, #tpu.memory_space<vmem>>, vector<32x1xf32>
    %c0_3 = arith.constant 0 : index
    %c0_4 = arith.constant 0 : index
    %2 = vector.load %arg5[%c0_3, %c0_4] : memref<2x1xf32, #tpu.memory_space<vmem>>, vector<2x1xf32>
    %cst = arith.constant 0.000000e+00 : f32
    %3 = vector.broadcast %cst : f32 to vector<4x32x128xf32>
    %c0_5 = arith.constant 0 : index
    %c0_6 = arith.constant 0 : index
    %c0_7 = arith.constant 0 : index
    %4 = vector.load %arg8[%c0_5, %c0_6, %c0_7] : memref<4x32x384xf32, #tpu.memory_space<vmem>>, vector<4x32x128xf32>
    tpu.vector_store %arg8[%c0_5, %c0_6, %c0_7], %3 {strides = array<i32>} : memref<4x32x384xf32, #tpu.memory_space<vmem>>, vector<4x32x128xf32>,
    %cst_8 = arith.constant 0.000000e+00 : f32
    %5 = vector.broadcast %cst_8 : f32 to vector<4x32x128xf32>
    %c0_9 = arith.constant 0 : index
    %c0_10 = arith.constant 0 : index
    %c256 = arith.constant 256 : index
    %6 = vector.load %arg8[%c0_9, %c0_10, %c256] : memref<4x32x384xf32, #tpu.memory_space<vmem>>, vector<4x32x128xf32>
    tpu.vector_store %arg8[%c0_9, %c0_10, %c256], %5 {strides = array<i32>} : memref<4x32x384xf32, #tpu.memory_space<vmem>>, vector<4x32x128xf32>,
    %c0_11 = arith.constant 0 : index
    %c0_12 = arith.constant 0 : index
    %c117 = arith.constant 117 : index
    %7 = vector.load %arg1[%c0_11, %c0_12, %c117] : memref<1x32x384xbf16, #tpu.memory_space<vmem>>, vector<1x32x128xbf16>
    %8 = vector.shape_cast %7 : vector<1x32x128xbf16> to vector<32x128xbf16>
    %c0_13 = arith.constant 0 : index
    %c0_14 = arith.constant 0 : index
    %c0_15 = arith.constant 0 : index
    %c0_16 = arith.constant 0 : index
    %9 = vector.load %arg2[%c0_13, %c0_14, %c0_15, %c0_16] : memref<4x4x32x32xbf16, #tpu.memory_space<vmem>>, vector<1x1x32x32xbf16>
    %10 = vector.shape_cast %9 : vector<1x1x32x32xbf16> to vector<32x32xbf16>
    %cst_17 = arith.constant dense<0.000000e+00> : vector<32x128xf32>
    %11 = tpu.matmul %10, %8, %cst_17 {dimension_numbers = #tpu.dot_dimension_numbers<[1], [0], [0], [1], [0, 0, 1, 1], [], []>} : vector<32x32xbf16>, vector<32x128xbf16>, vector<32x128xf32> -> vector<32x128xf32>
    %c0_18 = arith.constant 0 : index
    %c0_19 = arith.constant 0 : index
    %c118 = arith.constant 118 : index
    %12 = vector.load %arg1[%c0_18, %c0_19, %c118] : memref<1x32x384xbf16, #tpu.memory_space<vmem>>, vector<1x32x128xbf16>
    %13 = vector.shape_cast %12 : vector<1x32x128xbf16> to vector<32x128xbf16>
    %c0_20 = arith.constant 0 : index
    %c1 = arith.constant 1 : index
    %c0_21 = arith.constant 0 : index
    %c0_22 = arith.constant 0 : index
    %14 = vector.load %arg2[%c0_20, %c1, %c0_21, %c0_22] : memref<4x4x32x32xbf16, #tpu.memory_space<vmem>>, vector<1x1x32x32xbf16>
    %15 = vector.shape_cast %14 : vector<1x1x32x32xbf16> to vector<32x32xbf16>
    %cst_23 = arith.constant dense<0.000000e+00> : vector<32x128xf32>
    %16 = tpu.matmul %15, %13, %cst_23 {dimension_numbers = #tpu.dot_dimension_numbers<[1], [0], [0], [1], [0, 0, 1, 1], [], []>} : vector<32x32xbf16>, vector<32x128xbf16>, vector<32x128xf32> -> vector<32x128xf32>
    %17 = arith.addf %11, %16 : vector<32x128xf32>
    %c0_24 = arith.constant 0 : index
    %c0_25 = arith.constant 0 : index
    %c127 = arith.constant 127 : index
    %18 = vector.load %arg1[%c0_24, %c0_25, %c127] : memref<1x32x384xbf16, #tpu.memory_space<vmem>>, vector<1x32x128xbf16>
    %19 = vector.shape_cast %18 : vector<1x32x128xbf16> to vector<32x128xbf16>
    %c0_26 = arith.constant 0 : index
    %c2 = arith.constant 2 : index
    %c0_27 = arith.constant 0 : index
    %c0_28 = arith.constant 0 : index
    %20 = vector.load %arg2[%c0_26, %c2, %c0_27, %c0_28] : memref<4x4x32x32xbf16, #tpu.memory_space<vmem>>, vector<1x1x32x32xbf16>
    %21 = vector.shape_cast %20 : vector<1x1x32x32xbf16> to vector<32x32xbf16>
    %cst_29 = arith.constant dense<0.000000e+00> : vector<32x128xf32>
    %22 = tpu.matmul %21, %19, %cst_29 {dimension_numbers = #tpu.dot_dimension_numbers<[1], [0], [0], [1], [0, 0, 1, 1], [], []>} : vector<32x32xbf16>, vector<32x128xbf16>, vector<32x128xf32> -> vector<32x128xf32>
    %23 = arith.addf %17, %22 : vector<32x128xf32>
    %c0_30 = arith.constant 0 : index
    %c0_31 = arith.constant 0 : index
    %c128 = arith.constant 128 : index
    %24 = vector.load %arg1[%c0_30, %c0_31, %c128] : memref<1x32x384xbf16, #tpu.memory_space<vmem>>, vector<1x32x128xbf16>
    %25 = vector.shape_cast %24 : vector<1x32x128xbf16> to vector<32x128xbf16>
    %c0_32 = arith.constant 0 : index
    %c3 = arith.constant 3 : index
    %c0_33 = arith.constant 0 : index
    %c0_34 = arith.constant 0 : index
    %26 = vector.load %arg2[%c0_32, %c3, %c0_33, %c0_34] : memref<4x4x32x32xbf16, #tpu.memory_space<vmem>>, vector<1x1x32x32xbf16>
    %27 = vector.shape_cast %26 : vector<1x1x32x32xbf16> to vector<32x32xbf16>
    %cst_35 = arith.constant dense<0.000000e+00> : vector<32x128xf32>
    %28 = tpu.matmul %27, %25, %cst_35 {dimension_numbers = #tpu.dot_dimension_numbers<[1], [0], [0], [1], [0, 0, 1, 1], [], []>} : vector<32x32xbf16>, vector<32x128xbf16>, vector<32x128xf32> -> vector<32x128xf32>
    %29 = arith.addf %23, %28 : vector<32x128xf32>
    %30 = vector.broadcast %1 : vector<32x1xf32> to vector<32x128xf32>
    %31 = arith.addf %29, %30 : vector<32x128xf32>
    %cst_36 = arith.constant 0.000000e+00 : f32
    %32 = vector.broadcast %cst_36 : f32 to vector<32x128xf32>
    %33 = arith.maximumf %31, %32 : vector<32x128xf32>
    %34 = vector.broadcast %0 : vector<1x128xf32> to vector<32x128xf32>
    %35 = arith.mulf %33, %34 : vector<32x128xf32>
    %c0_37 = arith.constant 0 : index
    %c0_38 = arith.constant 0 : index
    %c128_39 = arith.constant 128 : index
    %36 = vector.load %arg8[%c0_37, %c0_38, %c128_39] : memref<4x32x384xf32, #tpu.memory_space<vmem>>, vector<1x32x128xf32>
    %37 = vector.shape_cast %36 : vector<1x32x128xf32> to vector<32x128xf32>
    %38 = vector.shape_cast %35 : vector<32x128xf32> to vector<1x32x128xf32>
    tpu.vector_store %arg8[%c0_37, %c0_38, %c128_39], %38 {strides = array<i32>} : memref<4x32x384xf32, #tpu.memory_space<vmem>>, vector<1x32x128xf32>,
    %c0_40 = arith.constant 0 : index
    %c0_41 = arith.constant 0 : index
    %c118_42 = arith.constant 118 : index
    %39 = vector.load %arg1[%c0_40, %c0_41, %c118_42] : memref<1x32x384xbf16, #tpu.memory_space<vmem>>, vector<1x32x128xbf16>
    %40 = vector.shape_cast %39 : vector<1x32x128xbf16> to vector<32x128xbf16>
    %c1_43 = arith.constant 1 : index
    %c0_44 = arith.constant 0 : index
    %c0_45 = arith.constant 0 : index
    %c0_46 = arith.constant 0 : index
    %41 = vector.load %arg2[%c1_43, %c0_44, %c0_45, %c0_46] : memref<4x4x32x32xbf16, #tpu.memory_space<vmem>>, vector<1x1x32x32xbf16>
    %42 = vector.shape_cast %41 : vector<1x1x32x32xbf16> to vector<32x32xbf16>
    %cst_47 = arith.constant dense<0.000000e+00> : vector<32x128xf32>
    %43 = tpu.matmul %42, %40, %cst_47 {dimension_numbers = #tpu.dot_dimension_numbers<[1], [0], [0], [1], [0, 0, 1, 1], [], []>} : vector<32x32xbf16>, vector<32x128xbf16>, vector<32x128xf32> -> vector<32x128xf32>
    %c0_48 = arith.constant 0 : index
    %c0_49 = arith.constant 0 : index
    %c119 = arith.constant 119 : index
    %44 = vector.load %arg1[%c0_48, %c0_49, %c119] : memref<1x32x384xbf16, #tpu.memory_space<vmem>>, vector<1x32x128xbf16>
    %45 = vector.shape_cast %44 : vector<1x32x128xbf16> to vector<32x128xbf16>
    %c1_50 = arith.constant 1 : index
    %c1_51 = arith.constant 1 : index
    %c0_52 = arith.constant 0 : index
    %c0_53 = arith.constant 0 : index
    %46 = vector.load %arg2[%c1_50, %c1_51, %c0_52, %c0_53] : memref<4x4x32x32xbf16, #tpu.memory_space<vmem>>, vector<1x1x32x32xbf16>
    %47 = vector.shape_cast %46 : vector<1x1x32x32xbf16> to vector<32x32xbf16>
    %cst_54 = arith.constant dense<0.000000e+00> : vector<32x128xf32>
    %48 = tpu.matmul %47, %45, %cst_54 {dimension_numbers = #tpu.dot_dimension_numbers<[1], [0], [0], [1], [0, 0, 1, 1], [], []>} : vector<32x32xbf16>, vector<32x128xbf16>, vector<32x128xf32> -> vector<32x128xf32>
    %49 = arith.addf %43, %48 : vector<32x128xf32>
    %c0_55 = arith.constant 0 : index
    %c0_56 = arith.constant 0 : index
    %c128_57 = arith.constant 128 : index
    %50 = vector.load %arg1[%c0_55, %c0_56, %c128_57] : memref<1x32x384xbf16, #tpu.memory_space<vmem>>, vector<1x32x128xbf16>
    %51 = vector.shape_cast %50 : vector<1x32x128xbf16> to vector<32x128xbf16>
    %c1_58 = arith.constant 1 : index
    %c2_59 = arith.constant 2 : index
    %c0_60 = arith.constant 0 : index
    %c0_61 = arith.constant 0 : index
    %52 = vector.load %arg2[%c1_58, %c2_59, %c0_60, %c0_61] : memref<4x4x32x32xbf16, #tpu.memory_space<vmem>>, vector<1x1x32x32xbf16>
    %53 = vector.shape_cast %52 : vector<1x1x32x32xbf16> to vector<32x32xbf16>
    %cst_62 = arith.constant dense<0.000000e+00> : vector<32x128xf32>
    %54 = tpu.matmul %53, %51, %cst_62 {dimension_numbers = #tpu.dot_dimension_numbers<[1], [0], [0], [1], [0, 0, 1, 1], [], []>} : vector<32x32xbf16>, vector<32x128xbf16>, vector<32x128xf32> -> vector<32x128xf32>
    %55 = arith.addf %49, %54 : vector<32x128xf32>
    %c0_63 = arith.constant 0 : index
    %c0_64 = arith.constant 0 : index
    %c129 = arith.constant 129 : index
    %56 = vector.load %arg1[%c0_63, %c0_64, %c129] : memref<1x32x384xbf16, #tpu.memory_space<vmem>>, vector<1x32x128xbf16>
    %57 = vector.shape_cast %56 : vector<1x32x128xbf16> to vector<32x128xbf16>
    %c1_65 = arith.constant 1 : index
    %c3_66 = arith.constant 3 : index
    %c0_67 = arith.constant 0 : index
    %c0_68 = arith.constant 0 : index
    %58 = vector.load %arg2[%c1_65, %c3_66, %c0_67, %c0_68] : memref<4x4x32x32xbf16, #tpu.memory_space<vmem>>, vector<1x1x32x32xbf16>
    %59 = vector.shape_cast %58 : vector<1x1x32x32xbf16> to vector<32x32xbf16>
    %cst_69 = arith.constant dense<0.000000e+00> : vector<32x128xf32>
    %60 = tpu.matmul %59, %57, %cst_69 {dimension_numbers = #tpu.dot_dimension_numbers<[1], [0], [0], [1], [0, 0, 1, 1], [], []>} : vector<32x32xbf16>, vector<32x128xbf16>, vector<32x128xf32> -> vector<32x128xf32>
    %61 = arith.addf %55, %60 : vector<32x128xf32>
    %62 = vector.broadcast %1 : vector<32x1xf32> to vector<32x128xf32>
    %63 = arith.addf %61, %62 : vector<32x128xf32>
    %cst_70 = arith.constant 0.000000e+00 : f32
    %64 = vector.broadcast %cst_70 : f32 to vector<32x128xf32>
    %65 = arith.maximumf %63, %64 : vector<32x128xf32>
    %66 = vector.broadcast %0 : vector<1x128xf32> to vector<32x128xf32>
    %67 = arith.mulf %65, %66 : vector<32x128xf32>
    %c1_71 = arith.constant 1 : index
    %c0_72 = arith.constant 0 : index
    %c128_73 = arith.constant 128 : index
    %68 = vector.load %arg8[%c1_71, %c0_72, %c128_73] : memref<4x32x384xf32, #tpu.memory_space<vmem>>, vector<1x32x128xf32>
    %69 = vector.shape_cast %68 : vector<1x32x128xf32> to vector<32x128xf32>
    %70 = vector.shape_cast %67 : vector<32x128xf32> to vector<1x32x128xf32>
    tpu.vector_store %arg8[%c1_71, %c0_72, %c128_73], %70 {strides = array<i32>} : memref<4x32x384xf32, #tpu.memory_space<vmem>>, vector<1x32x128xf32>,
    %c0_74 = arith.constant 0 : index
    %c0_75 = arith.constant 0 : index
    %c127_76 = arith.constant 127 : index
    %71 = vector.load %arg1[%c0_74, %c0_75, %c127_76] : memref<1x32x384xbf16, #tpu.memory_space<vmem>>, vector<1x32x128xbf16>
    %72 = vector.shape_cast %71 : vector<1x32x128xbf16> to vector<32x128xbf16>
    %c2_77 = arith.constant 2 : index
    %c0_78 = arith.constant 0 : index
    %c0_79 = arith.constant 0 : index
    %c0_80 = arith.constant 0 : index
    %73 = vector.load %arg2[%c2_77, %c0_78, %c0_79, %c0_80] : memref<4x4x32x32xbf16, #tpu.memory_space<vmem>>, vector<1x1x32x32xbf16>
    %74 = vector.shape_cast %73 : vector<1x1x32x32xbf16> to vector<32x32xbf16>
    %cst_81 = arith.constant dense<0.000000e+00> : vector<32x128xf32>
    %75 = tpu.matmul %74, %72, %cst_81 {dimension_numbers = #tpu.dot_dimension_numbers<[1], [0], [0], [1], [0, 0, 1, 1], [], []>} : vector<32x32xbf16>, vector<32x128xbf16>, vector<32x128xf32> -> vector<32x128xf32>
    %c0_82 = arith.constant 0 : index
    %c0_83 = arith.constant 0 : index
    %c128_84 = arith.constant 128 : index
    %76 = vector.load %arg1[%c0_82, %c0_83, %c128_84] : memref<1x32x384xbf16, #tpu.memory_space<vmem>>, vector<1x32x128xbf16>
    %77 = vector.shape_cast %76 : vector<1x32x128xbf16> to vector<32x128xbf16>
    %c2_85 = arith.constant 2 : index
    %c1_86 = arith.constant 1 : index
    %c0_87 = arith.constant 0 : index
    %c0_88 = arith.constant 0 : index
    %78 = vector.load %arg2[%c2_85, %c1_86, %c0_87, %c0_88] : memref<4x4x32x32xbf16, #tpu.memory_space<vmem>>, vector<1x1x32x32xbf16>
    %79 = vector.shape_cast %78 : vector<1x1x32x32xbf16> to vector<32x32xbf16>
    %cst_89 = arith.constant dense<0.000000e+00> : vector<32x128xf32>
    %80 = tpu.matmul %79, %77, %cst_89 {dimension_numbers = #tpu.dot_dimension_numbers<[1], [0], [0], [1], [0, 0, 1, 1], [], []>} : vector<32x32xbf16>, vector<32x128xbf16>, vector<32x128xf32> -> vector<32x128xf32>
    %81 = arith.addf %75, %80 : vector<32x128xf32>
    %c0_90 = arith.constant 0 : index
    %c0_91 = arith.constant 0 : index
    %c137 = arith.constant 137 : index
    %82 = vector.load %arg1[%c0_90, %c0_91, %c137] : memref<1x32x384xbf16, #tpu.memory_space<vmem>>, vector<1x32x128xbf16>
    %83 = vector.shape_cast %82 : vector<1x32x128xbf16> to vector<32x128xbf16>
    %c2_92 = arith.constant 2 : index
    %c2_93 = arith.constant 2 : index
    %c0_94 = arith.constant 0 : index
    %c0_95 = arith.constant 0 : index
    %84 = vector.load %arg2[%c2_92, %c2_93, %c0_94, %c0_95] : memref<4x4x32x32xbf16, #tpu.memory_space<vmem>>, vector<1x1x32x32xbf16>
    %85 = vector.shape_cast %84 : vector<1x1x32x32xbf16> to vector<32x32xbf16>
    %cst_96 = arith.constant dense<0.000000e+00> : vector<32x128xf32>
    %86 = tpu.matmul %85, %83, %cst_96 {dimension_numbers = #tpu.dot_dimension_numbers<[1], [0], [0], [1], [0, 0, 1, 1], [], []>} : vector<32x32xbf16>, vector<32x128xbf16>, vector<32x128xf32> -> vector<32x128xf32>
    %87 = arith.addf %81, %86 : vector<32x128xf32>
    %c0_97 = arith.constant 0 : index
    %c0_98 = arith.constant 0 : index
    %c138 = arith.constant 138 : index
    %88 = vector.load %arg1[%c0_97, %c0_98, %c138] : memref<1x32x384xbf16, #tpu.memory_space<vmem>>, vector<1x32x128xbf16>
    %89 = vector.shape_cast %88 : vector<1x32x128xbf16> to vector<32x128xbf16>
    %c2_99 = arith.constant 2 : index
    %c3_100 = arith.constant 3 : index
    %c0_101 = arith.constant 0 : index
    %c0_102 = arith.constant 0 : index
    %90 = vector.load %arg2[%c2_99, %c3_100, %c0_101, %c0_102] : memref<4x4x32x32xbf16, #tpu.memory_space<vmem>>, vector<1x1x32x32xbf16>
    %91 = vector.shape_cast %90 : vector<1x1x32x32xbf16> to vector<32x32xbf16>
    %cst_103 = arith.constant dense<0.000000e+00> : vector<32x128xf32>
    %92 = tpu.matmul %91, %89, %cst_103 {dimension_numbers = #tpu.dot_dimension_numbers<[1], [0], [0], [1], [0, 0, 1, 1], [], []>} : vector<32x32xbf16>, vector<32x128xbf16>, vector<32x128xf32> -> vector<32x128xf32>
    %93 = arith.addf %87, %92 : vector<32x128xf32>
    %94 = vector.broadcast %1 : vector<32x1xf32> to vector<32x128xf32>
    %95 = arith.addf %93, %94 : vector<32x128xf32>
    %cst_104 = arith.constant 0.000000e+00 : f32
    %96 = vector.broadcast %cst_104 : f32 to vector<32x128xf32>
    %97 = arith.maximumf %95, %96 : vector<32x128xf32>
    %98 = vector.broadcast %0 : vector<1x128xf32> to vector<32x128xf32>
    %99 = arith.mulf %97, %98 : vector<32x128xf32>
    %c2_105 = arith.constant 2 : index
    %c0_106 = arith.constant 0 : index
    %c128_107 = arith.constant 128 : index
    %100 = vector.load %arg8[%c2_105, %c0_106, %c128_107] : memref<4x32x384xf32, #tpu.memory_space<vmem>>, vector<1x32x128xf32>
    %101 = vector.shape_cast %100 : vector<1x32x128xf32> to vector<32x128xf32>
    %102 = vector.shape_cast %99 : vector<32x128xf32> to vector<1x32x128xf32>
    tpu.vector_store %arg8[%c2_105, %c0_106, %c128_107], %102 {strides = array<i32>} : memref<4x32x384xf32, #tpu.memory_space<vmem>>, vector<1x32x128xf32>,
    %c0_108 = arith.constant 0 : index
    %c0_109 = arith.constant 0 : index
    %c128_110 = arith.constant 128 : index
    %103 = vector.load %arg1[%c0_108, %c0_109, %c128_110] : memref<1x32x384xbf16, #tpu.memory_space<vmem>>, vector<1x32x128xbf16>
    %104 = vector.shape_cast %103 : vector<1x32x128xbf16> to vector<32x128xbf16>
    %c3_111 = arith.constant 3 : index
    %c0_112 = arith.constant 0 : index
    %c0_113 = arith.constant 0 : index
    %c0_114 = arith.constant 0 : index
    %105 = vector.load %arg2[%c3_111, %c0_112, %c0_113, %c0_114] : memref<4x4x32x32xbf16, #tpu.memory_space<vmem>>, vector<1x1x32x32xbf16>
    %106 = vector.shape_cast %105 : vector<1x1x32x32xbf16> to vector<32x32xbf16>
    %cst_115 = arith.constant dense<0.000000e+00> : vector<32x128xf32>
    %107 = tpu.matmul %106, %104, %cst_115 {dimension_numbers = #tpu.dot_dimension_numbers<[1], [0], [0], [1], [0, 0, 1, 1], [], []>} : vector<32x32xbf16>, vector<32x128xbf16>, vector<32x128xf32> -> vector<32x128xf32>
    %c0_116 = arith.constant 0 : index
    %c0_117 = arith.constant 0 : index
    %c129_118 = arith.constant 129 : index
    %108 = vector.load %arg1[%c0_116, %c0_117, %c129_118] : memref<1x32x384xbf16, #tpu.memory_space<vmem>>, vector<1x32x128xbf16>
    %109 = vector.shape_cast %108 : vector<1x32x128xbf16> to vector<32x128xbf16>
    %c3_119 = arith.constant 3 : index
    %c1_120 = arith.constant 1 : index
    %c0_121 = arith.constant 0 : index
    %c0_122 = arith.constant 0 : index
    %110 = vector.load %arg2[%c3_119, %c1_120, %c0_121, %c0_122] : memref<4x4x32x32xbf16, #tpu.memory_space<vmem>>, vector<1x1x32x32xbf16>
    %111 = vector.shape_cast %110 : vector<1x1x32x32xbf16> to vector<32x32xbf16>
    %cst_123 = arith.constant dense<0.000000e+00> : vector<32x128xf32>
    %112 = tpu.matmul %111, %109, %cst_123 {dimension_numbers = #tpu.dot_dimension_numbers<[1], [0], [0], [1], [0, 0, 1, 1], [], []>} : vector<32x32xbf16>, vector<32x128xbf16>, vector<32x128xf32> -> vector<32x128xf32>
    %113 = arith.addf %107, %112 : vector<32x128xf32>
    %c0_124 = arith.constant 0 : index
    %c0_125 = arith.constant 0 : index
    %c138_126 = arith.constant 138 : index
    %114 = vector.load %arg1[%c0_124, %c0_125, %c138_126] : memref<1x32x384xbf16, #tpu.memory_space<vmem>>, vector<1x32x128xbf16>
    %115 = vector.shape_cast %114 : vector<1x32x128xbf16> to vector<32x128xbf16>
    %c3_127 = arith.constant 3 : index
    %c2_128 = arith.constant 2 : index
    %c0_129 = arith.constant 0 : index
    %c0_130 = arith.constant 0 : index
    %116 = vector.load %arg2[%c3_127, %c2_128, %c0_129, %c0_130] : memref<4x4x32x32xbf16, #tpu.memory_space<vmem>>, vector<1x1x32x32xbf16>
    %117 = vector.shape_cast %116 : vector<1x1x32x32xbf16> to vector<32x32xbf16>
    %cst_131 = arith.constant dense<0.000000e+00> : vector<32x128xf32>
    %118 = tpu.matmul %117, %115, %cst_131 {dimension_numbers = #tpu.dot_dimension_numbers<[1], [0], [0], [1], [0, 0, 1, 1], [], []>} : vector<32x32xbf16>, vector<32x128xbf16>, vector<32x128xf32> -> vector<32x128xf32>
    %119 = arith.addf %113, %118 : vector<32x128xf32>
    %c0_132 = arith.constant 0 : index
    %c0_133 = arith.constant 0 : index
    %c139 = arith.constant 139 : index
    %120 = vector.load %arg1[%c0_132, %c0_133, %c139] : memref<1x32x384xbf16, #tpu.memory_space<vmem>>, vector<1x32x128xbf16>
    %121 = vector.shape_cast %120 : vector<1x32x128xbf16> to vector<32x128xbf16>
    %c3_134 = arith.constant 3 : index
    %c3_135 = arith.constant 3 : index
    %c0_136 = arith.constant 0 : index
    %c0_137 = arith.constant 0 : index
    %122 = vector.load %arg2[%c3_134, %c3_135, %c0_136, %c0_137] : memref<4x4x32x32xbf16, #tpu.memory_space<vmem>>, vector<1x1x32x32xbf16>
    %123 = vector.shape_cast %122 : vector<1x1x32x32xbf16> to vector<32x32xbf16>
    %cst_138 = arith.constant dense<0.000000e+00> : vector<32x128xf32>
    %124 = tpu.matmul %123, %121, %cst_138 {dimension_numbers = #tpu.dot_dimension_numbers<[1], [0], [0], [1], [0, 0, 1, 1], [], []>} : vector<32x32xbf16>, vector<32x128xbf16>, vector<32x128xf32> -> vector<32x128xf32>
    %125 = arith.addf %119, %124 : vector<32x128xf32>
    %126 = vector.broadcast %1 : vector<32x1xf32> to vector<32x128xf32>
    %127 = arith.addf %125, %126 : vector<32x128xf32>
    %cst_139 = arith.constant 0.000000e+00 : f32
    %128 = vector.broadcast %cst_139 : f32 to vector<32x128xf32>
    %129 = arith.maximumf %127, %128 : vector<32x128xf32>
    %130 = vector.broadcast %0 : vector<1x128xf32> to vector<32x128xf32>
    %131 = arith.mulf %129, %130 : vector<32x128xf32>
    %c3_140 = arith.constant 3 : index
    %c0_141 = arith.constant 0 : index
    %c128_142 = arith.constant 128 : index
    %132 = vector.load %arg8[%c3_140, %c0_141, %c128_142] : memref<4x32x384xf32, #tpu.memory_space<vmem>>, vector<1x32x128xf32>
    %133 = vector.shape_cast %132 : vector<1x32x128xf32> to vector<32x128xf32>
    %134 = vector.shape_cast %131 : vector<32x128xf32> to vector<1x32x128xf32>
    tpu.vector_store %arg8[%c3_140, %c0_141, %c128_142], %134 {strides = array<i32>} : memref<4x32x384xf32, #tpu.memory_space<vmem>>, vector<1x32x128xf32>,
    %c3_143 = arith.constant 3 : index
    %c0_144 = arith.constant 0 : index
    %c117_145 = arith.constant 117 : index
    %135 = vector.load %arg8[%c3_143, %c0_144, %c117_145] : memref<4x32x384xf32, #tpu.memory_space<vmem>>, vector<1x32x128xf32>
    %136 = vector.shape_cast %135 : vector<1x32x128xf32> to vector<32x128xf32>
    %c0_146 = arith.constant 0 : index
    %c0_147 = arith.constant 0 : index
    %c0_148 = arith.constant 0 : index
    %137 = vector.load %arg4[%c0_146, %c0_147, %c0_148] : memref<9x2x32xf32, #tpu.memory_space<vmem>>, vector<1x2x32xf32>
    %138 = vector.shape_cast %137 : vector<1x2x32xf32> to vector<2x32xf32>
    %cst_149 = arith.constant dense<0.000000e+00> : vector<2x128xf32>
    %139 = tpu.matmul %138, %136, %cst_149 {dimension_numbers = #tpu.dot_dimension_numbers<[1], [0], [0], [1], [0, 0, 1, 1], [], []>} : vector<2x32xf32>, vector<32x128xf32>, vector<2x128xf32> -> vector<2x128xf32>
    %c2_150 = arith.constant 2 : index
    %c0_151 = arith.constant 0 : index
    %c118_152 = arith.constant 118 : index
    %140 = vector.load %arg8[%c2_150, %c0_151, %c118_152] : memref<4x32x384xf32, #tpu.memory_space<vmem>>, vector<1x32x128xf32>
    %141 = vector.shape_cast %140 : vector<1x32x128xf32> to vector<32x128xf32>
    %c1_153 = arith.constant 1 : index
    %c0_154 = arith.constant 0 : index
    %c0_155 = arith.constant 0 : index
    %142 = vector.load %arg4[%c1_153, %c0_154, %c0_155] : memref<9x2x32xf32, #tpu.memory_space<vmem>>, vector<1x2x32xf32>
    %143 = vector.shape_cast %142 : vector<1x2x32xf32> to vector<2x32xf32>
    %cst_156 = arith.constant dense<0.000000e+00> : vector<2x128xf32>
    %144 = tpu.matmul %143, %141, %cst_156 {dimension_numbers = #tpu.dot_dimension_numbers<[1], [0], [0], [1], [0, 0, 1, 1], [], []>} : vector<2x32xf32>, vector<32x128xf32>, vector<2x128xf32> -> vector<2x128xf32>
    %145 = arith.addf %139, %144 : vector<2x128xf32>
    %c3_157 = arith.constant 3 : index
    %c0_158 = arith.constant 0 : index
    %c118_159 = arith.constant 118 : index
    %146 = vector.load %arg8[%c3_157, %c0_158, %c118_159] : memref<4x32x384xf32, #tpu.memory_space<vmem>>, vector<1x32x128xf32>
    %147 = vector.shape_cast %146 : vector<1x32x128xf32> to vector<32x128xf32>
    %c2_160 = arith.constant 2 : index
    %c0_161 = arith.constant 0 : index
    %c0_162 = arith.constant 0 : index
    %148 = vector.load %arg4[%c2_160, %c0_161, %c0_162] : memref<9x2x32xf32, #tpu.memory_space<vmem>>, vector<1x2x32xf32>
    %149 = vector.shape_cast %148 : vector<1x2x32xf32> to vector<2x32xf32>
    %cst_163 = arith.constant dense<0.000000e+00> : vector<2x128xf32>
    %150 = tpu.matmul %149, %147, %cst_163 {dimension_numbers = #tpu.dot_dimension_numbers<[1], [0], [0], [1], [0, 0, 1, 1], [], []>} : vector<2x32xf32>, vector<32x128xf32>, vector<2x128xf32> -> vector<2x128xf32>
    %151 = arith.addf %145, %150 : vector<2x128xf32>
    %c1_164 = arith.constant 1 : index
    %c0_165 = arith.constant 0 : index
    %c127_166 = arith.constant 127 : index
    %152 = vector.load %arg8[%c1_164, %c0_165, %c127_166] : memref<4x32x384xf32, #tpu.memory_space<vmem>>, vector<1x32x128xf32>
    %153 = vector.shape_cast %152 : vector<1x32x128xf32> to vector<32x128xf32>
    %c3_167 = arith.constant 3 : index
    %c0_168 = arith.constant 0 : index
    %c0_169 = arith.constant 0 : index
    %154 = vector.load %arg4[%c3_167, %c0_168, %c0_169] : memref<9x2x32xf32, #tpu.memory_space<vmem>>, vector<1x2x32xf32>
    %155 = vector.shape_cast %154 : vector<1x2x32xf32> to vector<2x32xf32>
    %cst_170 = arith.constant dense<0.000000e+00> : vector<2x128xf32>
    %156 = tpu.matmul %155, %153, %cst_170 {dimension_numbers = #tpu.dot_dimension_numbers<[1], [0], [0], [1], [0, 0, 1, 1], [], []>} : vector<2x32xf32>, vector<32x128xf32>, vector<2x128xf32> -> vector<2x128xf32>
    %157 = arith.addf %151, %156 : vector<2x128xf32>
    %c0_171 = arith.constant 0 : index
    %c0_172 = arith.constant 0 : index
    %c128_173 = arith.constant 128 : index
    %158 = vector.load %arg8[%c0_171, %c0_172, %c128_173] : memref<4x32x384xf32, #tpu.memory_space<vmem>>, vector<1x32x128xf32>
    %159 = vector.shape_cast %158 : vector<1x32x128xf32> to vector<32x128xf32>
    %c4 = arith.constant 4 : index
    %c0_174 = arith.constant 0 : index
    %c0_175 = arith.constant 0 : index
    %160 = vector.load %arg4[%c4, %c0_174, %c0_175] : memref<9x2x32xf32, #tpu.memory_space<vmem>>, vector<1x2x32xf32>
    %161 = vector.shape_cast %160 : vector<1x2x32xf32> to vector<2x32xf32>
    %cst_176 = arith.constant dense<0.000000e+00> : vector<2x128xf32>
    %162 = tpu.matmul %161, %159, %cst_176 {dimension_numbers = #tpu.dot_dimension_numbers<[1], [0], [0], [1], [0, 0, 1, 1], [], []>} : vector<2x32xf32>, vector<32x128xf32>, vector<2x128xf32> -> vector<2x128xf32>
    %163 = arith.addf %157, %162 : vector<2x128xf32>
    %c1_177 = arith.constant 1 : index
    %c0_178 = arith.constant 0 : index
    %c128_179 = arith.constant 128 : index
    %164 = vector.load %arg8[%c1_177, %c0_178, %c128_179] : memref<4x32x384xf32, #tpu.memory_space<vmem>>, vector<1x32x128xf32>
    %165 = vector.shape_cast %164 : vector<1x32x128xf32> to vector<32x128xf32>
    %c5 = arith.constant 5 : index
    %c0_180 = arith.constant 0 : index
    %c0_181 = arith.constant 0 : index
    %166 = vector.load %arg4[%c5, %c0_180, %c0_181] : memref<9x2x32xf32, #tpu.memory_space<vmem>>, vector<1x2x32xf32>
    %167 = vector.shape_cast %166 : vector<1x2x32xf32> to vector<2x32xf32>
    %cst_182 = arith.constant dense<0.000000e+00> : vector<2x128xf32>
    %168 = tpu.matmul %167, %165, %cst_182 {dimension_numbers = #tpu.dot_dimension_numbers<[1], [0], [0], [1], [0, 0, 1, 1], [], []>} : vector<2x32xf32>, vector<32x128xf32>, vector<2x128xf32> -> vector<2x128xf32>
    %169 = arith.addf %163, %168 : vector<2x128xf32>
    %c3_183 = arith.constant 3 : index
    %c0_184 = arith.constant 0 : index
    %c127_185 = arith.constant 127 : index
    %170 = vector.load %arg8[%c3_183, %c0_184, %c127_185] : memref<4x32x384xf32, #tpu.memory_space<vmem>>, vector<1x32x128xf32>
    %171 = vector.shape_cast %170 : vector<1x32x128xf32> to vector<32x128xf32>
    %c6 = arith.constant 6 : index
    %c0_186 = arith.constant 0 : index
    %c0_187 = arith.constant 0 : index
    %172 = vector.load %arg4[%c6, %c0_186, %c0_187] : memref<9x2x32xf32, #tpu.memory_space<vmem>>, vector<1x2x32xf32>
    %173 = vector.shape_cast %172 : vector<1x2x32xf32> to vector<2x32xf32>
    %cst_188 = arith.constant dense<0.000000e+00> : vector<2x128xf32>
    %174 = tpu.matmul %173, %171, %cst_188 {dimension_numbers = #tpu.dot_dimension_numbers<[1], [0], [0], [1], [0, 0, 1, 1], [], []>} : vector<2x32xf32>, vector<32x128xf32>, vector<2x128xf32> -> vector<2x128xf32>
    %175 = arith.addf %169, %174 : vector<2x128xf32>
    %c2_189 = arith.constant 2 : index
    %c0_190 = arith.constant 0 : index
    %c128_191 = arith.constant 128 : index
    %176 = vector.load %arg8[%c2_189, %c0_190, %c128_191] : memref<4x32x384xf32, #tpu.memory_space<vmem>>, vector<1x32x128xf32>
    %177 = vector.shape_cast %176 : vector<1x32x128xf32> to vector<32x128xf32>
    %c7 = arith.constant 7 : index
    %c0_192 = arith.constant 0 : index
    %c0_193 = arith.constant 0 : index
    %178 = vector.load %arg4[%c7, %c0_192, %c0_193] : memref<9x2x32xf32, #tpu.memory_space<vmem>>, vector<1x2x32xf32>
    %179 = vector.shape_cast %178 : vector<1x2x32xf32> to vector<2x32xf32>
    %cst_194 = arith.constant dense<0.000000e+00> : vector<2x128xf32>
    %180 = tpu.matmul %179, %177, %cst_194 {dimension_numbers = #tpu.dot_dimension_numbers<[1], [0], [0], [1], [0, 0, 1, 1], [], []>} : vector<2x32xf32>, vector<32x128xf32>, vector<2x128xf32> -> vector<2x128xf32>
    %181 = arith.addf %175, %180 : vector<2x128xf32>
    %c3_195 = arith.constant 3 : index
    %c0_196 = arith.constant 0 : index
    %c128_197 = arith.constant 128 : index
    %182 = vector.load %arg8[%c3_195, %c0_196, %c128_197] : memref<4x32x384xf32, #tpu.memory_space<vmem>>, vector<1x32x128xf32>
    %183 = vector.shape_cast %182 : vector<1x32x128xf32> to vector<32x128xf32>
    %c8 = arith.constant 8 : index
    %c0_198 = arith.constant 0 : index
    %c0_199 = arith.constant 0 : index
    %184 = vector.load %arg4[%c8, %c0_198, %c0_199] : memref<9x2x32xf32, #tpu.memory_space<vmem>>, vector<1x2x32xf32>
    %185 = vector.shape_cast %184 : vector<1x2x32xf32> to vector<2x32xf32>
    %cst_200 = arith.constant dense<0.000000e+00> : vector<2x128xf32>
    %186 = tpu.matmul %185, %183, %cst_200 {dimension_numbers = #tpu.dot_dimension_numbers<[1], [0], [0], [1], [0, 0, 1, 1], [], []>} : vector<2x32xf32>, vector<32x128xf32>, vector<2x128xf32> -> vector<2x128xf32>
    %187 = arith.addf %181, %186 : vector<2x128xf32>
    %188 = vector.broadcast %2 : vector<2x1xf32> to vector<2x128xf32>
    %189 = arith.addf %187, %188 : vector<2x128xf32>
    %c0_201 = arith.constant 0 : index
    %c0_202 = arith.constant 0 : index
    %c0_203 = arith.constant 0 : index
    %190 = vector.load %arg7[%c0_201, %c0_202, %c0_203] : memref<1x8x128xf32, #tpu.memory_space<vmem>>, vector<1x2x128xf32>
    %191 = vector.shape_cast %190 : vector<1x2x128xf32> to vector<2x128xf32>
    %192 = vector.shape_cast %189 : vector<2x128xf32> to vector<1x2x128xf32>
    tpu.vector_store %arg7[%c0_201, %c0_202, %c0_203], %192 {strides = array<i32>} : memref<1x8x128xf32, #tpu.memory_space<vmem>>, vector<1x2x128xf32>,
    %c2_204 = arith.constant 2 : index
    %c0_205 = arith.constant 0 : index
    %c118_206 = arith.constant 118 : index
    %193 = vector.load %arg8[%c2_204, %c0_205, %c118_206] : memref<4x32x384xf32, #tpu.memory_space<vmem>>, vector<1x32x128xf32>
    %194 = vector.shape_cast %193 : vector<1x32x128xf32> to vector<32x128xf32>
    %c0_207 = arith.constant 0 : index
    %c0_208 = arith.constant 0 : index
    %c0_209 = arith.constant 0 : index
    %195 = vector.load %arg4[%c0_207, %c0_208, %c0_209] : memref<9x2x32xf32, #tpu.memory_space<vmem>>, vector<1x2x32xf32>
    %196 = vector.shape_cast %195 : vector<1x2x32xf32> to vector<2x32xf32>
    %cst_210 = arith.constant dense<0.000000e+00> : vector<2x128xf32>
    %197 = tpu.matmul %196, %194, %cst_210 {dimension_numbers = #tpu.dot_dimension_numbers<[1], [0], [0], [1], [0, 0, 1, 1], [], []>} : vector<2x32xf32>, vector<32x128xf32>, vector<2x128xf32> -> vector<2x128xf32>
    %c3_211 = arith.constant 3 : index
    %c0_212 = arith.constant 0 : index
    %c118_213 = arith.constant 118 : index
    %198 = vector.load %arg8[%c3_211, %c0_212, %c118_213] : memref<4x32x384xf32, #tpu.memory_space<vmem>>, vector<1x32x128xf32>
    %199 = vector.shape_cast %198 : vector<1x32x128xf32> to vector<32x128xf32>
    %c1_214 = arith.constant 1 : index
    %c0_215 = arith.constant 0 : index
    %c0_216 = arith.constant 0 : index
    %200 = vector.load %arg4[%c1_214, %c0_215, %c0_216] : memref<9x2x32xf32, #tpu.memory_space<vmem>>, vector<1x2x32xf32>
    %201 = vector.shape_cast %200 : vector<1x2x32xf32> to vector<2x32xf32>
    %cst_217 = arith.constant dense<0.000000e+00> : vector<2x128xf32>
    %202 = tpu.matmul %201, %199, %cst_217 {dimension_numbers = #tpu.dot_dimension_numbers<[1], [0], [0], [1], [0, 0, 1, 1], [], []>} : vector<2x32xf32>, vector<32x128xf32>, vector<2x128xf32> -> vector<2x128xf32>
    %203 = arith.addf %197, %202 : vector<2x128xf32>
    %c2_218 = arith.constant 2 : index
    %c0_219 = arith.constant 0 : index
    %c119_220 = arith.constant 119 : index
    %204 = vector.load %arg8[%c2_218, %c0_219, %c119_220] : memref<4x32x384xf32, #tpu.memory_space<vmem>>, vector<1x32x128xf32>
    %205 = vector.shape_cast %204 : vector<1x32x128xf32> to vector<32x128xf32>
    %c2_221 = arith.constant 2 : index
    %c0_222 = arith.constant 0 : index
    %c0_223 = arith.constant 0 : index
    %206 = vector.load %arg4[%c2_221, %c0_222, %c0_223] : memref<9x2x32xf32, #tpu.memory_space<vmem>>, vector<1x2x32xf32>
    %207 = vector.shape_cast %206 : vector<1x2x32xf32> to vector<2x32xf32>
    %cst_224 = arith.constant dense<0.000000e+00> : vector<2x128xf32>
    %208 = tpu.matmul %207, %205, %cst_224 {dimension_numbers = #tpu.dot_dimension_numbers<[1], [0], [0], [1], [0, 0, 1, 1], [], []>} : vector<2x32xf32>, vector<32x128xf32>, vector<2x128xf32> -> vector<2x128xf32>
    %209 = arith.addf %203, %208 : vector<2x128xf32>
    %c0_225 = arith.constant 0 : index
    %c0_226 = arith.constant 0 : index
    %c128_227 = arith.constant 128 : index
    %210 = vector.load %arg8[%c0_225, %c0_226, %c128_227] : memref<4x32x384xf32, #tpu.memory_space<vmem>>, vector<1x32x128xf32>
    %211 = vector.shape_cast %210 : vector<1x32x128xf32> to vector<32x128xf32>
    %c3_228 = arith.constant 3 : index
    %c0_229 = arith.constant 0 : index
    %c0_230 = arith.constant 0 : index
    %212 = vector.load %arg4[%c3_228, %c0_229, %c0_230] : memref<9x2x32xf32, #tpu.memory_space<vmem>>, vector<1x2x32xf32>
    %213 = vector.shape_cast %212 : vector<1x2x32xf32> to vector<2x32xf32>
    %cst_231 = arith.constant dense<0.000000e+00> : vector<2x128xf32>
    %214 = tpu.matmul %213, %211, %cst_231 {dimension_numbers = #tpu.dot_dimension_numbers<[1], [0], [0], [1], [0, 0, 1, 1], [], []>} : vector<2x32xf32>, vector<32x128xf32>, vector<2x128xf32> -> vector<2x128xf32>
    %215 = arith.addf %209, %214 : vector<2x128xf32>
    %c1_232 = arith.constant 1 : index
    %c0_233 = arith.constant 0 : index
    %c128_234 = arith.constant 128 : index
    %216 = vector.load %arg8[%c1_232, %c0_233, %c128_234] : memref<4x32x384xf32, #tpu.memory_space<vmem>>, vector<1x32x128xf32>
    %217 = vector.shape_cast %216 : vector<1x32x128xf32> to vector<32x128xf32>
    %c4_235 = arith.constant 4 : index
    %c0_236 = arith.constant 0 : index
    %c0_237 = arith.constant 0 : index
    %218 = vector.load %arg4[%c4_235, %c0_236, %c0_237] : memref<9x2x32xf32, #tpu.memory_space<vmem>>, vector<1x2x32xf32>
    %219 = vector.shape_cast %218 : vector<1x2x32xf32> to vector<2x32xf32>
    %cst_238 = arith.constant dense<0.000000e+00> : vector<2x128xf32>
    %220 = tpu.matmul %219, %217, %cst_238 {dimension_numbers = #tpu.dot_dimension_numbers<[1], [0], [0], [1], [0, 0, 1, 1], [], []>} : vector<2x32xf32>, vector<32x128xf32>, vector<2x128xf32> -> vector<2x128xf32>
    %221 = arith.addf %215, %220 : vector<2x128xf32>
    %c0_239 = arith.constant 0 : index
    %c0_240 = arith.constant 0 : index
    %c129_241 = arith.constant 129 : index
    %222 = vector.load %arg8[%c0_239, %c0_240, %c129_241] : memref<4x32x384xf32, #tpu.memory_space<vmem>>, vector<1x32x128xf32>
    %223 = vector.shape_cast %222 : vector<1x32x128xf32> to vector<32x128xf32>
    %c5_242 = arith.constant 5 : index
    %c0_243 = arith.constant 0 : index
    %c0_244 = arith.constant 0 : index
    %224 = vector.load %arg4[%c5_242, %c0_243, %c0_244] : memref<9x2x32xf32, #tpu.memory_space<vmem>>, vector<1x2x32xf32>
    %225 = vector.shape_cast %224 : vector<1x2x32xf32> to vector<2x32xf32>
    %cst_245 = arith.constant dense<0.000000e+00> : vector<2x128xf32>
    %226 = tpu.matmul %225, %223, %cst_245 {dimension_numbers = #tpu.dot_dimension_numbers<[1], [0], [0], [1], [0, 0, 1, 1], [], []>} : vector<2x32xf32>, vector<32x128xf32>, vector<2x128xf32> -> vector<2x128xf32>
    %227 = arith.addf %221, %226 : vector<2x128xf32>
    %c2_246 = arith.constant 2 : index
    %c0_247 = arith.constant 0 : index
    %c128_248 = arith.constant 128 : index
    %228 = vector.load %arg8[%c2_246, %c0_247, %c128_248] : memref<4x32x384xf32, #tpu.memory_space<vmem>>, vector<1x32x128xf32>
    %229 = vector.shape_cast %228 : vector<1x32x128xf32> to vector<32x128xf32>
    %c6_249 = arith.constant 6 : index
    %c0_250 = arith.constant 0 : index
    %c0_251 = arith.constant 0 : index
    %230 = vector.load %arg4[%c6_249, %c0_250, %c0_251] : memref<9x2x32xf32, #tpu.memory_space<vmem>>, vector<1x2x32xf32>
    %231 = vector.shape_cast %230 : vector<1x2x32xf32> to vector<2x32xf32>
    %cst_252 = arith.constant dense<0.000000e+00> : vector<2x128xf32>
    %232 = tpu.matmul %231, %229, %cst_252 {dimension_numbers = #tpu.dot_dimension_numbers<[1], [0], [0], [1], [0, 0, 1, 1], [], []>} : vector<2x32xf32>, vector<32x128xf32>, vector<2x128xf32> -> vector<2x128xf32>
    %233 = arith.addf %227, %232 : vector<2x128xf32>
    %c3_253 = arith.constant 3 : index
    %c0_254 = arith.constant 0 : index
    %c128_255 = arith.constant 128 : index
    %234 = vector.load %arg8[%c3_253, %c0_254, %c128_255] : memref<4x32x384xf32, #tpu.memory_space<vmem>>, vector<1x32x128xf32>
    %235 = vector.shape_cast %234 : vector<1x32x128xf32> to vector<32x128xf32>
    %c7_256 = arith.constant 7 : index
    %c0_257 = arith.constant 0 : index
    %c0_258 = arith.constant 0 : index
    %236 = vector.load %arg4[%c7_256, %c0_257, %c0_258] : memref<9x2x32xf32, #tpu.memory_space<vmem>>, vector<1x2x32xf32>
    %237 = vector.shape_cast %236 : vector<1x2x32xf32> to vector<2x32xf32>
    %cst_259 = arith.constant dense<0.000000e+00> : vector<2x128xf32>
    %238 = tpu.matmul %237, %235, %cst_259 {dimension_numbers = #tpu.dot_dimension_numbers<[1], [0], [0], [1], [0, 0, 1, 1], [], []>} : vector<2x32xf32>, vector<32x128xf32>, vector<2x128xf32> -> vector<2x128xf32>
    %239 = arith.addf %233, %238 : vector<2x128xf32>
    %c2_260 = arith.constant 2 : index
    %c0_261 = arith.constant 0 : index
    %c129_262 = arith.constant 129 : index
    %240 = vector.load %arg8[%c2_260, %c0_261, %c129_262] : memref<4x32x384xf32, #tpu.memory_space<vmem>>, vector<1x32x128xf32>
    %241 = vector.shape_cast %240 : vector<1x32x128xf32> to vector<32x128xf32>
    %c8_263 = arith.constant 8 : index
    %c0_264 = arith.constant 0 : index
    %c0_265 = arith.constant 0 : index
    %242 = vector.load %arg4[%c8_263, %c0_264, %c0_265] : memref<9x2x32xf32, #tpu.memory_space<vmem>>, vector<1x2x32xf32>
    %243 = vector.shape_cast %242 : vector<1x2x32xf32> to vector<2x32xf32>
    %cst_266 = arith.constant dense<0.000000e+00> : vector<2x128xf32>
    %244 = tpu.matmul %243, %241, %cst_266 {dimension_numbers = #tpu.dot_dimension_numbers<[1], [0], [0], [1], [0, 0, 1, 1], [], []>} : vector<2x32xf32>, vector<32x128xf32>, vector<2x128xf32> -> vector<2x128xf32>
    %245 = arith.addf %239, %244 : vector<2x128xf32>
    %246 = vector.broadcast %2 : vector<2x1xf32> to vector<2x128xf32>
    %247 = arith.addf %245, %246 : vector<2x128xf32>
    %c0_267 = arith.constant 0 : index
    %c2_268 = arith.constant 2 : index
    %c0_269 = arith.constant 0 : index
    %248 = vector.load %arg7[%c0_267, %c2_268, %c0_269] : memref<1x8x128xf32, #tpu.memory_space<vmem>>, vector<1x2x128xf32>
    %249 = vector.shape_cast %248 : vector<1x2x128xf32> to vector<2x128xf32>
    %250 = vector.shape_cast %247 : vector<2x128xf32> to vector<1x2x128xf32>
    tpu.vector_store %arg7[%c0_267, %c2_268, %c0_269], %250 {strides = array<i32>} : memref<1x8x128xf32, #tpu.memory_space<vmem>>, vector<1x2x128xf32>,
    %c1_270 = arith.constant 1 : index
    %c0_271 = arith.constant 0 : index
    %c127_272 = arith.constant 127 : index
    %251 = vector.load %arg8[%c1_270, %c0_271, %c127_272] : memref<4x32x384xf32, #tpu.memory_space<vmem>>, vector<1x32x128xf32>
    %252 = vector.shape_cast %251 : vector<1x32x128xf32> to vector<32x128xf32>
    %c0_273 = arith.constant 0 : index
    %c0_274 = arith.constant 0 : index
    %c0_275 = arith.constant 0 : index
    %253 = vector.load %arg4[%c0_273, %c0_274, %c0_275] : memref<9x2x32xf32, #tpu.memory_space<vmem>>, vector<1x2x32xf32>
    %254 = vector.shape_cast %253 : vector<1x2x32xf32> to vector<2x32xf32>
    %cst_276 = arith.constant dense<0.000000e+00> : vector<2x128xf32>
    %255 = tpu.matmul %254, %252, %cst_276 {dimension_numbers = #tpu.dot_dimension_numbers<[1], [0], [0], [1], [0, 0, 1, 1], [], []>} : vector<2x32xf32>, vector<32x128xf32>, vector<2x128xf32> -> vector<2x128xf32>
    %c0_277 = arith.constant 0 : index
    %c0_278 = arith.constant 0 : index
    %c128_279 = arith.constant 128 : index
    %256 = vector.load %arg8[%c0_277, %c0_278, %c128_279] : memref<4x32x384xf32, #tpu.memory_space<vmem>>, vector<1x32x128xf32>
    %257 = vector.shape_cast %256 : vector<1x32x128xf32> to vector<32x128xf32>
    %c1_280 = arith.constant 1 : index
    %c0_281 = arith.constant 0 : index
    %c0_282 = arith.constant 0 : index
    %258 = vector.load %arg4[%c1_280, %c0_281, %c0_282] : memref<9x2x32xf32, #tpu.memory_space<vmem>>, vector<1x2x32xf32>
    %259 = vector.shape_cast %258 : vector<1x2x32xf32> to vector<2x32xf32>
    %cst_283 = arith.constant dense<0.000000e+00> : vector<2x128xf32>
    %260 = tpu.matmul %259, %257, %cst_283 {dimension_numbers = #tpu.dot_dimension_numbers<[1], [0], [0], [1], [0, 0, 1, 1], [], []>} : vector<2x32xf32>, vector<32x128xf32>, vector<2x128xf32> -> vector<2x128xf32>
    %261 = arith.addf %255, %260 : vector<2x128xf32>
    %c1_284 = arith.constant 1 : index
    %c0_285 = arith.constant 0 : index
    %c128_286 = arith.constant 128 : index
    %262 = vector.load %arg8[%c1_284, %c0_285, %c128_286] : memref<4x32x384xf32, #tpu.memory_space<vmem>>, vector<1x32x128xf32>
    %263 = vector.shape_cast %262 : vector<1x32x128xf32> to vector<32x128xf32>
    %c2_287 = arith.constant 2 : index
    %c0_288 = arith.constant 0 : index
    %c0_289 = arith.constant 0 : index
    %264 = vector.load %arg4[%c2_287, %c0_288, %c0_289] : memref<9x2x32xf32, #tpu.memory_space<vmem>>, vector<1x2x32xf32>
    %265 = vector.shape_cast %264 : vector<1x2x32xf32> to vector<2x32xf32>
    %cst_290 = arith.constant dense<0.000000e+00> : vector<2x128xf32>
    %266 = tpu.matmul %265, %263, %cst_290 {dimension_numbers = #tpu.dot_dimension_numbers<[1], [0], [0], [1], [0, 0, 1, 1], [], []>} : vector<2x32xf32>, vector<32x128xf32>, vector<2x128xf32> -> vector<2x128xf32>
    %267 = arith.addf %261, %266 : vector<2x128xf32>
    %c3_291 = arith.constant 3 : index
    %c0_292 = arith.constant 0 : index
    %c127_293 = arith.constant 127 : index
    %268 = vector.load %arg8[%c3_291, %c0_292, %c127_293] : memref<4x32x384xf32, #tpu.memory_space<vmem>>, vector<1x32x128xf32>
    %269 = vector.shape_cast %268 : vector<1x32x128xf32> to vector<32x128xf32>
    %c3_294 = arith.constant 3 : index
    %c0_295 = arith.constant 0 : index
    %c0_296 = arith.constant 0 : index
    %270 = vector.load %arg4[%c3_294, %c0_295, %c0_296] : memref<9x2x32xf32, #tpu.memory_space<vmem>>, vector<1x2x32xf32>
    %271 = vector.shape_cast %270 : vector<1x2x32xf32> to vector<2x32xf32>
    %cst_297 = arith.constant dense<0.000000e+00> : vector<2x128xf32>
    %272 = tpu.matmul %271, %269, %cst_297 {dimension_numbers = #tpu.dot_dimension_numbers<[1], [0], [0], [1], [0, 0, 1, 1], [], []>} : vector<2x32xf32>, vector<32x128xf32>, vector<2x128xf32> -> vector<2x128xf32>
    %273 = arith.addf %267, %272 : vector<2x128xf32>
    %c2_298 = arith.constant 2 : index
    %c0_299 = arith.constant 0 : index
    %c128_300 = arith.constant 128 : index
    %274 = vector.load %arg8[%c2_298, %c0_299, %c128_300] : memref<4x32x384xf32, #tpu.memory_space<vmem>>, vector<1x32x128xf32>
    %275 = vector.shape_cast %274 : vector<1x32x128xf32> to vector<32x128xf32>
    %c4_301 = arith.constant 4 : index
    %c0_302 = arith.constant 0 : index
    %c0_303 = arith.constant 0 : index
    %276 = vector.load %arg4[%c4_301, %c0_302, %c0_303] : memref<9x2x32xf32, #tpu.memory_space<vmem>>, vector<1x2x32xf32>
    %277 = vector.shape_cast %276 : vector<1x2x32xf32> to vector<2x32xf32>
    %cst_304 = arith.constant dense<0.000000e+00> : vector<2x128xf32>
    %278 = tpu.matmul %277, %275, %cst_304 {dimension_numbers = #tpu.dot_dimension_numbers<[1], [0], [0], [1], [0, 0, 1, 1], [], []>} : vector<2x32xf32>, vector<32x128xf32>, vector<2x128xf32> -> vector<2x128xf32>
    %279 = arith.addf %273, %278 : vector<2x128xf32>
    %c3_305 = arith.constant 3 : index
    %c0_306 = arith.constant 0 : index
    %c128_307 = arith.constant 128 : index
    %280 = vector.load %arg8[%c3_305, %c0_306, %c128_307] : memref<4x32x384xf32, #tpu.memory_space<vmem>>, vector<1x32x128xf32>
    %281 = vector.shape_cast %280 : vector<1x32x128xf32> to vector<32x128xf32>
    %c5_308 = arith.constant 5 : index
    %c0_309 = arith.constant 0 : index
    %c0_310 = arith.constant 0 : index
    %282 = vector.load %arg4[%c5_308, %c0_309, %c0_310] : memref<9x2x32xf32, #tpu.memory_space<vmem>>, vector<1x2x32xf32>
    %283 = vector.shape_cast %282 : vector<1x2x32xf32> to vector<2x32xf32>
    %cst_311 = arith.constant dense<0.000000e+00> : vector<2x128xf32>
    %284 = tpu.matmul %283, %281, %cst_311 {dimension_numbers = #tpu.dot_dimension_numbers<[1], [0], [0], [1], [0, 0, 1, 1], [], []>} : vector<2x32xf32>, vector<32x128xf32>, vector<2x128xf32> -> vector<2x128xf32>
    %285 = arith.addf %279, %284 : vector<2x128xf32>
    %c1_312 = arith.constant 1 : index
    %c0_313 = arith.constant 0 : index
    %c137_314 = arith.constant 137 : index
    %286 = vector.load %arg8[%c1_312, %c0_313, %c137_314] : memref<4x32x384xf32, #tpu.memory_space<vmem>>, vector<1x32x128xf32>
    %287 = vector.shape_cast %286 : vector<1x32x128xf32> to vector<32x128xf32>
    %c6_315 = arith.constant 6 : index
    %c0_316 = arith.constant 0 : index
    %c0_317 = arith.constant 0 : index
    %288 = vector.load %arg4[%c6_315, %c0_316, %c0_317] : memref<9x2x32xf32, #tpu.memory_space<vmem>>, vector<1x2x32xf32>
    %289 = vector.shape_cast %288 : vector<1x2x32xf32> to vector<2x32xf32>
    %cst_318 = arith.constant dense<0.000000e+00> : vector<2x128xf32>
    %290 = tpu.matmul %289, %287, %cst_318 {dimension_numbers = #tpu.dot_dimension_numbers<[1], [0], [0], [1], [0, 0, 1, 1], [], []>} : vector<2x32xf32>, vector<32x128xf32>, vector<2x128xf32> -> vector<2x128xf32>
    %291 = arith.addf %285, %290 : vector<2x128xf32>
    %c0_319 = arith.constant 0 : index
    %c0_320 = arith.constant 0 : index
    %c138_321 = arith.constant 138 : index
    %292 = vector.load %arg8[%c0_319, %c0_320, %c138_321] : memref<4x32x384xf32, #tpu.memory_space<vmem>>, vector<1x32x128xf32>
    %293 = vector.shape_cast %292 : vector<1x32x128xf32> to vector<32x128xf32>
    %c7_322 = arith.constant 7 : index
    %c0_323 = arith.constant 0 : index
    %c0_324 = arith.constant 0 : index
    %294 = vector.load %arg4[%c7_322, %c0_323, %c0_324] : memref<9x2x32xf32, #tpu.memory_space<vmem>>, vector<1x2x32xf32>
    %295 = vector.shape_cast %294 : vector<1x2x32xf32> to vector<2x32xf32>
    %cst_325 = arith.constant dense<0.000000e+00> : vector<2x128xf32>
    %296 = tpu.matmul %295, %293, %cst_325 {dimension_numbers = #tpu.dot_dimension_numbers<[1], [0], [0], [1], [0, 0, 1, 1], [], []>} : vector<2x32xf32>, vector<32x128xf32>, vector<2x128xf32> -> vector<2x128xf32>
    %297 = arith.addf %291, %296 : vector<2x128xf32>
    %c1_326 = arith.constant 1 : index
    %c0_327 = arith.constant 0 : index
    %c138_328 = arith.constant 138 : index
    %298 = vector.load %arg8[%c1_326, %c0_327, %c138_328] : memref<4x32x384xf32, #tpu.memory_space<vmem>>, vector<1x32x128xf32>
    %299 = vector.shape_cast %298 : vector<1x32x128xf32> to vector<32x128xf32>
    %c8_329 = arith.constant 8 : index
    %c0_330 = arith.constant 0 : index
    %c0_331 = arith.constant 0 : index
    %300 = vector.load %arg4[%c8_329, %c0_330, %c0_331] : memref<9x2x32xf32, #tpu.memory_space<vmem>>, vector<1x2x32xf32>
    %301 = vector.shape_cast %300 : vector<1x2x32xf32> to vector<2x32xf32>
    %cst_332 = arith.constant dense<0.000000e+00> : vector<2x128xf32>
    %302 = tpu.matmul %301, %299, %cst_332 {dimension_numbers = #tpu.dot_dimension_numbers<[1], [0], [0], [1], [0, 0, 1, 1], [], []>} : vector<2x32xf32>, vector<32x128xf32>, vector<2x128xf32> -> vector<2x128xf32>
    %303 = arith.addf %297, %302 : vector<2x128xf32>
    %304 = vector.broadcast %2 : vector<2x1xf32> to vector<2x128xf32>
    %305 = arith.addf %303, %304 : vector<2x128xf32>
    %c0_333 = arith.constant 0 : index
    %c4_334 = arith.constant 4 : index
    %c0_335 = arith.constant 0 : index
    %306 = vector.load %arg7[%c0_333, %c4_334, %c0_335] : memref<1x8x128xf32, #tpu.memory_space<vmem>>, vector<1x2x128xf32>
    %307 = vector.shape_cast %306 : vector<1x2x128xf32> to vector<2x128xf32>
    %308 = vector.shape_cast %305 : vector<2x128xf32> to vector<1x2x128xf32>
    tpu.vector_store %arg7[%c0_333, %c4_334, %c0_335], %308 {strides = array<i32>} : memref<1x8x128xf32, #tpu.memory_space<vmem>>, vector<1x2x128xf32>,
    %c0_336 = arith.constant 0 : index
    %c0_337 = arith.constant 0 : index
    %c128_338 = arith.constant 128 : index
    %309 = vector.load %arg8[%c0_336, %c0_337, %c128_338] : memref<4x32x384xf32, #tpu.memory_space<vmem>>, vector<1x32x128xf32>
    %310 = vector.shape_cast %309 : vector<1x32x128xf32> to vector<32x128xf32>
    %c0_339 = arith.constant 0 : index
    %c0_340 = arith.constant 0 : index
    %c0_341 = arith.constant 0 : index
    %311 = vector.load %arg4[%c0_339, %c0_340, %c0_341] : memref<9x2x32xf32, #tpu.memory_space<vmem>>, vector<1x2x32xf32>
    %312 = vector.shape_cast %311 : vector<1x2x32xf32> to vector<2x32xf32>
    %cst_342 = arith.constant dense<0.000000e+00> : vector<2x128xf32>
    %313 = tpu.matmul %312, %310, %cst_342 {dimension_numbers = #tpu.dot_dimension_numbers<[1], [0], [0], [1], [0, 0, 1, 1], [], []>} : vector<2x32xf32>, vector<32x128xf32>, vector<2x128xf32> -> vector<2x128xf32>
    %c1_343 = arith.constant 1 : index
    %c0_344 = arith.constant 0 : index
    %c128_345 = arith.constant 128 : index
    %314 = vector.load %arg8[%c1_343, %c0_344, %c128_345] : memref<4x32x384xf32, #tpu.memory_space<vmem>>, vector<1x32x128xf32>
    %315 = vector.shape_cast %314 : vector<1x32x128xf32> to vector<32x128xf32>
    %c1_346 = arith.constant 1 : index
    %c0_347 = arith.constant 0 : index
    %c0_348 = arith.constant 0 : index
    %316 = vector.load %arg4[%c1_346, %c0_347, %c0_348] : memref<9x2x32xf32, #tpu.memory_space<vmem>>, vector<1x2x32xf32>
    %317 = vector.shape_cast %316 : vector<1x2x32xf32> to vector<2x32xf32>
    %cst_349 = arith.constant dense<0.000000e+00> : vector<2x128xf32>
    %318 = tpu.matmul %317, %315, %cst_349 {dimension_numbers = #tpu.dot_dimension_numbers<[1], [0], [0], [1], [0, 0, 1, 1], [], []>} : vector<2x32xf32>, vector<32x128xf32>, vector<2x128xf32> -> vector<2x128xf32>
    %319 = arith.addf %313, %318 : vector<2x128xf32>
    %c0_350 = arith.constant 0 : index
    %c0_351 = arith.constant 0 : index
    %c129_352 = arith.constant 129 : index
    %320 = vector.load %arg8[%c0_350, %c0_351, %c129_352] : memref<4x32x384xf32, #tpu.memory_space<vmem>>, vector<1x32x128xf32>
    %321 = vector.shape_cast %320 : vector<1x32x128xf32> to vector<32x128xf32>
    %c2_353 = arith.constant 2 : index
    %c0_354 = arith.constant 0 : index
    %c0_355 = arith.constant 0 : index
    %322 = vector.load %arg4[%c2_353, %c0_354, %c0_355] : memref<9x2x32xf32, #tpu.memory_space<vmem>>, vector<1x2x32xf32>
    %323 = vector.shape_cast %322 : vector<1x2x32xf32> to vector<2x32xf32>
    %cst_356 = arith.constant dense<0.000000e+00> : vector<2x128xf32>
    %324 = tpu.matmul %323, %321, %cst_356 {dimension_numbers = #tpu.dot_dimension_numbers<[1], [0], [0], [1], [0, 0, 1, 1], [], []>} : vector<2x32xf32>, vector<32x128xf32>, vector<2x128xf32> -> vector<2x128xf32>
    %325 = arith.addf %319, %324 : vector<2x128xf32>
    %c2_357 = arith.constant 2 : index
    %c0_358 = arith.constant 0 : index
    %c128_359 = arith.constant 128 : index
    %326 = vector.load %arg8[%c2_357, %c0_358, %c128_359] : memref<4x32x384xf32, #tpu.memory_space<vmem>>, vector<1x32x128xf32>
    %327 = vector.shape_cast %326 : vector<1x32x128xf32> to vector<32x128xf32>
    %c3_360 = arith.constant 3 : index
    %c0_361 = arith.constant 0 : index
    %c0_362 = arith.constant 0 : index
    %328 = vector.load %arg4[%c3_360, %c0_361, %c0_362] : memref<9x2x32xf32, #tpu.memory_space<vmem>>, vector<1x2x32xf32>
    %329 = vector.shape_cast %328 : vector<1x2x32xf32> to vector<2x32xf32>
    %cst_363 = arith.constant dense<0.000000e+00> : vector<2x128xf32>
    %330 = tpu.matmul %329, %327, %cst_363 {dimension_numbers = #tpu.dot_dimension_numbers<[1], [0], [0], [1], [0, 0, 1, 1], [], []>} : vector<2x32xf32>, vector<32x128xf32>, vector<2x128xf32> -> vector<2x128xf32>
    %331 = arith.addf %325, %330 : vector<2x128xf32>
    %c3_364 = arith.constant 3 : index
    %c0_365 = arith.constant 0 : index
    %c128_366 = arith.constant 128 : index
    %332 = vector.load %arg8[%c3_364, %c0_365, %c128_366] : memref<4x32x384xf32, #tpu.memory_space<vmem>>, vector<1x32x128xf32>
    %333 = vector.shape_cast %332 : vector<1x32x128xf32> to vector<32x128xf32>
    %c4_367 = arith.constant 4 : index
    %c0_368 = arith.constant 0 : index
    %c0_369 = arith.constant 0 : index
    %334 = vector.load %arg4[%c4_367, %c0_368, %c0_369] : memref<9x2x32xf32, #tpu.memory_space<vmem>>, vector<1x2x32xf32>
    %335 = vector.shape_cast %334 : vector<1x2x32xf32> to vector<2x32xf32>
    %cst_370 = arith.constant dense<0.000000e+00> : vector<2x128xf32>
    %336 = tpu.matmul %335, %333, %cst_370 {dimension_numbers = #tpu.dot_dimension_numbers<[1], [0], [0], [1], [0, 0, 1, 1], [], []>} : vector<2x32xf32>, vector<32x128xf32>, vector<2x128xf32> -> vector<2x128xf32>
    %337 = arith.addf %331, %336 : vector<2x128xf32>
    %c2_371 = arith.constant 2 : index
    %c0_372 = arith.constant 0 : index
    %c129_373 = arith.constant 129 : index
    %338 = vector.load %arg8[%c2_371, %c0_372, %c129_373] : memref<4x32x384xf32, #tpu.memory_space<vmem>>, vector<1x32x128xf32>
    %339 = vector.shape_cast %338 : vector<1x32x128xf32> to vector<32x128xf32>
    %c5_374 = arith.constant 5 : index
    %c0_375 = arith.constant 0 : index
    %c0_376 = arith.constant 0 : index
    %340 = vector.load %arg4[%c5_374, %c0_375, %c0_376] : memref<9x2x32xf32, #tpu.memory_space<vmem>>, vector<1x2x32xf32>
    %341 = vector.shape_cast %340 : vector<1x2x32xf32> to vector<2x32xf32>
    %cst_377 = arith.constant dense<0.000000e+00> : vector<2x128xf32>
    %342 = tpu.matmul %341, %339, %cst_377 {dimension_numbers = #tpu.dot_dimension_numbers<[1], [0], [0], [1], [0, 0, 1, 1], [], []>} : vector<2x32xf32>, vector<32x128xf32>, vector<2x128xf32> -> vector<2x128xf32>
    %343 = arith.addf %337, %342 : vector<2x128xf32>
    %c0_378 = arith.constant 0 : index
    %c0_379 = arith.constant 0 : index
    %c138_380 = arith.constant 138 : index
    %344 = vector.load %arg8[%c0_378, %c0_379, %c138_380] : memref<4x32x384xf32, #tpu.memory_space<vmem>>, vector<1x32x128xf32>
    %345 = vector.shape_cast %344 : vector<1x32x128xf32> to vector<32x128xf32>
    %c6_381 = arith.constant 6 : index
    %c0_382 = arith.constant 0 : index
    %c0_383 = arith.constant 0 : index
    %346 = vector.load %arg4[%c6_381, %c0_382, %c0_383] : memref<9x2x32xf32, #tpu.memory_space<vmem>>, vector<1x2x32xf32>
    %347 = vector.shape_cast %346 : vector<1x2x32xf32> to vector<2x32xf32>
    %cst_384 = arith.constant dense<0.000000e+00> : vector<2x128xf32>
    %348 = tpu.matmul %347, %345, %cst_384 {dimension_numbers = #tpu.dot_dimension_numbers<[1], [0], [0], [1], [0, 0, 1, 1], [], []>} : vector<2x32xf32>, vector<32x128xf32>, vector<2x128xf32> -> vector<2x128xf32>
    %349 = arith.addf %343, %348 : vector<2x128xf32>
    %c1_385 = arith.constant 1 : index
    %c0_386 = arith.constant 0 : index
    %c138_387 = arith.constant 138 : index
    %350 = vector.load %arg8[%c1_385, %c0_386, %c138_387] : memref<4x32x384xf32, #tpu.memory_space<vmem>>, vector<1x32x128xf32>
    %351 = vector.shape_cast %350 : vector<1x32x128xf32> to vector<32x128xf32>
    %c7_388 = arith.constant 7 : index
    %c0_389 = arith.constant 0 : index
    %c0_390 = arith.constant 0 : index
    %352 = vector.load %arg4[%c7_388, %c0_389, %c0_390] : memref<9x2x32xf32, #tpu.memory_space<vmem>>, vector<1x2x32xf32>
    %353 = vector.shape_cast %352 : vector<1x2x32xf32> to vector<2x32xf32>
    %cst_391 = arith.constant dense<0.000000e+00> : vector<2x128xf32>
    %354 = tpu.matmul %353, %351, %cst_391 {dimension_numbers = #tpu.dot_dimension_numbers<[1], [0], [0], [1], [0, 0, 1, 1], [], []>} : vector<2x32xf32>, vector<32x128xf32>, vector<2x128xf32> -> vector<2x128xf32>
    %355 = arith.addf %349, %354 : vector<2x128xf32>
    %c0_392 = arith.constant 0 : index
    %c0_393 = arith.constant 0 : index
    %c139_394 = arith.constant 139 : index
    %356 = vector.load %arg8[%c0_392, %c0_393, %c139_394] : memref<4x32x384xf32, #tpu.memory_space<vmem>>, vector<1x32x128xf32>
    %357 = vector.shape_cast %356 : vector<1x32x128xf32> to vector<32x128xf32>
    %c8_395 = arith.constant 8 : index
    %c0_396 = arith.constant 0 : index
    %c0_397 = arith.constant 0 : index
    %358 = vector.load %arg4[%c8_395, %c0_396, %c0_397] : memref<9x2x32xf32, #tpu.memory_space<vmem>>, vector<1x2x32xf32>
    %359 = vector.shape_cast %358 : vector<1x2x32xf32> to vector<2x32xf32>
    %cst_398 = arith.constant dense<0.000000e+00> : vector<2x128xf32>
    %360 = tpu.matmul %359, %357, %cst_398 {dimension_numbers = #tpu.dot_dimension_numbers<[1], [0], [0], [1], [0, 0, 1, 1], [], []>} : vector<2x32xf32>, vector<32x128xf32>, vector<2x128xf32> -> vector<2x128xf32>
    %361 = arith.addf %355, %360 : vector<2x128xf32>
    %362 = vector.broadcast %2 : vector<2x1xf32> to vector<2x128xf32>
    %363 = arith.addf %361, %362 : vector<2x128xf32>
    %c0_399 = arith.constant 0 : index
    %c6_400 = arith.constant 6 : index
    %c0_401 = arith.constant 0 : index
    %364 = vector.load %arg7[%c0_399, %c6_400, %c0_401] : memref<1x8x128xf32, #tpu.memory_space<vmem>>, vector<1x2x128xf32>
    %365 = vector.shape_cast %364 : vector<1x2x128xf32> to vector<2x128xf32>
    %366 = vector.shape_cast %363 : vector<2x128xf32> to vector<1x2x128xf32>
    tpu.vector_store %arg7[%c0_399, %c6_400, %c0_401], %366 {strides = array<i32>} : memref<1x8x128xf32, #tpu.memory_space<vmem>>, vector<1x2x128xf32>,
    return
  }
  func.func @transform_0(%arg0: i32) -> (i32, i32, i32) {
    %c0_i32 = arith.constant 0 : i32
    %c0_i32_0 = arith.constant 0 : i32
    %c0_i32_1 = arith.constant 0 : i32
    return %arg0, %c0_i32, %c0_i32_0 : i32, i32, i32
  }
  func.func @transform_1(%arg0: i32) -> (i32, i32, i32, i32) {
    %c0_i32 = arith.constant 0 : i32
    %c0_i32_0 = arith.constant 0 : i32
    %c0_i32_1 = arith.constant 0 : i32
    %c0_i32_2 = arith.constant 0 : i32
    %c0_i32_3 = arith.constant 0 : i32
    return %c0_i32, %c0_i32_0, %c0_i32_1, %c0_i32_2 : i32, i32, i32, i32
  }
  func.func @transform_2(%arg0: i32) -> (i32, i32) {
    %c0_i32 = arith.constant 0 : i32
    %c0_i32_0 = arith.constant 0 : i32
    %c0_i32_1 = arith.constant 0 : i32
    return %c0_i32, %c0_i32_0 : i32, i32
  }
  func.func @transform_3(%arg0: i32) -> (i32, i32, i32) {
    %c0_i32 = arith.constant 0 : i32
    %c0_i32_0 = arith.constant 0 : i32
    %c0_i32_1 = arith.constant 0 : i32
    %c0_i32_2 = arith.constant 0 : i32
    return %c0_i32, %c0_i32_0, %c0_i32_1 : i32, i32, i32
  }
  func.func @transform_4(%arg0: i32) -> (i32, i32) {
    %c0_i32 = arith.constant 0 : i32
    %c0_i32_0 = arith.constant 0 : i32
    %c0_i32_1 = arith.constant 0 : i32
    return %c0_i32, %c0_i32_0 : i32, i32
  }
  func.func @transform_5(%arg0: i32) -> (i32, i32) {
    %c0_i32 = arith.constant 0 : i32
    %c0_i32_0 = arith.constant 0 : i32
    %c0_i32_1 = arith.constant 0 : i32
    return %c0_i32, %c0_i32_0 : i32, i32
  }
  func.func @transform_6(%arg0: i32) -> (i32, i32, i32) {
    %c0_i32 = arith.constant 0 : i32
    %c0_i32_0 = arith.constant 0 : i32
    %c0_i32_1 = arith.constant 0 : i32
    return %arg0, %c0_i32, %c0_i32_0 : i32, i32, i32
  }
}

module attributes {stable_mosaic.version = 11 : i64} {
  func.func @_dc_kernel(%arg0: i32, %arg1: memref<4x128xf32, #tpu.memory_space<vmem>>, %arg2: memref<4x128xf32, #tpu.memory_space<vmem>>, %arg3: memref<1x128xf32, #tpu.memory_space<vmem>>, %arg4: memref<4x128xf32, #tpu.memory_space<vmem>>) attributes {dimension_semantics = [#tpu.dimension_semantics<parallel>], iteration_bounds = array<i64: 2>, scalar_prefetch = 0 : i64, scratch_operands = 0 : i64, tpu.core_type = #tpu.core_type<tc>, window_params = [{transform_indices = @transform_0, window_bounds = array<i64: 4, 128>}, {transform_indices = @transform_1, window_bounds = array<i64: 4, 128>}, {transform_indices = @transform_2, window_bounds = array<i64: 1, 128>}, {transform_indices = @transform_3, window_bounds = array<i64: 4, 128>}]} {
    %c0 = arith.constant 0 : index
    %c0_0 = arith.constant 0 : index
    %0 = vector.load %arg3[%c0, %c0_0] : memref<1x128xf32, #tpu.memory_space<vmem>>, vector<1x128xf32>
    %cst = arith.constant 0.000000e+00 : f32
    %1 = vector.broadcast %cst : f32 to vector<1x128xf32>
    %2 = arith.cmpf one, %0, %1 : vector<1x128xf32>
    %c0_1 = arith.constant 0 : index
    %c0_2 = arith.constant 0 : index
    %3 = vector.load %arg2[%c0_1, %c0_2] : memref<4x128xf32, #tpu.memory_space<vmem>>, vector<4x128xf32>
    %c0_3 = arith.constant 0 : index
    %c0_4 = arith.constant 0 : index
    %4 = vector.load %arg1[%c0_3, %c0_4] : memref<4x128xf32, #tpu.memory_space<vmem>>, vector<4x128xf32>
    %5 = vector.shape_cast %2 : vector<1x128xi1> to vector<1x128xi1>
    %6 = vector.broadcast %5 : vector<1x128xi1> to vector<4x128xi1>
    %7 = arith.select %6, %3, %4 : vector<4x128xi1>, vector<4x128xf32>
    %c0_5 = arith.constant 0 : index
    %c0_6 = arith.constant 0 : index
    %8 = vector.load %arg4[%c0_5, %c0_6] : memref<4x128xf32, #tpu.memory_space<vmem>>, vector<4x128xf32>
    tpu.vector_store %arg4[%c0_5, %c0_6], %7 {strides = array<i32>} : memref<4x128xf32, #tpu.memory_space<vmem>>, vector<4x128xf32>,
    return
  }
  func.func @transform_0(%arg0: i32) -> (i32, i32) {
    %c0_i32 = arith.constant 0 : i32
    %c0_i32_0 = arith.constant 0 : i32
    return %c0_i32, %arg0 : i32, i32
  }
  func.func @transform_1(%arg0: i32) -> (i32, i32) {
    %c0_i32 = arith.constant 0 : i32
    %c0_i32_0 = arith.constant 0 : i32
    return %c0_i32, %arg0 : i32, i32
  }
  func.func @transform_2(%arg0: i32) -> (i32, i32) {
    %c0_i32 = arith.constant 0 : i32
    %c0_i32_0 = arith.constant 0 : i32
    return %c0_i32, %arg0 : i32, i32
  }
  func.func @transform_3(%arg0: i32) -> (i32, i32) {
    %c0_i32 = arith.constant 0 : i32
    %c0_i32_0 = arith.constant 0 : i32
    return %c0_i32, %arg0 : i32, i32
  }
}

</mosaic_0001>

<bundles_post_ra>
// kernel: transblock_uc_forward.4
= control target key start
LH: loop header
LB: loop body
LE: loop exit
PB: predicated region body
PF: predicated region fallthrough
CT: control target
= control target key end

     0   :  { %s4066_s21 = smov 0   ;;  %s5160_s0 = inlined_call_operand.vmem [shape: bf16[2,32,384], index: 0, kind: input, shape index: {}]   ;;  %s5161_s1 = inlined_call_operand.vmem [shape: bf16[4,4,32,32], index: 1, kind: input, shape index: {}]   ;;  %s5162_s2 = inlined_call_operand.vmem [shape: f32[32,1], index: 2, kind: input, shape index: {}]   ;;  %s5163_s3 = inlined_call_operand.vmem [shape: f32[9,2,32], index: 3, kind: input, shape index: {}]   ;;  %s5164_s4 = inlined_call_operand.vmem [shape: f32[2,1], index: 4, kind: input, shape index: {}]   ;;  %s5165_s5 = inlined_call_operand.vmem [shape: f32[1,128], index: 5, kind: input, shape index: {}]   ;;  %s5166_s6 = inlined_call_operand.vmem [shape: f32[2,8,128], index: 6, kind: output, shape index: {}]  }
   0x1 LB: > { %s3101_s22 = sadd.s32 4294967295, %s4019_s21   ;;  %p3105_p0 = scmp.ge.s32.totalorder %s4019_s21, 1  ;;  %s4019_s21 = sphi %s4066_s21, %s16_s21  }
   0x2   : > { %p212_p1 = scmp.lt.s32.totalorder %s4019_s21, 3 }
   0x4   : > { %p213_p2 = pnand %p3105_p0, %p212_p1 }
   0x6   : > { %216 = sbr.rel (%p213_p2) target bundleno = 824 (0x338), region = 44 }
   0xb   : > { %p241_p3 = scmp.lt.s32.totalorder %s3101_s22, 1  ;;  %v4021_v0 = vmov 0   ;;  %s4022_s27 = smov 10   ;;  %v253_v13 = vld [vmem:[%s5162_s2 + $0x8] sm:$0xff]  ;;  %v252_v14 = vld [vmem:[%s5162_s2] sm:$0xff]  ;;  %v254_v15 = vld [vmem:[%s5162_s2 + $0x10] sm:$0xff] }
   0xc   : > { %3610 = vset.pattern.permute.xlu1 %v4021_v0  ;;  %3609 = vset.pattern.permute.xlu0 %v4021_v0  ;;  %s4023_s28 = smov 11   ;;  %s4024_s29 = smov 1   ;;  %v255_v20 = vld [vmem:[%s5162_s2 + $0x18] sm:$0xff]  ;;  %vm341_vm0 = vcmask 261120   ;;  %vm336_vm1 = vcmask 80896   ;;  %vm385_vm2 = vcmask 89088  }
   0xd   : > { %s5171_s22 = smov (!%p241_p3, %s3101_s22), 1  ;;  %3611 = vset.pattern.permute.xlu2 %v4021_v0  ;;  %s4025_s14 = smov 9   ;;  %vm438_vm3 = vcmask 7168   ;;  %vm619_vm4 = vcmask 72704   ;;  %vm799_vm5 = vcmask 1039360   ;;  %vm1021_vm6 = vcmask 973824  }
   0xe   : > { %s3590_s23 = smul.u32 48, %s5171_s22  ;;  %s4026_s15 = smov 127   ;;  %vm1078_vm7 = vcmask 965632   ;;  %vm1336_vm8 = vcmask 957440  }
   0xf   : > { %s4027_s16 = smov 119   ;;  %s4028_s17 = smov 118  }
  0x10   : > { %s4080_s26 = scalar_lea.vmem %s5160_s0, %s3590_s23  ;;  %s4029_s24 = smov 117  }
  0x11   : > { %v3130_v1 = vld [vmem:[%s4080_s26 + $0x18] sm:$0xf]  ;;  %v3529_v2 = vld [vmem:[%s4080_s26 + $0x20] sm:$0xf0]  ;;  %v3122_v3 = vld [vmem:[%s4080_s26] sm:$0xf] }
  0x12   : > { %v3131_v4 = vor.u32 %v3529_v2, %v3130_v1  ;;  %v3527_v5 = vld [vmem:[%s4080_s26 + $0x8] sm:$0xf0]  ;;  %v3528_v7 = vld [vmem:[%s4080_s26 + $0x1c] sm:$0xf]  ;;  %v3132_v8 = vld [vmem:[%s4080_s26 + $0x24] sm:$0xf0] }
  0x13   : > { %v3123_v6 = vor.u32 %v3527_v5, %v3122_v3  ;;  %v3526_v9 = vld [vmem:[%s4080_s26 + $0x4] sm:$0xf]  ;;  %v3124_v10 = vld [vmem:[%s4080_s26 + $0xc] sm:$0xf0]  ;;  %v3135_v11 = vor.u32 %v3528_v7, %v3132_v8  ;;  %v3202_v18 = vld [vmem:[%s4080_s26] sm:$0xf] }
  0x14   : > { %332 = vrot.lane.b32.xlu1 %v3131_v4, %s4022_s27  ;;  %v3127_v12 = vor.u32 %v3526_v9, %v3124_v10  ;;  %v3540_v16 = vld [vmem:[%s4080_s26 + $0x4] sm:$0xf]  ;;  %v3204_v17 = vld [vmem:[%s4080_s26 + $0xc] sm:$0xf0]  ;;  %v3541_v19 = vld [vmem:[%s4080_s26 + $0x8] sm:$0xf0] }
  0x15   : > { %328 = vrot.lane.b32.xlu0 %v3123_v6, %s4022_s27  ;;  %377 = vrot.lane.b32.xlu2 %v3123_v6, %s4023_s28  ;;  %v3207_v21 = vor.u32 %v3540_v16, %v3204_v17  ;;  %v3203_v22 = vor.u32 %v3541_v19, %v3202_v18  ;;  %v3210_v23 = vld [vmem:[%s4080_s26 + $0x18] sm:$0xf]  ;;  %v3543_v24 = vld [vmem:[%s4080_s26 + $0x20] sm:$0xf0] }
  0x16   : > { %v3211_v25 = vor.u32 %v3543_v24, %v3210_v23  ;;  %v3542_v26 = vld [vmem:[%s4080_s26 + $0x1c] sm:$0xf]  ;;  %v3212_v27 = vld [vmem:[%s4080_s26 + $0x24] sm:$0xf0]  ;;  %v3264_v29 = vld [vmem:[%s4080_s26 + $0x4] sm:$0xf] }
  0x17   : > { %v3215_v28 = vor.u32 %v3542_v26, %v3212_v27  ;;  %v3553_v30 = vld [vmem:[%s4080_s26 + $0xc] sm:$0xf0]  ;;  %v3272_v31 = vld [vmem:[%s4080_s26 + $0x1c] sm:$0xf]  ;;  %v3555_v32 = vld [vmem:[%s4080_s26 + $0x24] sm:$0xf0] }
  0x18   : > { %v3552_v33 = vld [vmem:[%s4080_s26 + $0x8] sm:$0xf]  ;;  %v3266_v34 = vld [vmem:[%s4080_s26 + $0x10] sm:$0xf0]  ;;  %v3265_v35 = vor.u32 %v3553_v30, %v3264_v29  ;;  %v3273_v36 = vor.u32 %v3555_v32, %v3272_v31  ;;  %v3554_v38 = vld [vmem:[%s4080_s26 + $0x20] sm:$0xf] }
  0x19   : > { %v3269_v37 = vor.u32 %v3552_v33, %v3266_v34  ;;  %v3274_v39 = vld [vmem:[%s4080_s26 + $0x28] sm:$0xf0]  ;;  %v3558_v40 = vld [vmem:[%s4080_s26 + $0x4] sm:$0xf]  ;;  %v3318_v41 = vld [vmem:[%s4080_s26 + $0xc] sm:$0xf0] }
  0x1a   : > { %v3277_v42 = vor.u32 %v3554_v38, %v3274_v39  ;;  %v3321_v43 = vor.u32 %v3558_v40, %v3318_v41  ;;  %v3316_v44 = vld [vmem:[%s4080_s26] sm:$0xf]  ;;  %v3559_v45 = vld [vmem:[%s4080_s26 + $0x8] sm:$0xf0]  ;;  %v3324_v46 = vld [vmem:[%s4080_s26 + $0x18] sm:$0xf] }
  0x1b   : > { %v3561_v47 = vld [vmem:[%s4080_s26 + $0x20] sm:$0xf0]  ;;  %v3317_v48 = vor.u32 %v3559_v45, %v3316_v44  ;;  %v3569_v50 = vld [vmem:[%s4080_s26 + $0xc] sm:$0xf0]  ;;  %v3568_v53 = vld [vmem:[%s4080_s26 + $0x8] sm:$0xf] }
  0x1c   : > { %334 = vrot.lane.b32.xlu1 %v3135_v11, %s4022_s27  ;;  %v3346_v49 = vld [vmem:[%s4080_s26 + $0x4] sm:$0xf]  ;;  %v3325_v51 = vor.u32 %v3561_v47, %v3324_v46  ;;  %v3348_v54 = vld [vmem:[%s4080_s26 + $0x10] sm:$0xf0]  ;;  %v3570_v55 = vld [vmem:[%s4080_s26 + $0x20] sm:$0xf] }
  0x1d   : > { %330 = vrot.lane.b32.xlu0 %v3127_v12, %s4022_s27  ;;  %379 = vrot.lane.b32.xlu2 %v3127_v12, %s4023_s28  ;;  %v3347_v52 = vor.u32 %v3569_v50, %v3346_v49  ;;  %v3356_v56 = vld [vmem:[%s4080_s26 + $0x28] sm:$0xf0]  ;;  %v3560_v57 = vld [vmem:[%s4080_s26 + $0x1c] sm:$0xf]  ;;  %v3351_v60 = vor.u32 %v3568_v53, %v3348_v54 }
  0x1e   : > { %v3326_v58 = vld [vmem:[%s4080_s26 + $0x24] sm:$0xf0]  ;;  %v3359_v61 = vor.u32 %v3570_v55, %v3356_v56  ;;  %v3354_v62 = vld [vmem:[%s4080_s26 + $0x1c] sm:$0xf]  ;;  %v3396_v3 = vld [vmem:[%s4080_s26 + $0x10] sm:$0xf0] }
  0x1f   : > { %v3329_v59 = vor.u32 %v3560_v57, %v3326_v58  ;;  %v3571_v63 = vld [vmem:[%s4080_s26 + $0x24] sm:$0xf0]  ;;  %v3581_v7 = vld [vmem:[%s4080_s26 + $0xc] sm:$0xf0]  ;;  %v3402_v8 = vld [vmem:[%s4080_s26 + $0x1c] sm:$0xf] }
  0x20   : > { %v3355_v0 = vor.u32 %v3571_v63, %v3354_v62  ;;  %v3580_v2 = vld [vmem:[%s4080_s26 + $0x8] sm:$0xf]  ;;  %v3582_v16 = vld [vmem:[%s4080_s26 + $0x20] sm:$0xf]  ;;  %v3404_v17 = vld [vmem:[%s4080_s26 + $0x28] sm:$0xf0] }
  0x21   : > { %v3399_v5 = vor.u32 %v3580_v2, %v3396_v3  ;;  %v3583_v9 = vld [vmem:[%s4080_s26 + $0x24] sm:$0xf0]  ;;  %v3176_v18 = vld [vmem:[%s4080_s26 + $0x4] sm:$0xf]  ;;  %v3536_v19 = vld [vmem:[%s4080_s26 + $0xc] sm:$0xf0]  ;;  %v3407_v23 = vor.u32 %v3582_v16, %v3404_v17 }
  0x22   : > { %v3538_v24 = vld [vmem:[%s5161_s1 + $0x30] sm:$0xff]  ;;  %v3534_v44 = vld [vmem:[%s5161_s1 + $0x20] sm:$0xff]  ;;  %v3533_v45 = vld [vmem:[%s5161_s1 + $0x18] sm:$0xff] }
  0x23   : > { %v3532_v31 = vld [vmem:[%s5161_s1 + $0x10] sm:$0xff]  ;;  %v3246_v46 = vld [vmem:[%s4080_s26 + $0x1c] sm:$0xf]  ;;  %v3549_v47 = vld [vmem:[%s4080_s26 + $0x24] sm:$0xf0] }
  0x24   : > { %383 = vrot.lane.b32.xlu1 %v3135_v11, %s4023_s28  ;;  %v3548_v53 = vld [vmem:[%s4080_s26 + $0xc] sm:$0xf0]  ;;  %v3531_v55 = vld [vmem:[%s5161_s1 + $0x8] sm:$0xff]  ;;  %v3302_v16 = vld [vmem:[%s4080_s26 + $0x1c] sm:$0xf] }
  0x25   : > { %381 = vrot.lane.b32.xlu0 %v3131_v4, %s4023_s28  ;;  %430 = vrot.lane.b32.xlu2 %v3123_v6, %s4024_s29  ;;  %v3394_v6 = vld [vmem:[%s4080_s26 + $0x4] sm:$0xf]  ;;  %v3565_v17 = vld [vmem:[%s4080_s26 + $0x24] sm:$0xf0] }
  0x26   : > { %v3395_v10 = vor.u32 %v3581_v7, %v3394_v6 }
  0x2c   : > { %434 = vrot.lane.b32.xlu1 %v3131_v4, %s4024_s29 }
  0x2d   : > { %432 = vrot.lane.b32.xlu0 %v3127_v12, %s4024_s29  ;;  %436 = vrot.lane.b32.xlu2 %v3135_v11, %s4024_s29  ;;  %v3403_v12 = vor.u32 %v3583_v9, %v3402_v8  ;;  %v3544_v8 = vld [vmem:[%s5161_s1 + $0x40] sm:$0xff] }
  0x34   : > { %539 = vperm.xlu1 %3610, %v253_v13   ;;  %v3180_v13 = vld [vmem:[%s4080_s26 + $0x1c] sm:$0xf] }
  0x35   : > { %534 = vperm.xlu0 %3609, %v252_v14   ;;  %544 = vperm.xlu2 %3611, %v254_v15   ;;  %v3537_v14 = vld [vmem:[%s4080_s26 + $0x24] sm:$0xf0] }
  0x36   : > { %v3181_v15 = vor.u32 %v3537_v14, %v3180_v13 }
  0x38   : > { %515 = vmatpush.bf16.msra.mxu3 %v3181_v15 }
  0x3c   : > { %549 = vperm.xlu1 %3610, %v255_v20   ;;  %v3177_v20 = vor.u32 %v3536_v19, %v3176_v18  ;;  %v3303_v18 = vor.u32 %v3565_v17, %v3302_v16 }
  0x3d   : > { %613 = vrot.lane.b32.xlu0 %v3207_v21, %s4025_s14  ;;  %611 = vrot.lane.b32.xlu2 %v3203_v22, %s4025_s14 }
  0x3e   : > { %516 = vmatpush.bf16.msra.mxu3 %v3177_v20  ;;  %v3556_v20 = vld [vmem:[%s5161_s1 + $0x70] sm:$0xff] }
  0x41   : > { %3182 = vmatmul.msk.bf16.vlgmr.msra.gmra.mxu3 %vm341_vm0, %v3538_v24  ;;  %v3545_v24 = vld [vmem:[%s5161_s1 + $0x48] sm:$0xff] }
  0x44   : > { %615 = vrot.lane.b32.xlu1 %v3211_v25, %s4025_s14 }
  0x45   : > { %659 = vrot.lane.b32.xlu0 %v3203_v22, %s4022_s27  ;;  %617 = vrot.lane.b32.xlu2 %v3215_v28, %s4025_s14 }
  0x4c   : > { %661 = vrot.lane.b32.xlu1 %v3207_v21, %s4022_s27 }
  0x4d   : > { %665 = vrot.lane.b32.xlu0 %v3215_v28, %s4022_s27  ;;  %663 = vrot.lane.b32.xlu2 %v3211_v25, %s4022_s27 }
  0x54   : > { %791 = vrot.lane.b32.xlu1 %v3265_v35, %s4026_s15  ;;  %v3539_v35 = vld [vmem:[%s5161_s1 + $0x38] sm:$0xff] }
  0x55   : > { %795 = vrot.lane.b32.xlu0 %v3273_v36, %s4026_s15  ;;  %793 = vrot.lane.b32.xlu2 %v3269_v37, %s4026_s15  ;;  %v3530_v37 = vld [vmem:[%s5161_s1] sm:$0xff] }
  0x56   : > { %3183 = vmatmul.msk.bf16.gmra.mxu3 %vm341_vm0, %v3539_v35 }
  0x5c   : > { %797 = vrot.lane.b32.xlu1 %v3277_v42, %s4026_s15  ;;  %v256_v42 = vld [vmem:[%s5164_s4] sm:$0x3] }
  0x5d   : > { %943 = vrot.lane.b32.xlu0 %v3321_v43, %s4024_s29  ;;  %941 = vrot.lane.b32.xlu2 %v3317_v48, %s4024_s29  ;;  %v3247_v48 = vor.u32 %v3549_v47, %v3246_v46 }
  0x64   : > { %945 = vrot.lane.b32.xlu1 %v3325_v51, %s4024_s29 }
  0x65   : > { %1013 = vrot.lane.b32.xlu0 %v3347_v52, %s4027_s16  ;;  %947 = vrot.lane.b32.xlu2 %v3329_v59, %s4024_s29  ;;  %v3535_v59 = vld [vmem:[%s5161_s1 + $0x28] sm:$0xff] }
  0x6c   : > { %1015 = vrot.lane.b32.xlu1 %v3351_v60, %s4027_s16 }
  0x6d   : > { %1019 = vrot.lane.b32.xlu0 %v3359_v61, %s4027_s16  ;;  %1017 = vrot.lane.b32.xlu2 %v3355_v0, %s4027_s16 }
  0x6f   : > { %v4165_v1 = vpop.permute.xlu2 %377 }
  0x74   : > { %1070 = vrot.lane.b32.xlu1 %v3347_v52, %s4028_s17  ;;  %v3242_v52 = vld [vmem:[%s4080_s26 + $0x4] sm:$0xf] }
  0x75   : > { %1074 = vrot.lane.b32.xlu0 %v3355_v0, %s4028_s17  ;;  %1072 = vrot.lane.b32.xlu2 %v3351_v60, %s4028_s17  ;;  %v3243_v54 = vor.u32 %v3548_v53, %v3242_v52 }
  0x77   : > { %v380_v4 = vpop.permute.xlu2 %379 }
  0x78   : > { %v386_v36 = vsel %vm385_vm2, %v4165_v1, %v380_v4  ;;  %v3546_v1 = vld [vmem:[%s5161_s1 + $0x50] sm:$0xff] }
  0x7c   : > { %1076 = vrot.lane.b32.xlu1 %v3359_v61, %s4028_s17 }
  0x7d   : > { %1175 = vrot.lane.b32.xlu0 %v3399_v5, %s4026_s15  ;;  %1173 = vrot.lane.b32.xlu2 %v3395_v10, %s4026_s15 }
  0x7f   : > { %v431_v11 = vpop.permute.xlu2 %430 }
  0x84   : > { %1177 = vrot.lane.b32.xlu1 %v3403_v12, %s4026_s15 }
  0x85   : > { %1272 = vrot.lane.b32.xlu0 %v3395_v10, %s4028_s17  ;;  %1179 = vrot.lane.b32.xlu2 %v3407_v23, %s4026_s15 }
  0x86   : > { %v333_v21 = vpop.permute.xlu1 %332 }
  0x87   : > { %v329_v22 = vpop.permute.xlu0 %328  ;;  %v437_v25 = vpop.permute.xlu2 %436 }
  0x8c   : > { %1274 = vrot.lane.b32.xlu1 %v3399_v5, %s4028_s17 }
  0x8d   : > { %1278 = vrot.lane.b32.xlu0 %v3407_v23, %s4028_s17  ;;  %1276 = vrot.lane.b32.xlu2 %v3403_v12, %s4028_s17 }
  0x8e   : > { %v335_v26 = vpop.permute.xlu1 %334 }
  0x8f   : > { %v331_v27 = vpop.permute.xlu0 %330  ;;  %v338_v28 = vsel %vm336_vm1, %v333_v21, %v335_v26  ;;  %v4198_v30 = vpop.permute.xlu2 %544  ;;  %v3551_v21 = vld [vmem:[%s5161_s1 + $0x68] sm:$0xff] }
  0x90   : > { %354 = vmatpush.bf16.msra.mxu0 %v338_v28  ;;  %v337_v29 = vsel %vm336_vm1, %v329_v22, %v331_v27  ;;  %v3298_v22 = vld [vmem:[%s4080_s26 + $0x4] sm:$0xf] }
  0x94   : > { %1328 = vrot.lane.b32.xlu1 %v3395_v10, %s4029_s24  ;;  %355 = vmatpush.bf16.msra.mxu0 %v337_v29 }
  0x95   : > { %1332 = vrot.lane.b32.xlu0 %v3403_v12, %s4029_s24  ;;  %1330 = vrot.lane.b32.xlu2 %v3399_v5, %s4029_s24  ;;  %v3550_v5 = vld [vmem:[%s5161_s1 + $0x60] sm:$0xff] }
  0x96   : > { %v384_v32 = vpop.permute.xlu1 %383 }
  0x97   : > { %v382_v33 = vpop.permute.xlu0 %381  ;;  %3136 = vmatmul.msk.bf16.vlgmr.msra.gmra.mxu0 %vm341_vm0, %v3532_v31  ;;  %v612_v38 = vpop.permute.xlu2 %611 }
  0x98   : > { %v387_v34 = vsel %vm385_vm2, %v382_v33, %v384_v32  ;;  %v3566_v32 = vld [vmem:[%s5161_s1 + $0x90] sm:$0xff] }
  0x99   : > { %402 = vmatpush.bf16.msra.mxu1 %v387_v34 }
  0x9c   : > { %1334 = vrot.lane.b32.xlu1 %v3407_v23, %s4029_s24  ;;  %v3564_v23 = vld [vmem:[%s4080_s26 + $0xc] sm:$0xf0] }
  0x9d   : > { %403 = vmatpush.bf16.msra.mxu1 %v386_v36 }
  0x9e   : > { %v435_v39 = vpop.permute.xlu1 %434 }
  0x9f   : > { %v433_v40 = vpop.permute.xlu0 %432  ;;  %v440_v41 = vsel %vm438_vm3, %v435_v39, %v437_v25  ;;  %v618_v51 = vpop.permute.xlu2 %617  ;;  %v3299_v25 = vor.u32 %v3564_v23, %v3298_v22  ;;  %v3572_v39 = vld [vmem:[%s5161_s1 + $0xa0] sm:$0xff]  ;;  %v3589_v23 = vld [vmem:[%s5161_s1 + $0xf8] sm:$0xff] }
  0xa0   : > { %455 = vmatpush.bf16.msra.mxu2 %v440_v41  ;;  %3146 = vmatmul.msk.bf16.vlgmr.msra.gmra.mxu1 %vm341_vm0, %v3530_v37  ;;  %v439_v43 = vsel %vm438_vm3, %v431_v11, %v433_v40  ;;  %v3547_v11 = vld [vmem:[%s5161_s1 + $0x58] sm:$0xff]  ;;  %v3562_v40 = vld [vmem:[%s5161_s1 + $0x80] sm:$0xff] }
  0xa4   : > { %1795 = vperm.xlu1 %3610, %v256_v42   ;;  %456 = vmatpush.bf16.msra.mxu2 %v439_v43 }
  0xa6   : > { %v4232_v49 = vpop.permute.xlu1 %539 }
  0xa7   : > { %v4234_v50 = vpop.permute.xlu0 %534  ;;  %3160 = vmatmul.msk.bf16.vlgmr.msra.gmra.mxu2 %vm341_vm0, %v3534_v44  ;;  %3137 = vmatmul.msk.bf16.gmra.mxu0 %vm341_vm0, %v3533_v45  ;;  %v664_v58 = vpop.permute.xlu2 %663  ;;  %v3567_v44 = vld [vmem:[%s5161_s1 + $0x98] sm:$0xff] }
  0xa8   : > { %739 = vmatpush.bf16.msrb.mxu2 %v3247_v48  ;;  %v3424_v48 = vld [vmem:[%s4080_s26 + $0x1c] sm:$0xf] }
  0xac   : > { %740 = vmatpush.bf16.msrb.mxu2 %v3243_v54  ;;  %v3574_v54 = vld [vmem:[%s5161_s1 + $0xb0] sm:$0xff] }
  0xae   : > { %v4243_v56 = vpop.permute.xlu1 %549 }
  0xaf   : > { %v614_v57 = vpop.permute.xlu0 %613  ;;  %v794_v0 = vpop.permute.xlu2 %793 }
  0xb0   : > { %3147 = vmatmul.msk.bf16.gmra.mxu1 %vm341_vm0, %v3531_v55  ;;  %v620_v63 = vsel %vm619_vm4, %v612_v38, %v614_v57  ;;  %v3557_v38 = vld [vmem:[%s5161_s1 + $0x78] sm:$0xff]  ;;  %v3573_v55 = vld [vmem:[%s5161_s1 + $0xa8] sm:$0xff]  ;;  %v3420_v57 = vld [vmem:[%s4080_s26 + $0x4] sm:$0xf] }
  0xb6   : > { %v616_v60 = vpop.permute.xlu1 %615 }
  0xb7   : > { %v660_v61 = vpop.permute.xlu0 %659  ;;  %3161 = vmatmul.msk.bf16.gmra.mxu2 %vm341_vm0, %v3535_v59  ;;  %v621_v62 = vsel %vm619_vm4, %v616_v60, %v618_v51  ;;  %v942_v6 = vpop.permute.xlu2 %941  ;;  %v3577_v51 = vld [vmem:[%s4080_s26 + $0x24] sm:$0xf0] }
  0xb8   : > { %636 = vmatpush.bf16.msrb.mxu0 %v621_v62  ;;  %v3425_v53 = vor.u32 %v3577_v51, %v3424_v48  ;;  %v3563_v60 = vld [vmem:[%s5161_s1 + $0x88] sm:$0xff] }
  0xbc   : > { %637 = vmatpush.bf16.msrb.mxu0 %v620_v63 }
  0xbe   : > { %v662_v2 = vpop.permute.xlu1 %661 }
  0xbf   : > { %v666_v3 = vpop.permute.xlu0 %665  ;;  %3216 = vmatmul.msk.bf16.vlgmr.msrb.gmra.mxu0 %vm341_vm0, %v3546_v1  ;;  %v667_v7 = vsel %vm336_vm1, %v660_v61, %v662_v2  ;;  %v948_v12 = vpop.permute.xlu2 %947  ;;  %v3584_v2 = vld [vmem:[%s5161_s1 + $0xd0] sm:$0xff] }
  0xc0   : > { %v668_v4 = vsel %vm336_vm1, %v664_v58, %v666_v3  ;;  %902 = vmatpush.bf16.msra.mxu0 %v3303_v18  ;;  %v3576_v58 = vld [vmem:[%s4080_s26 + $0xc] sm:$0xf0] }
  0xc1   : > { %683 = vmatpush.bf16.msrb.mxu1 %v668_v4  ;;  %v3421_v61 = vor.u32 %v3576_v58, %v3420_v57  ;;  %v3588_v18 = vld [vmem:[%s5161_s1 + $0xf0] sm:$0xff] }
  0xc4   : > { %903 = vmatpush.bf16.msra.mxu0 %v3299_v25 }
  0xc5   : > { %684 = vmatpush.bf16.msrb.mxu1 %v667_v7 }
  0xc6   : > { %v792_v9 = vpop.permute.xlu1 %791 }
  0xc7   : > { %v796_v10 = vpop.permute.xlu0 %795  ;;  %3248 = vmatmul.msk.bf16.vlgmr.msrb.gmra.mxu2 %vm341_vm0, %v3550_v5  ;;  %v800_v19 = vsel %vm799_vm5, %v792_v9, %v794_v0  ;;  %v1018_v29 = vpop.permute.xlu2 %1017  ;;  %v3586_v9 = vld [vmem:[%s5161_s1 + $0xe0] sm:$0xff] }
  0xc8   : > { %3226 = vmatmul.msk.bf16.vlgmr.msrb.gmra.mxu1 %vm341_vm0, %v3544_v8  ;;  %v3575_v8 = vld [vmem:[%s5161_s1 + $0xb8] sm:$0xff] }
  0xce   : > { %v798_v13 = vpop.permute.xlu1 %797 }
  0xcf   : > { %v801_v14 = vsel %vm799_vm5, %v796_v10, %v798_v13  ;;  %v944_v15 = vpop.permute.xlu0 %943  ;;  %3217 = vmatmul.msk.bf16.gmra.mxu0 %vm341_vm0, %v3547_v11  ;;  %v1073_v36 = vpop.permute.xlu2 %1072  ;;  %v3578_v10 = vld [vmem:[%s5161_s1 + $0xc0] sm:$0xff] }
  0xd0   : > { %816 = vmatpush.bf16.msrb.mxu3 %v801_v14  ;;  %v949_v31 = vsel %vm438_vm3, %v942_v6, %v944_v15 }
  0xd4   : > { %817 = vmatpush.bf16.msrb.mxu3 %v800_v19  ;;  %v3587_v19 = vld [vmem:[%s5161_s1 + $0xe8] sm:$0xff] }
  0xd6   : > { %v946_v26 = vpop.permute.xlu1 %945 }
  0xd7   : > { %3278 = vmatmul.msk.bf16.vlgmr.msrb.gmra.mxu3 %vm341_vm0, %v3556_v20  ;;  %v1014_v27 = vpop.permute.xlu0 %1013  ;;  %v950_v28 = vsel %vm438_vm3, %v946_v26, %v948_v12  ;;  %3249 = vmatmul.msk.bf16.gmra.mxu2 %vm341_vm0, %v3551_v21  ;;  %v1174_v43 = vpop.permute.xlu2 %1173  ;;  %v3585_v12 = vld [vmem:[%s5161_s1 + $0xd8] sm:$0xff]  ;;  %v3579_v20 = vld [vmem:[%s5161_s1 + $0xc8] sm:$0xff] }
  0xd8   : > { %965 = vmatpush.bf16.msra.mxu1 %v950_v28 }
  0xd9   : > { %3227 = vmatmul.msk.bf16.gmra.mxu1 %vm341_vm0, %v3545_v24  ;;  %v518_v24 = vpop.f32.mrf.mxu3 }
  0xdc   : > { %966 = vmatpush.bf16.msra.mxu1 %v949_v31 }
  0xde   : > { %v1016_v33 = vpop.permute.xlu1 %1015 }
  0xdf   : > { %v1020_v34 = vpop.permute.xlu0 %1019  ;;  %3304 = vmatmul.msk.bf16.vlgmr.msra.gmra.mxu0 %vm341_vm0, %v3566_v32  ;;  %v1022_v37 = vsel %vm1021_vm6, %v1014_v27, %v1016_v33  ;;  %v1180_v59 = vpop.permute.xlu2 %1179 }
  0xe0   : > { %v1023_v35 = vsel %vm1021_vm6, %v1018_v29, %v1020_v34  ;;  %1244 = vmatpush.bf16.msrb.mxu1 %v3425_v53  ;;  %v4376_v34 = vld [vmem:[%s5165_s5] ss:$0 sm:$0xff] }
  0xe1   : > { %1038 = vmatpush.bf16.msra.mxu2 %v1023_v35  ;;  %v520_v32 = vpop.f32.mrf.mxu3 }
  0xe4   : > { %1245 = vmatpush.bf16.msrb.mxu1 %v3421_v61 }
  0xe5   : > { %1039 = vmatpush.bf16.msra.mxu2 %v1022_v37 }
  0xe6   : > { %v1071_v41 = vpop.permute.xlu1 %1070 }
  0xe7   : > { %3279 = vmatmul.msk.bf16.gmra.mxu3 %vm341_vm0, %v3557_v38  ;;  %v1075_v42 = vpop.permute.xlu0 %1074  ;;  %v1079_v52 = vsel %vm1078_vm7, %v1071_v41, %v1073_v36  ;;  %v1277_v5 = vpop.permute.xlu2 %1276 }
  0xe8   : > { %3360 = vmatmul.msk.bf16.vlgmr.msra.gmra.mxu2 %vm341_vm0, %v3572_v39 }
  0xe9   : > { %3330 = vmatmul.msk.bf16.vlgmr.msra.gmra.mxu1 %vm341_vm0, %v3562_v40 }
  0xee   : > { %v1077_v45 = vpop.permute.xlu1 %1076 }
  0xef   : > { %v1080_v46 = vsel %vm1078_vm7, %v1075_v42, %v1077_v45  ;;  %v1176_v47 = vpop.permute.xlu0 %1175  ;;  %3305 = vmatmul.msk.bf16.gmra.mxu0 %vm341_vm0, %v3567_v44  ;;  %v1331_v15 = vpop.permute.xlu2 %1330 }
  0xf0   : > { %1095 = vmatpush.bf16.msra.mxu3 %v1080_v46  ;;  %v1181_v1 = vsel %vm799_vm5, %v1174_v43, %v1176_v47  ;;  %v523_v46 = vpop.f32.mrf.mxu3 }
  0xf4   : > { %1096 = vmatpush.bf16.msra.mxu3 %v1079_v52 }
  0xf6   : > { %v1178_v62 = vpop.permute.xlu1 %1177 }
  0xf7   : > { %3374 = vmatmul.msk.bf16.vlgmr.msra.gmra.mxu3 %vm341_vm0, %v3574_v54  ;;  %v1273_v63 = vpop.permute.xlu0 %1272  ;;  %v1182_v0 = vsel %vm799_vm5, %v1178_v62, %v1180_v59 }
  0xf8   : > { %3361 = vmatmul.msk.bf16.gmra.mxu2 %vm341_vm0, %v3573_v55  ;;  %1197 = vmatpush.bf16.msrb.mxu0 %v1182_v0  ;;  %v525_v62 = vpop.f32.mrf.mxu3 }
  0xf9   : > { %3331 = vmatmul.msk.bf16.gmra.mxu1 %vm341_vm0, %v3563_v60 }
  0xfc   : > { %1198 = vmatpush.bf16.msrb.mxu0 %v1181_v1 }
  0xfe   : > { %v1275_v3 = vpop.permute.xlu1 %1274 }
  0xff   : > { %v1279_v4 = vpop.permute.xlu0 %1278  ;;  %3408 = vmatmul.msk.bf16.vlgmr.msrb.gmra.mxu0 %vm341_vm0, %v3584_v2  ;;  %v1280_v7 = vsel %vm1078_vm7, %v1273_v63, %v1275_v3 }
 0x100   : > { %v1281_v6 = vsel %vm1078_vm7, %v1277_v5, %v1279_v4 }
 0x101   : > { %1296 = vmatpush.bf16.msrb.mxu2 %v1281_v6 }
 0x105   : > { %1297 = vmatpush.bf16.msrb.mxu2 %v1280_v7 }
 0x106   : > { %v1329_v11 = vpop.permute.xlu1 %1328 }
 0x107   : > { %3375 = vmatmul.msk.bf16.gmra.mxu3 %vm341_vm0, %v3575_v8  ;;  %v1333_v13 = vpop.permute.xlu0 %1332  ;;  %v1337_v17 = vsel %vm1336_vm8, %v1329_v11, %v1331_v15 }
 0x108   : > { %3440 = vmatmul.msk.bf16.vlgmr.msrb.gmra.mxu2 %vm341_vm0, %v3586_v9 }
 0x109   : > { %3426 = vmatmul.msk.bf16.vlgmr.msrb.gmra.mxu1 %vm341_vm0, %v3578_v10 }
 0x10e   : > { %v1335_v14 = vpop.permute.xlu1 %1334 }
 0x10f   : > { %v1338_v16 = vsel %vm1336_vm8, %v1333_v13, %v1335_v14  ;;  %3409 = vmatmul.msk.bf16.gmra.mxu0 %vm341_vm0, %v3585_v12 }
 0x110   : > { %1353 = vmatpush.bf16.msrb.mxu3 %v1338_v16 }
 0x114   : > { %1354 = vmatpush.bf16.msrb.mxu3 %v1337_v17  ;;  %v357_v21 = vpop.f32.mrf.mxu0 }
 0x117   : > { %3454 = vmatmul.msk.bf16.vlgmr.msrb.gmra.mxu3 %vm341_vm0, %v3588_v18 }
 0x118   : > { %3441 = vmatmul.msk.bf16.gmra.mxu2 %vm341_vm0, %v3587_v19 }
 0x119   : > { %3427 = vmatmul.msk.bf16.gmra.mxu1 %vm341_vm0, %v3579_v20 }
 0x11c   : > { %v359_v26 = vpop.f32.mrf.mxu0 }
 0x11d   : > { %v405_v22 = vpop.f32.mrf.mxu1 }
 0x11e   : > { %v406_v25 = vadd.f32 %v405_v22, %v357_v21 }
 0x124   : > { %v362_v37 = vpop.f32.mrf.mxu0 }
 0x125   : > { %v407_v27 = vpop.f32.mrf.mxu1 }
 0x126   : > { %v408_v35 = vadd.f32 %v407_v27, %v359_v26 }
 0x127   : > { %3455 = vmatmul.msk.bf16.gmra.mxu3 %vm341_vm0, %v3589_v23 }
 0x12a   : > { %v458_v28 = vpop.f32.mrf.mxu2 }
 0x12b   : > { %v468_v29 = vadd.f32 %v458_v28, %v406_v25 }
 0x12c   : > { %v364_v53 = vpop.f32.mrf.mxu0 }
 0x12d   : > { %v528_v31 = vadd.f32 %v518_v24, %v468_v29  ;;  %v410_v39 = vpop.f32.mrf.mxu1  ;;  %v4030_v29 = vmov 0.0  }
 0x12e   : > { %v411_v45 = vadd.f32 %v410_v39, %v362_v37 }
 0x12f   : > { %v552_v33 = vadd.f32 %v4234_v50, %v528_v31 }
 0x131   : > { %v556_v36 = vmax.f32 %v552_v33, 0.0 }
 0x132   : > { %v460_v38 = vpop.f32.mrf.mxu2 }
 0x133   : > { %v4379_v40 = vmul.f32 %v4376_v34, %v556_v36  ;;  %v469_v41 = vadd.f32 %v460_v38, %v408_v35 }
 0x135   : > { %v529_v42 = vadd.f32 %v520_v32, %v469_v41  ;;  %v4382_v43 = vpack.i.bf16 0.0, %v4379_v40  ;;  %v412_v54 = vpop.f32.mrf.mxu1 }
 0x136   : > { %v413_v59 = vadd.f32 %v412_v54, %v364_v53 }
 0x137   : > { %v553_v44 = vadd.f32 %v4232_v49, %v529_v42  ;;  %3613 = vrot.lane.b32.xlu2 %v4382_v43, %s4026_s15 }
 0x139   : > { %v557_v47 = vmax.f32 %v553_v44, 0.0 }
 0x13a   : > { %v463_v48 = vpop.f32.mrf.mxu2 }
 0x13b   : > { %v4388_v51 = vmul.f32 %v4376_v34, %v557_v47  ;;  %v470_v52 = vadd.f32 %v463_v48, %v411_v45 }
 0x13c   : > { %v639_v3 = vpop.f32.mrf.mxu0 }
 0x13d   : > { %v530_v55 = vadd.f32 %v523_v46, %v470_v52  ;;  %v4391_v57 = vpack.i.bf16 0.0, %v4388_v51 }
 0x13f   : > { %v554_v58 = vadd.f32 %v4198_v30, %v530_v55  ;;  %3618 = vrot.lane.b32.xlu0 %v4391_v57, %s4026_s15 }
 0x141   : > { %v558_v60 = vmax.f32 %v554_v58, 0.0 }
 0x142   : > { %v465_v61 = vpop.f32.mrf.mxu2 }
 0x143   : > { %v4397_v63 = vmul.f32 %v4376_v34, %v558_v60  ;;  %v471_v0 = vadd.f32 %v465_v61, %v413_v59 }
 0x144   : > { %v641_v10 = vpop.f32.mrf.mxu0 }
 0x145   : > { %v531_v1 = vadd.f32 %v525_v62, %v471_v0  ;;  %v4400_v2 = vpack.i.bf16 0.0, %v4397_v63  ;;  %v686_v4 = vpop.f32.mrf.mxu1 }
 0x146   : > { %v687_v12 = vadd.f32 %v686_v4, %v639_v3 }
 0x147   : > { %v555_v5 = vadd.f32 %v4243_v56, %v531_v1  ;;  %3623 = vrot.lane.b32.xlu1 %v4400_v2, %s4026_s15 }
 0x149   : > { %v559_v6 = vmax.f32 %v555_v5, 0.0 }
 0x14a   : > { %v742_v7 = vpop.f32.mrf.mxu2 }
 0x14b   : > { %v4406_v8 = vmul.f32 %v4376_v34, %v559_v6  ;;  %v752_v14 = vadd.f32 %v742_v7, %v687_v12 }
 0x14c   : > { %v644_v15 = vpop.f32.mrf.mxu0 }
 0x14d   : > { %v4409_v9 = vpack.i.bf16 0.0, %v4406_v8  ;;  %v688_v11 = vpop.f32.mrf.mxu1 }
 0x14e   : > { %v689_v20 = vadd.f32 %v688_v11, %v641_v10 }
 0x14f   : > { %3633 = vrot.lane.b32.xlu1 %v4409_v9, %s4028_s17  ;;  %3628 = vrot.lane.b32.xlu2 %v4409_v9, %s4026_s15 }
 0x152   : > { %v744_v13 = vpop.f32.mrf.mxu2 }
 0x153   : > { %v753_v24 = vadd.f32 %v744_v13, %v689_v20 }
 0x154   : > { %v646_v25 = vpop.f32.mrf.mxu0 }
 0x156   : > { %v691_v16 = vpop.f32.mrf.mxu1 }
 0x157   : > { %v692_v32 = vadd.f32 %v691_v16, %v644_v15 }
 0x15a   : > { %v819_v17 = vpop.f32.mrf.mxu3  ;;  %v747_v19 = vpop.f32.mrf.mxu2 }
 0x15b   : > { %v829_v18 = vadd.f32 %v819_v17, %v752_v14  ;;  %v754_v37 = vadd.f32 %v747_v19, %v692_v32 }
 0x15c   : > { %v905_v45 = vpop.f32.mrf.mxu0 }
 0x15d   : > { %v833_v21 = vadd.f32 %v829_v18, %v4234_v50 }
 0x15e   : > { %v693_v27 = vpop.f32.mrf.mxu1 }
 0x15f   : > { %v837_v22 = vmax.f32 %v833_v21, 0.0  ;;  %v694_v44 = vadd.f32 %v693_v27, %v646_v25 }
 0x161   : > { %v4417_v23 = vmul.f32 %v4376_v34, %v837_v22 }
 0x162   : > { %v821_v26 = vpop.f32.mrf.mxu3  ;;  %v749_v35 = vpop.f32.mrf.mxu2 }
 0x163   : > { %v830_v28 = vadd.f32 %v821_v26, %v753_v24  ;;  %v3642_v31 = vpack.i.bf16 %v4417_v23, %v4030_v29  ;;  %v755_v52 = vadd.f32 %v749_v35, %v694_v44 }
 0x164   : > { %v907_v0 = vpop.f32.mrf.mxu0 }
 0x165   : > { %v834_v33 = vadd.f32 %v830_v28, %v4232_v49  ;;  %3643 = vrot.lane.b32.xlu1 %v3642_v31, %s4024_s29  ;;  %3638 = vrot.lane.b32.xlu2 %v3642_v31, %s4024_s29 }
 0x166   : > { %v968_v46 = vpop.f32.mrf.mxu1 }
 0x167   : > { %v838_v36 = vmax.f32 %v834_v33, 0.0  ;;  %v969_v58 = vadd.f32 %v968_v46, %v905_v45 }
 0x169   : > { %v4425_v38 = vmul.f32 %v4376_v34, %v838_v36 }
 0x16a   : > { %v824_v39 = vpop.f32.mrf.mxu3 }
 0x16b   : > { %v831_v41 = vadd.f32 %v824_v39, %v754_v37  ;;  %v3652_v42 = vpack.i.bf16 %v4425_v38, %v4030_v29  ;;  %v1041_v53 = vpop.f32.mrf.mxu2  ;;  %v4436_v60 = vpack.i.bf16 0.0, %v4425_v38 }
 0x16c   : > { %v1051_v4 = vadd.f32 %v1041_v53, %v969_v58  ;;  %v910_v16 = vpop.f32.mrf.mxu0 }
 0x16d   : > { %v835_v47 = vadd.f32 %v831_v41, %v4198_v30  ;;  %3653 = vrot.lane.b32.xlu2 %v3652_v42, %s4024_s29  ;;  %3648 = vrot.lane.b32.xlu0 %v3652_v42, %s4024_s29 }
 0x16e   : > { %v970_v1 = vpop.f32.mrf.mxu1 }
 0x16f   : > { %v839_v48 = vmax.f32 %v835_v47, 0.0  ;;  %v971_v7 = vadd.f32 %v970_v1, %v907_v0 }
 0x171   : > { %v4433_v54 = vmul.f32 %v4376_v34, %v839_v48 }
 0x172   : > { %v826_v55 = vpop.f32.mrf.mxu3 }
 0x173   : > { %v832_v59 = vadd.f32 %v826_v55, %v755_v52  ;;  %v3667_v61 = vpack.i.bf16 %v4433_v54, %v4030_v29  ;;  %v1043_v10 = vpop.f32.mrf.mxu2  ;;  %v4450_v12 = vpack.i.bf16 0.0, %v4433_v54 }
 0x174   : > { %v1052_v15 = vadd.f32 %v1043_v10, %v971_v7  ;;  %v912_v35 = vpop.f32.mrf.mxu0 }
 0x175   : > { %v836_v62 = vadd.f32 %v832_v59, %v4243_v56  ;;  %3658 = vrot.lane.b32.xlu2 %v4436_v60, %s4028_s17  ;;  %3663 = vrot.lane.b32.xlu0 %v4436_v60, %s4027_s16 }
 0x176   : > { %3668 = vrot.lane.b32.xlu1 %v3667_v61, %s4024_s29  ;;  %v973_v17 = vpop.f32.mrf.mxu1 }
 0x177   : > { %v840_v3 = vmax.f32 %v836_v62, 0.0  ;;  %v974_v21 = vadd.f32 %v973_v17, %v910_v16 }
 0x179   : > { %v4447_v5 = vmul.f32 %v4376_v34, %v840_v3 }
 0x17a   : > { %v1098_v6 = vpop.f32.mrf.mxu3 }
 0x17b   : > { %v1108_v11 = vadd.f32 %v1098_v6, %v1051_v4  ;;  %v3692_v13 = vpack.i.bf16 %v4447_v5, %v4030_v29  ;;  %v4460_v22 = vpack.i.bf16 0.0, %v4447_v5  ;;  %v1046_v24 = vpop.f32.mrf.mxu2 }
 0x17c   : > { %v1053_v27 = vadd.f32 %v1046_v24, %v974_v21  ;;  %v1200_v52 = vpop.f32.mrf.mxu0 }
 0x17d   : > { %3678 = vrot.lane.b32.xlu2 %v4450_v12, %s4028_s17  ;;  %3673 = vrot.lane.b32.xlu0 %v3667_v61, %s4024_s29  ;;  %v1112_v14 = vadd.f32 %v1108_v11, %v4234_v50 }
 0x17e   : > { %3693 = vrot.lane.b32.xlu1 %v3692_v13, %s4024_s29  ;;  %v975_v36 = vpop.f32.mrf.mxu1 }
 0x17f   : > { %v1116_v19 = vmax.f32 %v1112_v14, 0.0  ;;  %v976_v44 = vadd.f32 %v975_v36, %v912_v35 }
 0x181   : > { %v4468_v25 = vmul.f32 %v4376_v34, %v1116_v19 }
 0x182   : > { %v1100_v18 = vpop.f32.mrf.mxu3 }
 0x183   : > { %v1109_v20 = vadd.f32 %v1100_v18, %v1052_v15  ;;  %v3707_v33 = vpack.i.bf16 %v4468_v25, %v4030_v29  ;;  %v1048_v41 = vpop.f32.mrf.mxu2  ;;  %v3722_v61 = vpack.i.bf16 0.0, %v4468_v25 }
 0x184   : > { %v1054_v48 = vadd.f32 %v1048_v41, %v976_v44  ;;  %v1202_v6 = vpop.f32.mrf.mxu0 }
 0x185   : > { %3683 = vrot.lane.b32.xlu0 %v4450_v12, %s4027_s16  ;;  %3688 = vrot.lane.b32.xlu2 %v3692_v13, %s4024_s29  ;;  %v1113_v26 = vadd.f32 %v1109_v20, %v4232_v49 }
 0x186   : > { %3703 = vrot.lane.b32.xlu1 %v4460_v22, %s4027_s16  ;;  %v1247_v53 = vpop.f32.mrf.mxu1 }
 0x187   : > { %v1117_v31 = vmax.f32 %v1113_v26, 0.0  ;;  %v1248_v58 = vadd.f32 %v1247_v53, %v1200_v52 }
 0x189   : > { %v4478_v37 = vmul.f32 %v4376_v34, %v1117_v31 }
 0x18a   : > { %v1103_v28 = vpop.f32.mrf.mxu3 }
 0x18b   : > { %v1110_v32 = vadd.f32 %v1103_v28, %v1053_v27  ;;  %v3737_v45 = vpack.i.bf16 %v4478_v37, %v4030_v29  ;;  %v1299_v59 = vpop.f32.mrf.mxu2  ;;  %v3742_v0 = vpack.i.bf16 0.0, %v4478_v37 }
 0x18c   : > { %v1309_v3 = vadd.f32 %v1299_v59, %v1248_v58  ;;  %v1205_v26 = vpop.f32.mrf.mxu0 }
 0x18d   : > { %3698 = vrot.lane.b32.xlu0 %v4460_v22, %s4028_s17  ;;  %3708 = vrot.lane.b32.xlu2 %v3707_v33, %s4022_s27  ;;  %v1114_v39 = vadd.f32 %v1110_v32, %v4198_v30 }
 0x18e   : > { %3718 = vrot.lane.b32.xlu1 %v3707_v33, %s4025_s14  ;;  %v1249_v7 = vpop.f32.mrf.mxu1 }
 0x18f   : > { %v1118_v42 = vmax.f32 %v1114_v39, 0.0  ;;  %v1250_v14 = vadd.f32 %v1249_v7, %v1202_v6  ;;  %v4543_v6 = vpop.permute.xlu1 %1795 }
 0x190   : > { %5168 = vst [vmem:[#allocation3_spill] sm:$0xff] %v4543_v6 }
 0x191   : > { %v4487_v47 = vmul.f32 %v4376_v34, %v1118_v42  ;;  %v4516_v27 = vpop.permute.xlu2 %3613 }
 0x192   : > { %v1105_v46 = vpop.f32.mrf.mxu3 }
 0x193   : > { %v1111_v55 = vadd.f32 %v1105_v46, %v1054_v48  ;;  %v3752_v62 = vpack.i.bf16 %v4487_v47, %v4030_v29  ;;  %v3762_v13 = vpack.i.bf16 0.0, %v4487_v47  ;;  %v1301_v15 = vpop.f32.mrf.mxu2 }
 0x194   : > { %v1310_v18 = vadd.f32 %v1301_v15, %v1250_v14 }
 0x195   : > { %3713 = vrot.lane.b32.xlu0 %v3707_v33, %s4022_s27  ;;  %3738 = vrot.lane.b32.xlu2 %v3737_v45, %s4025_s14  ;;  %v1115_v1 = vadd.f32 %v1111_v55, %v4243_v56 }
 0x196   : > { %3733 = vrot.lane.b32.xlu1 %v3737_v45, %s4022_s27 }
 0x197   : > { %v1119_v10 = vmax.f32 %v1115_v1, 0.0 }
 0x199   : > { %v4508_v16 = vmul.f32 %v4376_v34, %v1119_v10 }
 0x19a   : > { %v1356_v4 = vpop.f32.mrf.mxu3 }
 0x19b   : > { %v1366_v11 = vadd.f32 %v1356_v4, %v1309_v3  ;;  %v3767_v21 = vpack.i.bf16 %v4508_v16, %v4030_v29  ;;  %v1304_v33 = vpop.f32.mrf.mxu2  ;;  %v3782_v48 = vpack.i.bf16 0.0, %v4508_v16 }
 0x19d   : > { %3723 = vrot.lane.b32.xlu0 %v3722_v61, %s4026_s15  ;;  %3753 = vrot.lane.b32.xlu2 %v3752_v62, %s4022_s27  ;;  %v1370_v17 = vadd.f32 %v1366_v11, %v4234_v50  ;;  %v1252_v50 = vpop.f32.mrf.mxu1 }
 0x19e   : > { %3743 = vrot.lane.b32.xlu1 %v3742_v0, %s4026_s15  ;;  %v1253_v32 = vadd.f32 %v1252_v50, %v1205_v26 }
 0x19f   : > { %v1374_v20 = vmax.f32 %v1370_v17, 0.0 }
 0x1a0   : > { %v1311_v39 = vadd.f32 %v1304_v33, %v1253_v32  ;;  %v4583_v32 = vpack.i.bf16 0.0, %v4417_v23 }
 0x1a1   : > { %v4519_v28 = vmul.f32 %v4376_v34, %v1374_v20 }
 0x1a2   : > { %v1358_v19 = vpop.f32.mrf.mxu3 }
 0x1a3   : > { %v1367_v24 = vadd.f32 %v1358_v19, %v1310_v18  ;;  %v3802_v35 = vpack.i.bf16 %v4519_v28, %v4030_v29  ;;  %v1306_v55 = vpop.f32.mrf.mxu2 }
 0x1a5   : > { %3728 = vrot.lane.b32.xlu0 %v3737_v45, %s4022_s27  ;;  %3763 = vrot.lane.b32.xlu2 %v3762_v13, %s4026_s15  ;;  %v1371_v31 = vadd.f32 %v1367_v24, %v4232_v49  ;;  %v1207_v49 = vpop.f32.mrf.mxu0  ;;  %v1254_v45 = vpop.f32.mrf.mxu1 }
 0x1a6   : > { %3748 = vrot.lane.b32.xlu1 %v3752_v62, %s4022_s27  ;;  %v1255_v52 = vadd.f32 %v1254_v45, %v1207_v49 }
 0x1a7   : > { %v1375_v36 = vmax.f32 %v1371_v31, 0.0 }
 0x1a9   : > { %v4527_v41 = vpop.permute.xlu2 %3628  ;;  %v4530_v44 = vmul.f32 %v4376_v34, %v1375_v36 }
 0x1aa   : > { %v1361_v42 = vpop.f32.mrf.mxu3 }
 0x1ab   : > { %v1368_v46 = vadd.f32 %v1361_v42, %v1311_v39  ;;  %v3812_v53 = vpack.i.bf16 %v4530_v44, %v4030_v29 }
 0x1ad   : > { %3758 = vrot.lane.b32.xlu0 %v3752_v62, %s4025_s14  ;;  %3768 = vrot.lane.b32.xlu2 %v3767_v21, %s4022_s27  ;;  %v1372_v58 = vadd.f32 %v1368_v46, %v4198_v30  ;;  %v1312_v62 = vadd.f32 %v1306_v55, %v1255_v52 }
 0x1ae   : > { %3778 = vrot.lane.b32.xlu1 %v3767_v21, %s4025_s14 }
 0x1af   : > { %v1376_v3 = vmax.f32 %v1372_v58, 0.0 }
 0x1b1   : > { %v4547_v7 = vmul.f32 %v4376_v34, %v1376_v3  ;;  %v4569_v19 = vpop.permute.xlu0 %3618 }
 0x1b2   : > { %v1363_v1 = vpop.f32.mrf.mxu3 }
 0x1b3   : > { %v1369_v4 = vadd.f32 %v1363_v1, %v1312_v62  ;;  %v3837_v11 = vpack.i.bf16 %v4547_v7, %v4030_v29 }
 0x1b5   : > { %3773 = vrot.lane.b32.xlu0 %v3767_v21, %s4022_s27  ;;  %3803 = vrot.lane.b32.xlu2 %v3802_v35, %s4022_s27  ;;  %v1373_v30 = vadd.f32 %v1369_v4, %v4243_v56 }
 0x1b6   : > { %3793 = vrot.lane.b32.xlu1 %v3802_v35, %s4022_s27 }
 0x1b7   : > { %v1377_v14 = vmax.f32 %v1373_v30, 0.0 }
 0x1b9   : > { %v4556_v15 = vpop.permute.xlu1 %3623  ;;  %v4562_v18 = vmul.f32 %v4376_v34, %v1377_v14 }
 0x1bb   : > { %v3867_v56 = vpack.i.bf16 %v4562_v18, %v4030_v29 }
 0x1bd   : > { %3783 = vrot.lane.b32.xlu0 %v3782_v48, %s4026_s15  ;;  %3808 = vrot.lane.b32.xlu2 %v3802_v35, %s4024_s29 }
 0x1be   : > { %3813 = vrot.lane.b32.xlu1 %v3812_v53, %s4023_s28 }
 0x1bf   : > { %v3639_v59 = vpop.permute.xlu2 %3638 }
 0x1c0   : > { %v3641_v46 = vunpack.i.h.bf16 %v3639_v59  ;;  %v3640_v52 = vunpack.i.l.bf16 %v3639_v59 }
 0x1c1   : > { %v4573_v21 = vpop.permute.xlu1 %3633 }
 0x1c2   : > { %v1603_v1 = vsel %vm438_vm3, %v3640_v52, %v3641_v46 }
 0x1c5   : > { %3788 = vrot.lane.b32.xlu0 %v3802_v35, %s4023_s28  ;;  %3818 = vrot.lane.b32.xlu2 %v3812_v53, %s4022_s27 }
 0x1c6   : > { %3823 = vrot.lane.b32.xlu1 %v3812_v53, %s4024_s29 }
 0x1c7   : > { %v4549_v10 = vpop.permute.xlu2 %3653 }
 0x1cd   : > { %3798 = vrot.lane.b32.xlu0 %v3802_v35, %s4024_s29  ;;  %3838 = vrot.lane.b32.xlu2 %v3837_v11, %s4023_s28 }
 0x1ce   : > { %3853 = vrot.lane.b32.xlu1 %v3837_v11, %s4022_s27 }
 0x1cf   : > { %v4559_v17 = vpop.permute.xlu2 %3658 }
 0x1d5   : > { %3828 = vrot.lane.b32.xlu0 %v3812_v53, %s4022_s27  ;;  %3848 = vrot.lane.b32.xlu2 %v3837_v11, %s4024_s29 }
 0x1d6   : > { %3868 = vrot.lane.b32.xlu1 %v3867_v56, %s4022_s27 }
 0x1d7   : > { %v4571_v20 = vpop.permute.xlu2 %3678  ;;  %v4579_v24 = vpop.permute.xlu1 %3643 }
 0x1dd   : > { %3833 = vrot.lane.b32.xlu0 %v3812_v53, %s4024_s29  ;;  %3858 = vrot.lane.b32.xlu2 %v3837_v11, %s4024_s29 }
 0x1de   : > { %3873 = vrot.lane.b32.xlu1 %v4400_v2, %s4028_s17 }
 0x1df   : > { %v3689_v34 = vpop.permute.xlu2 %3688  ;;  %v3649_v29 = vpop.permute.xlu0 %3648 }
 0x1e0   : > { %v3691_v26 = vunpack.i.h.bf16 %v3689_v34  ;;  %v3690_v50 = vunpack.i.l.bf16 %v3689_v34  ;;  %v3651_v39 = vunpack.i.h.bf16 %v3649_v29  ;;  %v3650_v42 = vunpack.i.l.bf16 %v3649_v29  ;;  %v3461_v34 = vld [vmem:[%s5163_s3 + $0x6] sm:$0x3] }
 0x1e2   : > { %v1606_v31 = vsel %vm438_vm3, %v3690_v50, %v3691_v26  ;;  %v1604_v55 = vsel %vm438_vm3, %v3650_v42, %v3651_v39 }
 0x1e3   : > { %1626 = vmatpush.msra.mxu3 %v1606_v31  ;;  %v3469_v31 = vld [vmem:[%s5163_s3 + $0xe] sm:$0x3] }
 0x1e5   : > { %3843 = vrot.lane.b32.xlu0 %v3837_v11, %s4022_s27  ;;  %3878 = vrot.lane.b32.xlu2 %v4583_v32, %s4028_s17 }
 0x1e6   : > { %3893 = vrot.lane.b32.xlu1 %v4391_v57, %s4028_s17 }
 0x1e7   : > { %v4590_v33 = vpop.permute.xlu2 %3708  ;;  %v4592_v35 = vpop.permute.xlu0 %3663 }
 0x1e8   : > { %v3669_v36 = vpop.permute.xlu1 %3668 }
 0x1e9   : > { %v3671_v49 = vunpack.i.h.bf16 %v3669_v36  ;;  %v3670_v45 = vunpack.i.l.bf16 %v3669_v36 }
 0x1eb   : > { %v1605_v53 = vsel %vm438_vm3, %v3670_v45, %v3671_v49 }
 0x1ec   : > { %1627 = vmatpush.msra.mxu3 %v1605_v53 }
 0x1ed   : > { %3898 = vrot.lane.b32.xlu2 %v3867_v56, %s4022_s27  ;;  %3863 = vrot.lane.b32.xlu0 %v3867_v56, %s4023_s28 }
 0x1ee   : > { %3913 = vrot.lane.b32.xlu1 %v4400_v2, %s4026_s15  ;;  %1628 = vmatpush.msra.mxu3 %v1604_v55 }
 0x1ef   : > { %v4600_v58 = vpop.permute.xlu2 %3738  ;;  %v4602_v62 = vpop.permute.xlu0 %3673 }
 0x1f0   : > { %v4605_v59 = vpop.permute.xlu1 %3693  ;;  %1629 = vmatpush.msra.mxu3 %v1603_v1 }
 0x1f1   : > { %3462 = vmatmul.msk.f32.vlgmr.msra.gmra.mxu3 %vm341_vm0, %v3461_v34  ;;  %v3711_v34 = vunpack.i.h.bf16 %v4590_v33 }
 0x1f2   : > { %1758 = vmatpush.msrb.mxu3 %v4508_v16 }
 0x1f4   : > { %1759 = vmatpush.msrb.mxu3 %v4487_v47 }
 0x1f5   : > { %3903 = vrot.lane.b32.xlu2 %v4382_v43, %s4028_s17  ;;  %3883 = vrot.lane.b32.xlu0 %v3867_v56, %s4024_s29 }
 0x1f6   : > { %1760 = vmatpush.msrb.mxu3 %v4478_v37  ;;  %3928 = vrot.lane.b32.xlu1 %v4382_v43, %s4026_s15 }
 0x1f7   : > { %v4616_v3 = vpop.permute.xlu2 %3753  ;;  %v4618_v4 = vpop.permute.xlu0 %3683 }
 0x1f8   : > { %1761 = vmatpush.msrb.mxu3 %v4468_v25  ;;  %v4620_v30 = vpop.permute.xlu1 %3703 }
 0x1f9   : > { %3470 = vmatmul.msk.f32.vlgmr.msrb.gmra.mxu3 %vm341_vm0, %v3469_v31 }
 0x1fd   : > { %3918 = vrot.lane.b32.xlu2 %v4391_v57, %s4026_s15  ;;  %3888 = vrot.lane.b32.xlu0 %v4583_v32, %s4027_s16 }
 0x1fe   : > { %3943 = vrot.lane.b32.xlu1 %v4409_v9, %s4029_s24 }
 0x1ff   : > { %v4628_v11 = vpop.permute.xlu2 %3763  ;;  %v4630_v14 = vpop.permute.xlu0 %3698 }
 0x200   : > { %v4635_v29 = vpop.permute.xlu1 %3718 }
 0x205   : > { %3933 = vrot.lane.b32.xlu2 %v3782_v48, %s4026_s15  ;;  %3908 = vrot.lane.b32.xlu0 %v4409_v9, %s4026_s15 }
 0x206   : > { %3958 = vrot.lane.b32.xlu1 %v3867_v56, %s4024_s29 }
 0x207   : > { %v3769_v26 = vpop.permute.xlu2 %3768  ;;  %v4644_v50 = vpop.permute.xlu0 %3713 }
 0x208   : > { %v4649_v36 = vpop.permute.xlu1 %3733  ;;  %v3771_v39 = vunpack.i.h.bf16 %v3769_v26  ;;  %v3770_v42 = vunpack.i.l.bf16 %v3769_v26  ;;  %v3710_v26 = vunpack.i.l.bf16 %v4590_v33 }
 0x20a   : > { %v1434_v48 = vsel %vm336_vm1, %v3770_v42, %v3771_v39  ;;  %v1431_v33 = vsel %vm336_vm1, %v3710_v26, %v3711_v34  ;;  %v3463_v26 = vld [vmem:[%s5163_s3 + $0x8] sm:$0x3] }
 0x20b   : > { %1454 = vmatpush.msra.mxu0 %v1434_v48 }
 0x20d   : > { %3948 = vrot.lane.b32.xlu2 %v3762_v13, %s4026_s15  ;;  %3923 = vrot.lane.b32.xlu0 %v4460_v22, %s4028_s17 }
 0x20e   : > { %3963 = vrot.lane.b32.xlu1 %v4436_v60, %s4028_s17 }
 0x20f   : > { %v4660_v56 = vpop.permute.xlu2 %3803  ;;  %v4662_v49 = vpop.permute.xlu0 %3723 }
 0x210   : > { %v4664_v45 = vpop.permute.xlu1 %3743 }
 0x215   : > { %3968 = vrot.lane.b32.xlu2 %v4400_v2, %s4029_s24  ;;  %3938 = vrot.lane.b32.xlu0 %v4450_v12, %s4028_s17 }
 0x216   : > { %3978 = vrot.lane.b32.xlu1 %v4400_v2, %s4028_s17 }
 0x217   : > { %v4672_v13 = vpop.permute.xlu2 %3808  ;;  %v3729_v60 = vpop.permute.xlu0 %3728 }
 0x218   : > { %v3749_v46 = vpop.permute.xlu1 %3748  ;;  %v3731_v53 = vunpack.i.h.bf16 %v3729_v60  ;;  %v3730_v55 = vunpack.i.l.bf16 %v3729_v60 }
 0x219   : > { %v3751_v22 = vunpack.i.h.bf16 %v3749_v46  ;;  %v3750_v52 = vunpack.i.l.bf16 %v3749_v46  ;;  %v3741_v46 = vunpack.i.h.bf16 %v4600_v58 }
 0x21a   : > { %v1432_v2 = vsel %vm336_vm1, %v3730_v55, %v3731_v53  ;;  %v3720_v53 = vunpack.i.l.bf16 %v4635_v29 }
 0x21b   : > { %v1433_v1 = vsel %vm336_vm1, %v3750_v52, %v3751_v22  ;;  %v3740_v22 = vunpack.i.l.bf16 %v4600_v58  ;;  %v3721_v52 = vunpack.i.h.bf16 %v4635_v29 }
 0x21c   : > { %1455 = vmatpush.msra.mxu0 %v1433_v1 }
 0x21d   : > { %3983 = vrot.lane.b32.xlu2 %v4583_v32, %s4028_s17  ;;  %3953 = vrot.lane.b32.xlu0 %v4409_v9, %s4028_s17  ;;  %v3456_v32 = vld [vmem:[%s5163_s3 + $0x2] sm:$0x3]  ;;  %v1947_v29 = vsel %vm619_vm4, %v3740_v22, %v3741_v46  ;;  %v3646_v22 = vunpack.i.h.bf16 %v4579_v24 }
 0x21e   : > { %3993 = vrot.lane.b32.xlu1 %v3722_v61, %s4026_s15  ;;  %1456 = vmatpush.msra.mxu0 %v1432_v2  ;;  %v3476_v2 = vld [vmem:[%s5163_s3 + $0x4] sm:$0x3] }
 0x21f   : > { %v4685_v12 = vpop.permute.xlu2 %3818  ;;  %v3759_v31 = vpop.permute.xlu0 %3758 }
 0x220   : > { %v3779_v39 = vpop.permute.xlu1 %3778  ;;  %1457 = vmatpush.msra.mxu0 %v1431_v33  ;;  %v3761_v61 = vunpack.i.h.bf16 %v3759_v31  ;;  %v3760_v60 = vunpack.i.l.bf16 %v3759_v31  ;;  %v3696_v31 = vunpack.i.h.bf16 %v4605_v59 }
 0x221   : > { %v3781_v42 = vunpack.i.h.bf16 %v3779_v39  ;;  %v3780_v48 = vunpack.i.l.bf16 %v3779_v39  ;;  %3457 = vmatmul.msk.f32.vlgmr.msra.gmra.mxu0 %vm341_vm0, %v3456_v32  ;;  %v3695_v39 = vunpack.i.l.bf16 %v4605_v59 }
 0x222   : > { %1656 = vmatpush.msrb.mxu0 %v4406_v8  ;;  %v1948_v55 = vsel %vm619_vm4, %v3760_v60, %v3761_v61  ;;  %v3471_v61 = vld [vmem:[%s5163_s3 + $0x10] sm:$0x3]  ;;  %v3656_v60 = vunpack.i.h.bf16 %v4549_v10 }
 0x223   : > { %v1949_v9 = vsel %vm619_vm4, %v3780_v48, %v3781_v42  ;;  %v3676_v42 = vunpack.i.h.bf16 %v4602_v62  ;;  %v3675_v48 = vunpack.i.l.bf16 %v4602_v62  ;;  %v3655_v62 = vunpack.i.l.bf16 %v4549_v10 }
 0x224   : > { %1657 = vmatpush.msrb.mxu0 %v4397_v63  ;;  %1969 = vmatpush.msra.mxu3 %v1949_v9  ;;  %v3484_v9 = vld [vmem:[%s5163_s3 + $0xc] sm:$0x3] }
 0x225   : > { %3998 = vrot.lane.b32.xlu2 %v4391_v57, %s4028_s17  ;;  %3973 = vrot.lane.b32.xlu0 %v3742_v0, %s4026_s15  ;;  %v1946_v0 = vsel %vm619_vm4, %v3720_v53, %v3721_v52  ;;  %v2282_v46 = vsel %vm438_vm3, %v3675_v48, %v3676_v42  ;;  %v3645_v52 = vunpack.i.l.bf16 %v4579_v24  ;;  %v2281_v10 = vsel %vm438_vm3, %v3655_v62, %v3656_v60  ;;  %v3486_v48 = vld [vmem:[%s5163_s3 + $0xe] sm:$0x3]  ;;  %v3499_v60 = vld [vmem:[%s5163_s3 + $0xa] sm:$0x3] }
 0x226   : > { %1658 = vmatpush.msrb.mxu0 %v4388_v51  ;;  %4008 = vrot.lane.b32.xlu1 %v4382_v43, %s4028_s17  ;;  %v3705_v42 = vunpack.i.l.bf16 %v4620_v30  ;;  %v3665_v62 = vunpack.i.l.bf16 %v4592_v35  ;;  %s3107_s17 = sshll.u32 %s5171_s22, 3 }
 0x227   : > { %1970 = vmatpush.msra.mxu3 %v1948_v55  ;;  %v4708_v58 = vpop.permute.xlu2 %3838  ;;  %v4710_v1 = vpop.permute.xlu0 %3773  ;;  %s5147_s23 = scalar_lea.vmem %s5166_s6, %s3107_s17 }
 0x228   : > { %1659 = vmatpush.msrb.mxu0 %v4379_v40  ;;  %v4713_v34 = vpop.permute.xlu1 %3793 }
 0x229   : > { %1971 = vmatpush.msra.mxu3 %v1947_v29  ;;  %3464 = vmatmul.msk.f32.vlgmr.msrb.gmra.mxu0 %vm341_vm0, %v3463_v26  ;;  %v2280_v29 = vsel %vm438_vm3, %v3645_v52, %v3646_v22  ;;  %v2227_v26 = vld [vmem:[%s5163_s3] sm:$0x3] }
 0x22a   : > { %1784 = vmatpush.msra.mxu0 %v4562_v18 }
 0x22b   : > { %1972 = vmatpush.msra.mxu3 %v1946_v0 }
 0x22c   : > { %1785 = vmatpush.msra.mxu0 %v4547_v7  ;;  %3477 = vmatmul.msk.f32.vlgmr.msra.gmra.mxu3 %vm341_vm0, %v3476_v2 }
 0x22d   : > { %2118 = vmatpush.msrb.mxu3 %v4508_v16  ;;  %3988 = vrot.lane.b32.xlu0 %v4391_v57, %s4029_s24  ;;  %v2283_v57 = vsel %vm438_vm3, %v3695_v39, %v3696_v31  ;;  %v3706_v39 = vunpack.i.h.bf16 %v4620_v30  ;;  %v3666_v30 = vunpack.i.h.bf16 %v4592_v35 }
 0x22e   : > { %1786 = vmatpush.msra.mxu0 %v4530_v44 }
 0x22f   : > { %2119 = vmatpush.msrb.mxu3 %v4487_v47  ;;  %v4735_v33 = vpop.permute.xlu2 %3848  ;;  %v4737_v32 = vpop.permute.xlu0 %3783 }
 0x230   : > { %1787 = vmatpush.msra.mxu0 %v4519_v28  ;;  %v4743_v59 = vpop.permute.xlu1 %3813 }
 0x231   : > { %2120 = vmatpush.msrb.mxu3 %v4478_v37  ;;  %3472 = vmatmul.msk.f32.vlgmr.msra.gmra.mxu0 %vm341_vm0, %v3471_v61  ;;  %v3685_v61 = vunpack.i.l.bf16 %v4618_v4 }
 0x232   : > { %1998 = vmatpush.msrb.mxu0 %v4406_v8 }
 0x233   : > { %2121 = vmatpush.msrb.mxu3 %v4468_v25 }
 0x234   : > { %1999 = vmatpush.msrb.mxu0 %v4397_v63  ;;  %3485 = vmatmul.msk.f32.vlgmr.msrb.gmra.mxu3 %vm341_vm0, %v3484_v9  ;;  %v2492_v9 = vsel %vm1021_vm6, %v3705_v42, %v3706_v39 }
 0x235   : > { %2303 = vmatpush.msra.mxu3 %v2283_v57  ;;  %4003 = vrot.lane.b32.xlu0 %v4382_v43, %s4029_s24  ;;  %v3478_v43 = vld [vmem:[%s5163_s3 + $0x6] sm:$0x3]  ;;  %v3686_v57 = vunpack.i.h.bf16 %v4618_v4 }
 0x236   : > { %2000 = vmatpush.msrb.mxu0 %v4388_v51 }
 0x237   : > { %2304 = vmatpush.msra.mxu3 %v2282_v46  ;;  %v4767_v53 = vpop.permute.xlu2 %3858  ;;  %v4769_v55 = vpop.permute.xlu0 %3788  ;;  %v2491_v22 = vsel %vm1021_vm6, %v3685_v61, %v3686_v57  ;;  %v3820_v57 = vunpack.i.l.bf16 %v4685_v12 }
 0x238   : > { %2001 = vmatpush.msrb.mxu0 %v4379_v40  ;;  %v4771_v24 = vpop.permute.xlu1 %3823 }
 0x239   : > { %2305 = vmatpush.msra.mxu3 %v2281_v10  ;;  %3479 = vmatmul.msk.f32.vlgmr.msrb.gmra.mxu0 %vm341_vm0, %v3478_v43 }
 0x23a   : > { %2143 = vmatpush.msra.mxu0 %v4562_v18 }
 0x23b   : > { %2306 = vmatpush.msra.mxu3 %v2280_v29  ;;  %v2490_v29 = vsel %vm1021_vm6, %v3665_v62, %v3666_v30  ;;  %v3796_v62 = vunpack.i.h.bf16 %v4713_v34 }
 0x23c   : > { %2144 = vmatpush.msra.mxu0 %v4547_v7  ;;  %3492 = vmatmul.msk.f32.vlgmr.msra.gmra.mxu3 %vm341_vm0, %v2227_v26 }
 0x23d   : > { %2446 = vmatpush.msrb.mxu3 %v4562_v18 }
 0x23e   : > { %2145 = vmatpush.msra.mxu0 %v4530_v44 }
 0x23f   : > { %2447 = vmatpush.msrb.mxu3 %v4547_v7  ;;  %v4789_v0 = vpop.permute.xlu2 %3878  ;;  %v4791_v2 = vpop.permute.xlu0 %3798 }
 0x240   : > { %2146 = vmatpush.msra.mxu0 %v4519_v28  ;;  %v4793_v31 = vpop.permute.xlu1 %3853 }
 0x241   : > { %2448 = vmatpush.msrb.mxu3 %v4530_v44  ;;  %3487 = vmatmul.msk.f32.vlgmr.msra.gmra.mxu0 %vm341_vm0, %v3486_v48  ;;  %v3821_v48 = vunpack.i.h.bf16 %v4685_v12 }
 0x242   : > { %2327 = vmatpush.msrb.mxu0 %v4447_v5 }
 0x243   : > { %2449 = vmatpush.msrb.mxu3 %v4519_v28 }
 0x244   : > { %2328 = vmatpush.msrb.mxu0 %v4433_v54  ;;  %3500 = vmatmul.msk.f32.vlgmr.msrb.gmra.mxu3 %vm341_vm0, %v3499_v60 }
 0x245   : > { %2663 = vmatpush.msra.mxu3 %v4447_v5 }
 0x246   : > { %2329 = vmatpush.msrb.mxu0 %v4425_v38 }
 0x247   : > { %2664 = vmatpush.msra.mxu3 %v4433_v54  ;;  %v4817_v4 = vpop.permute.xlu2 %3898  ;;  %v4819_v46 = vpop.permute.xlu0 %3828 }
 0x248   : > { %2330 = vmatpush.msrb.mxu0 %v4417_v23  ;;  %v3869_v52 = vpop.permute.xlu1 %3868  ;;  %v3831_v6 = vunpack.i.h.bf16 %v4819_v46 }
 0x249   : > { %2665 = vmatpush.msra.mxu3 %v4425_v38  ;;  %v3871_v35 = vunpack.i.h.bf16 %v3869_v52  ;;  %v3870_v10 = vunpack.i.l.bf16 %v3869_v52  ;;  %v1537_v52 = vsel %vm336_vm1, %v3820_v57, %v3821_v48  ;;  %v3816_v48 = vunpack.i.h.bf16 %v4743_v59 }
 0x24a   : > { %2512 = vmatpush.msra.mxu0 %v2492_v9  ;;  %v3795_v9 = vunpack.i.l.bf16 %v4713_v34  ;;  %v3840_v34 = vunpack.i.l.bf16 %v4708_v58  ;;  %v3815_v57 = vunpack.i.l.bf16 %v4743_v59 }
 0x24b   : > { %2666 = vmatpush.msra.mxu3 %v4417_v23  ;;  %v1539_v43 = vsel %vm336_vm1, %v3870_v10, %v3871_v35  ;;  %v3459_v35 = vld [vmem:[%s5163_s3 + $0x4] sm:$0x3] }
 0x24c   : > { %2513 = vmatpush.msra.mxu0 %v2491_v22  ;;  %1559 = vmatpush.msra.mxu2 %v1539_v43  ;;  %v1536_v12 = vsel %vm336_vm1, %v3795_v9, %v3796_v62  ;;  %v3841_v43 = vunpack.i.h.bf16 %v4708_v58  ;;  %v3790_v62 = vunpack.i.l.bf16 %v4769_v55  ;;  %v1488_v58 = vsel %vm385_vm2, %v3815_v57, %v3816_v48 }
 0x24d   : > { %2808 = vmatpush.msrb.mxu3 %v4562_v18  ;;  %v3493_v18 = vld [vmem:[%s5163_s3 + $0x4] sm:$0x3]  ;;  %v3826_v48 = vunpack.i.h.bf16 %v4771_v24  ;;  %v3825_v57 = vunpack.i.l.bf16 %v4771_v24  ;;  %v3755_v24 = vunpack.i.l.bf16 %v4616_v3 }
 0x24e   : > { %2514 = vmatpush.msra.mxu0 %v2490_v29  ;;  %v1489_v9 = vsel %vm385_vm2, %v3840_v34, %v3841_v43 }
 0x24f   : > { %2809 = vmatpush.msrb.mxu3 %v4547_v7  ;;  %v4829_v26 = vpop.permute.xlu2 %3903  ;;  %v4831_v39 = vpop.permute.xlu0 %3833  ;;  %3494 = vmatmul.msk.f32.vlgmr.msrb.gmra.mxu0 %vm341_vm0, %v3493_v18  ;;  %v3507_v7 = vld [vmem:[%s5163_s3 + $0x2] sm:$0x3] }
 0x250   : > { %v4833_v42 = vpop.permute.xlu1 %3873  ;;  %3508 = vmatmul.msk.f32.vlgmr.msra.gmra.mxu3 %vm341_vm0, %v3507_v7 }
 0x251   : > { %2810 = vmatpush.msrb.mxu3 %v4530_v44 }
 0x253   : > { %2811 = vmatpush.msrb.mxu3 %v4519_v28 }
 0x257   : > { %v4843_v44 = vpop.permute.xlu2 %3918  ;;  %v3844_v28 = vpop.permute.xlu0 %3843 }
 0x258   : > { %v4847_v61 = vpop.permute.xlu1 %3893  ;;  %v3846_v60 = vunpack.i.h.bf16 %v3844_v28  ;;  %v3845_v30 = vunpack.i.l.bf16 %v3844_v28 }
 0x25a   : > { %v1538_v22 = vsel %vm336_vm1, %v3845_v30, %v3846_v60  ;;  %v3791_v30 = vunpack.i.h.bf16 %v4769_v55  ;;  %v3850_v55 = vunpack.i.l.bf16 %v4735_v33 }
 0x25b   : > { %1560 = vmatpush.msra.mxu2 %v1538_v22 }
 0x25c   : > { %v1487_v59 = vsel %vm385_vm2, %v3790_v62, %v3791_v30  ;;  %v3801_v30 = vunpack.i.h.bf16 %v4791_v2  ;;  %v3901_v62 = vunpack.i.h.bf16 %v4817_v4 }
 0x25d   : > { %1561 = vmatpush.msra.mxu2 %v1537_v52 }
 0x25f   : > { %v4857_v10 = vpop.permute.xlu2 %3933  ;;  %v3864_v29 = vpop.permute.xlu0 %3863  ;;  %1562 = vmatpush.msra.mxu2 %v1536_v12  ;;  %v1395_v12 = vld [vmem:[%s5163_s3] sm:$0x3] }
 0x260   : > { %v4861_v18 = vpop.permute.xlu1 %3913  ;;  %v3866_v7 = vunpack.i.h.bf16 %v3864_v29  ;;  %v3865_v28 = vunpack.i.l.bf16 %v3864_v29  ;;  %3460 = vmatmul.msk.f32.vlgmr.msra.gmra.mxu2 %vm341_vm0, %v3459_v35  ;;  %v3851_v29 = vunpack.i.h.bf16 %v4735_v33  ;;  %v3800_v33 = vunpack.i.l.bf16 %v4791_v2 }
 0x261   : > { %v3855_v2 = vunpack.i.l.bf16 %v4793_v31 }
 0x262   : > { %v1490_v60 = vsel %vm385_vm2, %v3865_v28, %v3866_v7  ;;  %v3776_v7 = vunpack.i.h.bf16 %v4710_v1  ;;  %v3775_v28 = vunpack.i.l.bf16 %v4710_v1  ;;  %v1711_v1 = vsel %vm438_vm3, %v3850_v55, %v3851_v29 }
 0x263   : > { %1510 = vmatpush.msra.mxu1 %v1490_v60  ;;  %v1709_v29 = vsel %vm438_vm3, %v3800_v33, %v3801_v30  ;;  %v3830_v30 = vunpack.i.l.bf16 %v4819_v46  ;;  %v3716_v46 = vunpack.i.h.bf16 %v4644_v50 }
 0x265   : > { %1511 = vmatpush.msra.mxu1 %v1489_v9  ;;  %v3900_v9 = vunpack.i.l.bf16 %v4817_v4  ;;  %v3736_v4 = vunpack.i.h.bf16 %v4649_v36 }
 0x267   : > { %v4871_v22 = vpop.permute.xlu2 %3948  ;;  %1512 = vmatpush.msra.mxu1 %v1488_v58  ;;  %v3884_v35 = vpop.permute.xlu0 %3883  ;;  %v3756_v58 = vunpack.i.h.bf16 %v4616_v3  ;;  %v1845_v55 = vsel %vm336_vm1, %v3900_v9, %v3901_v62  ;;  %v3467_v3 = vld [vmem:[%s5163_s3 + $0xc] sm:$0x3]  ;;  %v3735_v9 = vunpack.i.l.bf16 %v4649_v36  ;;  %v3715_v36 = vunpack.i.l.bf16 %v4644_v50 }
 0x268   : > { %v4873_v52 = vpop.permute.xlu1 %3928  ;;  %v3886_v43 = vunpack.i.h.bf16 %v3884_v35  ;;  %v3885_v34 = vunpack.i.l.bf16 %v3884_v35  ;;  %v3856_v35 = vunpack.i.h.bf16 %v4793_v31  ;;  %v1900_v31 = vsel %vm336_vm1, %v3775_v28, %v3776_v7 }
 0x269   : > { %1513 = vmatpush.msra.mxu1 %v1487_v59  ;;  %v1898_v50 = vsel %vm336_vm1, %v3735_v9, %v3736_v4  ;;  %v1897_v4 = vsel %vm336_vm1, %v3715_v36, %v3716_v46  ;;  %v3786_v9 = vunpack.i.h.bf16 %v4737_v32  ;;  %v3745_v46 = vunpack.i.l.bf16 %v4664_v45  ;;  %v3482_v36 = vld [vmem:[%s5163_s3 + $0xa] sm:$0x3] }
 0x26a   : > { %3458 = vmatmul.msk.f32.vlgmr.msra.gmra.mxu1 %vm341_vm0, %v1395_v12  ;;  %v1712_v60 = vsel %vm438_vm3, %v3885_v34, %v3886_v43  ;;  %v1710_v12 = vsel %vm438_vm3, %v3825_v57, %v3826_v48  ;;  %v3465_v48 = vld [vmem:[%s5163_s3 + $0xa] sm:$0x3]  ;;  %v1844_v7 = vsel %vm336_vm1, %v3855_v2, %v3856_v35  ;;  %v3631_v35 = vunpack.i.h.bf16 %v4527_v41 }
 0x26b   : > { %1682 = vmatpush.msrb.mxu1 %v4447_v5  ;;  %1732 = vmatpush.msrb.mxu2 %v1712_v60  ;;  %v3630_v2 = vunpack.i.l.bf16 %v4527_v41 }
 0x26d   : > { %1683 = vmatpush.msrb.mxu1 %v4433_v54  ;;  %1733 = vmatpush.msrb.mxu2 %v1711_v1 }
 0x26f   : > { %1684 = vmatpush.msrb.mxu1 %v4425_v38  ;;  %v3969_v59 = vpop.permute.xlu2 %3968  ;;  %v3889_v34 = vpop.permute.xlu0 %3888  ;;  %1734 = vmatpush.msrb.mxu2 %v1710_v12 }
 0x270   : > { %v3944_v43 = vpop.permute.xlu1 %3943  ;;  %v3891_v1 = vunpack.i.h.bf16 %v3889_v34  ;;  %v3890_v12 = vunpack.i.l.bf16 %v3889_v34  ;;  %v3971_v33 = vunpack.i.h.bf16 %v3969_v59  ;;  %v3970_v62 = vunpack.i.l.bf16 %v3969_v59 }
 0x271   : > { %1685 = vmatpush.msrb.mxu1 %v4417_v23  ;;  %v3946_v57 = vunpack.i.h.bf16 %v3944_v43  ;;  %v3945_v60 = vunpack.i.l.bf16 %v3944_v43  ;;  %1735 = vmatpush.msrb.mxu2 %v1709_v29  ;;  %v3806_v34 = vunpack.i.h.bf16 %v4660_v56  ;;  %v1899_v59 = vsel %vm336_vm1, %v3755_v24, %v3756_v58 }
 0x272   : > { %3468 = vmatmul.msk.f32.vlgmr.msrb.gmra.mxu2 %vm341_vm0, %v3467_v3  ;;  %3466 = vmatmul.msk.f32.vlgmr.msrb.gmra.mxu1 %vm341_vm0, %v3465_v48  ;;  %v2489_v28 = vsel %vm1021_vm6, %v3890_v12, %v3891_v1  ;;  %v1843_v29 = vsel %vm336_vm1, %v3830_v30, %v3831_v6  ;;  %v3501_v3 = vld [vmem:[%s5163_s3 + $0xc] sm:$0x3]  ;;  %v3626_v58 = vunpack.i.h.bf16 %v4556_v15  ;;  %v3936_v48 = vunpack.i.h.bf16 %v4857_v10 }
 0x273   : > { %1865 = vmatpush.msra.mxu1 %v1845_v55  ;;  %v3017_v43 = vsel %vm1336_vm8, %v3945_v60, %v3946_v57  ;;  %v3805_v55 = vunpack.i.l.bf16 %v4660_v56  ;;  %1920 = vmatpush.msra.mxu2 %v1900_v31  ;;  %v3016_v56 = vsel %vm1336_vm8, %v3970_v62, %v3971_v33  ;;  %v3625_v31 = vunpack.i.l.bf16 %v4556_v15  ;;  %v1808_v60 = vld [vmem:[%s5163_s3] sm:$0x3]  ;;  %v3473_v15 = vld [vmem:[%s5163_s3 + $0x2] sm:$0x3] }
 0x274   : > { %2515 = vmatpush.msra.mxu0 %v2489_v28  ;;  %3037 = vmatpush.msra.mxu3 %v3017_v43  ;;  %v3935_v57 = vunpack.i.l.bf16 %v4857_v10  ;;  %v2073_v1 = vsel %vm799_vm5, %v3630_v2, %v3631_v35  ;;  %v3621_v10 = vunpack.i.h.bf16 %v4569_v19  ;;  %v3620_v12 = vunpack.i.l.bf16 %v4569_v19 }
 0x275   : > { %1866 = vmatpush.msra.mxu1 %v1844_v7  ;;  %1921 = vmatpush.msra.mxu2 %v1899_v59  ;;  %v1842_v6 = vsel %vm336_vm1, %v3805_v55, %v3806_v34  ;;  %v3951_v30 = vunpack.i.h.bf16 %v4871_v22  ;;  %v3950_v33 = vunpack.i.l.bf16 %v4871_v22  ;;  %v3616_v62 = vunpack.i.h.bf16 %v4516_v27  ;;  %v3480_v59 = vld [vmem:[%s5163_s3 + $0x8] sm:$0x3] }
 0x276   : > { %2686 = vmatpush.msrb.mxu0 %v4406_v8  ;;  %3038 = vmatpush.msra.mxu3 %v3016_v56  ;;  %v3785_v7 = vunpack.i.l.bf16 %v4737_v32  ;;  %v2072_v19 = vsel %vm799_vm5, %v3625_v31, %v3626_v58  ;;  %v2853_v22 = vsel %vm799_vm5, %v3935_v57, %v3936_v48  ;;  %v3765_v28 = vunpack.i.l.bf16 %v4628_v11  ;;  %v3490_v57 = vld [vmem:[%s5163_s3 + $0x2] sm:$0x3] }
 0x277   : > { %1867 = vmatpush.msra.mxu1 %v1843_v29  ;;  %1922 = vmatpush.msra.mxu2 %v1898_v50  ;;  %v4937_v24 = vpop.permute.xlu0 %3908  ;;  %v2852_v32 = vsel %vm799_vm5, %v3950_v33, %v3951_v30  ;;  %v3746_v55 = vunpack.i.h.bf16 %v4664_v45  ;;  %v3726_v35 = vunpack.i.h.bf16 %v4662_v49  ;;  %v3725_v45 = vunpack.i.l.bf16 %v4662_v49 }
 0x278   : > { %2687 = vmatpush.msrb.mxu0 %v4397_v63  ;;  %v4935_v41 = vpop.permute.xlu1 %3958  ;;  %v3860_v49 = vunpack.i.l.bf16 %v4767_v53  ;;  %v3836_v58 = vunpack.i.h.bf16 %v4831_v39  ;;  %v3810_v31 = vunpack.i.l.bf16 %v4672_v13  ;;  %v3680_v30 = vunpack.i.l.bf16 %v4571_v20 }
 0x279   : > { %1868 = vmatpush.msra.mxu1 %v1842_v6  ;;  %3502 = vmatmul.msk.f32.vlgmr.msra.gmra.mxu0 %vm341_vm0, %v3501_v3  ;;  %v3961_v2 = vunpack.i.h.bf16 %v4935_v41  ;;  %v3960_v29 = vunpack.i.l.bf16 %v4935_v41  ;;  %v2186_v56 = vsel %vm799_vm5, %v3745_v46, %v3746_v55  ;;  %v3861_v3 = vunpack.i.h.bf16 %v4767_v53 }
 0x27a   : > { %1923 = vmatpush.msra.mxu2 %v1897_v4  ;;  %2688 = vmatpush.msrb.mxu0 %v4388_v51  ;;  %v2185_v50 = vsel %vm799_vm5, %v3725_v45, %v3726_v35  ;;  %v3835_v41 = vunpack.i.l.bf16 %v4831_v39  ;;  %v3636_v4 = vunpack.i.h.bf16 %v4573_v21  ;;  %v3896_v33 = vunpack.i.h.bf16 %v4847_v61 }
 0x27b   : > { %2027 = vmatpush.msrb.mxu1 %v4447_v5  ;;  %v3615_v5 = vunpack.i.l.bf16 %v4516_v27  ;;  %3475 = vmatmul.msk.f32.vlgmr.msra.gmra.mxu2 %vm341_vm0, %v1808_v60  ;;  %v3766_v27 = vunpack.i.h.bf16 %v4628_v11  ;;  %v2372_v53 = vsel %vm438_vm3, %v3960_v29, %v3961_v2  ;;  %v2371_v39 = vsel %vm438_vm3, %v3860_v49, %v3861_v3 }
 0x27c   : > { %2093 = vmatpush.msrb.mxu2 %v2073_v1  ;;  %2689 = vmatpush.msrb.mxu0 %v4379_v40  ;;  %v3635_v60 = vunpack.i.l.bf16 %v4573_v21  ;;  %v3700_v1 = vunpack.i.l.bf16 %v4630_v14  ;;  %v3681_v21 = vunpack.i.h.bf16 %v4571_v20  ;;  %v3661_v20 = vunpack.i.h.bf16 %v4559_v17 }
 0x27d   : > { %2028 = vmatpush.msrb.mxu1 %v4433_v54  ;;  %v2071_v54 = vsel %vm799_vm5, %v3620_v12, %v3621_v10  ;;  %v2070_v11 = vsel %vm799_vm5, %v3615_v5, %v3616_v62  ;;  %v3876_v10 = vunpack.i.h.bf16 %v4833_v42  ;;  %v3875_v12 = vunpack.i.l.bf16 %v4833_v42 }
 0x27e   : > { %3474 = vmatmul.msk.f32.vlgmr.msra.gmra.mxu1 %vm341_vm0, %v3473_v15  ;;  %2094 = vmatpush.msrb.mxu2 %v2072_v19  ;;  %v2370_v15 = vsel %vm438_vm3, %v3835_v41, %v3836_v58  ;;  %v3895_v62 = vunpack.i.l.bf16 %v4847_v61  ;;  %v2558_v42 = vsel %vm1078_vm7, %v3635_v60, %v3636_v4  ;;  %v5051_v19 = vpop.permute.xlu2 %3983  ;;  %v3881_v61 = vunpack.i.h.bf16 %v4789_v0 }
 0x27f   : > { %2873 = vmatpush.msra.mxu0 %v2853_v22  ;;  %2029 = vmatpush.msrb.mxu1 %v4425_v38  ;;  %v4975_v34 = vpop.permute.xlu0 %3923  ;;  %v2188_v38 = vsel %vm799_vm5, %v3785_v7, %v3786_v9  ;;  %v3660_v7 = vunpack.i.l.bf16 %v4559_v17  ;;  %v2557_v22 = vsel %vm1078_vm7, %v3875_v12, %v3876_v10  ;;  %v3880_v17 = vunpack.i.l.bf16 %v4789_v0  ;;  %v3516_v12 = vld [vmem:[%s5163_s3 + $0xa] sm:$0x3] }
 0x280   : > { %2095 = vmatpush.msrb.mxu2 %v2071_v54  ;;  %v4973_v43 = vpop.permute.xlu1 %3963  ;;  %v2606_v54 = vsel %vm1078_vm7, %v3680_v30, %v3681_v21  ;;  %v3911_v55 = vunpack.i.h.bf16 %v4937_v24  ;;  %v3910_v46 = vunpack.i.l.bf16 %v4937_v24  ;;  %v3921_v35 = vunpack.i.h.bf16 %v4843_v44 }
 0x281   : > { %2874 = vmatpush.msra.mxu0 %v2852_v32  ;;  %2030 = vmatpush.msrb.mxu1 %v4417_v23  ;;  %v2187_v23 = vsel %vm799_vm5, %v3765_v28, %v3766_v27  ;;  %v3906_v27 = vunpack.i.h.bf16 %v4829_v26  ;;  %v3905_v28 = vunpack.i.l.bf16 %v4829_v26  ;;  %v3497_v32 = vld [vmem:[%s5163_s3 + $0x8] sm:$0x3]  ;;  %v3495_v26 = vld [vmem:[%s5163_s3 + $0x6] sm:$0x3]  ;;  %v2605_v0 = vsel %vm1078_vm7, %v3660_v7, %v3661_v20 }
 0x282   : > { %2096 = vmatpush.msrb.mxu2 %v2070_v11  ;;  %v2556_v11 = vsel %vm1078_vm7, %v3895_v62, %v3896_v33  ;;  %v3920_v24 = vunpack.i.l.bf16 %v4843_v44  ;;  %v2730_v2 = vsel %vm799_vm5, %v3910_v46, %v3911_v55  ;;  %v3930_v29 = vunpack.i.l.bf16 %v4873_v52  ;;  %v3512_v7 = vld [vmem:[%s5163_s3 + $0x6] sm:$0x3]  ;;  %v3522_v55 = vld [vmem:[%s5163_s3 + $0x10] sm:$0x3] }
 0x283   : > { %2208 = vmatpush.msra.mxu1 %v2188_v38  ;;  %3483 = vmatmul.msk.f32.vlgmr.msrb.gmra.mxu2 %vm341_vm0, %v3482_v36  ;;  %v3916_v36 = vunpack.i.h.bf16 %v4861_v18  ;;  %v2555_v45 = vsel %vm1078_vm7, %v3905_v28, %v3906_v27  ;;  %v3925_v58 = vunpack.i.l.bf16 %v4975_v34  ;;  %v3965_v10 = vunpack.i.l.bf16 %v4973_v43 }
 0x284   : > { %2248 = vmatpush.msra.mxu2 %v4406_v8  ;;  %v2642_v8 = vld [vmem:[%s5163_s3] sm:$0x3]  ;;  %v3986_v33 = vunpack.i.h.bf16 %v5051_v19  ;;  %v3985_v62 = vunpack.i.l.bf16 %v5051_v19  ;;  %v3510_v19 = vld [vmem:[%s5163_s3 + $0x4] sm:$0x3] }
 0x285   : > { %2209 = vmatpush.msra.mxu1 %v2187_v23  ;;  %3509 = vmatmul.msk.f32.vlgmr.msrb.gmra.mxu0 %vm341_vm0, %v2642_v8  ;;  %v2604_v23 = vsel %vm1078_vm7, %v3880_v17, %v3881_v61  ;;  %v2728_v8 = vsel %vm799_vm5, %v3920_v24, %v3921_v35  ;;  %v3520_v17 = vld [vmem:[%s5163_s3 + $0xe] sm:$0x3] }
 0x286   : > { %2249 = vmatpush.msra.mxu2 %v4397_v63  ;;  %3481 = vmatmul.msk.f32.vlgmr.msrb.gmra.mxu1 %vm341_vm0, %v3480_v59  ;;  %v3514_v63 = vld [vmem:[%s5163_s3 + $0x8] sm:$0x3]  ;;  %v3915_v59 = vunpack.i.l.bf16 %v4861_v18  ;;  %v3931_v18 = vunpack.i.h.bf16 %v4873_v52  ;;  %v2964_v27 = vsel %vm1078_vm7, %v3985_v62, %v3986_v33 }
 0x287   : > { %2210 = vmatpush.msra.mxu1 %v2186_v56  ;;  %v5012_v6 = vpop.permute.xlu0 %3938  ;;  %3515 = vmatmul.msk.f32.vlgmr.msrb.gmra.mxu3 %vm341_vm0, %v3514_v63  ;;  %v3926_v63 = vunpack.i.h.bf16 %v4975_v34 }
 0x288   : > { %2250 = vmatpush.msra.mxu2 %v4388_v51  ;;  %v3811_v51 = vunpack.i.h.bf16 %v4672_v13  ;;  %v5018_v48 = vpop.permute.xlu1 %3978  ;;  %v3701_v13 = vunpack.i.h.bf16 %v4630_v14  ;;  %v2729_v44 = vsel %vm799_vm5, %v3915_v59, %v3916_v36  ;;  %v3940_v60 = vunpack.i.l.bf16 %v5012_v6 }
 0x289   : > { %2211 = vmatpush.msra.mxu1 %v2185_v50  ;;  %v3999_v50 = vpop.permute.xlu2 %3998  ;;  %v3980_v4 = vunpack.i.l.bf16 %v5018_v48 }
 0x28a   : > { %2251 = vmatpush.msra.mxu2 %v4379_v40  ;;  %v3488_v40 = vld [vmem:[%s5163_s3 + $0x10] sm:$0x3]  ;;  %v2369_v14 = vsel %vm438_vm3, %v3810_v31, %v3811_v51  ;;  %v2607_v5 = vsel %vm1078_vm7, %v3700_v1, %v3701_v13  ;;  %v2727_v31 = vsel %vm799_vm5, %v3930_v29, %v3931_v18  ;;  %v4000_v13 = vunpack.i.l.bf16 %v3999_v50 }
 0x28b   : > { %2392 = vmatpush.msrb.mxu1 %v2372_v53  ;;  %3491 = vmatmul.msk.f32.vlgmr.msra.gmra.mxu2 %vm341_vm0, %v3490_v57  ;;  %v3981_v57 = vunpack.i.h.bf16 %v5018_v48 }
 0x28c   : > { %2421 = vmatpush.msrb.mxu2 %v4508_v16 }
 0x28d   : > { %2393 = vmatpush.msrb.mxu1 %v2371_v39  ;;  %v3503_v39 = vld [vmem:[%s5163_s3 + $0xe] sm:$0x3] }
 0x28e   : > { %2422 = vmatpush.msrb.mxu2 %v4487_v47  ;;  %3489 = vmatmul.msk.f32.vlgmr.msra.gmra.mxu1 %vm341_vm0, %v3488_v40  ;;  %v4001_v40 = vunpack.i.h.bf16 %v3999_v50 }
 0x28f   : > { %2394 = vmatpush.msrb.mxu1 %v2370_v15  ;;  %v5047_v9 = vpop.permute.xlu0 %3953  ;;  %v3966_v15 = vunpack.i.h.bf16 %v4973_v43  ;;  %v2901_v43 = vsel %vm1078_vm7, %v3980_v4, %v3981_v57 }
 0x290   : > { %2423 = vmatpush.msrb.mxu2 %v4478_v37  ;;  %v3994_v38 = vpop.permute.xlu1 %3993  ;;  %v3956_v41 = vunpack.i.h.bf16 %v5047_v9  ;;  %v3955_v52 = vunpack.i.l.bf16 %v5047_v9  ;;  %v2900_v9 = vsel %vm1078_vm7, %v4000_v13, %v4001_v40 }
 0x291   : > { %2395 = vmatpush.msrb.mxu1 %v2369_v14  ;;  %v3996_v53 = vunpack.i.h.bf16 %v3994_v38  ;;  %v3995_v51 = vunpack.i.l.bf16 %v3994_v38  ;;  %v2965_v20 = vsel %vm1078_vm7, %v3965_v10, %v3966_v15  ;;  %v1631_v38 = vpop.f32.mrf.mxu3 }
 0x292   : > { %2424 = vmatpush.msrb.mxu2 %v4468_v25  ;;  %v2902_v48 = vsel %vm1078_vm7, %v3955_v52, %v3956_v41  ;;  %v5169_v41 = vld [vmem:[#allocation3_spill] sm:$0xff] }
 0x293   : > { %2578 = vmatpush.msra.mxu1 %v2558_v42  ;;  %3498 = vmatmul.msk.f32.vlgmr.msrb.gmra.mxu2 %vm341_vm0, %v3497_v32 }
 0x294   : > { %2627 = vmatpush.msra.mxu2 %v2607_v5 }
 0x295   : > { %2579 = vmatpush.msra.mxu1 %v2557_v22 }
 0x296   : > { %2628 = vmatpush.msra.mxu2 %v2606_v54  ;;  %3496 = vmatmul.msk.f32.vlgmr.msrb.gmra.mxu1 %vm341_vm0, %v3495_v26 }
 0x297   : > { %2580 = vmatpush.msra.mxu1 %v2556_v11  ;;  %v3974_v56 = vpop.permute.xlu0 %3973  ;;  %v3518_v11 = vld [vmem:[%s5163_s3 + $0xc] sm:$0x3] }
 0x298   : > { %2629 = vmatpush.msra.mxu2 %v2605_v0  ;;  %v3976_v3 = vunpack.i.h.bf16 %v3974_v56  ;;  %v3975_v49 = vunpack.i.l.bf16 %v3974_v56  ;;  %v4009_v1 = vpop.permute.xlu1 %4008 }
 0x299   : > { %2581 = vmatpush.msra.mxu1 %v2555_v45  ;;  %v4011_v21 = vunpack.i.h.bf16 %v4009_v1  ;;  %v4010_v30 = vunpack.i.l.bf16 %v4009_v1 }
 0x29a   : > { %2630 = vmatpush.msra.mxu2 %v2604_v23  ;;  %v2851_v34 = vsel %vm799_vm5, %v3975_v49, %v3976_v3  ;;  %v1763_v23 = vpop.f32.mrf.mxu3 }
 0x29b   : > { %2750 = vmatpush.msrb.mxu1 %v2730_v2  ;;  %2875 = vmatpush.msra.mxu0 %v2851_v34  ;;  %v2899_v61 = vsel %vm1078_vm7, %v4010_v30, %v4011_v21 }
 0x29c   : > { %2779 = vmatpush.msrb.mxu2 %v4508_v16  ;;  %v3505_v16 = vld [vmem:[%s5163_s3 + $0x10] sm:$0x3] }
 0x29d   : > { %2751 = vmatpush.msrb.mxu1 %v2729_v44  ;;  %3506 = vmatmul.msk.f32.vlgmr.msra.gmra.mxu2 %vm341_vm0, %v3505_v16 }
 0x29e   : > { %2780 = vmatpush.msrb.mxu2 %v4487_v47  ;;  %v3941_v47 = vunpack.i.h.bf16 %v5012_v6  ;;  %3504 = vmatmul.msk.f32.vlgmr.msra.gmra.mxu1 %vm341_vm0, %v3503_v39  ;;  %v2967_v6 = vsel %vm1078_vm7, %v3925_v58, %v3926_v63  ;;  %v1459_v26 = vpop.f32.mrf.mxu0 }
 0x29f   : > { %2752 = vmatpush.msrb.mxu1 %v2728_v8 }
 0x2a0   : > { %2781 = vmatpush.msrb.mxu2 %v4478_v37  ;;  %v2850_v37 = vsel %vm799_vm5, %v3995_v51, %v3996_v53  ;;  %v2966_v14 = vsel %vm1078_vm7, %v3940_v60, %v3941_v47 }
 0x2a1   : > { %2753 = vmatpush.msrb.mxu1 %v2727_v31  ;;  %2876 = vmatpush.msra.mxu0 %v2850_v37 }
 0x2a2   : > { %2782 = vmatpush.msrb.mxu2 %v4468_v25  ;;  %v3989_v25 = vpop.permute.xlu0 %3988  ;;  %3517 = vmatmul.msk.f32.vlgmr.msra.gmra.mxu0 %vm341_vm0, %v3516_v12 }
 0x2a3   : > { %2922 = vmatpush.msra.mxu1 %v2902_v48  ;;  %v3991_v42 = vunpack.i.h.bf16 %v3989_v25  ;;  %v3990_v5 = vunpack.i.l.bf16 %v3989_v25 }
 0x2a4   : > { %2987 = vmatpush.msra.mxu2 %v2967_v6 }
 0x2a5   : > { %2923 = vmatpush.msra.mxu1 %v2901_v43  ;;  %v3015_v22 = vsel %vm1336_vm8, %v3990_v5, %v3991_v42  ;;  %3513 = vmatmul.msk.f32.vlgmr.msrb.gmra.mxu2 %vm341_vm0, %v3512_v7 }
 0x2a6   : > { %2988 = vmatpush.msra.mxu2 %v2966_v14  ;;  %3039 = vmatpush.msra.mxu3 %v3015_v22  ;;  %v1661_v36 = vpop.f32.mrf.mxu0 }
 0x2a7   : > { %2924 = vmatpush.msra.mxu1 %v2900_v9 }
 0x2a8   : > { %2989 = vmatpush.msra.mxu2 %v2965_v20  ;;  %3511 = vmatmul.msk.f32.vlgmr.msrb.gmra.mxu1 %vm341_vm0, %v3510_v19 }
 0x2a9   : > { %2925 = vmatpush.msra.mxu1 %v2899_v61 }
 0x2aa   : > { %2990 = vmatpush.msra.mxu2 %v2964_v27  ;;  %v4004_v28 = vpop.permute.xlu0 %4003 }
 0x2ab   : > { %v4006_v54 = vunpack.i.h.bf16 %v4004_v28  ;;  %v4005_v32 = vunpack.i.l.bf16 %v4004_v28 }
 0x2ad   : > { %v3014_v46 = vsel %vm1336_vm8, %v4005_v32, %v4006_v54  ;;  %3521 = vmatmul.msk.f32.vlgmr.msra.gmra.mxu2 %vm341_vm0, %v3520_v17 }
 0x2ae   : > { %3040 = vmatpush.msra.mxu3 %v3014_v46  ;;  %v1789_v2 = vpop.f32.mrf.mxu0 }
 0x2af   : > { %3523 = vmatmul.msk.f32.vlgmr.msra.gmra.mxu3 %vm341_vm0, %v3522_v55  ;;  %v1974_v49 = vpop.f32.mrf.mxu3 }
 0x2b0   : > { %3519 = vmatmul.msk.f32.vlgmr.msra.gmra.mxu1 %vm341_vm0, %v3518_v11 }
 0x2b6   : > { %v2003_v50 = vpop.f32.mrf.mxu0 }
 0x2b7   : > { %v2123_v51 = vpop.f32.mrf.mxu3 }
 0x2be   : > { %v2148_v34 = vpop.f32.mrf.mxu0 }
 0x2bf   : > { %v2308_v1 = vpop.f32.mrf.mxu3 }
 0x2c7   : > { %v2451_v43 = vpop.f32.mrf.mxu3 }
 0x2cc   : > { %v2332_v10 = vpop.f32.mrf.mxu0 }
 0x2d3   : > { %v2668_v20 = vpop.f32.mrf.mxu3 }
 0x2e3   : > { %v1564_v0 = vpop.f32.mrf.mxu2 }
 0x2e7   : > { %v1515_v59 = vpop.f32.mrf.mxu1 }
 0x2e8   : > { %v1516_v35 = vadd.f32 %v1515_v59, %v1459_v26 }
 0x2ea   : > { %v1567_v24 = vadd.f32 %v1564_v0, %v1516_v35 }
 0x2ec   : > { %v1634_v45 = vadd.f32 %v1631_v38, %v1567_v24 }
 0x2ee   : > { %v1664_v29 = vadd.f32 %v1661_v36, %v1634_v45 }
 0x2ef   : > { %v1687_v18 = vpop.f32.mrf.mxu1 }
 0x2f0   : > { %v1690_v44 = vadd.f32 %v1687_v18, %v1664_v29 }
 0x2f5   : > { %v1737_v56 = vpop.f32.mrf.mxu2 }
 0x2f6   : > { %v1740_v3 = vadd.f32 %v1737_v56, %v1690_v44  ;;  %v2517_v25 = vpop.f32.mrf.mxu0 }
 0x2f8   : > { %v1766_v8 = vadd.f32 %v1763_v23, %v1740_v3 }
 0x2fa   : > { %v1792_v58 = vadd.f32 %v1789_v2, %v1766_v8 }
 0x2fb   : > { %v1870_v63 = vpop.f32.mrf.mxu1 }
 0x2fc   : > { %v1798_v52 = vadd.f32 %v5169_v41, %v1792_v58 }
 0x2fe   : > { %1799 = vst [vmem:[%s5147_s23] sm:$0x3] %v1798_v52  ;;  %v1925_v16 = vpop.f32.mrf.mxu2 }
 0x2ff   : > { %v1926_v53 = vadd.f32 %v1925_v16, %v1870_v63 }
 0x301   : > { %v1977_v31 = vadd.f32 %v1974_v49, %v1926_v53 }
 0x302   : > { %v2691_v19 = vpop.f32.mrf.mxu0 }
 0x303   : > { %v2032_v39 = vpop.f32.mrf.mxu1  ;;  %v2006_v57 = vadd.f32 %v2003_v50, %v1977_v31  ;;  %v2692_v28 = vadd.f32 %v2691_v19, %v2668_v20 }
 0x305   : > { %v2035_v4 = vadd.f32 %v2032_v39, %v2006_v57 }
 0x306   : > { %v2098_v47 = vpop.f32.mrf.mxu2 }
 0x307   : > { %v2101_v60 = vadd.f32 %v2098_v47, %v2035_v4 }
 0x309   : > { %v2126_v40 = vadd.f32 %v2123_v51, %v2101_v60 }
 0x30a   : > { %v2813_v32 = vpop.f32.mrf.mxu3 }
 0x30b   : > { %v2213_v13 = vpop.f32.mrf.mxu1  ;;  %v2151_v15 = vadd.f32 %v2148_v34, %v2126_v40 }
 0x30d   : > { %v2216_v48 = vadd.f32 %v2213_v13, %v2151_v15 }
 0x30e   : > { %v2253_v37 = vpop.f32.mrf.mxu2 }
 0x30f   : > { %v2217_v6 = vadd.f32 %v2216_v48, %v5169_v41  ;;  %v2309_v12 = vadd.f32 %v2308_v1, %v2253_v37 }
 0x311   : > { %2218 = vst [vmem:[%s5147_s23 + $0x2] sm:$0x3] %v2217_v6  ;;  %v2335_v21 = vadd.f32 %v2332_v10, %v2309_v12 }
 0x313   : > { %v2397_v30 = vpop.f32.mrf.mxu1 }
 0x314   : > { %v2400_v14 = vadd.f32 %v2397_v30, %v2335_v21 }
 0x316   : > { %v2426_v33 = vpop.f32.mrf.mxu2 }
 0x317   : > { %v2429_v62 = vadd.f32 %v2426_v33, %v2400_v14 }
 0x319   : > { %v2454_v42 = vadd.f32 %v2451_v43, %v2429_v62 }
 0x31b   : > { %v2583_v5 = vpop.f32.mrf.mxu1  ;;  %v2520_v9 = vadd.f32 %v2517_v25, %v2454_v42 }
 0x31d   : > { %v2586_v7 = vadd.f32 %v2583_v5, %v2520_v9 }
 0x31f   : > { %v2878_v11 = vpop.f32.mrf.mxu0 }
 0x320   : > { %v2632_v22 = vpop.f32.mrf.mxu2 }
 0x321   : > { %v2635_v61 = vadd.f32 %v2632_v22, %v2586_v7 }
 0x323   : > { %v2636_v27 = vadd.f32 %v2635_v61, %v5169_v41 }
 0x325   : > { %v2755_v54 = vpop.f32.mrf.mxu1  ;;  %2637 = vst [vmem:[%s5147_s23 + $0x4] sm:$0x3] %v2636_v27 }
 0x326   : > { %v2758_v17 = vadd.f32 %v2755_v54, %v2692_v28 }
 0x328   : > { %v2784_v55 = vpop.f32.mrf.mxu2 }
 0x329   : > { %v2787_v46 = vadd.f32 %v2784_v55, %v2758_v17 }
 0x32b   : > { %v2816_v26 = vadd.f32 %v2813_v32, %v2787_v46 }
 0x32d   : > { %v2927_v38 = vpop.f32.mrf.mxu1  ;;  %v2881_v36 = vadd.f32 %v2878_v11, %v2816_v26 }
 0x32f   : > { %v2930_v59 = vadd.f32 %v2927_v38, %v2881_v36 }
 0x330   : > { %v2992_v0 = vpop.f32.mrf.mxu2 }
 0x331   : > { %v2995_v24 = vadd.f32 %v2992_v0, %v2930_v59 }
 0x332   : > { %v3042_v35 = vpop.f32.mrf.mxu3 }
 0x333   : > { %v3045_v45 = vadd.f32 %v3042_v35, %v2995_v24 }
 0x335   : > { %v3046_v23 = vadd.f32 %v3045_v45, %v5169_v41 }
 0x337   : > { %3047 = vst [vmem:[%s5147_s23 + $0x6] sm:$0x3] %v3046_v23 }
 0x338 PF: > { %s16_s21 = sadd.s32 1, %s4019_s21  }
 0x339   : > { %p13_p4 = scmp.ge.s32.totalorder %s16_s21, 4  }
 0x33b   :  { %15 = sbr.rel (!%p13_p4) target bundleno = 1 (0x1), region = 100 }

// kernel: transblock_uc_forward.5
= control target key start
LH: loop header
LB: loop body
LE: loop exit
PB: predicated region body
PF: predicated region fallthrough
CT: control target
= control target key end

     0   :  { %s328_s12 = smov 0   ;;  %s345_s0 = inlined_call_operand.vmem [shape: f32[4,256], index: 0, kind: input, shape index: {}]   ;;  %s346_s1 = inlined_call_operand.vmem [shape: f32[4,256], index: 1, kind: input, shape index: {}]   ;;  %s347_s2 = inlined_call_operand.vmem [shape: f32[1,256], index: 2, kind: input, shape index: {}]   ;;  %s348_s3 = inlined_call_operand.vmem [shape: f32[4,256], index: 3, kind: output, shape index: {}]  }
   0x1 LB: > { %s280_s13 = sadd.s32 4294967295, %s305_s12   ;;  %p284_p0 = scmp.ge.s32.totalorder %s305_s12, 1  ;;  %s305_s12 = sphi %s328_s12, %s13_s12  }
   0x2   : > { %p153_p1 = scmp.lt.s32.totalorder %s305_s12, 3 }
   0x4   : > { %p154_p2 = pnand %p284_p0, %p153_p1 }
   0x5   : > { %p182_p3 = scmp.lt.s32.totalorder (!%p154_p2), %s280_s13, 1 }
   0x6   : > { %157 = sbr.rel (%p154_p2) target bundleno = 21 (0x15), region = 32 }
   0xb   : > { %s350_s13 = smov (!%p182_p3, %s280_s13), 1  ;;  %v307_v1 = vmov 0  }
   0xc   : > { %s285_s14 = sshll.u32 %s350_s13, 2  ;;  %s192_s17 = scalar_lea.vmem %s347_s2, %s350_s13 }
   0xd   : > { %s185_s20 = scalar_lea.vmem %s345_s0, %s285_s14  ;;  %s189_s23 = scalar_lea.vmem %s346_s1, %s285_s14  ;;  %v197_v0 = vld [vmem:[%s192_s17] sm:$0x1] }
   0xe   : > { %vm198_vm0 = vcmp.ne.f32.partialorder %v197_v0, 0.0  ;;  %v199_v3 = vld [vmem:[%s189_s23] sm:$0xf]  ;;  %s196_s26 = scalar_lea.vmem %s348_s3, %s285_s14 }
   0xf   : > { %v201_v2 = vsel %vm198_vm0, 1, %v307_v1  ;;  %v200_v4 = vld [vmem:[%s185_s20] sm:$0xf] }
  0x10   : > { %v202_v5 = vperm.slane %v201_v2, 0 }
  0x12   : > { %vm203_vm1 = vcmp.eq.s32.totalorder %v202_v5, 1 }
  0x13   : > { %v204_v6 = vsel %vm203_vm1, %v199_v3, %v200_v4 }
  0x14   : > { %205 = vst [vmem:[%s196_s26] sm:$0xf] %v204_v6 }
  0x15 PF: > { %s13_s12 = sadd.s32 1, %s305_s12  }
  0x16   : > { %p10_p4 = scmp.ge.s32.totalorder %s13_s12, 4  }
  0x18   :  { %12 = sbr.rel (!%p10_p4) target bundleno = 1 (0x1), region = 68 }

// kernel: transblock_uc_forward.3
= control target key start
LH: loop header
LB: loop body
LE: loop exit
PB: predicated region body
PF: predicated region fallthrough
CT: control target
= control target key end

     0   :  { %s4495_s26 = smov 0   ;;  %s5896_s0 = inlined_call_operand.vmem [shape: f32[2,8,384], index: 0, kind: input, shape index: {}]   ;;  %s5897_s1 = inlined_call_operand.vmem [shape: f32[9,32,2], index: 1, kind: input, shape index: {}]   ;;  %s5898_s2 = inlined_call_operand.vmem [shape: f32[32,1], index: 2, kind: input, shape index: {}]   ;;  %s5899_s3 = inlined_call_operand.vmem [shape: f32[16,32,32], index: 3, kind: input, shape index: {}]   ;;  %s5900_s4 = inlined_call_operand.vmem [shape: f32[32,1], index: 4, kind: input, shape index: {}]   ;;  %s5901_s5 = inlined_call_operand.<no memory space> [shape: f32[1], index: 5, kind: input, shape index: {}]   ;;  %s5902_s6 = inlined_call_operand.vmem [shape: f32[1,128], index: 6, kind: input, shape index: {}]   ;;  %s5903_s7 = inlined_call_operand.vmem [shape: bf16[2,32,384], index: 7, kind: output, shape index: {}]  }
   0x1   :  { %12 = sst [smem:[#allocation3]] %s5901_s5 }
   0x2 LB: > { %s3728_s27 = sadd.s32 4294967295, %s4440_s26   ;;  %p3732_p0 = scmp.ge.s32.totalorder %s4440_s26, 1  ;;  %s4440_s26 = sphi %s4495_s26, %s18_s26  }
   0x3   : > { %p238_p1 = scmp.lt.s32.totalorder %s4440_s26, 3 }
   0x5   : > { %p239_p2 = pnand %p3732_p0, %p238_p1 }
   0x7   : > { %242 = sbr.rel (%p239_p2) target bundleno = 956 (0x3bc), region = 48 }
   0xc   : > { %p270_p3 = scmp.lt.s32.totalorder %s3728_s27, 1  ;;  %s4442_s8 = smov 10   ;;  %vm479_vm0 = vcmask 7168   ;;  %vm322_vm1 = vcmask 1041408   ;;  %v4574_v30 = vld [vmem:[%s5897_s1 + $0x60] sm:$0xff]  ;;  %vm309_vm2 = vcmask 15360  }
   0xd   : > { %s4443_s9 = smov 1   ;;  %s4444_s10 = smov 11   ;;  %v4584_v32 = vld [vmem:[%s5897_s1 + $0x68] sm:$0xff]  ;;  %v4593_v37 = vld [vmem:[%s5897_s1 + $0x70] sm:$0xff]  ;;  %vm307_vm3 = vcmask 80896   ;;  %v4604_v44 = vld [vmem:[%s5897_s1 + $0x20] sm:$0xff] }
   0xe   : > { %s5949_s27 = smov (!%p270_p3, %s3728_s27), 1  ;;  %s4445_s11 = smov 9   ;;  %v4609_v45 = vld [vmem:[%s5897_s1 + $0x40] sm:$0xff]  ;;  %v4619_v49 = vld [vmem:[%s5897_s1 + $0x78] sm:$0xff]  ;;  %vm362_vm4 = vcmask 89088   ;;  %v4642_v56 = vld [vmem:[%s5897_s1 + $0x28] sm:$0xff] }
   0xf   : > { %s4169_s5 = smul.u32 24, %s5949_s27  ;;  %s4446_s12 = smov 127   ;;  %v4647_v57 = vld [vmem:[%s5897_s1] sm:$0xff]  ;;  %v4653_v59 = vld [vmem:[%s5897_s1 + $0x48] sm:$0xff]  ;;  %v4681_v63 = vld [vmem:[%s5897_s1 + $0x30] sm:$0xff]  ;;  %vm958_vm5 = vcmask 72704  }
  0x10   : > { %s4447_s19 = smov 118   ;;  %v4659_v60 = vld [vmem:[%s5897_s1 + $0xe0] sm:$0xff]  ;;  %s4448_s18 = smov 119   ;;  %vm1126_vm6 = vcmask 1039360   ;;  %vm1756_vm7 = vcmask 965632   ;;  %vm1695_vm8 = vcmask 973824  }
  0x11   : > { %s4509_s30 = scalar_lea.vmem %s5896_s0, %s4169_s5  ;;  %s4449_s22 = smov 117   ;;  %vm2333_vm9 = vcmask 957440   ;;  %vm2488_vm10 = vcmask 261120  }
  0x12   : > { %v292_v0 = vld [vmem:[%s4509_s30] sm:$0x30]  ;;  %v286_v1 = vld [vmem:[%s4509_s30] sm:$0xc0]  ;;  %v464_v4 = vld [vmem:[%s4509_s30] sm:$0xc] }
  0x13   : > { %v301_v2 = vrot.slane %v292_v0, 4  ;;  %v356_v3 = vrot.slane %v286_v1, 6  ;;  %v473_v5 = vrot.slane %v464_v4, 2  ;;  %v293_v6 = vld [vmem:[%s4509_s30 + $0x8] sm:$0x30]  ;;  %s4170_s13 = smul.u32 48, %s5949_s27 }
  0x14   : > { %v287_v7 = vld [vmem:[%s4509_s30 + $0x8] sm:$0xc0]  ;;  %v4520_v8 = vld [vmem:[%s4509_s30 + $0x8] sm:$0xc]  ;;  %v302_v9 = vrot.slane %v293_v6, 4 }
  0x15   : > { %303 = vrot.lane.b32.xlu1 %v301_v2, %s4442_s8  ;;  %412 = vrot.lane.b32.xlu0 %v356_v3, %s4442_s8  ;;  %v4522_v10 = vrot.slane %v287_v7, 6  ;;  %v474_v11 = vrot.slane %v4520_v8, 2  ;;  %v834_v12 = vld [vmem:[%s4509_s30] sm:$0x30]  ;;  %v835_v14 = vld [vmem:[%s4509_s30 + $0x8] sm:$0x30] }
  0x16   : > { %475 = vrot.lane.b32.xlu2 %v473_v5, %s4443_s9  ;;  %v900_v13 = vrot.slane %v834_v12, 4  ;;  %v4540_v15 = vrot.slane %v835_v14, 4  ;;  %v840_v16 = vld [vmem:[%s4509_s30] sm:$0xc0]  ;;  %v4549_v18 = vld [vmem:[%s4509_s30 + $0x8] sm:$0xc0] }
  0x17   : > { %v848_v17 = vrot.slane %v840_v16, 6  ;;  %v849_v19 = vrot.slane %v4549_v18, 6  ;;  %v1114_v20 = vld [vmem:[%s4509_s30 + $0x8] sm:$0x3]  ;;  %v1115_v21 = vld [vmem:[%s4509_s30 + $0x10] sm:$0x3] }
  0x18   : > { %v4560_v22 = vld [vmem:[%s4509_s30 + $0x8] sm:$0xc]  ;;  %v1356_v23 = vld [vmem:[%s4509_s30] sm:$0xc]  ;;  %v1278_v27 = vld [vmem:[%s4509_s30 + $0x10] sm:$0x30] }
  0x19   : > { %v1414_v24 = vrot.slane %v4560_v22, 2  ;;  %v1413_v25 = vrot.slane %v1356_v23, 2  ;;  %v1286_v28 = vrot.slane %v1278_v27, 4  ;;  %v1514_v33 = vld [vmem:[%s4509_s30] sm:$0xc0]  ;;  %v4686_v0 = vld [vmem:[%s5897_s1 + $0x8] sm:$0xff] }
  0x1a   : > { %v1522_v34 = vrot.slane %v1514_v33, 6  ;;  %v1277_v38 = vld [vmem:[%s4509_s30 + $0x8] sm:$0x30]  ;;  %v1682_v39 = vld [vmem:[%s4509_s30 + $0x10] sm:$0xc]  ;;  %v4730_v14 = vld [vmem:[%s5897_s1 + $0x58] sm:$0xff] }
  0x1b   : > { %v1285_v40 = vrot.slane %v1277_v38, 4  ;;  %v1690_v41 = vrot.slane %v1682_v39, 2  ;;  %v528_v48 = vld [vmem:[%s4509_s30 + $0x8] sm:$0x3]  ;;  %v4628_v51 = vld [vmem:[%s4509_s30 + $0x8] sm:$0xc] }
  0x1c   : > { %v1744_v50 = vld [vmem:[%s4509_s30 + $0x8] sm:$0x3]  ;;  %v1689_v52 = vrot.slane %v4628_v51, 2  ;;  %v4671_v61 = vld [vmem:[%s4509_s30 + $0x10] sm:$0x3]  ;;  %v4762_v27 = vld [vmem:[%s5897_s1 + $0x18] sm:$0xff] }
  0x1d   : > { %305 = vrot.lane.b32.xlu1 %v302_v9, %s4442_s8  ;;  %414 = vrot.lane.b32.xlu0 %v4522_v10, %s4442_s8  ;;  %v4699_v6 = vld [vmem:[%s5897_s1 + $0xe8] sm:$0xff]  ;;  %v4780_v33 = vld [vmem:[%s5897_s1 + $0xf8] sm:$0xff] }
  0x1e   : > { %477 = vrot.lane.b32.xlu2 %v474_v11, %s4443_s9  ;;  %v2145_v7 = vld [vmem:[%s4509_s30 + $0x8] sm:$0x30]  ;;  %v4709_v8 = vld [vmem:[%s4509_s30 + $0x8] sm:$0x3]  ;;  %v4807_v38 = vld [vmem:[%s5897_s1 + $0xa0] sm:$0xff] }
  0x1f   : > { %v4814_v39 = vld [vmem:[%s5897_s1 + $0xc8] sm:$0xff]  ;;  %v1745_v51 = vld [vmem:[%s4509_s30 + $0x10] sm:$0x3] }
  0x20   : > { %v1576_v22 = vld [vmem:[%s4509_s30 + $0x8] sm:$0x30] }
  0x25   : > { %360 = vrot.lane.b32.xlu1 %v4522_v10, %s4444_s10  ;;  %358 = vrot.lane.b32.xlu0 %v356_v3, %s4444_s10 }
  0x26   : > { %639 = vrot.lane.b32.xlu2 %v356_v3, %s4443_s9  ;;  %v4691_v3 = vld [vmem:[%s5897_s1 + $0x50] sm:$0xff] }
  0x2d   : > { %641 = vrot.lane.b32.xlu0 %v4522_v10, %s4443_s9  ;;  %902 = vrot.lane.b32.xlu1 %v900_v13, %s4442_s8 }
  0x2e   : > { %904 = vrot.lane.b32.xlu2 %v4540_v15, %s4442_s8 }
  0x35   : > { %956 = vrot.lane.b32.xlu1 %v4540_v15, %s4445_s11  ;;  %954 = vrot.lane.b32.xlu0 %v900_v13, %s4445_s11 }
  0x36   : > { %850 = vrot.lane.b32.xlu2 %v848_v17, %s4442_s8  ;;  %v4737_v17 = vld [vmem:[%s5897_s1 + $0xf0] sm:$0xff] }
  0x3d   : > { %852 = vrot.lane.b32.xlu0 %v849_v19, %s4442_s8  ;;  %1122 = vrot.lane.b32.xlu1 %v1114_v20, %s4446_s12  ;;  %v4746_v20 = vld [vmem:[%s4509_s30 + $0x8] sm:$0xc0] }
  0x3e   : > { %1124 = vrot.lane.b32.xlu2 %v1115_v21, %s4446_s12  ;;  %v2264_v21 = vld [vmem:[%s4509_s30 + $0x10] sm:$0xc]  ;;  %v1523_v23 = vrot.slane %v4746_v20, 6  ;;  %v4952_v20 = vld [vmem:[%s5897_s1 + $0x118] sm:$0xff] }
  0x45   : > { %1417 = vrot.lane.b32.xlu1 %v1414_v24, %s4443_s9  ;;  %1415 = vrot.lane.b32.xlu0 %v1413_v25, %s4443_s9  ;;  %v2272_v25 = vrot.slane %v2264_v21, 2 }
  0x46   : > { %1287 = vrot.lane.b32.xlu2 %v1285_v40, %s4446_s12  ;;  %v282_v40 = vld [vmem:[%s5898_s2] sm:$0xff] }
  0x4d   : > { %1289 = vrot.lane.b32.xlu0 %v1286_v28, %s4446_s12  ;;  %1524 = vrot.lane.b32.xlu1 %v1522_v34, %s4443_s9  ;;  %v285_v34 = vld [vmem:[%s5898_s2 + $0x18] sm:$0xff] }
  0x4e   : > { %1526 = vrot.lane.b32.xlu2 %v1523_v23, %s4443_s9 }
  0x55   : > { %1811 = vrot.lane.b32.xlu1 %v1690_v41, %s4447_s19  ;;  %1809 = vrot.lane.b32.xlu0 %v1689_v52, %s4447_s19 }
  0x56   : > { %1691 = vrot.lane.b32.xlu2 %v1689_v52, %s4448_s18  ;;  %v283_v52 = vld [vmem:[%s5898_s2 + $0x8] sm:$0xff] }
  0x5d   : > { %1752 = vrot.lane.b32.xlu1 %v1744_v50, %s4447_s19  ;;  %1693 = vrot.lane.b32.xlu0 %v1690_v41, %s4448_s18  ;;  %v4830_v41 = vld [vmem:[%s5897_s1 + $0x90] sm:$0xff]  ;;  %v1007_v50 = vld [vmem:[%s4509_s30 + $0x8] sm:$0x3] }
  0x5e   : > { %1754 = vrot.lane.b32.xlu2 %v1745_v51, %s4447_s19 }
  0x65   : > { %1987 = vrot.lane.b32.xlu1 %v4671_v61, %s4446_s12  ;;  %1985 = vrot.lane.b32.xlu0 %v4709_v8, %s4446_s12 }
  0x6d   : > { %2275 = vrot.lane.b32.xlu0 %v2272_v25, %s4447_s19 }
  0x70   : > { %v476_v26 = vpop.permute.xlu2 %475 }
  0x75   : > { %2329 = vrot.lane.b32.xlu0 %v4709_v8, %s4449_s22 }
  0x78   : > { %v478_v29 = vpop.permute.xlu2 %477 }
  0x79   : > { %v480_v31 = vsel %vm479_vm0, %v476_v26, %v478_v29  ;;  %v4773_v29 = vld [vmem:[%s5897_s1 + $0xc0] sm:$0xff] }
  0x7a   : > { %3762 = vmatpush.msk.msra.mxu3 %vm322_vm1, %v480_v31 }
  0x7b   : > { %3763 = vmatmul.msk.f32.vlgmr.msra.gmra.mxu3 %vm309_vm2, %v4574_v30 }
  0x7c   : > { %3798 = vmatpush.msk.msrb.mxu3 %vm322_vm1, %v302_v9  ;;  %v2153_v9 = vrot.slane %v2145_v7, 4 }
  0x7d   : > { %2213 = vrot.lane.b32.xlu0 %v4671_v61, %s4447_s19 }
  0x7e   : > { %2155 = vrot.lane.b32.xlu1 %v2153_v9, %s4446_s12  ;;  %v4914_v9 = vld [vmem:[%s5897_s1 + $0x108] sm:$0xff] }
  0x80   : > { %v640_v53 = vpop.permute.xlu2 %639 }
  0x83   : > { %3764 = vmatmul.msk.f32.gmra.mxu3 %vm309_vm2, %v4584_v32 }
  0x86   : > { %2331 = vrot.lane.b32.xlu1 %v4671_v61, %s4449_s22  ;;  %v4876_v61 = vld [vmem:[%s5897_s1 + $0xd8] sm:$0xff] }
  0x87   : > { %v304_v35 = vpop.permute.xlu1 %303  ;;  %v413_v36 = vpop.permute.xlu0 %412 }
  0x88   : > { %v905_v62 = vpop.permute.xlu2 %904 }
  0x8b   : > { %3765 = vmatmul.msk.f32.gmra.mxu3 %vm309_vm2, %v4593_v37 }
  0x8f   : > { %v306_v42 = vpop.permute.xlu1 %305  ;;  %v415_v43 = vpop.permute.xlu0 %414 }
  0x90   : > { %v308_v46 = vsel %vm307_vm3, %v304_v35, %v306_v42  ;;  %v416_v47 = vsel %vm307_vm3, %v413_v36, %v415_v43  ;;  %v851_v26 = vpop.permute.xlu2 %850  ;;  %v5904_v35 = vmov 0   ;;  %v4802_v36 = vld [vmem:[%s5897_s1 + $0x88] sm:$0xff]  ;;  %v4842_v43 = vld [vmem:[%s5897_s1 + $0xd0] sm:$0xff] }
  0x91   : > { %3739 = vmatpush.msk.msra.mxu0 %vm322_vm1, %v308_v46  ;;  %3753 = vmatpush.msk.msra.mxu2 %vm322_vm1, %v416_v47  ;;  %v4835_v42 = vld [vmem:[%s5897_s1 + $0xa8] sm:$0xff] }
  0x92   : > { %3740 = vmatmul.msk.f32.vlgmr.msra.gmra.mxu0 %vm309_vm2, %v4604_v44  ;;  %3754 = vmatmul.msk.f32.vlgmr.msra.gmra.mxu2 %vm309_vm2, %v4609_v45 }
  0x93   : > { %3771 = vmatpush.msk.msrb.mxu0 %vm322_vm1, %v528_v48  ;;  %3766 = vmatmul.msk.f32.gmra.mxu3 %vm309_vm2, %v4619_v49 }
  0x94   : > { %4189 = vset.pattern.permute.xlu1 %v5904_v35  ;;  %4191 = vset.pattern.permute.xlu0 %v5904_v35 }
  0x95   : > { %3807 = vmatpush.msk.msra.mxu0 %vm322_vm1, %v4522_v10  ;;  %v4720_v10 = vld [vmem:[%s5897_s1 + $0x38] sm:$0xff]  ;;  %4190 = vset.pattern.permute.xlu2 %v5904_v35 }
  0x96   : > { %812 = vperm.xlu1 %4189, %v285_v34   ;;  %802 = vperm.xlu0 %4191, %v283_v52  }
  0x97   : > { %v361_v54 = vpop.permute.xlu1 %360  ;;  %v359_v55 = vpop.permute.xlu0 %358 }
  0x98   : > { %v363_v58 = vsel %vm362_vm4, %v359_v55, %v361_v54  ;;  %v1125_v47 = vpop.permute.xlu2 %1124  ;;  %v4865_v55 = vld [vmem:[%s5897_s1 + $0x98] sm:$0xff] }
  0x99   : > { %3744 = vmatpush.msk.msra.mxu1 %vm322_vm1, %v363_v58  ;;  %v4870_v58 = vld [vmem:[%s5897_s1 + $0xb0] sm:$0xff] }
  0x9a   : > { %3741 = vmatmul.msk.f32.gmra.mxu0 %vm309_vm2, %v4642_v56  ;;  %3745 = vmatmul.msk.f32.vlgmr.msra.gmra.mxu1 %vm309_vm2, %v4647_v57 }
  0x9b   : > { %3755 = vmatmul.msk.f32.gmra.mxu2 %vm309_vm2, %v4653_v59  ;;  %3780 = vmatpush.msk.msrb.mxu1 %vm322_vm1, %v474_v11  ;;  %v4725_v11 = vld [vmem:[%s5897_s1 + $0x10] sm:$0xff] }
  0x9c   : > { %3799 = vmatmul.msk.f32.vlgmr.msrb.gmra.mxu3 %vm309_vm2, %v4659_v60 }
  0x9e   : > { %797 = vperm.xlu1 %4189, %v282_v40  }
  0x9f   : > { %v642_v1 = vpop.permute.xlu0 %641  ;;  %v903_v2 = vpop.permute.xlu1 %902 }
  0xa0   : > { %v643_v4 = vsel %vm479_vm0, %v640_v53, %v642_v1  ;;  %v906_v5 = vsel %vm307_vm3, %v903_v2, %v905_v62  ;;  %v1060_v53 = vld [vmem:[%s4509_s30 + $0x8] sm:$0xc]  ;;  %v4891_v2 = vld [vmem:[%s5897_s1 + $0xb8] sm:$0xff] }
  0xa1   : > { %3789 = vmatpush.msk.msrb.mxu2 %vm322_vm1, %v643_v4  ;;  %v1066_v54 = vrot.slane %v1060_v53, 2  ;;  %v2263_v62 = vld [vmem:[%s4509_s30 + $0x8] sm:$0xc]  ;;  %v4896_v4 = vld [vmem:[%s5897_s1 + $0x100] sm:$0xff] }
  0xa2   : > { %3742 = vmatmul.msk.f32.gmra.mxu0 %vm309_vm2, %v4681_v63  ;;  %3746 = vmatmul.msk.f32.gmra.mxu1 %vm309_vm2, %v4686_v0  ;;  %v2271_v1 = vrot.slane %v2263_v62, 2 }
  0xa3   : > { %3756 = vmatmul.msk.f32.gmra.mxu2 %vm309_vm2, %v4691_v3 }
  0xa4   : > { %3800 = vmatmul.msk.f32.gmra.mxu3 %vm309_vm2, %v4699_v6  ;;  %3821 = vmatpush.msk.msra.mxu2 %vm322_vm1, %v906_v5  ;;  %v2146_v5 = vld [vmem:[%s4509_s30 + $0x10] sm:$0x30] }
  0xa5   : > { %2273 = vrot.lane.b32.xlu2 %v2271_v1, %s4447_s19  ;;  %v2154_v7 = vrot.slane %v2146_v5, 4 }
  0xa7   : > { %v957_v12 = vpop.permute.xlu1 %956  ;;  %v955_v13 = vpop.permute.xlu0 %954 }
  0xa8   : > { %v959_v16 = vsel %vm958_vm5, %v955_v13, %v957_v12  ;;  %v4931_v13 = vld [vmem:[%s5897_s1 + $0x110] sm:$0xff] }
  0xa9   : > { %3830 = vmatpush.msk.msra.mxu3 %vm322_vm1, %v959_v16  ;;  %v1362_v16 = vld [vmem:[%s4509_s30 + $0x8] sm:$0x3] }
  0xaa   : > { %3743 = vmatmul.msk.f32.gmra.mxu0 %vm309_vm2, %v4720_v10  ;;  %3747 = vmatmul.msk.f32.gmra.mxu1 %vm309_vm2, %v4725_v11 }
  0xab   : > { %3757 = vmatmul.msk.f32.gmra.mxu2 %vm309_vm2, %v4730_v14  ;;  %3866 = vmatpush.msk.msrb.mxu3 %vm322_vm1, %v4540_v15  ;;  %v4767_v15 = vld [vmem:[%s5897_s1 + $0x80] sm:$0xff] }
  0xac   : > { %3801 = vmatmul.msk.f32.gmra.mxu3 %vm309_vm2, %v4737_v17 }
  0xad   : > { %2157 = vrot.lane.b32.xlu2 %v2154_v7, %s4446_s12 }
  0xaf   : > { %v853_v28 = vpop.permute.xlu0 %852  ;;  %v1123_v46 = vpop.permute.xlu1 %1122 }
  0xb0   : > { %v854_v31 = vsel %vm307_vm3, %v851_v26, %v853_v28  ;;  %v1127_v48 = vsel %vm1126_vm6, %v1123_v46, %v1125_v47 }
  0xb1   : > { %3816 = vmatpush.msk.msra.mxu1 %vm322_vm1, %v854_v31 }
  0xb2   : > { %3748 = vmatmul.msk.f32.gmra.mxu1 %vm309_vm2, %v4762_v27  ;;  %3772 = vmatmul.msk.f32.vlgmr.msrb.gmra.mxu0 %vm309_vm2, %v4767_v15 }
  0xb3   : > { %3790 = vmatmul.msk.f32.vlgmr.msrb.gmra.mxu2 %vm309_vm2, %v4773_v29  ;;  %3839 = vmatpush.msk.msrb.mxu0 %vm322_vm1, %v1007_v50 }
  0xb4   : > { %3802 = vmatmul.msk.f32.gmra.mxu3 %vm309_vm2, %v4780_v33  ;;  %3857 = vmatpush.msk.msrb.mxu2 %vm322_vm1, %v1127_v48 }
  0xb5   : > { %2211 = vrot.lane.b32.xlu2 %v4709_v8, %s4447_s19  ;;  %v284_v8 = vld [vmem:[%s5898_s2 + $0x10] sm:$0xff] }
  0xb7   : > { %v1418_v18 = vpop.permute.xlu1 %1417 }
  0xba   : > { %3773 = vmatmul.msk.f32.gmra.mxu0 %vm309_vm2, %v4802_v36  ;;  %3781 = vmatmul.msk.f32.vlgmr.msrb.gmra.mxu1 %vm309_vm2, %v4807_v38 }
  0xbb   : > { %3791 = vmatmul.msk.f32.gmra.mxu2 %vm309_vm2, %v4814_v39  ;;  %3848 = vmatpush.msk.msrb.mxu1 %vm322_vm1, %v1066_v54 }
  0xbc   : > { %3831 = vmatmul.msk.f32.vlgmr.msra.gmra.mxu3 %vm309_vm2, %v4609_v45 }
  0xbd   : > { %807 = vperm.xlu2 %4190, %v284_v8  }
  0xbf   : > { %v1525_v28 = vpop.permute.xlu1 %1524 }
  0xc2   : > { %3774 = vmatmul.msk.f32.gmra.mxu0 %vm309_vm2, %v4830_v41  ;;  %3782 = vmatmul.msk.f32.gmra.mxu1 %vm309_vm2, %v4835_v42 }
  0xc3   : > { %3792 = vmatmul.msk.f32.gmra.mxu2 %vm309_vm2, %v4842_v43 }
  0xc4   : > { %3832 = vmatmul.msk.f32.gmra.mxu3 %vm309_vm2, %v4653_v59 }
  0xc7   : > { %v1812_v48 = vpop.permute.xlu1 %1811 }
  0xca   : > { %3775 = vmatmul.msk.f32.gmra.mxu0 %vm309_vm2, %v4865_v55  ;;  %3783 = vmatmul.msk.f32.gmra.mxu1 %vm309_vm2, %v4870_v58 }
  0xcb   : > { %3793 = vmatmul.msk.f32.gmra.mxu2 %vm309_vm2, %v4876_v61 }
  0xcc   : > { %3833 = vmatmul.msk.f32.gmra.mxu3 %vm309_vm2, %v4691_v3 }
  0xd2   : > { %3784 = vmatmul.msk.f32.gmra.mxu1 %vm309_vm2, %v4891_v2  ;;  %3808 = vmatmul.msk.f32.vlgmr.msra.gmra.mxu0 %vm309_vm2, %v4896_v4 }
  0xd3   : > { %3822 = vmatmul.msk.f32.vlgmr.msra.gmra.mxu2 %vm309_vm2, %v4647_v57  ;;  %3875 = vmatpush.msk.msra.mxu0 %vm322_vm1, %v849_v19  ;;  %v1416_v19 = vpop.permute.xlu0 %1415 }
  0xd4   : > { %3834 = vmatmul.msk.f32.gmra.mxu3 %vm309_vm2, %v4730_v14  ;;  %v1419_v12 = vsel %vm479_vm0, %v1416_v19, %v1418_v18  ;;  %3893 = vmatpush.msk.msra.mxu2 %vm322_vm1, %v1362_v16 }
  0xd5   : > { %3898 = vmatpush.msk.msra.mxu3 %vm322_vm1, %v1419_v12 }
  0xda   : > { %3809 = vmatmul.msk.f32.gmra.mxu0 %vm309_vm2, %v4914_v9  ;;  %3817 = vmatmul.msk.f32.vlgmr.msra.gmra.mxu1 %vm309_vm2, %v4604_v44 }
  0xdb   : > { %3823 = vmatmul.msk.f32.gmra.mxu2 %vm309_vm2, %v4686_v0  ;;  %v1290_v21 = vpop.permute.xlu0 %1289 }
  0xdc   : > { %3867 = vmatmul.msk.f32.vlgmr.msrb.gmra.mxu3 %vm309_vm2, %v4773_v29 }
  0xdd   : > { %3934 = vmatpush.msk.msrb.mxu3 %vm322_vm1, %v1523_v23  ;;  %v1288_v23 = vpop.permute.xlu2 %1287 }
  0xde   : > { %v1291_v25 = vsel %vm1126_vm6, %v1288_v23, %v1290_v21 }
  0xdf   : > { %3884 = vmatpush.msk.msra.mxu1 %vm322_vm1, %v1291_v25 }
  0xe2   : > { %3810 = vmatmul.msk.f32.gmra.mxu0 %vm309_vm2, %v4931_v13  ;;  %3818 = vmatmul.msk.f32.gmra.mxu1 %vm309_vm2, %v4642_v56 }
  0xe3   : > { %3824 = vmatmul.msk.f32.gmra.mxu2 %vm309_vm2, %v4725_v11  ;;  %v1810_v50 = vpop.permute.xlu0 %1809 }
  0xe4   : > { %3868 = vmatmul.msk.f32.gmra.mxu3 %vm309_vm2, %v4814_v39  ;;  %v1813_v51 = vsel %vm1756_vm7, %v1810_v50, %v1812_v48 }
  0xe5   : > { %v1527_v34 = vpop.permute.xlu2 %1526 }
  0xe6   : > { %v1528_v40 = vsel %vm479_vm0, %v1525_v28, %v1527_v34 }
  0xea   : > { %3811 = vmatmul.msk.f32.gmra.mxu0 %vm309_vm2, %v4952_v20  ;;  %3819 = vmatmul.msk.f32.gmra.mxu1 %vm309_vm2, %v4681_v63 }
  0xeb   : > { %3825 = vmatmul.msk.f32.gmra.mxu2 %vm309_vm2, %v4762_v27  ;;  %v1694_v19 = vpop.permute.xlu0 %1693 }
  0xec   : > { %3869 = vmatmul.msk.f32.gmra.mxu3 %vm309_vm2, %v4842_v43 }
  0xed   : > { %v1692_v5 = vpop.permute.xlu2 %1691 }
  0xee   : > { %v1696_v12 = vsel %vm1695_vm8, %v1692_v5, %v1694_v19 }
  0xf2   : > { %3820 = vmatmul.msk.f32.gmra.mxu1 %vm309_vm2, %v4720_v10  ;;  %3840 = vmatmul.msk.f32.vlgmr.msrb.gmra.mxu0 %vm309_vm2, %v4574_v30 }
  0xf3   : > { %3858 = vmatmul.msk.f32.vlgmr.msrb.gmra.mxu2 %vm309_vm2, %v4807_v38  ;;  %3907 = vmatpush.msk.msrb.mxu0 %vm322_vm1, %v1414_v24  ;;  %v1582_v24 = vrot.slane %v1576_v22, 4 }
  0xf4   : > { %3870 = vmatmul.msk.f32.gmra.mxu3 %vm309_vm2, %v4876_v61 }
  0xf5   : > { %3925 = vmatpush.msk.msrb.mxu2 %vm322_vm1, %v1582_v24  ;;  %v1755_v24 = vpop.permute.xlu2 %1754 }
  0xfa   : > { %3841 = vmatmul.msk.f32.gmra.mxu0 %vm309_vm2, %v4584_v32  ;;  %3849 = vmatmul.msk.f32.vlgmr.msrb.gmra.mxu1 %vm309_vm2, %v4767_v15 }
  0xfb   : > { %3859 = vmatmul.msk.f32.gmra.mxu2 %vm309_vm2, %v4835_v42  ;;  %3916 = vmatpush.msk.msrb.mxu1 %vm322_vm1, %v1528_v40 }
  0xfc   : > { %3899 = vmatmul.msk.f32.vlgmr.msra.gmra.mxu3 %vm309_vm2, %v4647_v57 }
  0xfe   : > { %v512_v26 = vpop.f32.mrf.mxu3 }
 0x102   : > { %3842 = vmatmul.msk.f32.gmra.mxu0 %vm309_vm2, %v4593_v37  ;;  %3850 = vmatmul.msk.f32.gmra.mxu1 %vm309_vm2, %v4802_v36 }
 0x103   : > { %3860 = vmatmul.msk.f32.gmra.mxu2 %vm309_vm2, %v4870_v58 }
 0x104   : > { %3900 = vmatmul.msk.f32.gmra.mxu3 %vm309_vm2, %v4686_v0 }
 0x106   : > { %v515_v31 = vpop.f32.mrf.mxu3 }
 0x10a   : > { %3843 = vmatmul.msk.f32.gmra.mxu0 %vm309_vm2, %v4619_v49  ;;  %3851 = vmatmul.msk.f32.gmra.mxu1 %vm309_vm2, %v4830_v41 }
 0x10b   : > { %3861 = vmatmul.msk.f32.gmra.mxu2 %vm309_vm2, %v4891_v2 }
 0x10c   : > { %3901 = vmatmul.msk.f32.gmra.mxu3 %vm309_vm2, %v4725_v11 }
 0x10e   : > { %v518_v47 = vpop.f32.mrf.mxu3 }
 0x10f   : > { %v342_v46 = vpop.f32.mrf.mxu0 }
 0x112   : > { %3852 = vmatmul.msk.f32.gmra.mxu1 %vm309_vm2, %v4865_v55  ;;  %3876 = vmatmul.msk.f32.vlgmr.msra.gmra.mxu0 %vm309_vm2, %v4659_v60 }
 0x113   : > { %3894 = vmatmul.msk.f32.vlgmr.msra.gmra.mxu2 %vm309_vm2, %v4604_v44  ;;  %3943 = vmatpush.msk.msra.mxu0 %vm322_vm1, %v1696_v12 }
 0x114   : > { %3902 = vmatmul.msk.f32.gmra.mxu3 %vm309_vm2, %v4762_v27  ;;  %3961 = vmatpush.msk.msra.mxu2 %vm322_vm1, %v1813_v51 }
 0x115   : > { %v448_v52 = vpop.f32.mrf.mxu2 }
 0x116   : > { %v521_v1 = vpop.f32.mrf.mxu3 }
 0x117   : > { %v345_v53 = vpop.f32.mrf.mxu0  ;;  %v395_v54 = vpop.f32.mrf.mxu1 }
 0x118   : > { %v396_v62 = vadd.f32 %v395_v54, %v342_v46 }
 0x11a   : > { %v460_v7 = vadd.f32 %v448_v52, %v396_v62  ;;  %3877 = vmatmul.msk.f32.gmra.mxu0 %vm309_vm2, %v4699_v6  ;;  %3885 = vmatmul.msk.f32.vlgmr.msra.gmra.mxu1 %vm309_vm2, %v4896_v4 }
 0x11b   : > { %3895 = vmatmul.msk.f32.gmra.mxu2 %vm309_vm2, %v4642_v56 }
 0x11c   : > { %v524_v18 = vadd.f32 %v512_v26, %v460_v7  ;;  %3935 = vmatmul.msk.f32.vlgmr.msrb.gmra.mxu3 %vm309_vm2, %v4807_v38  ;;  %v1753_v26 = vpop.permute.xlu1 %1752 }
 0x11d   : > { %v1757_v34 = vsel %vm1756_vm7, %v1753_v26, %v1755_v24 }
 0x11e   : > { %v451_v16 = vpop.f32.mrf.mxu2  ;;  %3952 = vmatpush.msk.msra.mxu1 %vm322_vm1, %v1757_v34 }
 0x11f   : > { %v348_v8 = vpop.f32.mrf.mxu0  ;;  %v398_v21 = vpop.f32.mrf.mxu1 }
 0x120   : > { %v399_v23 = vadd.f32 %v398_v21, %v345_v53  ;;  %v727_v25 = vpop.f32.mrf.mxu3 }
 0x122   : > { %v461_v22 = vadd.f32 %v451_v16, %v399_v23  ;;  %3878 = vmatmul.msk.f32.gmra.mxu0 %vm309_vm2, %v4737_v17  ;;  %3886 = vmatmul.msk.f32.gmra.mxu1 %vm309_vm2, %v4914_v9 }
 0x123   : > { %3896 = vmatmul.msk.f32.gmra.mxu2 %vm309_vm2, %v4681_v63 }
 0x124   : > { %v525_v28 = vadd.f32 %v515_v31, %v461_v22  ;;  %3936 = vmatmul.msk.f32.gmra.mxu3 %vm309_vm2, %v4835_v42  ;;  %v1883_v31 = vld [vmem:[%s4509_s30 + $0x8] sm:$0xc]  ;;  %v1986_v22 = vpop.permute.xlu0 %1985 }
 0x125   : > { %v1889_v53 = vrot.slane %v1883_v31, 2 }
 0x126   : > { %v454_v40 = vpop.f32.mrf.mxu2 }
 0x127   : > { %v351_v46 = vpop.f32.mrf.mxu0  ;;  %v401_v48 = vpop.f32.mrf.mxu1  ;;  %3970 = vmatpush.msk.msra.mxu3 %vm322_vm1, %v1889_v53 }
 0x128   : > { %v402_v50 = vadd.f32 %v401_v48, %v348_v8  ;;  %v730_v51 = vpop.f32.mrf.mxu3  ;;  %v1988_v8 = vpop.permute.xlu1 %1987 }
 0x12a   : > { %v462_v52 = vadd.f32 %v454_v40, %v402_v50  ;;  %3879 = vmatmul.msk.f32.gmra.mxu0 %vm309_vm2, %v4780_v33  ;;  %3887 = vmatmul.msk.f32.gmra.mxu1 %vm309_vm2, %v4931_v13  ;;  %v1989_v40 = vsel %vm1126_vm6, %v1986_v22, %v1988_v8  ;;  %v2037_v8 = vld [vmem:[%s4509_s30 + $0x8] sm:$0x30] }
 0x12b   : > { %3897 = vmatmul.msk.f32.gmra.mxu2 %vm309_vm2, %v4720_v10 }
 0x12c   : > { %v526_v54 = vadd.f32 %v518_v47, %v462_v52  ;;  %3937 = vmatmul.msk.f32.gmra.mxu3 %vm309_vm2, %v4870_v58 }
 0x12e   : > { %v457_v62 = vpop.f32.mrf.mxu2 }
 0x12f   : > { %v404_v5 = vpop.f32.mrf.mxu1  ;;  %v566_v7 = vpop.f32.mrf.mxu0 }
 0x130   : > { %v405_v19 = vadd.f32 %v404_v5, %v351_v46  ;;  %v733_v12 = vpop.f32.mrf.mxu3  ;;  %v578_v21 = vadd.f32 %v566_v7, %v524_v18  ;;  %v2276_v5 = vpop.permute.xlu0 %2275 }
 0x132   : > { %v463_v16 = vadd.f32 %v457_v62, %v405_v19  ;;  %3888 = vmatmul.msk.f32.gmra.mxu1 %vm309_vm2, %v4952_v20  ;;  %3908 = vmatmul.msk.f32.vlgmr.msrb.gmra.mxu0 %vm309_vm2, %v4609_v45 }
 0x133   : > { %3926 = vmatmul.msk.f32.vlgmr.msrb.gmra.mxu2 %vm309_vm2, %v4767_v15 }
 0x134   : > { %v527_v47 = vadd.f32 %v521_v1, %v463_v16  ;;  %3938 = vmatmul.msk.f32.gmra.mxu3 %vm309_vm2, %v4891_v2 }
 0x136   : > { %v675_v23 = vpop.f32.mrf.mxu2 }
 0x137   : > { %v569_v26 = vpop.f32.mrf.mxu0  ;;  %v618_v24 = vpop.f32.mrf.mxu1 }
 0x138   : > { %v630_v34 = vadd.f32 %v618_v24, %v578_v21  ;;  %v736_v46 = vpop.f32.mrf.mxu3  ;;  %v579_v18 = vadd.f32 %v569_v26, %v525_v28  ;;  %v2156_v28 = vpop.permute.xlu1 %2155 }
 0x13a   : > { %v687_v48 = vadd.f32 %v675_v23, %v630_v34  ;;  %3909 = vmatmul.msk.f32.gmra.mxu0 %vm309_vm2, %v4653_v59  ;;  %3917 = vmatmul.msk.f32.vlgmr.msrb.gmra.mxu1 %vm309_vm2, %v4574_v30 }
 0x13b   : > { %3927 = vmatmul.msk.f32.gmra.mxu2 %vm309_vm2, %v4802_v36  ;;  %3984 = vmatpush.msk.msrb.mxu1 %vm322_vm1, %v1989_v40 }
 0x13c   : > { %v5059_v1 = vadd.f32 %v727_v25, %v687_v48  ;;  %3971 = vmatmul.msk.f32.vlgmr.msra.gmra.mxu3 %vm309_vm2, %v4604_v44  ;;  %v2274_v25 = vpop.permute.xlu2 %2273  ;;  %v1878_v48 = vld [vmem:[%s4509_s30 + $0x8] sm:$0x3] }
 0x13d   : > { %3975 = vmatpush.msk.msrb.mxu0 %vm322_vm1, %v1878_v48 }
 0x13e   : > { %5914 = vst [vmem:[#allocation4_spill] sm:$0xff] %v5059_v1  ;;  %v678_v50 = vpop.f32.mrf.mxu2 }
 0x13f   : > { %v572_v52 = vpop.f32.mrf.mxu0  ;;  %v621_v31 = vpop.f32.mrf.mxu1 }
 0x140   : > { %v631_v53 = vadd.f32 %v621_v31, %v579_v18  ;;  %v991_v62 = vpop.f32.mrf.mxu3  ;;  %v580_v19 = vadd.f32 %v572_v52, %v526_v54  ;;  %v2091_v18 = vld [vmem:[%s4509_s30 + $0x8] sm:$0xc0]  ;;  %s3639_s30 = sld [smem:[#allocation3]] }
 0x141   : > { %v2097_v31 = vrot.slane %v2091_v18, 6 }
 0x142   : > { %v688_v7 = vadd.f32 %v678_v50, %v631_v53  ;;  %3910 = vmatmul.msk.f32.gmra.mxu0 %vm309_vm2, %v4691_v3  ;;  %3918 = vmatmul.msk.f32.gmra.mxu1 %vm309_vm2, %v4584_v32  ;;  %v2043_v3 = vrot.slane %v2037_v8, 4 }
 0x143   : > { %3928 = vmatmul.msk.f32.gmra.mxu2 %vm309_vm2, %v4830_v41  ;;  %4002 = vmatpush.msk.msrb.mxu3 %vm322_vm1, %v2097_v31 }
 0x144   : > { %v5069_v44 = vadd.f32 %v730_v51, %v688_v7  ;;  %3972 = vmatmul.msk.f32.gmra.mxu3 %vm309_vm2, %v4642_v56  ;;  %3993 = vmatpush.msk.msrb.mxu2 %vm322_vm1, %v2043_v3  ;;  %v2330_v56 = vpop.permute.xlu0 %2329  ;;  %v2158_v54 = vpop.permute.xlu2 %2157 }
 0x145   : > { %v2159_v7 = vsel %vm1126_vm6, %v2156_v28, %v2158_v54 }
 0x146   : > { %5915 = vst [vmem:[#allocation5_spill] sm:$0xff] %v5069_v44  ;;  %v681_v16 = vpop.f32.mrf.mxu2 }
 0x147   : > { %v575_v21 = vpop.f32.mrf.mxu0  ;;  %v624_v23 = vpop.f32.mrf.mxu1 }
 0x148   : > { %v632_v22 = vadd.f32 %v624_v23, %v580_v19  ;;  %v994_v26 = vpop.f32.mrf.mxu3  ;;  %v581_v34 = vadd.f32 %v575_v21, %v527_v47  ;;  %v2332_v19 = vpop.permute.xlu1 %2331 }
 0x14a   : > { %v689_v24 = vadd.f32 %v681_v16, %v632_v22  ;;  %3911 = vmatmul.msk.f32.gmra.mxu0 %vm309_vm2, %v4730_v14  ;;  %3919 = vmatmul.msk.f32.gmra.mxu1 %vm309_vm2, %v4593_v37  ;;  %v2277_v16 = vsel %vm1756_vm7, %v2274_v25, %v2276_v5 }
 0x14b   : > { %3929 = vmatmul.msk.f32.gmra.mxu2 %vm309_vm2, %v4865_v55 }
 0x14c   : > { %v5081_v51 = vadd.f32 %v733_v12, %v689_v24  ;;  %3973 = vmatmul.msk.f32.gmra.mxu3 %vm309_vm2, %v4681_v63  ;;  %v2334_v63 = vsel %vm2333_vm9, %v2330_v56, %v2332_v19  ;;  %v2214_v5 = vpop.permute.xlu0 %2213  ;;  %v2212_v8 = vpop.permute.xlu2 %2211 }
 0x14d   : > { %4038 = vmatpush.msk.msra.mxu3 %vm322_vm1, %v2334_v63  ;;  %v2215_v3 = vsel %vm1756_vm7, %v2212_v8, %v2214_v5 }
 0x14e   : > { %v684_v40 = vpop.f32.mrf.mxu2 }
 0x14f   : > { %v627_v50 = vpop.f32.mrf.mxu1  ;;  %v5087_v52 = vpop.f32.mrf.mxu0 }
 0x150   : > { %5916 = vst [vmem:[#allocation6_spill] sm:$0xff] %v5087_v52  ;;  %v633_v53 = vadd.f32 %v627_v50, %v581_v34  ;;  %v997_v12 = vpop.f32.mrf.mxu3 }
 0x152   : > { %v690_v47 = vadd.f32 %v684_v40, %v633_v53  ;;  %3920 = vmatmul.msk.f32.gmra.mxu1 %vm309_vm2, %v4619_v49  ;;  %3944 = vmatmul.msk.f32.vlgmr.msra.gmra.mxu0 %vm309_vm2, %v4773_v29 }
 0x153   : > { %3962 = vmatmul.msk.f32.vlgmr.msra.gmra.mxu2 %vm309_vm2, %v4896_v4  ;;  %4011 = vmatpush.msk.msra.mxu0 %vm322_vm1, %v2159_v7 }
 0x154   : > { %v5101_v28 = vadd.f32 %v736_v46, %v690_v47  ;;  %3974 = vmatmul.msk.f32.gmra.mxu3 %vm309_vm2, %v4720_v10  ;;  %4029 = vmatpush.msk.msra.mxu2 %vm322_vm1, %v2277_v16  ;;  %v4016_v47 = vld [vmem:[%s5897_s1 + $0xc0] sm:$0xff] }
 0x156   : > { %5917 = vst [vmem:[#allocation7_spill] sm:$0xff] %v5101_v28  ;;  %v938_v25 = vpop.f32.mrf.mxu2 }
 0x157   : > { %v5107_v21 = vpop.f32.mrf.mxu0  ;;  %v886_v29 = vpop.f32.mrf.mxu1 }
 0x158   : > { %5918 = vst [vmem:[#allocation8_spill] sm:$0xff] %v5107_v21  ;;  %v939_v23 = vadd.f32 %v938_v25, %v886_v29  ;;  %v1000_v22 = vpop.f32.mrf.mxu3  ;;  %v4018_v29 = vld [vmem:[%s5897_s1 + $0xd0] sm:$0xff] }
 0x15a   : > { %v5110_v24 = vadd.f32 %v991_v62, %v939_v23  ;;  %3945 = vmatmul.msk.f32.gmra.mxu0 %vm309_vm2, %v4814_v39  ;;  %3953 = vmatmul.msk.f32.vlgmr.msra.gmra.mxu1 %vm309_vm2, %v4659_v60 }
 0x15b   : > { %3963 = vmatmul.msk.f32.gmra.mxu2 %vm309_vm2, %v4914_v9  ;;  %4020 = vmatpush.msk.msra.mxu1 %vm322_vm1, %v2215_v3 }
 0x15c   : > { %4003 = vmatmul.msk.f32.vlgmr.msrb.gmra.mxu3 %vm309_vm2, %v4767_v15 }
 0x15e   : > { %v941_v10 = vpop.f32.mrf.mxu2 }
 0x15f   : > { %v5121_v46 = vpop.f32.mrf.mxu0  ;;  %v889_v56 = vpop.f32.mrf.mxu1 }
 0x160   : > { %v942_v62 = vadd.f32 %v941_v10, %v889_v56  ;;  %v5123_v54 = vpop.f32.mrf.mxu3 }
 0x162   : > { %v5125_v34 = vadd.f32 %v994_v26, %v942_v62  ;;  %3946 = vmatmul.msk.f32.gmra.mxu0 %vm309_vm2, %v4842_v43  ;;  %3954 = vmatmul.msk.f32.gmra.mxu1 %vm309_vm2, %v4699_v6 }
 0x163   : > { %3964 = vmatmul.msk.f32.gmra.mxu2 %vm309_vm2, %v4931_v13 }
 0x164   : > { %5919 = vst [vmem:[#allocation9_spill] sm:$0xff] %v5125_v34  ;;  %4004 = vmatmul.msk.f32.gmra.mxu3 %vm309_vm2, %v4802_v36 }
 0x166   : > { %v944_v15 = vpop.f32.mrf.mxu2 }
 0x167   : > { %v5135_v39 = vpop.f32.mrf.mxu0  ;;  %v892_v40 = vpop.f32.mrf.mxu1 }
 0x168   : > { %5920 = vst [vmem:[#allocation10_spill] sm:$0xff] %v5135_v39  ;;  %v945_v48 = vadd.f32 %v944_v15, %v892_v40  ;;  %v5137_v18 = vpop.f32.mrf.mxu3 }
 0x169   : > { %5921 = vst [vmem:[#allocation11_spill] sm:$0xff] %v5137_v18  ;;  %v5278_v18 = vpop.permute.xlu1 %812 }
 0x16a   : > { %v5139_v26 = vadd.f32 %v997_v12, %v945_v48  ;;  %3947 = vmatmul.msk.f32.gmra.mxu0 %vm309_vm2, %v4876_v61  ;;  %3955 = vmatmul.msk.f32.gmra.mxu1 %vm309_vm2, %v4737_v17 }
 0x16b   : > { %3965 = vmatmul.msk.f32.gmra.mxu2 %vm309_vm2, %v4952_v20 }
 0x16c   : > { %4005 = vmatmul.msk.f32.gmra.mxu3 %vm309_vm2, %v4830_v41 }
 0x16e   : > { %v947_v36 = vpop.f32.mrf.mxu2 }
 0x16f   : > { %v895_v43 = vpop.f32.mrf.mxu1  ;;  %v5149_v50 = vpop.f32.mrf.mxu0 }
 0x170   : > { %v948_v31 = vadd.f32 %v947_v36, %v895_v43  ;;  %v5151_v53 = vpop.f32.mrf.mxu3 }
 0x171   : > { %v5283_v44 = vpop.permute.xlu1 %797 }
 0x172   : > { %v5153_v7 = vadd.f32 %v1000_v22, %v948_v31  ;;  %3956 = vmatmul.msk.f32.gmra.mxu1 %vm309_vm2, %v4780_v33  ;;  %3976 = vmatmul.msk.f32.vlgmr.msrb.gmra.mxu0 %vm309_vm2, %v4647_v57  ;;  %v4019_v22 = vld [vmem:[%s5897_s1 + $0xd8] sm:$0xff] }
 0x173   : > { %3994 = vmatmul.msk.f32.vlgmr.msrb.gmra.mxu2 %vm309_vm2, %v4574_v30 }
 0x174   : > { %4006 = vmatmul.msk.f32.gmra.mxu3 %vm309_vm2, %v4865_v55 }
 0x176   : > { %v5163_v41 = vpop.f32.mrf.mxu2 }
 0x177   : > { %v5165_v61 = vpop.f32.mrf.mxu0  ;;  %v5167_v12 = vpop.f32.mrf.mxu1 }
 0x178   : > { %5922 = vst [vmem:[#allocation12_spill] sm:$0xff] %v5165_v61  ;;  %v5169_v19 = vpop.f32.mrf.mxu3 }
 0x17a   : > { %3977 = vmatmul.msk.f32.gmra.mxu0 %vm309_vm2, %v4686_v0  ;;  %3985 = vmatmul.msk.f32.vlgmr.msrb.gmra.mxu1 %vm309_vm2, %v4609_v45 }
 0x17b   : > { %3995 = vmatmul.msk.f32.gmra.mxu2 %vm309_vm2, %v4584_v32 }
 0x17c   : > { %4039 = vmatmul.msk.f32.vlgmr.msra.gmra.mxu3 %vm309_vm2, %v4896_v4  ;;  %v3982_v4 = vld [vmem:[%s5897_s1 + $0x50] sm:$0xff] }
 0x17e   : > { %v5179_v30 = vpop.f32.mrf.mxu2 }
 0x17f   : > { %5923 = vst [vmem:[#allocation13_spill] sm:$0xff] %v5179_v30  ;;  %v5181_v57 = vpop.f32.mrf.mxu0  ;;  %v5183_v55 = vpop.f32.mrf.mxu1 }
 0x180   : > { %5924 = vst [vmem:[#allocation14_spill] sm:$0xff] %v5183_v55  ;;  %v5185_v16 = vpop.f32.mrf.mxu3 }
 0x182   : > { %3978 = vmatmul.msk.f32.gmra.mxu0 %vm309_vm2, %v4725_v11  ;;  %3986 = vmatmul.msk.f32.gmra.mxu1 %vm309_vm2, %v4653_v59 }
 0x183   : > { %3996 = vmatmul.msk.f32.gmra.mxu2 %vm309_vm2, %v4593_v37 }
 0x184   : > { %4040 = vmatmul.msk.f32.gmra.mxu3 %vm309_vm2, %v4914_v9 }
 0x186   : > { %v5195_v32 = vpop.f32.mrf.mxu2 }
 0x187   : > { %v5197_v45 = vpop.f32.mrf.mxu0  ;;  %v5199_v0 = vpop.f32.mrf.mxu1 }
 0x188   : > { %v1454_v11 = vpop.f32.mrf.mxu3 }
 0x18a   : > { %3979 = vmatmul.msk.f32.gmra.mxu0 %vm309_vm2, %v4762_v27  ;;  %3987 = vmatmul.msk.f32.gmra.mxu1 %vm309_vm2, %v3982_v4 }
 0x18b   : > { %3997 = vmatmul.msk.f32.gmra.mxu2 %vm309_vm2, %v4619_v49 }
 0x18c   : > { %4041 = vmatmul.msk.f32.gmra.mxu3 %vm309_vm2, %v4931_v13 }
 0x18e   : > { %v5211_v37 = vpop.f32.mrf.mxu2 }
 0x18f   : > { %v5213_v59 = vpop.f32.mrf.mxu1  ;;  %v5215_v9 = vpop.f32.mrf.mxu0 }
 0x190   : > { %v5217_v63 = vpop.f32.mrf.mxu3 }
 0x192   : > { %3988 = vmatmul.msk.f32.gmra.mxu1 %vm309_vm2, %v4730_v14  ;;  %4012 = vmatmul.msk.f32.vlgmr.msra.gmra.mxu0 %vm309_vm2, %v4807_v38 }
 0x193   : > { %4030 = vmatmul.msk.f32.vlgmr.msra.gmra.mxu2 %vm309_vm2, %v4659_v60 }
 0x194   : > { %4042 = vmatmul.msk.f32.gmra.mxu3 %vm309_vm2, %v4952_v20  ;;  %v4017_v20 = vld [vmem:[%s5897_s1 + $0xc8] sm:$0xff] }
 0x196   : > { %v1399_v49 = vpop.f32.mrf.mxu2 }
 0x197   : > { %v5227_v27 = vpop.f32.mrf.mxu0  ;;  %v5229_v13 = vpop.f32.mrf.mxu1 }
 0x198   : > { %5925 = vst [vmem:[#allocation15_spill] sm:$0xff] %v5227_v27  ;;  %v5234_v5 = vpop.f32.mrf.mxu3 }
 0x19a   : > { %4013 = vmatmul.msk.f32.gmra.mxu0 %vm309_vm2, %v4835_v42  ;;  %4021 = vmatmul.msk.f32.vlgmr.msra.gmra.mxu1 %vm309_vm2, %v4016_v47  ;;  %v1452_v47 = vadd.f32 %v5185_v16, %v1399_v49 }
 0x19b   : > { %4031 = vmatmul.msk.f32.gmra.mxu2 %vm309_vm2, %v4699_v6 }
 0x19e   : > { %v1402_v60 = vpop.f32.mrf.mxu2 }
 0x19f   : > { %v5241_v14 = vpop.f32.mrf.mxu0  ;;  %v5243_v38 = vpop.f32.mrf.mxu1 }
 0x1a0   : > { %5926 = vst [vmem:[#allocation16_spill] sm:$0xff] %v5243_v38  ;;  %v1665_v25 = vpop.f32.mrf.mxu3  ;;  %v1455_v38 = vadd.f32 %v1454_v11, %v1402_v60 }
 0x1a2   : > { %4014 = vmatmul.msk.f32.gmra.mxu0 %vm309_vm2, %v4870_v58  ;;  %4022 = vmatmul.msk.f32.gmra.mxu1 %vm309_vm2, %v4017_v20 }
 0x1a3   : > { %4032 = vmatmul.msk.f32.gmra.mxu2 %vm309_vm2, %v4737_v17 }
 0x1a6   : > { %v1405_v42 = vpop.f32.mrf.mxu2 }
 0x1a7   : > { %v5253_v6 = vpop.f32.mrf.mxu0  ;;  %v5255_v8 = vpop.f32.mrf.mxu1  ;;  %v1458_v49 = vadd.f32 %v5217_v63, %v1405_v42 }
 0x1a8   : > { %v1668_v23 = vpop.f32.mrf.mxu3 }
 0x1aa   : > { %4015 = vmatmul.msk.f32.gmra.mxu0 %vm309_vm2, %v4891_v2  ;;  %4023 = vmatmul.msk.f32.gmra.mxu1 %vm309_vm2, %v4018_v29 }
 0x1ab   : > { %4033 = vmatmul.msk.f32.gmra.mxu2 %vm309_vm2, %v4780_v33 }
 0x1ae   : > { %v1408_v58 = vpop.f32.mrf.mxu2 }
 0x1af   : > { %v5265_v17 = vpop.f32.mrf.mxu1  ;;  %v1498_v3 = vpop.f32.mrf.mxu0 }
 0x1b0   : > { %v1671_v10 = vpop.f32.mrf.mxu3  ;;  %v1510_v20 = vadd.f32 %v1498_v3, %v1452_v47 }
 0x1b2   : > { %4024 = vmatmul.msk.f32.gmra.mxu1 %vm309_vm2, %v4019_v22 }
 0x1b6   : > { %v1614_v56 = vpop.f32.mrf.mxu2 }
 0x1b7   : > { %v1501_v62 = vpop.f32.mrf.mxu0  ;;  %v1560_v15 = vpop.f32.mrf.mxu1 }
 0x1b8   : > { %v5271_v2 = vpop.f32.mrf.mxu3  ;;  %v1572_v29 = vadd.f32 %v1560_v15, %v1510_v20  ;;  %v1511_v30 = vadd.f32 %v1501_v62, %v1455_v38 }
 0x1ba   : > { %v1626_v27 = vadd.f32 %v1614_v56, %v1572_v29 }
 0x1bc   : > { %v1677_v39 = vadd.f32 %v1665_v25, %v1626_v27 }
 0x1be   : > { %v1617_v40 = vpop.f32.mrf.mxu2 }
 0x1bf   : > { %v1504_v48 = vpop.f32.mrf.mxu0  ;;  %v1563_v36 = vpop.f32.mrf.mxu1 }
 0x1c0   : > { %v5273_v33 = vpop.f32.mrf.mxu3  ;;  %v1573_v28 = vadd.f32 %v1563_v36, %v1511_v30  ;;  %v1512_v47 = vadd.f32 %v1504_v48, %v1458_v49 }
 0x1c2   : > { %v1627_v3 = vadd.f32 %v1617_v40, %v1573_v28  ;;  %v1461_v28 = vadd.f32 %v5234_v5, %v1408_v58  ;;  %v5906_v40 = vmov 0.0  }
 0x1c4   : > { %v1678_v11 = vadd.f32 %v1668_v23, %v1627_v3 }
 0x1c6   : > { %v1620_v43 = vpop.f32.mrf.mxu2 }
 0x1c7   : > { %v1507_v31 = vpop.f32.mrf.mxu0  ;;  %v1566_v4 = vpop.f32.mrf.mxu1 }
 0x1c8   : > { %v5276_v35 = vpop.f32.mrf.mxu3  ;;  %v1574_v60 = vadd.f32 %v1566_v4, %v1512_v47  ;;  %v1513_v56 = vadd.f32 %v1507_v31, %v1461_v28 }
 0x1ce   : > { %v1623_v22 = vpop.f32.mrf.mxu2 }
 0x1cf   : > { %v1569_v52 = vpop.f32.mrf.mxu1  ;;  %v1728_v1 = vpop.f32.mrf.mxu0 }
 0x1d0   : > { %v1740_v55 = vadd.f32 %v1728_v1, %v1677_v39  ;;  %v5280_v34 = vpop.f32.mrf.mxu3  ;;  %v5289_v1 = vld [vmem:[%s5902_s6] ss:$0 sm:$0xff]  ;;  %v1575_v4 = vadd.f32 %v1569_v52, %v1513_v56 }
 0x1d2   : > { %v1629_v49 = vadd.f32 %v1623_v22, %v1575_v4 }
 0x1d6   : > { %v1845_v61 = vpop.f32.mrf.mxu2 }
 0x1d7   : > { %v1731_v21 = vpop.f32.mrf.mxu0  ;;  %v1789_v16 = vpop.f32.mrf.mxu1 }
 0x1d8   : > { %v1801_v15 = vadd.f32 %v1789_v16, %v1740_v55  ;;  %v1741_v39 = vadd.f32 %v1731_v21, %v1678_v11  ;;  %v1628_v55 = vadd.f32 %v1620_v43, %v1574_v60  ;;  %v5295_v23 = vpop.f32.mrf.mxu3  ;;  %v5301_v21 = vpop.permute.xlu0 %802  ;;  %v1680_v11 = vadd.f32 %v5271_v2, %v1629_v49 }
 0x1da   : > { %v1857_v20 = vadd.f32 %v1845_v61, %v1801_v15  ;;  %v1679_v36 = vadd.f32 %v1671_v10, %v1628_v55 }
 0x1dc   : > { %v1861_v38 = vadd.f32 %v1857_v20, %v5283_v44  ;;  %v5311_v20 = vpop.permute.xlu2 %807 }
 0x1de   : > { %v1865_v30 = vmax.f32 %v1861_v38, 0.0  ;;  %v1848_v27 = vpop.f32.mrf.mxu2 }
 0x1df   : > { %v1734_v25 = vpop.f32.mrf.mxu0  ;;  %v1792_v63 = vpop.f32.mrf.mxu1 }
 0x1e0   : > { %v5293_v61 = vmul.f32 %v5289_v1, %v1865_v30  ;;  %v1802_v42 = vadd.f32 %v1792_v63, %v1741_v39  ;;  %v1742_v58 = vadd.f32 %v1734_v25, %v1679_v36  ;;  %v2129_v52 = vpop.f32.mrf.mxu3 }
 0x1e2   : > { %5927 = vst [vmem:[#allocation17_spill] sm:$0xff] %v5293_v61  ;;  %v1858_v62 = vadd.f32 %v1848_v27, %v1802_v42  ;;  %v5299_v48 = vpack.i.bf16 %v5293_v61, %v5906_v40 }
 0x1e4   : > { %v1862_v5 = vadd.f32 %v1858_v62, %v5301_v21  ;;  %4193 = vrot.lane.b32.xlu0 %v5299_v48, %s4442_s8 }
 0x1e6   : > { %v1866_v43 = vmax.f32 %v1862_v5, 0.0  ;;  %v1851_v29 = vpop.f32.mrf.mxu2 }
 0x1e7   : > { %v1737_v16 = vpop.f32.mrf.mxu0  ;;  %v1795_v31 = vpop.f32.mrf.mxu1 }
 0x1e8   : > { %v5307_v3 = vmul.f32 %v5289_v1, %v1866_v43  ;;  %v1803_v15 = vadd.f32 %v1795_v31, %v1742_v58  ;;  %v1743_v38 = vadd.f32 %v1737_v16, %v1680_v11  ;;  %v2132_v2 = vpop.f32.mrf.mxu3 }
 0x1ea   : > { %5928 = vst [vmem:[#allocation18_spill] sm:$0xff] %v5307_v3  ;;  %v1859_v47 = vadd.f32 %v1851_v29, %v1803_v15  ;;  %v4197_v10 = vpack.i.bf16 %v5307_v3, %v5906_v40 }
 0x1ec   : > { %v1863_v60 = vadd.f32 %v1859_v47, %v5311_v20  ;;  %4198 = vrot.lane.b32.xlu2 %v4197_v10, %s4442_s8 }
 0x1ee   : > { %v1867_v39 = vmax.f32 %v1863_v60, 0.0  ;;  %v1854_v22 = vpop.f32.mrf.mxu2 }
 0x1ef   : > { %v1798_v30 = vpop.f32.mrf.mxu1  ;;  %v1965_v27 = vpop.f32.mrf.mxu0 }
 0x1f0   : > { %v5317_v25 = vmul.f32 %v5289_v1, %v1867_v39  ;;  %v1804_v63 = vadd.f32 %v1798_v30, %v1743_v38  ;;  %v2135_v29 = vpop.f32.mrf.mxu3  ;;  %v1966_v11 = vadd.f32 %v1965_v27, %v5273_v33 }
 0x1f2   : > { %5929 = vst [vmem:[#allocation19_spill] sm:$0xff] %v5317_v25  ;;  %v1860_v28 = vadd.f32 %v1854_v22, %v1804_v63  ;;  %v4207_v55 = vpack.i.bf16 %v5317_v25, %v5906_v40 }
 0x1f4   : > { %v1864_v42 = vadd.f32 %v1860_v28, %v5278_v18  ;;  %4208 = vrot.lane.b32.xlu1 %v4207_v55, %s4442_s8  ;;  %4203 = vrot.lane.b32.xlu2 %v4197_v10, %s4445_s11 }
 0x1f6   : > { %v1868_v56 = vmax.f32 %v1864_v42, 0.0  ;;  %v2075_v62 = vpop.f32.mrf.mxu2 }
 0x1f7   : > { %v1968_v36 = vpop.f32.mrf.mxu0  ;;  %v2021_v4 = vpop.f32.mrf.mxu1 }
 0x1f8   : > { %v5325_v5 = vmul.f32 %v5289_v1, %v1868_v56  ;;  %v5332_v10 = vpop.f32.mrf.mxu3  ;;  %v2033_v60 = vadd.f32 %v2021_v4, %v1966_v11  ;;  %v1969_v63 = vadd.f32 %v1968_v36, %v5276_v35  ;;  %v1059_v56 = vadd.f32 %v5197_v45, %v5153_v7 }
 0x1fa   : > { %v4222_v58 = vpack.i.bf16 %v5325_v5, %v5906_v40  ;;  %v2087_v30 = vadd.f32 %v2075_v62, %v2033_v60  ;;  %v1113_v3 = vadd.f32 %v5213_v59, %v1059_v56 }
 0x1fc   : > { %4213 = vrot.lane.b32.xlu1 %v4207_v55, %s4445_s11  ;;  %4223 = vrot.lane.b32.xlu0 %v4222_v58, %s4445_s11  ;;  %v2141_v55 = vadd.f32 %v2129_v52, %v2087_v30  ;;  %v1174_v62 = vadd.f32 %v5211_v37, %v1113_v3 }
 0x1fe   : > { %v2078_v43 = vpop.f32.mrf.mxu2 }
 0x1ff   : > { %v1971_v16 = vpop.f32.mrf.mxu0  ;;  %v2024_v31 = vpop.f32.mrf.mxu1 }
 0x200   : > { %v2366_v28 = vpop.f32.mrf.mxu3  ;;  %v2034_v42 = vadd.f32 %v2024_v31, %v1969_v63  ;;  %v1972_v4 = vadd.f32 %v1971_v16, %v5280_v34 }
 0x202   : > { %v2088_v33 = vadd.f32 %v2078_v43, %v2034_v42 }
 0x204   : > { %4218 = vrot.lane.b32.xlu1 %v4222_v58, %s4442_s8  ;;  %v2142_v35 = vadd.f32 %v2132_v2, %v2088_v33  ;;  %v793_v33 = vadd.f32 %v5121_v46, %v5081_v51 }
 0x206   : > { %v2081_v49 = vpop.f32.mrf.mxu2  ;;  %v817_v51 = vadd.f32 %v5311_v20, %v793_v33  ;;  %v5937_v33 = vld [vmem:[#allocation10_spill] sm:$0xff] }
 0x207   : > { %v1974_v15 = vpop.f32.mrf.mxu0  ;;  %v2027_v47 = vpop.f32.mrf.mxu1 }
 0x208   : > { %v2035_v36 = vadd.f32 %v2027_v47, %v1972_v4  ;;  %v2369_v31 = vpop.f32.mrf.mxu3 }
 0x20a   : > { %v2089_v30 = vadd.f32 %v2081_v49, %v2035_v36  ;;  %v1056_v49 = vadd.f32 %v5149_v50, %v5110_v24 }
 0x20c   : > { %v2143_v2 = vadd.f32 %v2135_v29, %v2089_v30  ;;  %v1110_v29 = vadd.f32 %v5167_v12, %v1056_v49 }
 0x20e   : > { %v2084_v38 = vpop.f32.mrf.mxu2 }
 0x20f   : > { %v2030_v39 = vpop.f32.mrf.mxu1  ;;  %v2191_v22 = vpop.f32.mrf.mxu0 }
 0x210   : > { %v2203_v58 = vadd.f32 %v2191_v22, %v2141_v55  ;;  %v1225_v22 = vadd.f32 %v5169_v19, %v1174_v62  ;;  %v2372_v56 = vpop.f32.mrf.mxu3 }
 0x216   : > { %v2309_v40 = vpop.f32.mrf.mxu2 }
 0x217   : > { %v2194_v61 = vpop.f32.mrf.mxu0  ;;  %v2247_v25 = vpop.f32.mrf.mxu1 }
 0x218   : > { %v2259_v27 = vadd.f32 %v2247_v25, %v2203_v58  ;;  %v2204_v60 = vadd.f32 %v2194_v61, %v2142_v35  ;;  %v1276_v25 = vadd.f32 %v5253_v6, %v1225_v22  ;;  %v1058_v6 = vadd.f32 %v5181_v57, %v5139_v26  ;;  %v2375_v22 = vpop.f32.mrf.mxu3 }
 0x21a   : > { %v2321_v11 = vadd.f32 %v2309_v40, %v2259_v27  ;;  %v1975_v40 = vadd.f32 %v1974_v15, %v5295_v23  ;;  %v1338_v61 = vadd.f32 %v5265_v17, %v1276_v25  ;;  %v1171_v27 = vadd.f32 %v5163_v41, %v1110_v29 }
 0x21c   : > { %v2378_v52 = vadd.f32 %v2366_v28, %v2321_v11  ;;  %v2036_v16 = vadd.f32 %v2030_v39, %v1975_v40  ;;  %v5930_v28 = vmov 0.0   ;;  %v1112_v39 = vadd.f32 %v5199_v0, %v1058_v6 }
 0x21d   : > { %v1342_v55 = vadd.f32 %v1338_v61, %v5278_v18  ;;  %v1222_v46 = vadd.f32 %v5123_v54, %v1171_v27  ;;  %v5931_v61 = vld [vmem:[#allocation5_spill] sm:$0xff] }
 0x21e   : > { %v2382_v7 = vadd.f32 %v2378_v52, %v5283_v44  ;;  %v2312_v45 = vpop.f32.mrf.mxu2  ;;  %v2090_v58 = vadd.f32 %v2084_v38, %v2036_v16  ;;  %v1173_v12 = vadd.f32 %v5195_v32, %v1112_v39 }
 0x21f   : > { %v2250_v59 = vpop.f32.mrf.mxu1  ;;  %v2197_v34 = vpop.f32.mrf.mxu0  ;;  %v1346_v4 = vmax.f32 %v1342_v55, 0.0 }
 0x220   : > { %v2386_v63 = vmax.f32 %v2382_v7, 0.0  ;;  %v2260_v43 = vadd.f32 %v2250_v59, %v2204_v60  ;;  %v2205_v23 = vadd.f32 %v2197_v34, %v2143_v2  ;;  %v2144_v11 = vadd.f32 %v5332_v10, %v2090_v58  ;;  %v5932_v2 = vld [vmem:[#allocation8_spill] sm:$0xff] }
 0x221   : > { %v1224_v41 = vadd.f32 %v5151_v53, %v1173_v12  ;;  %v5384_v52 = vmul.f32 %v5289_v1, %v1346_v4  ;;  %v1273_v7 = vadd.f32 %v5215_v9, %v1222_v46  ;;  %v792_v16 = vadd.f32 %v5932_v2, %v5931_v61  ;;  %v5938_v12 = vld [vmem:[#allocation13_spill] sm:$0xff] }
 0x222   : > { %v5346_v37 = vmul.f32 %v5289_v1, %v2386_v63  ;;  %v2322_v3 = vadd.f32 %v2312_v45, %v2260_v43  ;;  %v821_v63 = vmax.f32 %v817_v51, 0.0  ;;  %v4312_v46 = vpack.i.bf16 0.0, %v5325_v5 }
 0x223   : > { %v1275_v45 = vadd.f32 %v5241_v14, %v1224_v41  ;;  %v1335_v54 = vadd.f32 %v5229_v13, %v1273_v7  ;;  %v4272_v25 = vpack.i.bf16 %v5384_v52, %v5930_v28  ;;  %v816_v29 = vadd.f32 %v5301_v21, %v792_v16  ;;  %v5942_v7 = vld [vmem:[#allocation19_spill] sm:$0xff] }
 0x224   : > { %v2379_v47 = vadd.f32 %v2369_v31, %v2322_v3  ;;  %v5351_v19 = vpack.i.bf16 %v5346_v37, %v5930_v28  ;;  %v5404_v14 = vmul.f32 %v5289_v1, %v821_v63 }
 0x225   : > { %v1337_v53 = vadd.f32 %v5255_v8, %v1275_v45  ;;  %v1339_v13 = vadd.f32 %v1335_v54, %v5283_v44  ;;  %v820_v58 = vmax.f32 %v816_v29, 0.0  ;;  %v4322_v45 = vpack.i.bf16 0.0, %v5942_v7 }
 0x226   : > { %v2383_v15 = vadd.f32 %v2379_v47, %v5301_v21  ;;  %4228 = vrot.lane.b32.xlu1 %v5351_v19, %s4442_s8  ;;  %v2315_v17 = vpop.f32.mrf.mxu2  ;;  %v5416_v47 = vpack.i.bf16 0.0, %v5404_v14 }
 0x227   : > { %v2253_v42 = vpop.f32.mrf.mxu1  ;;  %v2200_v0 = vpop.f32.mrf.mxu0  ;;  %v1341_v8 = vadd.f32 %v1337_v53, %v5311_v20  ;;  %v1343_v49 = vmax.f32 %v1339_v13, 0.0 }
 0x228   : > { %v2387_v24 = vmax.f32 %v2383_v15, 0.0  ;;  %v2261_v50 = vadd.f32 %v2253_v42, %v2205_v23  ;;  %v2206_v35 = vadd.f32 %v2200_v0, %v2144_v11  ;;  %v5934_v15 = vld [vmem:[#allocation12_spill] sm:$0xff]  ;;  %v5935_v42 = vld [vmem:[#allocation14_spill] sm:$0xff]  ;;  %v5446_v0 = vmul.f32 %v5289_v1, %v820_v58 }
 0x229   : > { %v1345_v6 = vmax.f32 %v1341_v8, 0.0  ;;  %v5429_v39 = vmul.f32 %v5289_v1, %v1343_v49  ;;  %v5946_v58 = vld [vmem:[#allocation18_spill] sm:$0xff] }
 0x22a   : > { %v5364_v26 = vmul.f32 %v5289_v1, %v2387_v24  ;;  %v2323_v57 = vadd.f32 %v2315_v17, %v2261_v50  ;;  %v5453_v41 = vpack.i.bf16 0.0, %v5446_v0 }
 0x22b   : > { %v5432_v55 = vmul.f32 %v5289_v1, %v1345_v6  ;;  %v4302_v24 = vpack.i.bf16 %v5429_v39, %v5930_v28 }
 0x22c   : > { %v2380_v62 = vadd.f32 %v2372_v56, %v2323_v57  ;;  %v5373_v38 = vpack.i.bf16 %v5364_v26, %v5930_v28  ;;  %v5936_v57 = vld [vmem:[#allocation7_spill] sm:$0xff] }
 0x22d   : > { %v4282_v50 = vpack.i.bf16 %v5432_v55, %v5930_v28  ;;  %v794_v27 = vadd.f32 %v5937_v33, %v5936_v57 }
 0x22e   : > { %v2384_v36 = vadd.f32 %v2380_v62, %v5311_v20  ;;  %4238 = vrot.lane.b32.xlu1 %v5373_v38, %s4444_s10  ;;  %4233 = vrot.lane.b32.xlu0 %v5373_v38, %s4442_s8  ;;  %v2318_v10 = vpop.f32.mrf.mxu2  ;;  %v5933_v20 = vld [vmem:[#allocation9_spill] sm:$0xff]  ;;  %v5939_v62 = vld [vmem:[#allocation11_spill] sm:$0xff] }
 0x22f   : > { %v2256_v32 = vpop.f32.mrf.mxu1  ;;  %v1057_v17 = vadd.f32 %v5934_v15, %v5933_v20  ;;  %v818_v11 = vadd.f32 %v5278_v18, %v794_v27 }
 0x230   : > { %v2388_v31 = vmax.f32 %v2384_v36, 0.0  ;;  %v2262_v60 = vadd.f32 %v2256_v32, %v2206_v35  ;;  %v5940_v36 = vld [vmem:[#allocation15_spill] sm:$0xff] }
 0x231   : > { %v1111_v56 = vadd.f32 %v5935_v42, %v1057_v17  ;;  %v822_v32 = vmax.f32 %v818_v11, 0.0 }
 0x232   : > { %v5389_v59 = vmul.f32 %v5289_v1, %v2388_v31  ;;  %v2324_v30 = vadd.f32 %v2318_v10, %v2262_v60  ;;  %v5941_v10 = vld [vmem:[#allocation16_spill] sm:$0xff] }
 0x233   : > { %v1172_v4 = vadd.f32 %v5938_v12, %v1111_v56 }
 0x234   : > { %v2381_v43 = vadd.f32 %v2375_v22, %v2324_v30  ;;  %v5397_v34 = vpack.i.bf16 %v5389_v59, %v5930_v28  ;;  %v5943_v22 = vld [vmem:[#allocation4_spill] sm:$0xff]  ;;  %v5944_v30 = vld [vmem:[#allocation6_spill] sm:$0xff] }
 0x235   : > { %v1223_v35 = vadd.f32 %v5939_v62, %v1172_v4  ;;  %v791_v63 = vadd.f32 %v5944_v30, %v5943_v22  ;;  %v4045_v30 = vld [vmem:[%s5899_s3 + $0x30] sm:$0xff] }
 0x236   : > { %v2385_v9 = vadd.f32 %v2381_v43, %v5278_v18  ;;  %4273 = vrot.lane.b32.xlu1 %v4272_v25, %s4443_s9  ;;  %4248 = vrot.lane.b32.xlu0 %v5397_v34, %s4444_s10  ;;  %v5462_v18 = vmul.f32 %v5289_v1, %v822_v32  ;;  %v5945_v43 = vld [vmem:[#allocation17_spill] sm:$0xff] }
 0x237   : > { %4243 = vrot.lane.b32.xlu2 %v5397_v34, %s4442_s8  ;;  %v1274_v51 = vadd.f32 %v5940_v36, %v1223_v35  ;;  %v4342_v25 = vpack.i.bf16 0.0, %v5945_v43 }
 0x238   : > { %v2389_v40 = vmax.f32 %v2385_v9, 0.0  ;;  %v5469_v53 = vpack.i.bf16 0.0, %v5462_v18 }
 0x239   : > { %v1336_v31 = vadd.f32 %v5941_v10, %v1274_v51  ;;  %v4043_v10 = vld [vmem:[%s5899_s3 + $0x20] sm:$0xff] }
 0x23a   : > { %v5411_v3 = vmul.f32 %v5289_v1, %v2389_v40 }
 0x23b   : > { %v1340_v60 = vadd.f32 %v1336_v31, %v5301_v21  ;;  %v4402_v31 = vpack.i.bf16 0.0, %v5429_v39 }
 0x23c   : > { %v4252_v23 = vpack.i.bf16 %v5411_v3, %v5930_v28 }
 0x23d   : > { %v1344_v54 = vmax.f32 %v1340_v60, 0.0  ;;  %v4044_v60 = vld [vmem:[%s5899_s3 + $0x28] sm:$0xff] }
 0x23e   : > { %4288 = vrot.lane.b32.xlu1 %v5416_v47, %s4446_s12  ;;  %4268 = vrot.lane.b32.xlu0 %v5351_v19, %s4444_s10 }
 0x23f   : > { %4253 = vrot.lane.b32.xlu2 %v4252_v23, %s4442_s8  ;;  %v5478_v21 = vmul.f32 %v5289_v1, %v1344_v54 }
 0x241   : > { %v4292_v13 = vpack.i.bf16 %v5478_v21, %v5930_v28  ;;  %v4357_v28 = vpack.i.bf16 0.0, %v5384_v52  ;;  %v4392_v56 = vpack.i.bf16 0.0, %v5478_v21 }
 0x246   : > { %4303 = vrot.lane.b32.xlu1 %v4302_v24, %s4443_s9  ;;  %4283 = vrot.lane.b32.xlu0 %v4282_v50, %s4443_s9  ;;  %v4199_v8 = vpop.permute.xlu2 %4198  ;;  %v4332_v24 = vpack.i.bf16 0.0, %v5946_v58 }
 0x247   : > { %4258 = vrot.lane.b32.xlu2 %v4252_v23, %s4444_s10  ;;  %v4201_v4 = vunpack.i.h.bf16 %v4199_v8  ;;  %v4200_v11 = vunpack.i.l.bf16 %v4199_v8 }
 0x24e   : > { %4313 = vrot.lane.b32.xlu1 %v4312_v46, %s4446_s12  ;;  %4298 = vrot.lane.b32.xlu0 %v5453_v41, %s4446_s12  ;;  %v4204_v16 = vpop.permute.xlu2 %4203  ;;  %v2481_v46 = vsel %vm307_vm3, %v4200_v11, %v4201_v4 }
 0x24f   : > { %4263 = vrot.lane.b32.xlu2 %v5299_v48, %s4445_s11  ;;  %v815_v48 = vadd.f32 %v5283_v44, %v791_v63  ;;  %v4362_v44 = vpack.i.bf16 0.0, %v5432_v55  ;;  %v4206_v17 = vunpack.i.h.bf16 %v4204_v16  ;;  %v4205_v29 = vunpack.i.l.bf16 %v4204_v16  ;;  %v3611_v63 = vld [vmem:[%s5900_s4] sm:$0xff] }
 0x251   : > { %v819_v9 = vmax.f32 %v815_v48, 0.0 }
 0x256   : > { %4328 = vrot.lane.b32.xlu1 %v5373_v38, %s4443_s9  ;;  %4323 = vrot.lane.b32.xlu0 %v4322_v45, %s4446_s12  ;;  %v5488_v38 = vmul.f32 %v5289_v1, %v819_v9  ;;  %v4194_v61 = vpop.permute.xlu0 %4193  ;;  %v3612_v45 = vld [vmem:[%s5900_s4 + $0x8] sm:$0xff] }
 0x257   : > { %4278 = vrot.lane.b32.xlu2 %v5469_v53, %s4446_s12  ;;  %v4196_v35 = vunpack.i.h.bf16 %v4194_v61  ;;  %v4195_v36 = vunpack.i.l.bf16 %v4194_v61 }
 0x258   : > { %v5492_v40 = vpack.i.bf16 0.0, %v5488_v38 }
 0x259   : > { %v2480_v32 = vsel %vm307_vm3, %v4195_v36, %v4196_v35  ;;  %v3613_v35 = vld [vmem:[%s5900_s4 + $0x10] sm:$0xff]  ;;  %v4056_v36 = vld [vmem:[%s5899_s3 + $0x48] sm:$0xff] }
 0x25e   : > { %4343 = vrot.lane.b32.xlu1 %v4342_v25, %s4446_s12  ;;  %4338 = vrot.lane.b32.xlu0 %v5351_v19, %s4443_s9 }
 0x25f   : > { %4293 = vrot.lane.b32.xlu2 %v4292_v13, %s4443_s9 }
 0x266   : > { %v4209_v2 = vpop.permute.xlu1 %4208  ;;  %4363 = vrot.lane.b32.xlu1 %v4362_v44, %s4447_s19  ;;  %4353 = vrot.lane.b32.xlu0 %v4252_v23, %s4443_s9 }
 0x267   : > { %4308 = vrot.lane.b32.xlu2 %v5492_v40, %s4446_s12  ;;  %v4211_v57 = vunpack.i.h.bf16 %v4209_v2  ;;  %v4210_v33 = vunpack.i.l.bf16 %v4209_v2 }
 0x269   : > { %v2482_v51 = vsel %vm307_vm3, %v4210_v33, %v4211_v57 }
 0x26e   : > { %v4214_v19 = vpop.permute.xlu1 %4213  ;;  %4378 = vrot.lane.b32.xlu1 %v5469_v53, %s4447_s19  ;;  %4358 = vrot.lane.b32.xlu0 %v4357_v28, %s4448_s18  ;;  %v4224_v1 = vpop.permute.xlu0 %4223 }
 0x26f   : > { %v4216_v49 = vunpack.i.h.bf16 %v4214_v19  ;;  %v4215_v6 = vunpack.i.l.bf16 %v4214_v19  ;;  %4318 = vrot.lane.b32.xlu2 %v5397_v34, %s4443_s9  ;;  %v4226_v20 = vunpack.i.h.bf16 %v4224_v1  ;;  %v4225_v23 = vunpack.i.l.bf16 %v4224_v1 }
 0x270   : > { %v2699_v34 = vsel %vm958_vm5, %v4205_v29, %v4206_v17  ;;  %v4055_v29 = vld [vmem:[%s5899_s3 + $0x40] sm:$0xff] }
 0x271   : > { %v2701_v15 = vsel %vm958_vm5, %v4225_v23, %v4226_v20  ;;  %v2700_v42 = vsel %vm958_vm5, %v4215_v6, %v4216_v49 }
 0x272   : > { %2730 = vmatpush.msrb.mxu3 %v2701_v15 }
 0x274   : > { %2731 = vmatpush.msrb.mxu3 %v2700_v42 }
 0x276   : > { %v4219_v50 = vpop.permute.xlu1 %4218  ;;  %4373 = vrot.lane.b32.xlu0 %v4362_v44, %s4448_s18  ;;  %4393 = vrot.lane.b32.xlu1 %v4392_v56, %s4448_s18  ;;  %v3614_v44 = vld [vmem:[%s5900_s4 + $0x18] sm:$0xff] }
 0x277   : > { %v4221_v27 = vunpack.i.h.bf16 %v4219_v50  ;;  %v4220_v12 = vunpack.i.l.bf16 %v4219_v50  ;;  %4333 = vrot.lane.b32.xlu2 %v4332_v24, %s4446_s12  ;;  %2732 = vmatpush.msrb.mxu3 %v2699_v34 }
 0x279   : > { %v2483_v62 = vsel %vm307_vm3, %v4220_v12, %v4221_v27 }
 0x27a   : > { %2513 = vmatpush.msrb.mxu0 %v2483_v62 }
 0x27c   : > { %2514 = vmatpush.msrb.mxu0 %v2482_v51 }
 0x27e   : > { %4388 = vrot.lane.b32.xlu0 %v5416_v47, %s4449_s22  ;;  %2515 = vmatpush.msrb.mxu0 %v2481_v46 }
 0x27f   : > { %4408 = vrot.lane.b32.xlu1 %v5453_v41, %s4449_s22  ;;  %4348 = vrot.lane.b32.xlu2 %v4357_v28, %s4447_s19 }
 0x280   : > { %2516 = vmatpush.msrb.mxu0 %v2480_v32 }
 0x281   : > { %4047 = vmatmul.msk.f32.vlgmr.msrb.gmra.mxu0 %vm2488_vm10, %v4043_v10 }
 0x286   : > { %4403 = vrot.lane.b32.xlu0 %v4402_v31, %s4447_s19 }
 0x287   : > { %4423 = vrot.lane.b32.xlu1 %v5492_v40, %s4449_s22  ;;  %4368 = vrot.lane.b32.xlu2 %v5469_v53, %s4449_s22  ;;  %v4046_v53 = vld [vmem:[%s5899_s3 + $0x38] sm:$0xff] }
 0x289   : > { %4048 = vmatmul.msk.f32.gmra.mxu0 %vm2488_vm10, %v4044_v60 }
 0x28e   : > { %4418 = vrot.lane.b32.xlu0 %v5453_v41, %s4447_s19 }
 0x28f   : > { %3622 = vperm.xlu1 %4189, %v3612_v45   ;;  %4383 = vrot.lane.b32.xlu2 %v4392_v56, %s4447_s19 }
 0x291   : > { %v4244_v22 = vpop.permute.xlu2 %4243  ;;  %4049 = vmatmul.msk.f32.gmra.mxu0 %vm2488_vm10, %v4045_v30 }
 0x292   : > { %v4246_v48 = vunpack.i.h.bf16 %v4244_v22  ;;  %v4245_v25 = vunpack.i.l.bf16 %v4244_v22  ;;  %v2439_v22 = vld [vmem:[%s5899_s3] sm:$0xff] }
 0x296   : > { %3617 = vperm.xlu0 %4191, %v3611_v63   ;;  %v4064_v63 = vld [vmem:[%s5899_s3 + $0x68] sm:$0xff] }
 0x297   : > { %4398 = vrot.lane.b32.xlu2 %v5416_v47, %s4447_s19  ;;  %v2626_v47 = vsel %vm307_vm3, %v4245_v25, %v4246_v48 }
 0x298   : > { %v4229_v54 = vpop.permute.xlu1 %4228 }
 0x299   : > { %v4254_v41 = vpop.permute.xlu2 %4253  ;;  %4050 = vmatmul.msk.f32.gmra.mxu0 %vm2488_vm10, %v4046_v53  ;;  %v4231_v28 = vunpack.i.h.bf16 %v4229_v54  ;;  %v4230_v19 = vunpack.i.l.bf16 %v4229_v54  ;;  %v4057_v54 = vld [vmem:[%s5899_s3 + $0x50] sm:$0xff] }
 0x29a   : > { %v4256_v9 = vunpack.i.h.bf16 %v4254_v41  ;;  %v4255_v13 = vunpack.i.l.bf16 %v4254_v41 }
 0x29b   : > { %v2624_v17 = vsel %vm307_vm3, %v4230_v19, %v4231_v28 }
 0x29c   : > { %v2627_v8 = vsel %vm307_vm3, %v4255_v13, %v4256_v9 }
 0x29d   : > { %2656 = vmatpush.msrb.mxu2 %v2627_v8 }
 0x29e   : > { %3632 = vperm.xlu0 %4191, %v3614_v44  }
 0x29f   : > { %2657 = vmatpush.msrb.mxu2 %v2626_v47  ;;  %4413 = vrot.lane.b32.xlu2 %v4402_v31, %s4448_s18  ;;  %s5842_s18 = scalar_lea.vmem %s5903_s7, %s4170_s13 }
 0x2a0   : > { %v4239_v61 = vpop.permute.xlu1 %4238  ;;  %v4234_v2 = vpop.permute.xlu0 %4233 }
 0x2a1   : > { %v4259_v1 = vpop.permute.xlu2 %4258  ;;  %v4236_v16 = vunpack.i.h.bf16 %v4234_v2  ;;  %v4235_v49 = vunpack.i.l.bf16 %v4234_v2  ;;  %v4241_v42 = vunpack.i.h.bf16 %v4239_v61  ;;  %v4240_v56 = vunpack.i.l.bf16 %v4239_v61  ;;  %v4065_v61 = vld [vmem:[%s5899_s3 + $0x70] sm:$0xff] }
 0x2a2   : > { %v4261_v6 = vunpack.i.h.bf16 %v4259_v1  ;;  %v4260_v20 = vunpack.i.l.bf16 %v4259_v1 }
 0x2a3   : > { %v2625_v23 = vsel %vm307_vm3, %v4235_v49, %v4236_v16 }
 0x2a4   : > { %v2557_v15 = vsel %vm362_vm4, %v4260_v20, %v4261_v6  ;;  %2658 = vmatpush.msrb.mxu2 %v2625_v23 }
 0x2a5   : > { %2586 = vmatpush.msrb.mxu1 %v2557_v15  ;;  %v2441_v15 = vld [vmem:[%s5899_s3 + $0x10] sm:$0xff] }
 0x2a6   : > { %2659 = vmatpush.msrb.mxu2 %v2624_v17 }
 0x2a7   : > { %4428 = vrot.lane.b32.xlu2 %v5492_v40, %s4447_s19  ;;  %4059 = vmatmul.msk.f32.vlgmr.msrb.gmra.mxu2 %vm2488_vm10, %v4055_v29 }
 0x2a8   : > { %2924 = vmatpush.msra.mxu2 %v5384_v52  ;;  %v4274_v24 = vpop.permute.xlu1 %4273  ;;  %v4249_v50 = vpop.permute.xlu0 %4248 }
 0x2a9   : > { %v4276_v34 = vunpack.i.h.bf16 %v4274_v24  ;;  %v4275_v57 = vunpack.i.l.bf16 %v4274_v24  ;;  %v4264_v33 = vpop.permute.xlu2 %4263  ;;  %v4251_v27 = vunpack.i.h.bf16 %v4249_v50  ;;  %v4250_v12 = vunpack.i.l.bf16 %v4249_v50 }
 0x2aa   : > { %2925 = vmatpush.msra.mxu2 %v5432_v55  ;;  %v4266_v4 = vunpack.i.h.bf16 %v4264_v33  ;;  %v4265_v11 = vunpack.i.l.bf16 %v4264_v33  ;;  %v4063_v55 = vld [vmem:[%s5899_s3 + $0x60] sm:$0xff] }
 0x2ab   : > { %v2556_v40 = vsel %vm362_vm4, %v4250_v12, %v4251_v27  ;;  %v2791_v52 = vsel %vm479_vm0, %v4275_v57, %v4276_v34  ;;  %v2442_v27 = vld [vmem:[%s5899_s3 + $0x18] sm:$0xff]  ;;  %v4095_v12 = vld [vmem:[%s5899_s3 + $0xe0] sm:$0xff] }
 0x2ac   : > { %2926 = vmatpush.msra.mxu2 %v5478_v21  ;;  %2587 = vmatpush.msrb.mxu1 %v2556_v40  ;;  %v2698_v62 = vsel %vm958_vm5, %v4265_v11, %v4266_v4  ;;  %v2555_v21 = vsel %vm362_vm4, %v4240_v56, %v4241_v42  ;;  %v4087_v42 = vld [vmem:[%s5899_s3 + $0xc0] sm:$0xff]  ;;  %v4073_v4 = vld [vmem:[%s5899_s3 + $0x90] sm:$0xff]  ;;  %v4088_v11 = vld [vmem:[%s5899_s3 + $0xc8] sm:$0xff] }
 0x2ad   : > { %2820 = vmatpush.msra.mxu0 %v2791_v52  ;;  %2733 = vmatpush.msrb.mxu3 %v2698_v62 }
 0x2ae   : > { %2927 = vmatpush.msra.mxu2 %v5429_v39  ;;  %2588 = vmatpush.msrb.mxu1 %v2555_v21 }
 0x2af   : > { %3627 = vperm.xlu2 %4190, %v3613_v35   ;;  %4067 = vmatmul.msk.f32.vlgmr.msrb.gmra.mxu3 %vm2488_vm10, %v4063_v55 }
 0x2b0   : > { %3188 = vmatpush.msrb.mxu2 %v5411_v3  ;;  %v4289_v51 = vpop.permute.xlu1 %4288  ;;  %v4269_v46 = vpop.permute.xlu0 %4268 }
 0x2b1   : > { %v4279_v32 = vpop.permute.xlu2 %4278  ;;  %v4271_v10 = vunpack.i.h.bf16 %v4269_v46  ;;  %v4270_v31 = vunpack.i.l.bf16 %v4269_v46  ;;  %4060 = vmatmul.msk.f32.gmra.mxu2 %vm2488_vm10, %v4056_v36  ;;  %v4291_v39 = vunpack.i.h.bf16 %v4289_v51  ;;  %v4290_v60 = vunpack.i.l.bf16 %v4289_v51  ;;  %v4079_v51 = vld [vmem:[%s5899_s3 + $0xa0] sm:$0xff] }
 0x2b2   : > { %3189 = vmatpush.msrb.mxu2 %v5389_v59  ;;  %v4281_v45 = vunpack.i.h.bf16 %v4279_v32  ;;  %v4280_v3 = vunpack.i.l.bf16 %v4279_v32  ;;  %v4096_v32 = vld [vmem:[%s5899_s3 + $0xe8] sm:$0xff] }
 0x2b3   : > { %v2554_v30 = vsel %vm362_vm4, %v4270_v31, %v4271_v10  ;;  %v4074_v31 = vld [vmem:[%s5899_s3 + $0x98] sm:$0xff] }
 0x2b4   : > { %3190 = vmatpush.msrb.mxu2 %v5364_v26  ;;  %2589 = vmatpush.msrb.mxu1 %v2554_v30  ;;  %v2985_v59 = vsel %vm1126_vm6, %v4280_v3, %v4281_v45  ;;  %v2984_v26 = vsel %vm1126_vm6, %v4290_v60, %v4291_v39  ;;  %v4089_v39 = vld [vmem:[%s5899_s3 + $0xd0] sm:$0xff] }
 0x2b5   : > { %3014 = vmatpush.msra.mxu3 %v2985_v59  ;;  %4051 = vmatmul.msk.f32.vlgmr.msrb.gmra.mxu1 %vm2488_vm10, %v2439_v22 }
 0x2b6   : > { %3191 = vmatpush.msrb.mxu2 %v5346_v37  ;;  %2874 = vmatpush.msra.mxu1 %v5462_v18 }
 0x2b7   : > { %3015 = vmatpush.msra.mxu3 %v2984_v26 }
 0x2b8   : > { %2875 = vmatpush.msra.mxu1 %v5404_v14  ;;  %v4304_v41 = vpop.permute.xlu1 %4303  ;;  %v4284_v37 = vpop.permute.xlu0 %4283  ;;  %4068 = vmatmul.msk.f32.gmra.mxu3 %vm2488_vm10, %v4064_v63  ;;  %v2440_v14 = vld [vmem:[%s5899_s3 + $0x8] sm:$0xff] }
 0x2b9   : > { %v4294_v53 = vpop.permute.xlu2 %4293  ;;  %v4286_v48 = vunpack.i.h.bf16 %v4284_v37  ;;  %v4285_v25 = vunpack.i.l.bf16 %v4284_v37  ;;  %4061 = vmatmul.msk.f32.gmra.mxu2 %vm2488_vm10, %v4057_v54  ;;  %v4306_v13 = vunpack.i.h.bf16 %v4304_v41  ;;  %v4305_v44 = vunpack.i.l.bf16 %v4304_v41 }
 0x2ba   : > { %v4296_v9 = vunpack.i.h.bf16 %v4294_v53  ;;  %v4295_v18 = vunpack.i.l.bf16 %v4294_v53  ;;  %2876 = vmatpush.msra.mxu1 %v5446_v0  ;;  %v4071_v0 = vld [vmem:[%s5899_s3 + $0x80] sm:$0xff] }
 0x2bb   : > { %v2790_v8 = vsel %vm479_vm0, %v4285_v25, %v4286_v48 }
 0x2bc   : > { %2877 = vmatpush.msra.mxu1 %v5488_v38  ;;  %2821 = vmatpush.msra.mxu0 %v2790_v8  ;;  %v2789_v47 = vsel %vm479_vm0, %v4295_v18, %v4296_v9  ;;  %v2788_v38 = vsel %vm479_vm0, %v4305_v44, %v4306_v13  ;;  %v4080_v9 = vld [vmem:[%s5899_s3 + $0xa8] sm:$0xff] }
 0x2bd   : > { %4052 = vmatmul.msk.f32.gmra.mxu1 %vm2488_vm10, %v2440_v14  ;;  %v4097_v14 = vld [vmem:[%s5899_s3 + $0xf0] sm:$0xff] }
 0x2be   : > { %3138 = vmatpush.msrb.mxu1 %v5325_v5  ;;  %2822 = vmatpush.msra.mxu0 %v2789_v47  ;;  %v4058_v5 = vld [vmem:[%s5899_s3 + $0x58] sm:$0xff] }
 0x2c0   : > { %3139 = vmatpush.msrb.mxu1 %v5942_v7  ;;  %v4314_v2 = vpop.permute.xlu1 %4313  ;;  %v4299_v28 = vpop.permute.xlu0 %4298  ;;  %2823 = vmatpush.msra.mxu0 %v2788_v38 }
 0x2c1   : > { %4069 = vmatmul.msk.f32.gmra.mxu3 %vm2488_vm10, %v4065_v61  ;;  %v4309_v19 = vpop.permute.xlu2 %4308  ;;  %v4301_v1 = vunpack.i.h.bf16 %v4299_v28  ;;  %v4300_v16 = vunpack.i.l.bf16 %v4299_v28  ;;  %4075 = vmatmul.msk.f32.vlgmr.msra.gmra.mxu0 %vm2488_vm10, %v4071_v0  ;;  %v4316_v49 = vunpack.i.h.bf16 %v4314_v2  ;;  %v4315_v7 = vunpack.i.l.bf16 %v4314_v2  ;;  %v4090_v0 = vld [vmem:[%s5899_s3 + $0xd8] sm:$0xff]  ;;  %v4103_v28 = vld [vmem:[%s5899_s3 + $0x100] sm:$0xff] }
 0x2c2   : > { %3140 = vmatpush.msrb.mxu1 %v5946_v58  ;;  %v4311_v6 = vunpack.i.h.bf16 %v4309_v19  ;;  %v4310_v20 = vunpack.i.l.bf16 %v4309_v19  ;;  %4062 = vmatmul.msk.f32.gmra.mxu2 %vm2488_vm10, %v4058_v5  ;;  %v4066_v58 = vld [vmem:[%s5899_s3 + $0x78] sm:$0xff] }
 0x2c3   : > { %v2983_v23 = vsel %vm1126_vm6, %v4300_v16, %v4301_v1  ;;  %v3249_v29 = vsel %vm1126_vm6, %v4315_v7, %v4316_v49 }
 0x2c4   : > { %3141 = vmatpush.msrb.mxu1 %v5945_v43  ;;  %3016 = vmatpush.msra.mxu3 %v2983_v23  ;;  %v2982_v17 = vsel %vm1126_vm6, %v4310_v20, %v4311_v6  ;;  %v4072_v43 = vld [vmem:[%s5899_s3 + $0x88] sm:$0xff] }
 0x2c5   : > { %4053 = vmatmul.msk.f32.gmra.mxu1 %vm2488_vm10, %v2441_v15 }
 0x2c6   : > { %3017 = vmatpush.msra.mxu3 %v2982_v17  ;;  %v4081_v17 = vld [vmem:[%s5899_s3 + $0xb0] sm:$0xff] }
 0x2c8   : > { %3278 = vmatpush.msrb.mxu3 %v3249_v29  ;;  %v5650_v56 = vpop.permute.xlu1 %4328  ;;  %v4324_v24 = vpop.permute.xlu0 %4323  ;;  %v4098_v29 = vld [vmem:[%s5899_s3 + $0xf8] sm:$0xff] }
 0x2c9   : > { %4070 = vmatmul.msk.f32.gmra.mxu3 %vm2488_vm10, %v4066_v58  ;;  %v4319_v50 = vpop.permute.xlu2 %4318  ;;  %v4326_v34 = vunpack.i.h.bf16 %v4324_v24  ;;  %v4325_v57 = vunpack.i.l.bf16 %v4324_v24  ;;  %4076 = vmatmul.msk.f32.gmra.mxu0 %vm2488_vm10, %v4072_v43  ;;  %v4331_v53 = vunpack.i.h.bf16 %v5650_v56  ;;  %v4330_v48 = vunpack.i.l.bf16 %v5650_v56  ;;  %v4119_v43 = vld [vmem:[%s5899_s3 + $0x140] sm:$0xff]  ;;  %v4104_v24 = vld [vmem:[%s5899_s3 + $0x108] sm:$0xff] }
 0x2ca   : > { %4091 = vmatmul.msk.f32.vlgmr.msra.gmra.mxu2 %vm2488_vm10, %v4087_v42  ;;  %v4321_v3 = vunpack.i.h.bf16 %v4319_v50  ;;  %v4320_v22 = vunpack.i.l.bf16 %v4319_v50 }
 0x2cb   : > { %v3248_v33 = vsel %vm1126_vm6, %v4325_v57, %v4326_v34  ;;  %v3057_v61 = vsel %vm479_vm0, %v4330_v48, %v4331_v53 }
 0x2cc   : > { %3279 = vmatpush.msrb.mxu3 %v3248_v33  ;;  %v3058_v8 = vsel %vm479_vm0, %v4320_v22, %v4321_v3  ;;  %v4111_v22 = vld [vmem:[%s5899_s3 + $0x120] sm:$0xff] }
 0x2cd   : > { %4054 = vmatmul.msk.f32.gmra.mxu1 %vm2488_vm10, %v2442_v27 }
 0x2d0   : > { %v4344_v40 = vpop.permute.xlu1 %4343  ;;  %v4339_v52 = vpop.permute.xlu0 %4338 }
 0x2d1   : > { %4099 = vmatmul.msk.f32.vlgmr.msra.gmra.mxu3 %vm2488_vm10, %v4095_v12  ;;  %v4334_v62 = vpop.permute.xlu2 %4333  ;;  %4077 = vmatmul.msk.f32.gmra.mxu0 %vm2488_vm10, %v4073_v4  ;;  %v4346_v35 = vunpack.i.h.bf16 %v4344_v40  ;;  %v4345_v55 = vunpack.i.l.bf16 %v4344_v40  ;;  %v4341_v18 = vunpack.i.h.bf16 %v4339_v52  ;;  %v4340_v13 = vunpack.i.l.bf16 %v4339_v52  ;;  %v4082_v40 = vld [vmem:[%s5899_s3 + $0xb8] sm:$0xff] }
 0x2d2   : > { %v4336_v21 = vunpack.i.h.bf16 %v4334_v62  ;;  %v4335_v36 = vunpack.i.l.bf16 %v4334_v62  ;;  %4092 = vmatmul.msk.f32.gmra.mxu2 %vm2488_vm10, %v4088_v11 }
 0x2d3   : > { %v3246_v10 = vsel %vm1126_vm6, %v4345_v55, %v4346_v35  ;;  %v3056_v2 = vsel %vm479_vm0, %v4340_v13, %v4341_v18  ;;  %v4127_v35 = vld [vmem:[%s5899_s3 + $0x160] sm:$0xff]  ;;  %v4120_v55 = vld [vmem:[%s5899_s3 + $0x148] sm:$0xff] }
 0x2d4   : > { %v3247_v46 = vsel %vm1126_vm6, %v4335_v36, %v4336_v21  ;;  %v4105_v36 = vld [vmem:[%s5899_s3 + $0x110] sm:$0xff] }
 0x2d5   : > { %3280 = vmatpush.msrb.mxu3 %v3247_v46  ;;  %4083 = vmatmul.msk.f32.vlgmr.msra.gmra.mxu1 %vm2488_vm10, %v4079_v51 }
 0x2d7   : > { %3281 = vmatpush.msrb.mxu3 %v3246_v10 }
 0x2d8   : > { %v4364_v60 = vpop.permute.xlu1 %4363  ;;  %v4354_v45 = vpop.permute.xlu0 %4353 }
 0x2d9   : > { %4100 = vmatmul.msk.f32.gmra.mxu3 %vm2488_vm10, %v4096_v32  ;;  %v4349_v30 = vpop.permute.xlu2 %4348  ;;  %v4356_v59 = vunpack.i.h.bf16 %v4354_v45  ;;  %v4355_v63 = vunpack.i.l.bf16 %v4354_v45  ;;  %4078 = vmatmul.msk.f32.gmra.mxu0 %vm2488_vm10, %v4074_v31  ;;  %v4366_v26 = vunpack.i.h.bf16 %v4364_v60  ;;  %v4365_v54 = vunpack.i.l.bf16 %v4364_v60 }
 0x2da   : > { %v4351_v41 = vunpack.i.h.bf16 %v4349_v30  ;;  %v4350_v37 = vunpack.i.l.bf16 %v4349_v30  ;;  %4093 = vmatmul.msk.f32.gmra.mxu2 %vm2488_vm10, %v4089_v39 }
 0x2db   : > { %v3059_v25 = vsel %vm479_vm0, %v4355_v63, %v4356_v59  ;;  %v3486_v47 = vsel %vm1756_vm7, %v4365_v54, %v4366_v26  ;;  %v4128_v63 = vld [vmem:[%s5899_s3 + $0x168] sm:$0xff]  ;;  %v4121_v26 = vld [vmem:[%s5899_s3 + $0x150] sm:$0xff] }
 0x2dc   : > { %3088 = vmatpush.msrb.mxu0 %v3059_v25  ;;  %v3487_v44 = vsel %vm1756_vm7, %v4350_v37, %v4351_v41  ;;  %v4106_v41 = vld [vmem:[%s5899_s3 + $0x118] sm:$0xff] }
 0x2dd   : > { %3516 = vmatpush.msra.mxu2 %v3487_v44  ;;  %4084 = vmatmul.msk.f32.gmra.mxu1 %vm2488_vm10, %v4080_v9 }
 0x2de   : > { %3089 = vmatpush.msrb.mxu0 %v3058_v8 }
 0x2df   : > { %3517 = vmatpush.msra.mxu2 %v3486_v47 }
 0x2e0   : > { %v4379_v38 = vpop.permute.xlu1 %4378  ;;  %v4359_v5 = vpop.permute.xlu0 %4358  ;;  %3090 = vmatpush.msrb.mxu0 %v3057_v61 }
 0x2e1   : > { %4101 = vmatmul.msk.f32.gmra.mxu3 %vm2488_vm10, %v4097_v14  ;;  %v4381_v19 = vunpack.i.h.bf16 %v4379_v38  ;;  %v4380_v1 = vunpack.i.l.bf16 %v4379_v38  ;;  %v4369_v16 = vpop.permute.xlu2 %4368  ;;  %v4361_v49 = vunpack.i.h.bf16 %v4359_v5  ;;  %v4360_v7 = vunpack.i.l.bf16 %v4359_v5  ;;  %v4112_v14 = vld [vmem:[%s5899_s3 + $0x128] sm:$0xff]  ;;  %v4122_v38 = vld [vmem:[%s5899_s3 + $0x158] sm:$0xff] }
 0x2e2   : > { %v4371_v6 = vunpack.i.h.bf16 %v4369_v16  ;;  %v4370_v20 = vunpack.i.l.bf16 %v4369_v16  ;;  %3091 = vmatpush.msrb.mxu0 %v3056_v2  ;;  %4094 = vmatmul.msk.f32.gmra.mxu2 %vm2488_vm10, %v4090_v0  ;;  %v4129_v0 = vld [vmem:[%s5899_s3 + $0x170] sm:$0xff]  ;;  %v4135_v2 = vld [vmem:[%s5899_s3 + $0x180] sm:$0xff] }
 0x2e3   : > { %4107 = vmatmul.msk.f32.vlgmr.msrb.gmra.mxu0 %vm2488_vm10, %v4103_v28  ;;  %v3339_v23 = vsel %vm1695_vm8, %v4360_v7, %v4361_v49  ;;  %v3413_v15 = vsel %vm1756_vm7, %v4380_v1, %v4381_v19 }
 0x2e4   : > { %3368 = vmatpush.msra.mxu0 %v3339_v23  ;;  %3442 = vmatpush.msra.mxu1 %v3413_v15  ;;  %v3561_v58 = vsel %vm2333_vm9, %v4370_v20, %v4371_v6  ;;  %v4113_v6 = vld [vmem:[%s5899_s3 + $0x130] sm:$0xff]  ;;  %v4130_v20 = vld [vmem:[%s5899_s3 + $0x178] sm:$0xff]  ;;  %v4151_v15 = vld [vmem:[%s5899_s3 + $0x1c0] sm:$0xff] }
 0x2e5   : > { %3590 = vmatpush.msra.mxu3 %v3561_v58  ;;  %4085 = vmatmul.msk.f32.gmra.mxu1 %vm2488_vm10, %v4081_v17  ;;  %v4136_v17 = vld [vmem:[%s5899_s3 + $0x188] sm:$0xff]  ;;  %v4114_v58 = vld [vmem:[%s5899_s3 + $0x138] sm:$0xff] }
 0x2e8   : > { %v4394_v42 = vpop.permute.xlu1 %4393  ;;  %v4374_v56 = vpop.permute.xlu0 %4373 }
 0x2e9   : > { %4102 = vmatmul.msk.f32.gmra.mxu3 %vm2488_vm10, %v4098_v29  ;;  %v4396_v50 = vunpack.i.h.bf16 %v4394_v42  ;;  %v4395_v34 = vunpack.i.l.bf16 %v4394_v42  ;;  %v4384_v57 = vpop.permute.xlu2 %4383  ;;  %v4376_v33 = vunpack.i.h.bf16 %v4374_v56  ;;  %v4375_v27 = vunpack.i.l.bf16 %v4374_v56  ;;  %v4159_v29 = vld [vmem:[%s5899_s3 + $0x1e0] sm:$0xff]  ;;  %v4137_v42 = vld [vmem:[%s5899_s3 + $0x190] sm:$0xff] }
 0x2ea   : > { %v4386_v12 = vunpack.i.h.bf16 %v4384_v57  ;;  %v4385_v4 = vunpack.i.l.bf16 %v4384_v57  ;;  %4123 = vmatmul.msk.f32.vlgmr.msrb.gmra.mxu2 %vm2488_vm10, %v4119_v43  ;;  %v4152_v43 = vld [vmem:[%s5899_s3 + $0x1c8] sm:$0xff]  ;;  %v4143_v56 = vld [vmem:[%s5899_s3 + $0x1a0] sm:$0xff]  ;;  %v4138_v57 = vld [vmem:[%s5899_s3 + $0x198] sm:$0xff] }
 0x2eb   : > { %4108 = vmatmul.msk.f32.gmra.mxu0 %vm2488_vm10, %v4104_v24  ;;  %v3338_v11 = vsel %vm1695_vm8, %v4375_v27, %v4376_v33  ;;  %v3337_v62 = vsel %vm1695_vm8, %v4395_v34, %v4396_v50  ;;  %v4160_v24 = vld [vmem:[%s5899_s3 + $0x1e8] sm:$0xff]  ;;  %v4153_v34 = vld [vmem:[%s5899_s3 + $0x1d0] sm:$0xff]  ;;  %v5947_v33 = vmov 0  }
 0x2ec   : > { %3369 = vmatpush.msra.mxu0 %v3338_v11  ;;  %v3485_v52 = vsel %vm1756_vm7, %v4385_v4, %v4386_v12  ;;  %3657 = vst [vmem:[%s5842_s18] sm:$0xf] %v5947_v33  ;;  %v4144_v27 = vld [vmem:[%s5899_s3 + $0x1a8] sm:$0xff]  ;;  %v4161_v12 = vld [vmem:[%s5899_s3 + $0x1f0] sm:$0xff]  ;;  %v4154_v4 = vld [vmem:[%s5899_s3 + $0x1d8] sm:$0xff] }
 0x2ed   : > { %3518 = vmatpush.msra.mxu2 %v3485_v52  ;;  %4086 = vmatmul.msk.f32.gmra.mxu1 %vm2488_vm10, %v4082_v40  ;;  %3658 = vst [vmem:[%s5842_s18 + $0xc] sm:$0xf] %v5947_v33  ;;  %v4145_v40 = vld [vmem:[%s5899_s3 + $0x1b0] sm:$0xff]  ;;  %v4162_v52 = vld [vmem:[%s5899_s3 + $0x1f8] sm:$0xff] }
 0x2ee   : > { %3370 = vmatpush.msra.mxu0 %v3337_v62  ;;  %3659 = vst [vmem:[%s5842_s18 + $0x18] sm:$0xf] %v5947_v33 }
 0x2ef   : > { %3660 = vst [vmem:[%s5842_s18 + $0x24] sm:$0xf] %v5947_v33 }
 0x2f0   : > { %v4389_v21 = vpop.permute.xlu0 %4388  ;;  %3661 = vst [vmem:[%s5842_s18 + $0x8] sm:$0xf] %v5947_v33 }
 0x2f1   : > { %4131 = vmatmul.msk.f32.vlgmr.msrb.gmra.mxu3 %vm2488_vm10, %v4127_v35  ;;  %v4409_v51 = vpop.permute.xlu1 %4408  ;;  %v4399_v46 = vpop.permute.xlu2 %4398  ;;  %v4391_v32 = vunpack.i.h.bf16 %v4389_v21  ;;  %v4390_v10 = vunpack.i.l.bf16 %v4389_v21  ;;  %3662 = vst [vmem:[%s5842_s18 + $0x14] sm:$0xf] %v5947_v33  ;;  %v4146_v35 = vld [vmem:[%s5899_s3 + $0x1b8] sm:$0xff] }
 0x2f2   : > { %v4411_v31 = vunpack.i.h.bf16 %v4409_v51  ;;  %v4410_v39 = vunpack.i.l.bf16 %v4409_v51  ;;  %v4401_v60 = vunpack.i.h.bf16 %v4399_v46  ;;  %v4400_v45 = vunpack.i.l.bf16 %v4399_v46  ;;  %4124 = vmatmul.msk.f32.gmra.mxu2 %vm2488_vm10, %v4120_v55  ;;  %3663 = vst [vmem:[%s5842_s18 + $0x20] sm:$0xf] %v5947_v33 }
 0x2f3   : > { %4109 = vmatmul.msk.f32.gmra.mxu0 %vm2488_vm10, %v4105_v36  ;;  %v3560_v3 = vsel %vm2333_vm9, %v4390_v10, %v4391_v32  ;;  %3664 = vst [vmem:[%s5842_s18 + $0x2c] sm:$0xf] %v5947_v33 }
 0x2f4   : > { %v3412_v30 = vsel %vm1756_vm7, %v4400_v45, %v4401_v60  ;;  %3591 = vmatpush.msra.mxu3 %v3560_v3  ;;  %v3559_v59 = vsel %vm2333_vm9, %v4410_v39, %v4411_v31 }
 0x2f5   : > { %3443 = vmatpush.msra.mxu1 %v3412_v30 }
 0x2f6   : > { %4115 = vmatmul.msk.f32.vlgmr.msrb.gmra.mxu1 %vm2488_vm10, %v4111_v22  ;;  %3592 = vmatpush.msra.mxu3 %v3559_v59 }
 0x2f8   : > { %v4404_v54 = vpop.permute.xlu0 %4403 }
 0x2f9   : > { %4132 = vmatmul.msk.f32.gmra.mxu3 %vm2488_vm10, %v4128_v63  ;;  %v4424_v37 = vpop.permute.xlu1 %4423  ;;  %v4414_v53 = vpop.permute.xlu2 %4413  ;;  %v4406_v48 = vunpack.i.h.bf16 %v4404_v54  ;;  %v4405_v25 = vunpack.i.l.bf16 %v4404_v54 }
 0x2fa   : > { %v4426_v9 = vunpack.i.h.bf16 %v4424_v37  ;;  %v4425_v18 = vunpack.i.l.bf16 %v4424_v37  ;;  %v4416_v13 = vunpack.i.h.bf16 %v4414_v53  ;;  %v4415_v44 = vunpack.i.l.bf16 %v4414_v53  ;;  %4125 = vmatmul.msk.f32.gmra.mxu2 %vm2488_vm10, %v4121_v26 }
 0x2fb   : > { %4110 = vmatmul.msk.f32.gmra.mxu0 %vm2488_vm10, %v4106_v41  ;;  %v3484_v8 = vsel %vm1756_vm7, %v4405_v25, %v4406_v48 }
 0x2fc   : > { %v3336_v47 = vsel %vm1695_vm8, %v4415_v44, %v4416_v13  ;;  %3519 = vmatpush.msra.mxu2 %v3484_v8  ;;  %v3558_v61 = vsel %vm2333_vm9, %v4425_v18, %v4426_v9 }
 0x2fd   : > { %3371 = vmatpush.msra.mxu0 %v3336_v47  ;;  %3593 = vmatpush.msra.mxu3 %v3558_v61 }
 0x2fe   : > { %4116 = vmatmul.msk.f32.gmra.mxu1 %vm2488_vm10, %v4112_v14  ;;  %v2518_v50 = vpop.f32.mrf.mxu0 }
 0x300   : > { %v4419_v5 = vpop.permute.xlu0 %4418 }
 0x301   : > { %4133 = vmatmul.msk.f32.gmra.mxu3 %vm2488_vm10, %v4129_v0  ;;  %v4429_v28 = vpop.permute.xlu2 %4428  ;;  %v4421_v19 = vunpack.i.h.bf16 %v4419_v5  ;;  %v4420_v1 = vunpack.i.l.bf16 %v4419_v5 }
 0x302   : > { %v4431_v16 = vunpack.i.h.bf16 %v4429_v28  ;;  %v4430_v49 = vunpack.i.l.bf16 %v4429_v28  ;;  %4126 = vmatmul.msk.f32.gmra.mxu2 %vm2488_vm10, %v4122_v38 }
 0x303   : > { %4139 = vmatmul.msk.f32.vlgmr.msra.gmra.mxu0 %vm2488_vm10, %v4135_v2  ;;  %v3411_v7 = vsel %vm1756_vm7, %v4420_v1, %v4421_v19 }
 0x304   : > { %3444 = vmatpush.msra.mxu1 %v3411_v7  ;;  %v3410_v23 = vsel %vm1756_vm7, %v4430_v49, %v4431_v16 }
 0x306   : > { %4117 = vmatmul.msk.f32.gmra.mxu1 %vm2488_vm10, %v4113_v6  ;;  %v2521_v11 = vpop.f32.mrf.mxu0 }
 0x307   : > { %3445 = vmatpush.msra.mxu1 %v3410_v23 }
 0x309   : > { %4134 = vmatmul.msk.f32.gmra.mxu3 %vm2488_vm10, %v4130_v20 }
 0x30a   : > { %4155 = vmatmul.msk.f32.vlgmr.msra.gmra.mxu2 %vm2488_vm10, %v4151_v15 }
 0x30b   : > { %4140 = vmatmul.msk.f32.gmra.mxu0 %vm2488_vm10, %v4136_v17 }
 0x30e   : > { %4118 = vmatmul.msk.f32.gmra.mxu1 %vm2488_vm10, %v4114_v58  ;;  %v2524_v62 = vpop.f32.mrf.mxu0 }
 0x311   : > { %4163 = vmatmul.msk.f32.vlgmr.msra.gmra.mxu3 %vm2488_vm10, %v4159_v29 }
 0x312   : > { %4156 = vmatmul.msk.f32.gmra.mxu2 %vm2488_vm10, %v4152_v43 }
 0x313   : > { %4141 = vmatmul.msk.f32.gmra.mxu0 %vm2488_vm10, %v4137_v42 }
 0x316   : > { %4147 = vmatmul.msk.f32.vlgmr.msra.gmra.mxu1 %vm2488_vm10, %v4143_v56  ;;  %v2527_v46 = vpop.f32.mrf.mxu0 }
 0x319   : > { %4164 = vmatmul.msk.f32.gmra.mxu3 %vm2488_vm10, %v4160_v24 }
 0x31a   : > { %4157 = vmatmul.msk.f32.gmra.mxu2 %vm2488_vm10, %v4153_v34 }
 0x31b   : > { %4142 = vmatmul.msk.f32.gmra.mxu0 %vm2488_vm10, %v4138_v57 }
 0x31e   : > { %4148 = vmatmul.msk.f32.gmra.mxu1 %vm2488_vm10, %v4144_v27 }
 0x321   : > { %4165 = vmatmul.msk.f32.gmra.mxu3 %vm2488_vm10, %v4161_v12 }
 0x322   : > { %4158 = vmatmul.msk.f32.gmra.mxu2 %vm2488_vm10, %v4154_v4 }
 0x326   : > { %4149 = vmatmul.msk.f32.gmra.mxu1 %vm2488_vm10, %v4145_v40 }
 0x329   : > { %4166 = vmatmul.msk.f32.gmra.mxu3 %vm2488_vm10, %v4162_v52 }
 0x32a   : > { %v2661_v55 = vpop.f32.mrf.mxu2 }
 0x32e   : > { %4150 = vmatmul.msk.f32.gmra.mxu1 %vm2488_vm10, %v4146_v35 }
 0x332   : > { %v2591_v21 = vpop.f32.mrf.mxu1  ;;  %v2735_v36 = vpop.f32.mrf.mxu3 }
 0x333   : > { %v2592_v51 = vadd.f32 %v2591_v21, %v2518_v50 }
 0x334   : > { %v2664_v32 = vpop.f32.mrf.mxu2 }
 0x335   : > { %v2673_v10 = vadd.f32 %v2661_v55, %v2592_v51 }
 0x337   : > { %v2747_v31 = vadd.f32 %v2735_v36, %v2673_v10 }
 0x33a   : > { %v2594_v39 = vpop.f32.mrf.mxu1 }
 0x33b   : > { %v2738_v60 = vpop.f32.mrf.mxu3  ;;  %v2595_v45 = vadd.f32 %v2594_v39, %v2521_v11 }
 0x33c   : > { %v2667_v3 = vpop.f32.mrf.mxu2 }
 0x33d   : > { %v2674_v22 = vadd.f32 %v2664_v32, %v2595_v45 }
 0x33e   : > { %v2825_v30 = vpop.f32.mrf.mxu0 }
 0x33f   : > { %v2748_v59 = vadd.f32 %v2738_v60, %v2674_v22  ;;  %v2837_v43 = vadd.f32 %v2825_v30, %v2747_v31 }
 0x342   : > { %v2597_v63 = vpop.f32.mrf.mxu1 }
 0x343   : > { %v2598_v54 = vadd.f32 %v2597_v63, %v2524_v62 }
 0x344   : > { %v2741_v26 = vpop.f32.mrf.mxu3 }
 0x345   : > { %v2670_v41 = vpop.f32.mrf.mxu2  ;;  %v2675_v37 = vadd.f32 %v2667_v3, %v2598_v54 }
 0x346   : > { %v2828_v53 = vpop.f32.mrf.mxu0 }
 0x347   : > { %v2749_v48 = vadd.f32 %v2741_v26, %v2675_v37  ;;  %v2838_v33 = vadd.f32 %v2828_v53, %v2748_v59 }
 0x34a   : > { %v2600_v25 = vpop.f32.mrf.mxu1 }
 0x34b   : > { %v2601_v18 = vadd.f32 %v2600_v25, %v2527_v46 }
 0x34c   : > { %v2744_v9 = vpop.f32.mrf.mxu3 }
 0x34d   : > { %v2929_v13 = vpop.f32.mrf.mxu2  ;;  %v2676_v44 = vadd.f32 %v2670_v41, %v2601_v18 }
 0x34e   : > { %v2831_v8 = vpop.f32.mrf.mxu0 }
 0x34f   : > { %v2750_v14 = vadd.f32 %v2744_v9, %v2676_v44  ;;  %v2839_v21 = vadd.f32 %v2831_v8, %v2749_v48 }
 0x352   : > { %v2879_v47 = vpop.f32.mrf.mxu1 }
 0x353   : > { %v2891_v24 = vadd.f32 %v2879_v47, %v2837_v43  ;;  %v3618_v47 = vpop.permute.xlu0 %3617 }
 0x354   : > { %v3019_v61 = vpop.f32.mrf.mxu3 }
 0x355   : > { %v2932_v0 = vpop.f32.mrf.mxu2  ;;  %v2941_v57 = vadd.f32 %v2929_v13, %v2891_v24 }
 0x356   : > { %v2834_v38 = vpop.f32.mrf.mxu0 }
 0x357   : > { %v3031_v4 = vadd.f32 %v3019_v61, %v2941_v57  ;;  %v2840_v22 = vadd.f32 %v2834_v38, %v2750_v14  ;;  %v3644_v61 = vstv %s3639_s30 }
 0x35a   : > { %v2882_v5 = vpop.f32.mrf.mxu1 }
 0x35b   : > { %v2892_v11 = vadd.f32 %v2882_v5, %v2838_v33 }
 0x35c   : > { %v3022_v2 = vpop.f32.mrf.mxu3 }
 0x35d   : > { %v2935_v28 = vpop.f32.mrf.mxu2  ;;  %v2942_v62 = vadd.f32 %v2932_v0, %v2892_v11 }
 0x35f   : > { %v3032_v46 = vadd.f32 %v3022_v2, %v2942_v62 }
 0x360   : > { %v3093_v19 = vpop.f32.mrf.mxu0 }
 0x361   : > { %v3105_v52 = vadd.f32 %v3093_v19, %v3031_v4 }
 0x362   : > { %v2885_v1 = vpop.f32.mrf.mxu1 }
 0x363   : > { %v2893_v32 = vadd.f32 %v2885_v1, %v2839_v21 }
 0x364   : > { %v3025_v16 = vpop.f32.mrf.mxu3 }
 0x365   : > { %v2938_v49 = vpop.f32.mrf.mxu2  ;;  %v2943_v60 = vadd.f32 %v2935_v28, %v2893_v32 }
 0x367   : > { %v3033_v41 = vadd.f32 %v3025_v16, %v2943_v60 }
 0x368   : > { %v3096_v7 = vpop.f32.mrf.mxu0 }
 0x369   : > { %v3106_v39 = vadd.f32 %v3096_v7, %v3032_v46 }
 0x36a   : > { %v2888_v6 = vpop.f32.mrf.mxu1 }
 0x36b   : > { %v2894_v63 = vadd.f32 %v2888_v6, %v2840_v22 }
 0x36c   : > { %v3028_v20 = vpop.f32.mrf.mxu3 }
 0x36d   : > { %v3193_v23 = vpop.f32.mrf.mxu2  ;;  %v2944_v9 = vadd.f32 %v2938_v49, %v2894_v63 }
 0x36f   : > { %v3034_v38 = vadd.f32 %v3028_v20, %v2944_v9  ;;  %v3623_v20 = vpop.permute.xlu1 %3622 }
 0x370   : > { %v3099_v58 = vpop.f32.mrf.mxu0 }
 0x371   : > { %v3107_v48 = vadd.f32 %v3099_v58, %v3033_v41 }
 0x373   : > { %v3143_v15 = vpop.f32.mrf.mxu1 }
 0x374   : > { %v3283_v17 = vpop.f32.mrf.mxu3  ;;  %v3155_v35 = vadd.f32 %v3143_v15, %v3105_v52 }
 0x375   : > { %v3196_v29 = vpop.f32.mrf.mxu2 }
 0x376   : > { %v3205_v10 = vadd.f32 %v3193_v23, %v3155_v35  ;;  %v4433_v23 = vld [vmem:[%s5902_s6] ss:$0 sm:$0xff] }
 0x378   : > { %v3102_v34 = vpop.f32.mrf.mxu0  ;;  %v3295_v45 = vadd.f32 %v3283_v17, %v3205_v10 }
 0x379   : > { %v3108_v7 = vadd.f32 %v3102_v34, %v3034_v38 }
 0x37b   : > { %v3146_v42 = vpop.f32.mrf.mxu1 }
 0x37c   : > { %v3286_v56 = vpop.f32.mrf.mxu3  ;;  %v3156_v3 = vadd.f32 %v3146_v42, %v3106_v39 }
 0x37d   : > { %v3199_v50 = vpop.f32.mrf.mxu2 }
 0x37e   : > { %v3206_v37 = vadd.f32 %v3196_v29, %v3156_v3 }
 0x380   : > { %v3373_v55 = vpop.f32.mrf.mxu0  ;;  %v3296_v13 = vadd.f32 %v3286_v56, %v3206_v37 }
 0x381   : > { %v3385_v30 = vadd.f32 %v3373_v55, %v3295_v45  ;;  %v3628_v55 = vpop.permute.xlu2 %3627 }
 0x383   : > { %v3149_v27 = vpop.f32.mrf.mxu1 }
 0x384   : > { %v3289_v12 = vpop.f32.mrf.mxu3  ;;  %v3157_v44 = vadd.f32 %v3149_v27, %v3107_v48 }
 0x385   : > { %v3202_v40 = vpop.f32.mrf.mxu2 }
 0x386   : > { %v3207_v28 = vadd.f32 %v3199_v50, %v3157_v44 }
 0x388   : > { %v3376_v59 = vpop.f32.mrf.mxu0  ;;  %v3297_v17 = vadd.f32 %v3289_v12, %v3207_v28 }
 0x389   : > { %v3386_v0 = vadd.f32 %v3376_v59, %v3296_v13 }
 0x38b   : > { %v3152_v36 = vpop.f32.mrf.mxu1 }
 0x38c   : > { %v3292_v51 = vpop.f32.mrf.mxu3  ;;  %v3158_v58 = vadd.f32 %v3152_v36, %v3108_v7 }
 0x38d   : > { %v3521_v31 = vpop.f32.mrf.mxu2 }
 0x38e   : > { %v3208_v34 = vadd.f32 %v3202_v40, %v3158_v58 }
 0x390   : > { %v3379_v16 = vpop.f32.mrf.mxu0  ;;  %v3298_v12 = vadd.f32 %v3292_v51, %v3208_v34 }
 0x391   : > { %v3387_v56 = vadd.f32 %v3379_v16, %v3297_v17 }
 0x393   : > { %v3447_v26 = vpop.f32.mrf.mxu1 }
 0x394   : > { %v3595_v54 = vpop.f32.mrf.mxu3  ;;  %v3459_v53 = vadd.f32 %v3447_v26, %v3385_v30  ;;  %v3633_v30 = vpop.permute.xlu0 %3632 }
 0x395   : > { %v3524_v18 = vpop.f32.mrf.mxu2 }
 0x396   : > { %v3533_v25 = vadd.f32 %v3521_v31, %v3459_v53 }
 0x398   : > { %v3607_v8 = vadd.f32 %v3595_v54, %v3533_v25  ;;  %v3382_v52 = vpop.f32.mrf.mxu0 }
 0x399   : > { %v3388_v36 = vadd.f32 %v3382_v52, %v3298_v12 }
 0x39a   : > { %v3635_v14 = vadd.f32 %v3618_v47, %v3607_v8 }
 0x39b   : > { %v3450_v5 = vpop.f32.mrf.mxu1 }
 0x39c   : > { %v3598_v2 = vpop.f32.mrf.mxu3  ;;  %vm3640_vm11 = vcmp.ge.f32.partialorder %v3635_v14, 0.0  ;;  %v3645_v19 = vmul.f32 %v3644_v61, %v3635_v14  ;;  %v3460_v1 = vadd.f32 %v3450_v5, %v3386_v0 }
 0x39d   : > { %v3527_v42 = vpop.f32.mrf.mxu2 }
 0x39e   : > { %v3649_v6 = vsel %vm3640_vm11, %v3635_v14, %v3645_v19  ;;  %v3534_v49 = vadd.f32 %v3524_v18, %v3460_v1 }
 0x39f   : > { %v3653_v15 = vmul.f32 %v4433_v23, %v3649_v6 }
 0x3a0   : > { %v3608_v29 = vadd.f32 %v3598_v2, %v3534_v49 }
 0x3a1   : > { %v3665_v43 = vpack.c.bf16 %v3653_v15, %v3653_v15 }
 0x3a2   : > { %v3636_v24 = vadd.f32 %v3623_v20, %v3608_v29 }
 0x3a3   : > { %3669 = vst [vmem:[%s5842_s18 + $0x4] sm:$0xf] %v3665_v43  ;;  %v3453_v50 = vpop.f32.mrf.mxu1 }
 0x3a4   : > { %v3601_v57 = vpop.f32.mrf.mxu3  ;;  %vm3641_vm12 = vcmp.ge.f32.partialorder %v3636_v24, 0.0  ;;  %v3646_v33 = vmul.f32 %v3644_v61, %v3636_v24  ;;  %v3461_v27 = vadd.f32 %v3453_v50, %v3387_v56 }
 0x3a5   : > { %v3530_v10 = vpop.f32.mrf.mxu2 }
 0x3a6   : > { %v3650_v4 = vsel %vm3641_vm12, %v3636_v24, %v3646_v33  ;;  %v3535_v11 = vadd.f32 %v3527_v42, %v3461_v27 }
 0x3a7   : > { %v3654_v62 = vmul.f32 %v4433_v23, %v3650_v4 }
 0x3a8   : > { %v3609_v35 = vadd.f32 %v3601_v57, %v3535_v11 }
 0x3a9   : > { %v3666_v21 = vpack.c.bf16 %v3654_v62, %v3654_v62 }
 0x3aa   : > { %v3637_v46 = vadd.f32 %v3628_v55, %v3609_v35 }
 0x3ab   : > { %3670 = vst [vmem:[%s5842_s18 + $0x10] sm:$0xf] %v3666_v21  ;;  %v3456_v32 = vpop.f32.mrf.mxu1 }
 0x3ac   : > { %vm3642_vm13 = vcmp.ge.f32.partialorder %v3637_v46, 0.0  ;;  %v3647_v31 = vmul.f32 %v3644_v61, %v3637_v46  ;;  %v3462_v40 = vadd.f32 %v3456_v32, %v3388_v36  ;;  %v3604_v39 = vpop.f32.mrf.mxu3 }
 0x3ae   : > { %v3651_v60 = vsel %vm3642_vm13, %v3637_v46, %v3647_v31  ;;  %v3536_v45 = vadd.f32 %v3530_v10, %v3462_v40 }
 0x3af   : > { %v3655_v3 = vmul.f32 %v4433_v23, %v3651_v60 }
 0x3b0   : > { %v3610_v22 = vadd.f32 %v3604_v39, %v3536_v45 }
 0x3b1   : > { %v3667_v51 = vpack.c.bf16 %v3655_v3, %v3655_v3 }
 0x3b2   : > { %v3638_v59 = vadd.f32 %v3633_v30, %v3610_v22 }
 0x3b3   : > { %3671 = vst [vmem:[%s5842_s18 + $0x1c] sm:$0xf] %v3667_v51 }
 0x3b4   : > { %vm3643_vm14 = vcmp.ge.f32.partialorder %v3638_v59, 0.0  ;;  %v3648_v63 = vmul.f32 %v3644_v61, %v3638_v59 }
 0x3b6   : > { %v3652_v26 = vsel %vm3643_vm14, %v3638_v59, %v3648_v63 }
 0x3b7   : > { %v3656_v54 = vmul.f32 %v4433_v23, %v3652_v26 }
 0x3b9   : > { %v3668_v41 = vpack.c.bf16 %v3656_v54, %v3656_v54 }
 0x3bb   : > { %3672 = vst [vmem:[%s5842_s18 + $0x28] sm:$0xf] %v3668_v41 }
 0x3bc PF: > { %s18_s26 = sadd.s32 1, %s4440_s26  }
 0x3bd   : > { %p15_p4 = scmp.ge.s32.totalorder %s18_s26, 4  }
 0x3bf   :  { %17 = sbr.rel (!%p15_p4) target bundleno = 2 (0x2), region = 104 }

</bundles_post_ra>
